<compile_context>
chip_gen: v6e
topology: v6e:2x2x1
jax: 0.10.0
libtpu: 0.0.40
codegen_flags: <defaults>
</compile_context>

<pallas_src>
import math

import jax
import jax.numpy as jnp
from jax import lax
from jax.experimental import pallas as pl
from jax.experimental.pallas import tpu as pltpu


# ---------------------------------------------------------------------------
# Fused kernel: layers 1..4 + final projection, one batch element per grid step.
# ---------------------------------------------------------------------------
def _discriminator_kernel(x1_ref, w1_ref, b1_ref,
                          wg2_ref, b2_ref, p2_ref,
                          wg3_ref, b3_ref, p3_ref,
                          wg4_ref, b4_ref,
                          wl_ref, bl_ref,
                          out_ref, feat_ref,
                          s2_ref, s3_ref, s4_ref):
    """Ref shapes (C1..C4 = image_size * {1,2,4,8}):
      x1_ref : (1, 1024, 16)    layer-1 im2col, rows pre-ordered by output parity
      w1_ref : (16, C1)           b1_ref: (1, C1)
      wgl_ref: (4, 4*Cin, Cout)   taps grouped by 2x2 shift (dy,dx); b: (1, Cout)
      pl_ref : (4, M/4, M)        one-hot parity-group selectors for layer-l output
      wl_ref : (16, C4)           last-conv weight, rows = r*4+s;  bl_ref: (1, 1)
      out_ref: (1, 1, 1)          feat_ref: (1, 16, C4)   (128-lane dense)
      s*_ref : (4, Hq, Wq, Cin)   space-to-depth(2) of the zero-padded activation,
                                  slot index = ay*2+ax (intra-superpixel offset).
    """

    def lrelu(z):
        return jnp.where(z >= 0, z, 0.1 * z)

    def store_group(s_ref, g, grp):
        # grp: (ho2*wo2, C) spatial-major rows of parity group g = py*2 + px.
        hq, wq, c = s_ref.shape[1], s_ref.shape[2], s_ref.shape[3]
        ho2, wo2 = hq - 1, wq - 1
        u0, v0 = divmod(g, 2)          # (py, px) -> placement offset in padded grid
        slot = 3 - g                   # (ay, ax) = (1-py, 1-px)
        if wo2 % 8 == 0:               # sublane-aligned reshape -> one block store
            s_ref[slot, u0:u0 + ho2, v0:v0 + wo2, :] = grp.reshape(ho2, wo2, c)
        else:                          # tiny 4x4 maps: store row by row
            for u in range(ho2):
                s_ref[slot, u0 + u, v0:v0 + wo2, :] = grp[u * wo2:(u + 1) * wo2, :]

    def conv_s2(s_ref, wg_ref, b_ref):
        # 4x4 / stride-2 / pad-1 conv on the s2d scratch: 4 shifted K=4*Cin matmuls.
        hq, wq = s_ref.shape[1], s_ref.shape[2]
        ho, wo = hq - 1, wq - 1
        s_all = jnp.concatenate([s_ref[0], s_ref[1], s_ref[2], s_ref[3]], axis=-1)
        k4 = s_all.shape[-1]
        acc = jnp.zeros((ho * wo, wg_ref.shape[2]), jnp.float32)
        for dy in range(2):
            for dx in range(2):
                patch = s_all[dy:dy + ho, dx:dx + wo, :].reshape(ho * wo, k4)
                acc = acc + jnp.dot(patch, wg_ref[dy * 2 + dx],
                                    preferred_element_type=jnp.float32)
        return lrelu(acc + b_ref[...])

    # ---- layer 1: K=16 dot per parity group, scattered straight into s2 scratch ----
    s2_ref[...] = jnp.zeros(s2_ref.shape, s2_ref.dtype)
    m1 = x1_ref.shape[1] // 4
    for g in range(4):
        xg = x1_ref[0, g * m1:(g + 1) * m1, :]                         # (m1, 16)
        zg = jnp.dot(xg, w1_ref[...],
                     preferred_element_type=jnp.float32) + b1_ref[...]
        store_group(s2_ref, g, lrelu(zg))

    # ---- layer 2 ----
    o2 = conv_s2(s2_ref, wg2_ref, b2_ref)                              # (256, C2)
    s3_ref[...] = jnp.zeros(s3_ref.shape, s3_ref.dtype)
    for g in range(4):
        grp = jnp.dot(p2_ref[g], o2, preferred_element_type=jnp.float32)
        store_group(s3_ref, g, grp)

    # ---- layer 3 ----
    o3 = conv_s2(s3_ref, wg3_ref, b3_ref)                              # (64, C3)
    s4_ref[...] = jnp.zeros(s4_ref.shape, s4_ref.dtype)
    for g in range(4):
        grp = jnp.dot(p3_ref[g], o3, preferred_element_type=jnp.float32)
        store_group(s4_ref, g, grp)

    # ---- layer 4 ----
    o4 = conv_s2(s4_ref, wg4_ref, b4_ref)                              # (16, C4)

    # ---- outputs: lane-dense feature block + scalar logit ----
    feat_ref[0] = o4
    prod = o4 * wl_ref[...]
    val = jnp.sum(jnp.sum(prod, axis=1, keepdims=True), axis=0, keepdims=True)  # (1,1)
    out_ref[0] = val + bl_ref[...]


# ---------------------------------------------------------------------------
# Wrapper-side (cheap, weight/input glue only).
# ---------------------------------------------------------------------------
def _regroup_conv_weight(w):
    """(Cout, Cin, 4, 4) -> (4, 4*Cin, Cout): tap dy*2+dx, channel ay*2Cin+ax*Cin+ci."""
    cout, cin = w.shape[0], w.shape[1]
    wr = jnp.transpose(w, (2, 3, 1, 0)).reshape(2, 2, 2, 2, cin, cout)  # (dy,ay,dx,ax,ci,co)
    wr = wr.transpose(0, 2, 1, 3, 4, 5).reshape(4, 4 * cin, cout)
    return wr.astype(jnp.float32)


def _parity_selectors(ho, wo, dtype=jnp.float32):
    """(4, ho*wo/4, ho*wo) one-hot selectors picking rows (2t+py, 2q+px) per group."""
    sels = []
    for py in range(2):
        for px in range(2):
            rr = 2 * jnp.arange(ho // 2)[:, None] + py
            ss = 2 * jnp.arange(wo // 2)[None, :] + px
            idx = (rr * wo + ss).reshape(-1)
            sels.append(jax.nn.one_hot(idx, ho * wo, dtype=dtype))
    return jnp.stack(sels, axis=0)


def _layer1_im2col(x_nhwc):
    """(B,H,W,1) -> (B, H/2*W/2, 16) 4x4/s2/p1 patches, rows ordered (py, px, t, q)."""
    B, H, W, _ = x_nhwc.shape
    xp = jnp.pad(x_nhwc, ((0, 0), (1, 1), (1, 1), (0, 0)))
    taps = [xp[:, ky:ky + H:2, kx:kx + W:2, 0] for ky in range(4) for kx in range(4)]
    im = jnp.stack(taps, axis=-1)                                    # (B, H/2, W/2, 16)
    im = im.reshape(B, H // 4, 2, W // 4, 2, 16)                     # (B, t, py, q, px, k)
    im = jnp.transpose(im, (0, 2, 4, 1, 3, 5))                       # (B, py, px, t, q, k)
    return im.reshape(B, (H // 2) * (W // 2), 16)


def discriminator_forward(x_nchw, params):
    (w1, b1), (w2, b2), (w3, b3), (w4, b4), (wl, bl) = params
    B, cin0, H, W = x_nchw.shape
    assert cin0 == 1 and H == 64 and W == 64, "architecture implies 1x64x64 inputs"
    c1, c2, c3, c4 = w1.shape[0], w2.shape[0], w3.shape[0], w4.shape[0]
    h2, w2sp = H // 4, W // 4     # layer-2 output spatial (16, 16)
    h3, w3sp = H // 8, W // 8     # (8, 8)
    h4, w4sp = H // 16, W // 16   # (4, 4)

    x_nhwc = jnp.transpose(x_nchw, (0, 2, 3, 1)).astype(jnp.float32)
    x1g = _layer1_im2col(x_nhwc)                                     # (B, 1024, 16)

    w1m = w1.reshape(c1, 16).T.astype(jnp.float32)                   # (16, C1)
    wg2 = _regroup_conv_weight(w2)
    wg3 = _regroup_conv_weight(w3)
    wg4 = _regroup_conv_weight(w4)
    p2 = _parity_selectors(h2, w2sp)                                 # (4, 64, 256)
    p3 = _parity_selectors(h3, w3sp)                                 # (4, 16, 64)
    wlm = jnp.transpose(wl[0], (1, 2, 0)).reshape(h4 * w4sp, c4).astype(jnp.float32)

    b1m = b1.reshape(1, -1).astype(jnp.float32)
    b2m = b2.reshape(1, -1).astype(jnp.float32)
    b3m = b3.reshape(1, -1).astype(jnp.float32)
    b4m = b4.reshape(1, -1).astype(jnp.float32)
    blm = bl.reshape(1, 1).astype(jnp.float32)

    def full_spec(shape):
        n = len(shape)
        return pl.BlockSpec(shape, lambda b: (0,) * n)

    in_specs = [
        pl.BlockSpec((1, x1g.shape[1], 16), lambda b: (b, 0, 0)),
        full_spec((16, c1)), full_spec((1, c1)),
        full_spec((4, 4 * c1, c2)), full_spec((1, c2)), full_spec(p2.shape),
        full_spec((4, 4 * c2, c3)), full_spec((1, c3)), full_spec(p3.shape),
        full_spec((4, 4 * c3, c4)), full_spec((1, c4)),
        full_spec((h4 * w4sp, c4)), full_spec((1, 1)),
    ]
    out_specs = (
        pl.BlockSpec((1, 1, 1), lambda b: (b, 0, 0)),
        pl.BlockSpec((1, h4 * w4sp, c4), lambda b: (b, 0, 0)),
    )
    # NOTE: for image_size=64-scale weights, consider single-buffering the constant
    # weight specs / raising vmem_limit_bytes (v7x has 64 MiB VMEM); unnecessary here.
    scratch = [
        pltpu.VMEM((4, h2 + 1, w2sp + 1, c1), jnp.float32),
        pltpu.VMEM((4, h3 + 1, w3sp + 1, c2), jnp.float32),
        pltpu.VMEM((4, h4 + 1, w4sp + 1, c3), jnp.float32),
    ]

    logits, feat = pl.pallas_call(
        _discriminator_kernel,
        out_shape=(jax.ShapeDtypeStruct((B, 1, 1), jnp.float32),
                   jax.ShapeDtypeStruct((B, h4 * w4sp, c4), jnp.float32)),
        grid_spec=pltpu.PrefetchScalarGridSpec(
            num_scalar_prefetch=0, grid=(B,),
            in_specs=in_specs, out_specs=out_specs, scratch_shapes=scratch),
        compiler_params=pltpu.CompilerParams(dimension_semantics=("parallel",)),
    )(x1g, w1m, b1m, wg2, b2m, p2, wg3, b3m, p3, wg4, b4m, wlm, blm)

    out = logits.reshape(B, 1, 1, 1)
    # NCHW flatten order for `feature` restored by a free wrapper transpose.
    feature = jnp.transpose(feat, (0, 2, 1)).reshape(B, c4 * h4 * w4sp)
    return out, feature


# ---------------------------------------------------------------------------
# Deterministic parameter init (PyTorch Conv2d default-style uniform bounds).
# ---------------------------------------------------------------------------
def init_params(key, image_size=16):
    layer_chans = [
        (image_size, 1),
        (image_size * 2, image_size),
        (image_size * 4, image_size * 2),
        (image_size * 8, image_size * 4),
        (1, image_size * 8),
    ]
    params = []
    for cout, cin in layer_chans:
        key, kw, kb = jax.random.split(key, 3)
        bound = 1.0 / math.sqrt(cin * 4 * 4)
        w = jax.random.uniform(kw, (cout, cin, 4, 4), jnp.float32, -bound, bound)
        b = jax.random.uniform(kb, (cout,), jnp.float32, -bound, bound)
        params.append((w, b))
    return params


# ---------------------------------------------------------------------------
# Pure-JAX reference (for correctness check only).
# ---------------------------------------------------------------------------
def reference_forward(x_nchw, params):
    dn = ("NCHW", "OIHW", "NCHW")
    out = x_nchw.astype(jnp.float32)
    for w, b in params[:-1]:
        out = lax.conv_general_dilated(out, w, (2, 2), ((1, 1), (1, 1)),
                                       dimension_numbers=dn)
        out = out + b[None, :, None, None]
        out = jnp.where(out >= 0, out, 0.1 * out)
    feature = out.reshape(out.shape[0], -1)
    w, b = params[-1]
    last = lax.conv_general_dilated(out, w, (1, 1), "VALID", dimension_numbers=dn)
    last = last + b[None, :, None, None]
    return last, feature


if __name__ == "__main__":
    key = jax.random.PRNGKey(0)
    kx, kp = jax.random.split(key)

    image_size = 16   # channel multiplier (PyTorch default 64; shrunk for a small test)
    B = 2
    x = jax.random.normal(kx, (B, 1, 64, 64), jnp.float32)  # NCHW; 64x64 as arch implies
    params = init_params(kp, image_size=image_size)

    fwd = jax.jit(discriminator_forward)
    out, feature = fwd(x, params)
    out = jax.block_until_ready(out)
    feature = jax.block_until_ready(feature)

    assert out.shape == (B, 1, 1, 1)
    assert feature.shape == (B, image_size * 8 * 4 * 4)

    ref_out, ref_feat = reference_forward(x, params)
    assert jnp.allclose(out, ref_out, atol=1e-3, rtol=1e-3), "out mismatch"
    assert jnp.allclose(feature, ref_feat, atol=1e-3, rtol=1e-3), "feature mismatch"

    print("KERNEL_OK")
</pallas_src>

<mosaic_0001>
module attributes {stable_mosaic.version = 11 : i64} {
  func.func @_discriminator_kernel(%arg0: i32, %arg1: memref<1x1024x16xf32, #tpu.memory_space<vmem>>, %arg2: memref<16x16xf32, #tpu.memory_space<vmem>>, %arg3: memref<1x16xf32, #tpu.memory_space<vmem>>, %arg4: memref<4x64x32xf32, #tpu.memory_space<vmem>>, %arg5: memref<1x32xf32, #tpu.memory_space<vmem>>, %arg6: memref<4x64x256xf32, #tpu.memory_space<vmem>>, %arg7: memref<4x128x64xf32, #tpu.memory_space<vmem>>, %arg8: memref<1x64xf32, #tpu.memory_space<vmem>>, %arg9: memref<4x16x64xf32, #tpu.memory_space<vmem>>, %arg10: memref<4x256x128xf32, #tpu.memory_space<vmem>>, %arg11: memref<1x128xf32, #tpu.memory_space<vmem>>, %arg12: memref<16x128xf32, #tpu.memory_space<vmem>>, %arg13: memref<1x1xf32, #tpu.memory_space<vmem>>, %arg14: memref<1x1x1xf32, #tpu.memory_space<vmem>>, %arg15: memref<1x16x128xf32, #tpu.memory_space<vmem>>, %arg16: memref<4x17x17x16xf32, #tpu.memory_space<vmem>>, %arg17: memref<4x9x9x32xf32, #tpu.memory_space<vmem>>, %arg18: memref<4x5x5x64xf32, #tpu.memory_space<vmem>>) attributes {dimension_semantics = [#tpu.dimension_semantics<parallel>], iteration_bounds = array<i64: 2>, scalar_prefetch = 0 : i64, scratch_operands = 3 : i64, tpu.core_type = #tpu.core_type<tc>, window_params = [{transform_indices = @transform_0, window_bounds = array<i64: 1, 1024, 16>}, {pipeline_mode = #tpu.pipeline_mode<synchronous>, transform_indices = @transform_1, window_bounds = array<i64: 16, 16>}, {pipeline_mode = #tpu.pipeline_mode<synchronous>, transform_indices = @transform_2, window_bounds = array<i64: 1, 16>}, {pipeline_mode = #tpu.pipeline_mode<synchronous>, transform_indices = @transform_3, window_bounds = array<i64: 4, 64, 32>}, {pipeline_mode = #tpu.pipeline_mode<synchronous>, transform_indices = @transform_4, window_bounds = array<i64: 1, 32>}, {pipeline_mode = #tpu.pipeline_mode<synchronous>, transform_indices = @transform_5, window_bounds = array<i64: 4, 64, 256>}, {pipeline_mode = #tpu.pipeline_mode<synchronous>, transform_indices = @transform_6, window_bounds = array<i64: 4, 128, 64>}, {pipeline_mode = #tpu.pipeline_mode<synchronous>, transform_indices = @transform_7, window_bounds = array<i64: 1, 64>}, {pipeline_mode = #tpu.pipeline_mode<synchronous>, transform_indices = @transform_8, window_bounds = array<i64: 4, 16, 64>}, {pipeline_mode = #tpu.pipeline_mode<synchronous>, transform_indices = @transform_9, window_bounds = array<i64: 4, 256, 128>}, {pipeline_mode = #tpu.pipeline_mode<synchronous>, transform_indices = @transform_10, window_bounds = array<i64: 1, 128>}, {pipeline_mode = #tpu.pipeline_mode<synchronous>, transform_indices = @transform_11, window_bounds = array<i64: 16, 128>}, {pipeline_mode = #tpu.pipeline_mode<synchronous>, transform_indices = @transform_12, window_bounds = array<i64: 1, 1>}, {transform_indices = @transform_13, window_bounds = array<i64: 1, 1, 1>}, {transform_indices = @transform_14, window_bounds = array<i64: 1, 16, 128>}]} {
    %cst = arith.constant 0.000000e+00 : f32
    %0 = vector.broadcast %cst : f32 to vector<4x17x17x16xf32>
    %c0 = arith.constant 0 : index
    %c0_0 = arith.constant 0 : index
    %c0_1 = arith.constant 0 : index
    %c0_2 = arith.constant 0 : index
    %1 = vector.load %arg16[%c0, %c0_0, %c0_1, %c0_2] : memref<4x17x17x16xf32, #tpu.memory_space<vmem>>, vector<4x17x17x16xf32>
    tpu.vector_store %arg16[%c0, %c0_0, %c0_1, %c0_2], %0 {strides = array<i32>} : memref<4x17x17x16xf32, #tpu.memory_space<vmem>>, vector<4x17x17x16xf32>,
    %c0_3 = arith.constant 0 : index
    %c0_4 = arith.constant 0 : index
    %c0_5 = arith.constant 0 : index
    %2 = vector.load %arg1[%c0_3, %c0_4, %c0_5] : memref<1x1024x16xf32, #tpu.memory_space<vmem>>, vector<1x256x16xf32>
    %3 = vector.shape_cast %2 : vector<1x256x16xf32> to vector<256x16xf32>
    %c0_6 = arith.constant 0 : index
    %c0_7 = arith.constant 0 : index
    %4 = vector.load %arg2[%c0_6, %c0_7] : memref<16x16xf32, #tpu.memory_space<vmem>>, vector<16x16xf32>
    %cst_8 = arith.constant dense<0.000000e+00> : vector<256x16xf32>
    %5 = tpu.matmul %3, %4, %cst_8 {dimension_numbers = #tpu.dot_dimension_numbers<[1], [0], [0], [1], [0, 0, 1, 1], [], []>} : vector<256x16xf32>, vector<16x16xf32>, vector<256x16xf32> -> vector<256x16xf32>
    %c0_9 = arith.constant 0 : index
    %c0_10 = arith.constant 0 : index
    %6 = vector.load %arg3[%c0_9, %c0_10] : memref<1x16xf32, #tpu.memory_space<vmem>>, vector<1x16xf32>
    %7 = vector.broadcast %6 : vector<1x16xf32> to vector<256x16xf32>
    %8 = arith.addf %5, %7 : vector<256x16xf32>
    %cst_11 = arith.constant 0.000000e+00 : f32
    %9 = vector.broadcast %cst_11 : f32 to vector<256x16xf32>
    %10 = arith.cmpf oge, %8, %9 : vector<256x16xf32>
    %cst_12 = arith.constant 1.000000e-01 : f32
    %11 = vector.broadcast %cst_12 : f32 to vector<256x16xf32>
    %12 = arith.mulf %11, %8 : vector<256x16xf32>
    %13 = arith.select %10, %8, %12 : vector<256x16xi1>, vector<256x16xf32>
    %14 = vector.shape_cast %13 : vector<256x16xf32> to vector<16x16x16xf32>
    %c3 = arith.constant 3 : index
    %c0_13 = arith.constant 0 : index
    %c0_14 = arith.constant 0 : index
    %c0_15 = arith.constant 0 : index
    %15 = vector.load %arg16[%c3, %c0_13, %c0_14, %c0_15] : memref<4x17x17x16xf32, #tpu.memory_space<vmem>>, vector<1x16x16x16xf32>
    %16 = vector.shape_cast %15 : vector<1x16x16x16xf32> to vector<16x16x16xf32>
    %17 = vector.shape_cast %14 : vector<16x16x16xf32> to vector<1x16x16x16xf32>
    tpu.vector_store %arg16[%c3, %c0_13, %c0_14, %c0_15], %17 {strides = array<i32>} : memref<4x17x17x16xf32, #tpu.memory_space<vmem>>, vector<1x16x16x16xf32>,
    %c0_16 = arith.constant 0 : index
    %c256 = arith.constant 256 : index
    %c0_17 = arith.constant 0 : index
    %18 = vector.load %arg1[%c0_16, %c256, %c0_17] : memref<1x1024x16xf32, #tpu.memory_space<vmem>>, vector<1x256x16xf32>
    %19 = vector.shape_cast %18 : vector<1x256x16xf32> to vector<256x16xf32>
    %c0_18 = arith.constant 0 : index
    %c0_19 = arith.constant 0 : index
    %20 = vector.load %arg2[%c0_18, %c0_19] : memref<16x16xf32, #tpu.memory_space<vmem>>, vector<16x16xf32>
    %cst_20 = arith.constant dense<0.000000e+00> : vector<256x16xf32>
    %21 = tpu.matmul %19, %20, %cst_20 {dimension_numbers = #tpu.dot_dimension_numbers<[1], [0], [0], [1], [0, 0, 1, 1], [], []>} : vector<256x16xf32>, vector<16x16xf32>, vector<256x16xf32> -> vector<256x16xf32>
    %c0_21 = arith.constant 0 : index
    %c0_22 = arith.constant 0 : index
    %22 = vector.load %arg3[%c0_21, %c0_22] : memref<1x16xf32, #tpu.memory_space<vmem>>, vector<1x16xf32>
    %23 = vector.broadcast %22 : vector<1x16xf32> to vector<256x16xf32>
    %24 = arith.addf %21, %23 : vector<256x16xf32>
    %cst_23 = arith.constant 0.000000e+00 : f32
    %25 = vector.broadcast %cst_23 : f32 to vector<256x16xf32>
    %26 = arith.cmpf oge, %24, %25 : vector<256x16xf32>
    %cst_24 = arith.constant 1.000000e-01 : f32
    %27 = vector.broadcast %cst_24 : f32 to vector<256x16xf32>
    %28 = arith.mulf %27, %24 : vector<256x16xf32>
    %29 = arith.select %26, %24, %28 : vector<256x16xi1>, vector<256x16xf32>
    %30 = vector.shape_cast %29 : vector<256x16xf32> to vector<16x16x16xf32>
    %c2 = arith.constant 2 : index
    %c0_25 = arith.constant 0 : index
    %c1 = arith.constant 1 : index
    %c0_26 = arith.constant 0 : index
    %31 = vector.load %arg16[%c2, %c0_25, %c1, %c0_26] : memref<4x17x17x16xf32, #tpu.memory_space<vmem>>, vector<1x16x16x16xf32>
    %32 = vector.shape_cast %31 : vector<1x16x16x16xf32> to vector<16x16x16xf32>
    %33 = vector.shape_cast %30 : vector<16x16x16xf32> to vector<1x16x16x16xf32>
    tpu.vector_store %arg16[%c2, %c0_25, %c1, %c0_26], %33 {strides = array<i32>} : memref<4x17x17x16xf32, #tpu.memory_space<vmem>>, vector<1x16x16x16xf32>,
    %c0_27 = arith.constant 0 : index
    %c512 = arith.constant 512 : index
    %c0_28 = arith.constant 0 : index
    %34 = vector.load %arg1[%c0_27, %c512, %c0_28] : memref<1x1024x16xf32, #tpu.memory_space<vmem>>, vector<1x256x16xf32>
    %35 = vector.shape_cast %34 : vector<1x256x16xf32> to vector<256x16xf32>
    %c0_29 = arith.constant 0 : index
    %c0_30 = arith.constant 0 : index
    %36 = vector.load %arg2[%c0_29, %c0_30] : memref<16x16xf32, #tpu.memory_space<vmem>>, vector<16x16xf32>
    %cst_31 = arith.constant dense<0.000000e+00> : vector<256x16xf32>
    %37 = tpu.matmul %35, %36, %cst_31 {dimension_numbers = #tpu.dot_dimension_numbers<[1], [0], [0], [1], [0, 0, 1, 1], [], []>} : vector<256x16xf32>, vector<16x16xf32>, vector<256x16xf32> -> vector<256x16xf32>
    %c0_32 = arith.constant 0 : index
    %c0_33 = arith.constant 0 : index
    %38 = vector.load %arg3[%c0_32, %c0_33] : memref<1x16xf32, #tpu.memory_space<vmem>>, vector<1x16xf32>
    %39 = vector.broadcast %38 : vector<1x16xf32> to vector<256x16xf32>
    %40 = arith.addf %37, %39 : vector<256x16xf32>
    %cst_34 = arith.constant 0.000000e+00 : f32
    %41 = vector.broadcast %cst_34 : f32 to vector<256x16xf32>
    %42 = arith.cmpf oge, %40, %41 : vector<256x16xf32>
    %cst_35 = arith.constant 1.000000e-01 : f32
    %43 = vector.broadcast %cst_35 : f32 to vector<256x16xf32>
    %44 = arith.mulf %43, %40 : vector<256x16xf32>
    %45 = arith.select %42, %40, %44 : vector<256x16xi1>, vector<256x16xf32>
    %46 = vector.shape_cast %45 : vector<256x16xf32> to vector<16x16x16xf32>
    %c1_36 = arith.constant 1 : index
    %c1_37 = arith.constant 1 : index
    %c0_38 = arith.constant 0 : index
    %c0_39 = arith.constant 0 : index
    %47 = vector.load %arg16[%c1_36, %c1_37, %c0_38, %c0_39] : memref<4x17x17x16xf32, #tpu.memory_space<vmem>>, vector<1x16x16x16xf32>
    %48 = vector.shape_cast %47 : vector<1x16x16x16xf32> to vector<16x16x16xf32>
    %49 = vector.shape_cast %46 : vector<16x16x16xf32> to vector<1x16x16x16xf32>
    tpu.vector_store %arg16[%c1_36, %c1_37, %c0_38, %c0_39], %49 {strides = array<i32>} : memref<4x17x17x16xf32, #tpu.memory_space<vmem>>, vector<1x16x16x16xf32>,
    %c0_40 = arith.constant 0 : index
    %c768 = arith.constant 768 : index
    %c0_41 = arith.constant 0 : index
    %50 = vector.load %arg1[%c0_40, %c768, %c0_41] : memref<1x1024x16xf32, #tpu.memory_space<vmem>>, vector<1x256x16xf32>
    %51 = vector.shape_cast %50 : vector<1x256x16xf32> to vector<256x16xf32>
    %c0_42 = arith.constant 0 : index
    %c0_43 = arith.constant 0 : index
    %52 = vector.load %arg2[%c0_42, %c0_43] : memref<16x16xf32, #tpu.memory_space<vmem>>, vector<16x16xf32>
    %cst_44 = arith.constant dense<0.000000e+00> : vector<256x16xf32>
    %53 = tpu.matmul %51, %52, %cst_44 {dimension_numbers = #tpu.dot_dimension_numbers<[1], [0], [0], [1], [0, 0, 1, 1], [], []>} : vector<256x16xf32>, vector<16x16xf32>, vector<256x16xf32> -> vector<256x16xf32>
    %c0_45 = arith.constant 0 : index
    %c0_46 = arith.constant 0 : index
    %54 = vector.load %arg3[%c0_45, %c0_46] : memref<1x16xf32, #tpu.memory_space<vmem>>, vector<1x16xf32>
    %55 = vector.broadcast %54 : vector<1x16xf32> to vector<256x16xf32>
    %56 = arith.addf %53, %55 : vector<256x16xf32>
    %cst_47 = arith.constant 0.000000e+00 : f32
    %57 = vector.broadcast %cst_47 : f32 to vector<256x16xf32>
    %58 = arith.cmpf oge, %56, %57 : vector<256x16xf32>
    %cst_48 = arith.constant 1.000000e-01 : f32
    %59 = vector.broadcast %cst_48 : f32 to vector<256x16xf32>
    %60 = arith.mulf %59, %56 : vector<256x16xf32>
    %61 = arith.select %58, %56, %60 : vector<256x16xi1>, vector<256x16xf32>
    %62 = vector.shape_cast %61 : vector<256x16xf32> to vector<16x16x16xf32>
    %c0_49 = arith.constant 0 : index
    %c1_50 = arith.constant 1 : index
    %c1_51 = arith.constant 1 : index
    %c0_52 = arith.constant 0 : index
    %63 = vector.load %arg16[%c0_49, %c1_50, %c1_51, %c0_52] : memref<4x17x17x16xf32, #tpu.memory_space<vmem>>, vector<1x16x16x16xf32>
    %64 = vector.shape_cast %63 : vector<1x16x16x16xf32> to vector<16x16x16xf32>
    %65 = vector.shape_cast %62 : vector<16x16x16xf32> to vector<1x16x16x16xf32>
    tpu.vector_store %arg16[%c0_49, %c1_50, %c1_51, %c0_52], %65 {strides = array<i32>} : memref<4x17x17x16xf32, #tpu.memory_space<vmem>>, vector<1x16x16x16xf32>,
    %c0_53 = arith.constant 0 : index
    %c0_54 = arith.constant 0 : index
    %c0_55 = arith.constant 0 : index
    %c0_56 = arith.constant 0 : index
    %66 = vector.load %arg16[%c0_53, %c0_54, %c0_55, %c0_56] : memref<4x17x17x16xf32, #tpu.memory_space<vmem>>, vector<1x17x17x16xf32>
    %67 = vector.shape_cast %66 : vector<1x17x17x16xf32> to vector<17x17x16xf32>
    %c1_57 = arith.constant 1 : index
    %c0_58 = arith.constant 0 : index
    %c0_59 = arith.constant 0 : index
    %c0_60 = arith.constant 0 : index
    %68 = vector.load %arg16[%c1_57, %c0_58, %c0_59, %c0_60] : memref<4x17x17x16xf32, #tpu.memory_space<vmem>>, vector<1x17x17x16xf32>
    %69 = vector.shape_cast %68 : vector<1x17x17x16xf32> to vector<17x17x16xf32>
    %c2_61 = arith.constant 2 : index
    %c0_62 = arith.constant 0 : index
    %c0_63 = arith.constant 0 : index
    %c0_64 = arith.constant 0 : index
    %70 = vector.load %arg16[%c2_61, %c0_62, %c0_63, %c0_64] : memref<4x17x17x16xf32, #tpu.memory_space<vmem>>, vector<1x17x17x16xf32>
    %71 = vector.shape_cast %70 : vector<1x17x17x16xf32> to vector<17x17x16xf32>
    %c3_65 = arith.constant 3 : index
    %c0_66 = arith.constant 0 : index
    %c0_67 = arith.constant 0 : index
    %c0_68 = arith.constant 0 : index
    %72 = vector.load %arg16[%c3_65, %c0_66, %c0_67, %c0_68] : memref<4x17x17x16xf32, #tpu.memory_space<vmem>>, vector<1x17x17x16xf32>
    %73 = vector.shape_cast %72 : vector<1x17x17x16xf32> to vector<17x17x16xf32>
    %74 = tpu.concatenate %67, %69, %71, %73 in 2 : vector<17x17x16xf32>, vector<17x17x16xf32>, vector<17x17x16xf32>, vector<17x17x16xf32> -> vector<17x17x64xf32>
    %cst_69 = arith.constant 0.000000e+00 : f32
    %75 = vector.broadcast %cst_69 : f32 to vector<256x32xf32>
    %76 = vector.extract_strided_slice %74 {offsets = [0, 0, 0], sizes = [16, 16, 64], strides = [1, 1, 1]} : vector<17x17x64xf32> to vector<16x16x64xf32>
    %77 = vector.shape_cast %76 : vector<16x16x64xf32> to vector<256x64xf32>
    %c0_70 = arith.constant 0 : index
    %c0_71 = arith.constant 0 : index
    %c0_72 = arith.constant 0 : index
    %78 = vector.load %arg4[%c0_70, %c0_71, %c0_72] : memref<4x64x32xf32, #tpu.memory_space<vmem>>, vector<1x64x32xf32>
    %79 = vector.shape_cast %78 : vector<1x64x32xf32> to vector<64x32xf32>
    %cst_73 = arith.constant dense<0.000000e+00> : vector<256x32xf32>
    %80 = tpu.matmul %77, %79, %cst_73 {dimension_numbers = #tpu.dot_dimension_numbers<[1], [0], [0], [1], [0, 0, 1, 1], [], []>} : vector<256x64xf32>, vector<64x32xf32>, vector<256x32xf32> -> vector<256x32xf32>
    %81 = arith.addf %75, %80 : vector<256x32xf32>
    %82 = vector.extract_strided_slice %74 {offsets = [0, 1, 0], sizes = [16, 16, 64], strides = [1, 1, 1]} : vector<17x17x64xf32> to vector<16x16x64xf32>
    %83 = vector.shape_cast %82 : vector<16x16x64xf32> to vector<256x64xf32>
    %c1_74 = arith.constant 1 : index
    %c0_75 = arith.constant 0 : index
    %c0_76 = arith.constant 0 : index
    %84 = vector.load %arg4[%c1_74, %c0_75, %c0_76] : memref<4x64x32xf32, #tpu.memory_space<vmem>>, vector<1x64x32xf32>
    %85 = vector.shape_cast %84 : vector<1x64x32xf32> to vector<64x32xf32>
    %cst_77 = arith.constant dense<0.000000e+00> : vector<256x32xf32>
    %86 = tpu.matmul %83, %85, %cst_77 {dimension_numbers = #tpu.dot_dimension_numbers<[1], [0], [0], [1], [0, 0, 1, 1], [], []>} : vector<256x64xf32>, vector<64x32xf32>, vector<256x32xf32> -> vector<256x32xf32>
    %87 = arith.addf %81, %86 : vector<256x32xf32>
    %88 = vector.extract_strided_slice %74 {offsets = [1, 0, 0], sizes = [16, 16, 64], strides = [1, 1, 1]} : vector<17x17x64xf32> to vector<16x16x64xf32>
    %89 = vector.shape_cast %88 : vector<16x16x64xf32> to vector<256x64xf32>
    %c2_78 = arith.constant 2 : index
    %c0_79 = arith.constant 0 : index
    %c0_80 = arith.constant 0 : index
    %90 = vector.load %arg4[%c2_78, %c0_79, %c0_80] : memref<4x64x32xf32, #tpu.memory_space<vmem>>, vector<1x64x32xf32>
    %91 = vector.shape_cast %90 : vector<1x64x32xf32> to vector<64x32xf32>
    %cst_81 = arith.constant dense<0.000000e+00> : vector<256x32xf32>
    %92 = tpu.matmul %89, %91, %cst_81 {dimension_numbers = #tpu.dot_dimension_numbers<[1], [0], [0], [1], [0, 0, 1, 1], [], []>} : vector<256x64xf32>, vector<64x32xf32>, vector<256x32xf32> -> vector<256x32xf32>
    %93 = arith.addf %87, %92 : vector<256x32xf32>
    %94 = vector.extract_strided_slice %74 {offsets = [1, 1, 0], sizes = [16, 16, 64], strides = [1, 1, 1]} : vector<17x17x64xf32> to vector<16x16x64xf32>
    %95 = vector.shape_cast %94 : vector<16x16x64xf32> to vector<256x64xf32>
    %c3_82 = arith.constant 3 : index
    %c0_83 = arith.constant 0 : index
    %c0_84 = arith.constant 0 : index
    %96 = vector.load %arg4[%c3_82, %c0_83, %c0_84] : memref<4x64x32xf32, #tpu.memory_space<vmem>>, vector<1x64x32xf32>
    %97 = vector.shape_cast %96 : vector<1x64x32xf32> to vector<64x32xf32>
    %cst_85 = arith.constant dense<0.000000e+00> : vector<256x32xf32>
    %98 = tpu.matmul %95, %97, %cst_85 {dimension_numbers = #tpu.dot_dimension_numbers<[1], [0], [0], [1], [0, 0, 1, 1], [], []>} : vector<256x64xf32>, vector<64x32xf32>, vector<256x32xf32> -> vector<256x32xf32>
    %99 = arith.addf %93, %98 : vector<256x32xf32>
    %c0_86 = arith.constant 0 : index
    %c0_87 = arith.constant 0 : index
    %100 = vector.load %arg5[%c0_86, %c0_87] : memref<1x32xf32, #tpu.memory_space<vmem>>, vector<1x32xf32>
    %101 = vector.broadcast %100 : vector<1x32xf32> to vector<256x32xf32>
    %102 = arith.addf %99, %101 : vector<256x32xf32>
    %cst_88 = arith.constant 0.000000e+00 : f32
    %103 = vector.broadcast %cst_88 : f32 to vector<256x32xf32>
    %104 = arith.cmpf oge, %102, %103 : vector<256x32xf32>
    %cst_89 = arith.constant 1.000000e-01 : f32
    %105 = vector.broadcast %cst_89 : f32 to vector<256x32xf32>
    %106 = arith.mulf %105, %102 : vector<256x32xf32>
    %107 = arith.select %104, %102, %106 : vector<256x32xi1>, vector<256x32xf32>
    %cst_90 = arith.constant 0.000000e+00 : f32
    %108 = vector.broadcast %cst_90 : f32 to vector<4x9x9x32xf32>
    %c0_91 = arith.constant 0 : index
    %c0_92 = arith.constant 0 : index
    %c0_93 = arith.constant 0 : index
    %c0_94 = arith.constant 0 : index
    %109 = vector.load %arg17[%c0_91, %c0_92, %c0_93, %c0_94] : memref<4x9x9x32xf32, #tpu.memory_space<vmem>>, vector<4x9x9x32xf32>
    tpu.vector_store %arg17[%c0_91, %c0_92, %c0_93, %c0_94], %108 {strides = array<i32>} : memref<4x9x9x32xf32, #tpu.memory_space<vmem>>, vector<4x9x9x32xf32>,
    %c0_95 = arith.constant 0 : index
    %c0_96 = arith.constant 0 : index
    %c0_97 = arith.constant 0 : index
    %110 = vector.load %arg6[%c0_95, %c0_96, %c0_97] : memref<4x64x256xf32, #tpu.memory_space<vmem>>, vector<1x64x256xf32>
    %111 = vector.shape_cast %110 : vector<1x64x256xf32> to vector<64x256xf32>
    %cst_98 = arith.constant dense<0.000000e+00> : vector<64x32xf32>
    %112 = tpu.matmul %111, %107, %cst_98 {dimension_numbers = #tpu.dot_dimension_numbers<[1], [0], [0], [1], [0, 0, 1, 1], [], []>} : vector<64x256xf32>, vector<256x32xf32>, vector<64x32xf32> -> vector<64x32xf32>
    %113 = vector.shape_cast %112 : vector<64x32xf32> to vector<8x8x32xf32>
    %c3_99 = arith.constant 3 : index
    %c0_100 = arith.constant 0 : index
    %c0_101 = arith.constant 0 : index
    %c0_102 = arith.constant 0 : index
    %114 = vector.load %arg17[%c3_99, %c0_100, %c0_101, %c0_102] : memref<4x9x9x32xf32, #tpu.memory_space<vmem>>, vector<1x8x8x32xf32>
    %115 = vector.shape_cast %114 : vector<1x8x8x32xf32> to vector<8x8x32xf32>
    %116 = vector.shape_cast %113 : vector<8x8x32xf32> to vector<1x8x8x32xf32>
    tpu.vector_store %arg17[%c3_99, %c0_100, %c0_101, %c0_102], %116 {strides = array<i32>} : memref<4x9x9x32xf32, #tpu.memory_space<vmem>>, vector<1x8x8x32xf32>,
    %c1_103 = arith.constant 1 : index
    %c0_104 = arith.constant 0 : index
    %c0_105 = arith.constant 0 : index
    %117 = vector.load %arg6[%c1_103, %c0_104, %c0_105] : memref<4x64x256xf32, #tpu.memory_space<vmem>>, vector<1x64x256xf32>
    %118 = vector.shape_cast %117 : vector<1x64x256xf32> to vector<64x256xf32>
    %cst_106 = arith.constant dense<0.000000e+00> : vector<64x32xf32>
    %119 = tpu.matmul %118, %107, %cst_106 {dimension_numbers = #tpu.dot_dimension_numbers<[1], [0], [0], [1], [0, 0, 1, 1], [], []>} : vector<64x256xf32>, vector<256x32xf32>, vector<64x32xf32> -> vector<64x32xf32>
    %120 = vector.shape_cast %119 : vector<64x32xf32> to vector<8x8x32xf32>
    %c2_107 = arith.constant 2 : index
    %c0_108 = arith.constant 0 : index
    %c1_109 = arith.constant 1 : index
    %c0_110 = arith.constant 0 : index
    %121 = vector.load %arg17[%c2_107, %c0_108, %c1_109, %c0_110] : memref<4x9x9x32xf32, #tpu.memory_space<vmem>>, vector<1x8x8x32xf32>
    %122 = vector.shape_cast %121 : vector<1x8x8x32xf32> to vector<8x8x32xf32>
    %123 = vector.shape_cast %120 : vector<8x8x32xf32> to vector<1x8x8x32xf32>
    tpu.vector_store %arg17[%c2_107, %c0_108, %c1_109, %c0_110], %123 {strides = array<i32>} : memref<4x9x9x32xf32, #tpu.memory_space<vmem>>, vector<1x8x8x32xf32>,
    %c2_111 = arith.constant 2 : index
    %c0_112 = arith.constant 0 : index
    %c0_113 = arith.constant 0 : index
    %124 = vector.load %arg6[%c2_111, %c0_112, %c0_113] : memref<4x64x256xf32, #tpu.memory_space<vmem>>, vector<1x64x256xf32>
    %125 = vector.shape_cast %124 : vector<1x64x256xf32> to vector<64x256xf32>
    %cst_114 = arith.constant dense<0.000000e+00> : vector<64x32xf32>
    %126 = tpu.matmul %125, %107, %cst_114 {dimension_numbers = #tpu.dot_dimension_numbers<[1], [0], [0], [1], [0, 0, 1, 1], [], []>} : vector<64x256xf32>, vector<256x32xf32>, vector<64x32xf32> -> vector<64x32xf32>
    %127 = vector.shape_cast %126 : vector<64x32xf32> to vector<8x8x32xf32>
    %c1_115 = arith.constant 1 : index
    %c1_116 = arith.constant 1 : index
    %c0_117 = arith.constant 0 : index
    %c0_118 = arith.constant 0 : index
    %128 = vector.load %arg17[%c1_115, %c1_116, %c0_117, %c0_118] : memref<4x9x9x32xf32, #tpu.memory_space<vmem>>, vector<1x8x8x32xf32>
    %129 = vector.shape_cast %128 : vector<1x8x8x32xf32> to vector<8x8x32xf32>
    %130 = vector.shape_cast %127 : vector<8x8x32xf32> to vector<1x8x8x32xf32>
    tpu.vector_store %arg17[%c1_115, %c1_116, %c0_117, %c0_118], %130 {strides = array<i32>} : memref<4x9x9x32xf32, #tpu.memory_space<vmem>>, vector<1x8x8x32xf32>,
    %c3_119 = arith.constant 3 : index
    %c0_120 = arith.constant 0 : index
    %c0_121 = arith.constant 0 : index
    %131 = vector.load %arg6[%c3_119, %c0_120, %c0_121] : memref<4x64x256xf32, #tpu.memory_space<vmem>>, vector<1x64x256xf32>
    %132 = vector.shape_cast %131 : vector<1x64x256xf32> to vector<64x256xf32>
    %cst_122 = arith.constant dense<0.000000e+00> : vector<64x32xf32>
    %133 = tpu.matmul %132, %107, %cst_122 {dimension_numbers = #tpu.dot_dimension_numbers<[1], [0], [0], [1], [0, 0, 1, 1], [], []>} : vector<64x256xf32>, vector<256x32xf32>, vector<64x32xf32> -> vector<64x32xf32>
    %134 = vector.shape_cast %133 : vector<64x32xf32> to vector<8x8x32xf32>
    %c0_123 = arith.constant 0 : index
    %c1_124 = arith.constant 1 : index
    %c1_125 = arith.constant 1 : index
    %c0_126 = arith.constant 0 : index
    %135 = vector.load %arg17[%c0_123, %c1_124, %c1_125, %c0_126] : memref<4x9x9x32xf32, #tpu.memory_space<vmem>>, vector<1x8x8x32xf32>
    %136 = vector.shape_cast %135 : vector<1x8x8x32xf32> to vector<8x8x32xf32>
    %137 = vector.shape_cast %134 : vector<8x8x32xf32> to vector<1x8x8x32xf32>
    tpu.vector_store %arg17[%c0_123, %c1_124, %c1_125, %c0_126], %137 {strides = array<i32>} : memref<4x9x9x32xf32, #tpu.memory_space<vmem>>, vector<1x8x8x32xf32>,
    %c0_127 = arith.constant 0 : index
    %c0_128 = arith.constant 0 : index
    %c0_129 = arith.constant 0 : index
    %c0_130 = arith.constant 0 : index
    %138 = vector.load %arg17[%c0_127, %c0_128, %c0_129, %c0_130] : memref<4x9x9x32xf32, #tpu.memory_space<vmem>>, vector<1x9x9x32xf32>
    %139 = vector.shape_cast %138 : vector<1x9x9x32xf32> to vector<9x9x32xf32>
    %c1_131 = arith.constant 1 : index
    %c0_132 = arith.constant 0 : index
    %c0_133 = arith.constant 0 : index
    %c0_134 = arith.constant 0 : index
    %140 = vector.load %arg17[%c1_131, %c0_132, %c0_133, %c0_134] : memref<4x9x9x32xf32, #tpu.memory_space<vmem>>, vector<1x9x9x32xf32>
    %141 = vector.shape_cast %140 : vector<1x9x9x32xf32> to vector<9x9x32xf32>
    %c2_135 = arith.constant 2 : index
    %c0_136 = arith.constant 0 : index
    %c0_137 = arith.constant 0 : index
    %c0_138 = arith.constant 0 : index
    %142 = vector.load %arg17[%c2_135, %c0_136, %c0_137, %c0_138] : memref<4x9x9x32xf32, #tpu.memory_space<vmem>>, vector<1x9x9x32xf32>
    %143 = vector.shape_cast %142 : vector<1x9x9x32xf32> to vector<9x9x32xf32>
    %c3_139 = arith.constant 3 : index
    %c0_140 = arith.constant 0 : index
    %c0_141 = arith.constant 0 : index
    %c0_142 = arith.constant 0 : index
    %144 = vector.load %arg17[%c3_139, %c0_140, %c0_141, %c0_142] : memref<4x9x9x32xf32, #tpu.memory_space<vmem>>, vector<1x9x9x32xf32>
    %145 = vector.shape_cast %144 : vector<1x9x9x32xf32> to vector<9x9x32xf32>
    %146 = tpu.concatenate %139, %141, %143, %145 in 2 : vector<9x9x32xf32>, vector<9x9x32xf32>, vector<9x9x32xf32>, vector<9x9x32xf32> -> vector<9x9x128xf32>
    %cst_143 = arith.constant 0.000000e+00 : f32
    %147 = vector.broadcast %cst_143 : f32 to vector<64x64xf32>
    %148 = vector.extract_strided_slice %146 {offsets = [0, 0, 0], sizes = [8, 8, 128], strides = [1, 1, 1]} : vector<9x9x128xf32> to vector<8x8x128xf32>
    %149 = vector.shape_cast %148 : vector<8x8x128xf32> to vector<64x128xf32>
    %c0_144 = arith.constant 0 : index
    %c0_145 = arith.constant 0 : index
    %c0_146 = arith.constant 0 : index
    %150 = vector.load %arg7[%c0_144, %c0_145, %c0_146] : memref<4x128x64xf32, #tpu.memory_space<vmem>>, vector<1x128x64xf32>
    %151 = vector.shape_cast %150 : vector<1x128x64xf32> to vector<128x64xf32>
    %cst_147 = arith.constant dense<0.000000e+00> : vector<64x64xf32>
    %152 = tpu.matmul %149, %151, %cst_147 {dimension_numbers = #tpu.dot_dimension_numbers<[1], [0], [0], [1], [0, 0, 1, 1], [], []>} : vector<64x128xf32>, vector<128x64xf32>, vector<64x64xf32> -> vector<64x64xf32>
    %153 = arith.addf %147, %152 : vector<64x64xf32>
    %154 = vector.extract_strided_slice %146 {offsets = [0, 1, 0], sizes = [8, 8, 128], strides = [1, 1, 1]} : vector<9x9x128xf32> to vector<8x8x128xf32>
    %155 = vector.shape_cast %154 : vector<8x8x128xf32> to vector<64x128xf32>
    %c1_148 = arith.constant 1 : index
    %c0_149 = arith.constant 0 : index
    %c0_150 = arith.constant 0 : index
    %156 = vector.load %arg7[%c1_148, %c0_149, %c0_150] : memref<4x128x64xf32, #tpu.memory_space<vmem>>, vector<1x128x64xf32>
    %157 = vector.shape_cast %156 : vector<1x128x64xf32> to vector<128x64xf32>
    %cst_151 = arith.constant dense<0.000000e+00> : vector<64x64xf32>
    %158 = tpu.matmul %155, %157, %cst_151 {dimension_numbers = #tpu.dot_dimension_numbers<[1], [0], [0], [1], [0, 0, 1, 1], [], []>} : vector<64x128xf32>, vector<128x64xf32>, vector<64x64xf32> -> vector<64x64xf32>
    %159 = arith.addf %153, %158 : vector<64x64xf32>
    %160 = vector.extract_strided_slice %146 {offsets = [1, 0, 0], sizes = [8, 8, 128], strides = [1, 1, 1]} : vector<9x9x128xf32> to vector<8x8x128xf32>
    %161 = vector.shape_cast %160 : vector<8x8x128xf32> to vector<64x128xf32>
    %c2_152 = arith.constant 2 : index
    %c0_153 = arith.constant 0 : index
    %c0_154 = arith.constant 0 : index
    %162 = vector.load %arg7[%c2_152, %c0_153, %c0_154] : memref<4x128x64xf32, #tpu.memory_space<vmem>>, vector<1x128x64xf32>
    %163 = vector.shape_cast %162 : vector<1x128x64xf32> to vector<128x64xf32>
    %cst_155 = arith.constant dense<0.000000e+00> : vector<64x64xf32>
    %164 = tpu.matmul %161, %163, %cst_155 {dimension_numbers = #tpu.dot_dimension_numbers<[1], [0], [0], [1], [0, 0, 1, 1], [], []>} : vector<64x128xf32>, vector<128x64xf32>, vector<64x64xf32> -> vector<64x64xf32>
    %165 = arith.addf %159, %164 : vector<64x64xf32>
    %166 = vector.extract_strided_slice %146 {offsets = [1, 1, 0], sizes = [8, 8, 128], strides = [1, 1, 1]} : vector<9x9x128xf32> to vector<8x8x128xf32>
    %167 = vector.shape_cast %166 : vector<8x8x128xf32> to vector<64x128xf32>
    %c3_156 = arith.constant 3 : index
    %c0_157 = arith.constant 0 : index
    %c0_158 = arith.constant 0 : index
    %168 = vector.load %arg7[%c3_156, %c0_157, %c0_158] : memref<4x128x64xf32, #tpu.memory_space<vmem>>, vector<1x128x64xf32>
    %169 = vector.shape_cast %168 : vector<1x128x64xf32> to vector<128x64xf32>
    %cst_159 = arith.constant dense<0.000000e+00> : vector<64x64xf32>
    %170 = tpu.matmul %167, %169, %cst_159 {dimension_numbers = #tpu.dot_dimension_numbers<[1], [0], [0], [1], [0, 0, 1, 1], [], []>} : vector<64x128xf32>, vector<128x64xf32>, vector<64x64xf32> -> vector<64x64xf32>
    %171 = arith.addf %165, %170 : vector<64x64xf32>
    %c0_160 = arith.constant 0 : index
    %c0_161 = arith.constant 0 : index
    %172 = vector.load %arg8[%c0_160, %c0_161] : memref<1x64xf32, #tpu.memory_space<vmem>>, vector<1x64xf32>
    %173 = vector.broadcast %172 : vector<1x64xf32> to vector<64x64xf32>
    %174 = arith.addf %171, %173 : vector<64x64xf32>
    %cst_162 = arith.constant 0.000000e+00 : f32
    %175 = vector.broadcast %cst_162 : f32 to vector<64x64xf32>
    %176 = arith.cmpf oge, %174, %175 : vector<64x64xf32>
    %cst_163 = arith.constant 1.000000e-01 : f32
    %177 = vector.broadcast %cst_163 : f32 to vector<64x64xf32>
    %178 = arith.mulf %177, %174 : vector<64x64xf32>
    %179 = arith.select %176, %174, %178 : vector<64x64xi1>, vector<64x64xf32>
    %cst_164 = arith.constant 0.000000e+00 : f32
    %180 = vector.broadcast %cst_164 : f32 to vector<4x5x5x64xf32>
    %c0_165 = arith.constant 0 : index
    %c0_166 = arith.constant 0 : index
    %c0_167 = arith.constant 0 : index
    %c0_168 = arith.constant 0 : index
    %181 = vector.load %arg18[%c0_165, %c0_166, %c0_167, %c0_168] : memref<4x5x5x64xf32, #tpu.memory_space<vmem>>, vector<4x5x5x64xf32>
    tpu.vector_store %arg18[%c0_165, %c0_166, %c0_167, %c0_168], %180 {strides = array<i32>} : memref<4x5x5x64xf32, #tpu.memory_space<vmem>>, vector<4x5x5x64xf32>,
    %c0_169 = arith.constant 0 : index
    %c0_170 = arith.constant 0 : index
    %c0_171 = arith.constant 0 : index
    %182 = vector.load %arg9[%c0_169, %c0_170, %c0_171] : memref<4x16x64xf32, #tpu.memory_space<vmem>>, vector<1x16x64xf32>
    %183 = vector.shape_cast %182 : vector<1x16x64xf32> to vector<16x64xf32>
    %cst_172 = arith.constant dense<0.000000e+00> : vector<16x64xf32>
    %184 = tpu.matmul %183, %179, %cst_172 {dimension_numbers = #tpu.dot_dimension_numbers<[1], [0], [0], [1], [0, 0, 1, 1], [], []>} : vector<16x64xf32>, vector<64x64xf32>, vector<16x64xf32> -> vector<16x64xf32>
    %185 = vector.extract_strided_slice %184 {offsets = [0, 0], sizes = [4, 64], strides = [1, 1]} : vector<16x64xf32> to vector<4x64xf32>
    %c3_173 = arith.constant 3 : index
    %c0_174 = arith.constant 0 : index
    %c0_175 = arith.constant 0 : index
    %c0_176 = arith.constant 0 : index
    %186 = vector.load %arg18[%c3_173, %c0_174, %c0_175, %c0_176] : memref<4x5x5x64xf32, #tpu.memory_space<vmem>>, vector<1x1x4x64xf32>
    %187 = vector.shape_cast %186 : vector<1x1x4x64xf32> to vector<4x64xf32>
    %188 = vector.shape_cast %185 : vector<4x64xf32> to vector<1x1x4x64xf32>
    tpu.vector_store %arg18[%c3_173, %c0_174, %c0_175, %c0_176], %188 {strides = array<i32>} : memref<4x5x5x64xf32, #tpu.memory_space<vmem>>, vector<1x1x4x64xf32>,
    %189 = vector.extract_strided_slice %184 {offsets = [4, 0], sizes = [4, 64], strides = [1, 1]} : vector<16x64xf32> to vector<4x64xf32>
    %c3_177 = arith.constant 3 : index
    %c1_178 = arith.constant 1 : index
    %c0_179 = arith.constant 0 : index
    %c0_180 = arith.constant 0 : index
    %190 = vector.load %arg18[%c3_177, %c1_178, %c0_179, %c0_180] : memref<4x5x5x64xf32, #tpu.memory_space<vmem>>, vector<1x1x4x64xf32>
    %191 = vector.shape_cast %190 : vector<1x1x4x64xf32> to vector<4x64xf32>
    %192 = vector.shape_cast %189 : vector<4x64xf32> to vector<1x1x4x64xf32>
    tpu.vector_store %arg18[%c3_177, %c1_178, %c0_179, %c0_180], %192 {strides = array<i32>} : memref<4x5x5x64xf32, #tpu.memory_space<vmem>>, vector<1x1x4x64xf32>,
    %193 = vector.extract_strided_slice %184 {offsets = [8, 0], sizes = [4, 64], strides = [1, 1]} : vector<16x64xf32> to vector<4x64xf32>
    %c3_181 = arith.constant 3 : index
    %c2_182 = arith.constant 2 : index
    %c0_183 = arith.constant 0 : index
    %c0_184 = arith.constant 0 : index
    %194 = vector.load %arg18[%c3_181, %c2_182, %c0_183, %c0_184] : memref<4x5x5x64xf32, #tpu.memory_space<vmem>>, vector<1x1x4x64xf32>
    %195 = vector.shape_cast %194 : vector<1x1x4x64xf32> to vector<4x64xf32>
    %196 = vector.shape_cast %193 : vector<4x64xf32> to vector<1x1x4x64xf32>
    tpu.vector_store %arg18[%c3_181, %c2_182, %c0_183, %c0_184], %196 {strides = array<i32>} : memref<4x5x5x64xf32, #tpu.memory_space<vmem>>, vector<1x1x4x64xf32>,
    %197 = vector.extract_strided_slice %184 {offsets = [12, 0], sizes = [4, 64], strides = [1, 1]} : vector<16x64xf32> to vector<4x64xf32>
    %c3_185 = arith.constant 3 : index
    %c3_186 = arith.constant 3 : index
    %c0_187 = arith.constant 0 : index
    %c0_188 = arith.constant 0 : index
    %198 = vector.load %arg18[%c3_185, %c3_186, %c0_187, %c0_188] : memref<4x5x5x64xf32, #tpu.memory_space<vmem>>, vector<1x1x4x64xf32>
    %199 = vector.shape_cast %198 : vector<1x1x4x64xf32> to vector<4x64xf32>
    %200 = vector.shape_cast %197 : vector<4x64xf32> to vector<1x1x4x64xf32>
    tpu.vector_store %arg18[%c3_185, %c3_186, %c0_187, %c0_188], %200 {strides = array<i32>} : memref<4x5x5x64xf32, #tpu.memory_space<vmem>>, vector<1x1x4x64xf32>,
    %c1_189 = arith.constant 1 : index
    %c0_190 = arith.constant 0 : index
    %c0_191 = arith.constant 0 : index
    %201 = vector.load %arg9[%c1_189, %c0_190, %c0_191] : memref<4x16x64xf32, #tpu.memory_space<vmem>>, vector<1x16x64xf32>
    %202 = vector.shape_cast %201 : vector<1x16x64xf32> to vector<16x64xf32>
    %cst_192 = arith.constant dense<0.000000e+00> : vector<16x64xf32>
    %203 = tpu.matmul %202, %179, %cst_192 {dimension_numbers = #tpu.dot_dimension_numbers<[1], [0], [0], [1], [0, 0, 1, 1], [], []>} : vector<16x64xf32>, vector<64x64xf32>, vector<16x64xf32> -> vector<16x64xf32>
    %204 = vector.extract_strided_slice %203 {offsets = [0, 0], sizes = [4, 64], strides = [1, 1]} : vector<16x64xf32> to vector<4x64xf32>
    %c2_193 = arith.constant 2 : index
    %c0_194 = arith.constant 0 : index
    %c1_195 = arith.constant 1 : index
    %c0_196 = arith.constant 0 : index
    %205 = vector.load %arg18[%c2_193, %c0_194, %c1_195, %c0_196] : memref<4x5x5x64xf32, #tpu.memory_space<vmem>>, vector<1x1x4x64xf32>
    %206 = vector.shape_cast %205 : vector<1x1x4x64xf32> to vector<4x64xf32>
    %207 = vector.shape_cast %204 : vector<4x64xf32> to vector<1x1x4x64xf32>
    tpu.vector_store %arg18[%c2_193, %c0_194, %c1_195, %c0_196], %207 {strides = array<i32>} : memref<4x5x5x64xf32, #tpu.memory_space<vmem>>, vector<1x1x4x64xf32>,
    %208 = vector.extract_strided_slice %203 {offsets = [4, 0], sizes = [4, 64], strides = [1, 1]} : vector<16x64xf32> to vector<4x64xf32>
    %c2_197 = arith.constant 2 : index
    %c1_198 = arith.constant 1 : index
    %c1_199 = arith.constant 1 : index
    %c0_200 = arith.constant 0 : index
    %209 = vector.load %arg18[%c2_197, %c1_198, %c1_199, %c0_200] : memref<4x5x5x64xf32, #tpu.memory_space<vmem>>, vector<1x1x4x64xf32>
    %210 = vector.shape_cast %209 : vector<1x1x4x64xf32> to vector<4x64xf32>
    %211 = vector.shape_cast %208 : vector<4x64xf32> to vector<1x1x4x64xf32>
    tpu.vector_store %arg18[%c2_197, %c1_198, %c1_199, %c0_200], %211 {strides = array<i32>} : memref<4x5x5x64xf32, #tpu.memory_space<vmem>>, vector<1x1x4x64xf32>,
    %212 = vector.extract_strided_slice %203 {offsets = [8, 0], sizes = [4, 64], strides = [1, 1]} : vector<16x64xf32> to vector<4x64xf32>
    %c2_201 = arith.constant 2 : index
    %c2_202 = arith.constant 2 : index
    %c1_203 = arith.constant 1 : index
    %c0_204 = arith.constant 0 : index
    %213 = vector.load %arg18[%c2_201, %c2_202, %c1_203, %c0_204] : memref<4x5x5x64xf32, #tpu.memory_space<vmem>>, vector<1x1x4x64xf32>
    %214 = vector.shape_cast %213 : vector<1x1x4x64xf32> to vector<4x64xf32>
    %215 = vector.shape_cast %212 : vector<4x64xf32> to vector<1x1x4x64xf32>
    tpu.vector_store %arg18[%c2_201, %c2_202, %c1_203, %c0_204], %215 {strides = array<i32>} : memref<4x5x5x64xf32, #tpu.memory_space<vmem>>, vector<1x1x4x64xf32>,
    %216 = vector.extract_strided_slice %203 {offsets = [12, 0], sizes = [4, 64], strides = [1, 1]} : vector<16x64xf32> to vector<4x64xf32>
    %c2_205 = arith.constant 2 : index
    %c3_206 = arith.constant 3 : index
    %c1_207 = arith.constant 1 : index
    %c0_208 = arith.constant 0 : index
    %217 = vector.load %arg18[%c2_205, %c3_206, %c1_207, %c0_208] : memref<4x5x5x64xf32, #tpu.memory_space<vmem>>, vector<1x1x4x64xf32>
    %218 = vector.shape_cast %217 : vector<1x1x4x64xf32> to vector<4x64xf32>
    %219 = vector.shape_cast %216 : vector<4x64xf32> to vector<1x1x4x64xf32>
    tpu.vector_store %arg18[%c2_205, %c3_206, %c1_207, %c0_208], %219 {strides = array<i32>} : memref<4x5x5x64xf32, #tpu.memory_space<vmem>>, vector<1x1x4x64xf32>,
    %c2_209 = arith.constant 2 : index
    %c0_210 = arith.constant 0 : index
    %c0_211 = arith.constant 0 : index
    %220 = vector.load %arg9[%c2_209, %c0_210, %c0_211] : memref<4x16x64xf32, #tpu.memory_space<vmem>>, vector<1x16x64xf32>
    %221 = vector.shape_cast %220 : vector<1x16x64xf32> to vector<16x64xf32>
    %cst_212 = arith.constant dense<0.000000e+00> : vector<16x64xf32>
    %222 = tpu.matmul %221, %179, %cst_212 {dimension_numbers = #tpu.dot_dimension_numbers<[1], [0], [0], [1], [0, 0, 1, 1], [], []>} : vector<16x64xf32>, vector<64x64xf32>, vector<16x64xf32> -> vector<16x64xf32>
    %223 = vector.extract_strided_slice %222 {offsets = [0, 0], sizes = [4, 64], strides = [1, 1]} : vector<16x64xf32> to vector<4x64xf32>
    %c1_213 = arith.constant 1 : index
    %c1_214 = arith.constant 1 : index
    %c0_215 = arith.constant 0 : index
    %c0_216 = arith.constant 0 : index
    %224 = vector.load %arg18[%c1_213, %c1_214, %c0_215, %c0_216] : memref<4x5x5x64xf32, #tpu.memory_space<vmem>>, vector<1x1x4x64xf32>
    %225 = vector.shape_cast %224 : vector<1x1x4x64xf32> to vector<4x64xf32>
    %226 = vector.shape_cast %223 : vector<4x64xf32> to vector<1x1x4x64xf32>
    tpu.vector_store %arg18[%c1_213, %c1_214, %c0_215, %c0_216], %226 {strides = array<i32>} : memref<4x5x5x64xf32, #tpu.memory_space<vmem>>, vector<1x1x4x64xf32>,
    %227 = vector.extract_strided_slice %222 {offsets = [4, 0], sizes = [4, 64], strides = [1, 1]} : vector<16x64xf32> to vector<4x64xf32>
    %c1_217 = arith.constant 1 : index
    %c2_218 = arith.constant 2 : index
    %c0_219 = arith.constant 0 : index
    %c0_220 = arith.constant 0 : index
    %228 = vector.load %arg18[%c1_217, %c2_218, %c0_219, %c0_220] : memref<4x5x5x64xf32, #tpu.memory_space<vmem>>, vector<1x1x4x64xf32>
    %229 = vector.shape_cast %228 : vector<1x1x4x64xf32> to vector<4x64xf32>
    %230 = vector.shape_cast %227 : vector<4x64xf32> to vector<1x1x4x64xf32>
    tpu.vector_store %arg18[%c1_217, %c2_218, %c0_219, %c0_220], %230 {strides = array<i32>} : memref<4x5x5x64xf32, #tpu.memory_space<vmem>>, vector<1x1x4x64xf32>,
    %231 = vector.extract_strided_slice %222 {offsets = [8, 0], sizes = [4, 64], strides = [1, 1]} : vector<16x64xf32> to vector<4x64xf32>
    %c1_221 = arith.constant 1 : index
    %c3_222 = arith.constant 3 : index
    %c0_223 = arith.constant 0 : index
    %c0_224 = arith.constant 0 : index
    %232 = vector.load %arg18[%c1_221, %c3_222, %c0_223, %c0_224] : memref<4x5x5x64xf32, #tpu.memory_space<vmem>>, vector<1x1x4x64xf32>
    %233 = vector.shape_cast %232 : vector<1x1x4x64xf32> to vector<4x64xf32>
    %234 = vector.shape_cast %231 : vector<4x64xf32> to vector<1x1x4x64xf32>
    tpu.vector_store %arg18[%c1_221, %c3_222, %c0_223, %c0_224], %234 {strides = array<i32>} : memref<4x5x5x64xf32, #tpu.memory_space<vmem>>, vector<1x1x4x64xf32>,
    %235 = vector.extract_strided_slice %222 {offsets = [12, 0], sizes = [4, 64], strides = [1, 1]} : vector<16x64xf32> to vector<4x64xf32>
    %c1_225 = arith.constant 1 : index
    %c4 = arith.constant 4 : index
    %c0_226 = arith.constant 0 : index
    %c0_227 = arith.constant 0 : index
    %236 = vector.load %arg18[%c1_225, %c4, %c0_226, %c0_227] : memref<4x5x5x64xf32, #tpu.memory_space<vmem>>, vector<1x1x4x64xf32>
    %237 = vector.shape_cast %236 : vector<1x1x4x64xf32> to vector<4x64xf32>
    %238 = vector.shape_cast %235 : vector<4x64xf32> to vector<1x1x4x64xf32>
    tpu.vector_store %arg18[%c1_225, %c4, %c0_226, %c0_227], %238 {strides = array<i32>} : memref<4x5x5x64xf32, #tpu.memory_space<vmem>>, vector<1x1x4x64xf32>,
    %c3_228 = arith.constant 3 : index
    %c0_229 = arith.constant 0 : index
    %c0_230 = arith.constant 0 : index
    %239 = vector.load %arg9[%c3_228, %c0_229, %c0_230] : memref<4x16x64xf32, #tpu.memory_space<vmem>>, vector<1x16x64xf32>
    %240 = vector.shape_cast %239 : vector<1x16x64xf32> to vector<16x64xf32>
    %cst_231 = arith.constant dense<0.000000e+00> : vector<16x64xf32>
    %241 = tpu.matmul %240, %179, %cst_231 {dimension_numbers = #tpu.dot_dimension_numbers<[1], [0], [0], [1], [0, 0, 1, 1], [], []>} : vector<16x64xf32>, vector<64x64xf32>, vector<16x64xf32> -> vector<16x64xf32>
    %242 = vector.extract_strided_slice %241 {offsets = [0, 0], sizes = [4, 64], strides = [1, 1]} : vector<16x64xf32> to vector<4x64xf32>
    %c0_232 = arith.constant 0 : index
    %c1_233 = arith.constant 1 : index
    %c1_234 = arith.constant 1 : index
    %c0_235 = arith.constant 0 : index
    %243 = vector.load %arg18[%c0_232, %c1_233, %c1_234, %c0_235] : memref<4x5x5x64xf32, #tpu.memory_space<vmem>>, vector<1x1x4x64xf32>
    %244 = vector.shape_cast %243 : vector<1x1x4x64xf32> to vector<4x64xf32>
    %245 = vector.shape_cast %242 : vector<4x64xf32> to vector<1x1x4x64xf32>
    tpu.vector_store %arg18[%c0_232, %c1_233, %c1_234, %c0_235], %245 {strides = array<i32>} : memref<4x5x5x64xf32, #tpu.memory_space<vmem>>, vector<1x1x4x64xf32>,
    %246 = vector.extract_strided_slice %241 {offsets = [4, 0], sizes = [4, 64], strides = [1, 1]} : vector<16x64xf32> to vector<4x64xf32>
    %c0_236 = arith.constant 0 : index
    %c2_237 = arith.constant 2 : index
    %c1_238 = arith.constant 1 : index
    %c0_239 = arith.constant 0 : index
    %247 = vector.load %arg18[%c0_236, %c2_237, %c1_238, %c0_239] : memref<4x5x5x64xf32, #tpu.memory_space<vmem>>, vector<1x1x4x64xf32>
    %248 = vector.shape_cast %247 : vector<1x1x4x64xf32> to vector<4x64xf32>
    %249 = vector.shape_cast %246 : vector<4x64xf32> to vector<1x1x4x64xf32>
    tpu.vector_store %arg18[%c0_236, %c2_237, %c1_238, %c0_239], %249 {strides = array<i32>} : memref<4x5x5x64xf32, #tpu.memory_space<vmem>>, vector<1x1x4x64xf32>,
    %250 = vector.extract_strided_slice %241 {offsets = [8, 0], sizes = [4, 64], strides = [1, 1]} : vector<16x64xf32> to vector<4x64xf32>
    %c0_240 = arith.constant 0 : index
    %c3_241 = arith.constant 3 : index
    %c1_242 = arith.constant 1 : index
    %c0_243 = arith.constant 0 : index
    %251 = vector.load %arg18[%c0_240, %c3_241, %c1_242, %c0_243] : memref<4x5x5x64xf32, #tpu.memory_space<vmem>>, vector<1x1x4x64xf32>
    %252 = vector.shape_cast %251 : vector<1x1x4x64xf32> to vector<4x64xf32>
    %253 = vector.shape_cast %250 : vector<4x64xf32> to vector<1x1x4x64xf32>
    tpu.vector_store %arg18[%c0_240, %c3_241, %c1_242, %c0_243], %253 {strides = array<i32>} : memref<4x5x5x64xf32, #tpu.memory_space<vmem>>, vector<1x1x4x64xf32>,
    %254 = vector.extract_strided_slice %241 {offsets = [12, 0], sizes = [4, 64], strides = [1, 1]} : vector<16x64xf32> to vector<4x64xf32>
    %c0_244 = arith.constant 0 : index
    %c4_245 = arith.constant 4 : index
    %c1_246 = arith.constant 1 : index
    %c0_247 = arith.constant 0 : index
    %255 = vector.load %arg18[%c0_244, %c4_245, %c1_246, %c0_247] : memref<4x5x5x64xf32, #tpu.memory_space<vmem>>, vector<1x1x4x64xf32>
    %256 = vector.shape_cast %255 : vector<1x1x4x64xf32> to vector<4x64xf32>
    %257 = vector.shape_cast %254 : vector<4x64xf32> to vector<1x1x4x64xf32>
    tpu.vector_store %arg18[%c0_244, %c4_245, %c1_246, %c0_247], %257 {strides = array<i32>} : memref<4x5x5x64xf32, #tpu.memory_space<vmem>>, vector<1x1x4x64xf32>,
    %c0_248 = arith.constant 0 : index
    %c0_249 = arith.constant 0 : index
    %c0_250 = arith.constant 0 : index
    %c0_251 = arith.constant 0 : index
    %258 = vector.load %arg18[%c0_248, %c0_249, %c0_250, %c0_251] : memref<4x5x5x64xf32, #tpu.memory_space<vmem>>, vector<1x5x5x64xf32>
    %259 = vector.shape_cast %258 : vector<1x5x5x64xf32> to vector<5x5x64xf32>
    %c1_252 = arith.constant 1 : index
    %c0_253 = arith.constant 0 : index
    %c0_254 = arith.constant 0 : index
    %c0_255 = arith.constant 0 : index
    %260 = vector.load %arg18[%c1_252, %c0_253, %c0_254, %c0_255] : memref<4x5x5x64xf32, #tpu.memory_space<vmem>>, vector<1x5x5x64xf32>
    %261 = vector.shape_cast %260 : vector<1x5x5x64xf32> to vector<5x5x64xf32>
    %c2_256 = arith.constant 2 : index
    %c0_257 = arith.constant 0 : index
    %c0_258 = arith.constant 0 : index
    %c0_259 = arith.constant 0 : index
    %262 = vector.load %arg18[%c2_256, %c0_257, %c0_258, %c0_259] : memref<4x5x5x64xf32, #tpu.memory_space<vmem>>, vector<1x5x5x64xf32>
    %263 = vector.shape_cast %262 : vector<1x5x5x64xf32> to vector<5x5x64xf32>
    %c3_260 = arith.constant 3 : index
    %c0_261 = arith.constant 0 : index
    %c0_262 = arith.constant 0 : index
    %c0_263 = arith.constant 0 : index
    %264 = vector.load %arg18[%c3_260, %c0_261, %c0_262, %c0_263] : memref<4x5x5x64xf32, #tpu.memory_space<vmem>>, vector<1x5x5x64xf32>
    %265 = vector.shape_cast %264 : vector<1x5x5x64xf32> to vector<5x5x64xf32>
    %266 = tpu.concatenate %259, %261, %263, %265 in 2 : vector<5x5x64xf32>, vector<5x5x64xf32>, vector<5x5x64xf32>, vector<5x5x64xf32> -> vector<5x5x256xf32>
    %cst_264 = arith.constant 0.000000e+00 : f32
    %267 = vector.broadcast %cst_264 : f32 to vector<16x128xf32>
    %268 = vector.extract_strided_slice %266 {offsets = [0, 0, 0], sizes = [4, 4, 256], strides = [1, 1, 1]} : vector<5x5x256xf32> to vector<4x4x256xf32>
    %269 = vector.shape_cast %268 : vector<4x4x256xf32> to vector<16x256xf32>
    %c0_265 = arith.constant 0 : index
    %c0_266 = arith.constant 0 : index
    %c0_267 = arith.constant 0 : index
    %270 = vector.load %arg10[%c0_265, %c0_266, %c0_267] : memref<4x256x128xf32, #tpu.memory_space<vmem>>, vector<1x256x128xf32>
    %271 = vector.shape_cast %270 : vector<1x256x128xf32> to vector<256x128xf32>
    %cst_268 = arith.constant dense<0.000000e+00> : vector<16x128xf32>
    %272 = tpu.matmul %269, %271, %cst_268 {dimension_numbers = #tpu.dot_dimension_numbers<[1], [0], [0], [1], [0, 0, 1, 1], [], []>} : vector<16x256xf32>, vector<256x128xf32>, vector<16x128xf32> -> vector<16x128xf32>
    %273 = arith.addf %267, %272 : vector<16x128xf32>
    %274 = vector.extract_strided_slice %266 {offsets = [0, 1, 0], sizes = [4, 4, 256], strides = [1, 1, 1]} : vector<5x5x256xf32> to vector<4x4x256xf32>
    %275 = vector.shape_cast %274 : vector<4x4x256xf32> to vector<16x256xf32>
    %c1_269 = arith.constant 1 : index
    %c0_270 = arith.constant 0 : index
    %c0_271 = arith.constant 0 : index
    %276 = vector.load %arg10[%c1_269, %c0_270, %c0_271] : memref<4x256x128xf32, #tpu.memory_space<vmem>>, vector<1x256x128xf32>
    %277 = vector.shape_cast %276 : vector<1x256x128xf32> to vector<256x128xf32>
    %cst_272 = arith.constant dense<0.000000e+00> : vector<16x128xf32>
    %278 = tpu.matmul %275, %277, %cst_272 {dimension_numbers = #tpu.dot_dimension_numbers<[1], [0], [0], [1], [0, 0, 1, 1], [], []>} : vector<16x256xf32>, vector<256x128xf32>, vector<16x128xf32> -> vector<16x128xf32>
    %279 = arith.addf %273, %278 : vector<16x128xf32>
    %280 = vector.extract_strided_slice %266 {offsets = [1, 0, 0], sizes = [4, 4, 256], strides = [1, 1, 1]} : vector<5x5x256xf32> to vector<4x4x256xf32>
    %281 = vector.shape_cast %280 : vector<4x4x256xf32> to vector<16x256xf32>
    %c2_273 = arith.constant 2 : index
    %c0_274 = arith.constant 0 : index
    %c0_275 = arith.constant 0 : index
    %282 = vector.load %arg10[%c2_273, %c0_274, %c0_275] : memref<4x256x128xf32, #tpu.memory_space<vmem>>, vector<1x256x128xf32>
    %283 = vector.shape_cast %282 : vector<1x256x128xf32> to vector<256x128xf32>
    %cst_276 = arith.constant dense<0.000000e+00> : vector<16x128xf32>
    %284 = tpu.matmul %281, %283, %cst_276 {dimension_numbers = #tpu.dot_dimension_numbers<[1], [0], [0], [1], [0, 0, 1, 1], [], []>} : vector<16x256xf32>, vector<256x128xf32>, vector<16x128xf32> -> vector<16x128xf32>
    %285 = arith.addf %279, %284 : vector<16x128xf32>
    %286 = vector.extract_strided_slice %266 {offsets = [1, 1, 0], sizes = [4, 4, 256], strides = [1, 1, 1]} : vector<5x5x256xf32> to vector<4x4x256xf32>
    %287 = vector.shape_cast %286 : vector<4x4x256xf32> to vector<16x256xf32>
    %c3_277 = arith.constant 3 : index
    %c0_278 = arith.constant 0 : index
    %c0_279 = arith.constant 0 : index
    %288 = vector.load %arg10[%c3_277, %c0_278, %c0_279] : memref<4x256x128xf32, #tpu.memory_space<vmem>>, vector<1x256x128xf32>
    %289 = vector.shape_cast %288 : vector<1x256x128xf32> to vector<256x128xf32>
    %cst_280 = arith.constant dense<0.000000e+00> : vector<16x128xf32>
    %290 = tpu.matmul %287, %289, %cst_280 {dimension_numbers = #tpu.dot_dimension_numbers<[1], [0], [0], [1], [0, 0, 1, 1], [], []>} : vector<16x256xf32>, vector<256x128xf32>, vector<16x128xf32> -> vector<16x128xf32>
    %291 = arith.addf %285, %290 : vector<16x128xf32>
    %c0_281 = arith.constant 0 : index
    %c0_282 = arith.constant 0 : index
    %292 = vector.load %arg11[%c0_281, %c0_282] : memref<1x128xf32, #tpu.memory_space<vmem>>, vector<1x128xf32>
    %293 = vector.broadcast %292 : vector<1x128xf32> to vector<16x128xf32>
    %294 = arith.addf %291, %293 : vector<16x128xf32>
    %cst_283 = arith.constant 0.000000e+00 : f32
    %295 = vector.broadcast %cst_283 : f32 to vector<16x128xf32>
    %296 = arith.cmpf oge, %294, %295 : vector<16x128xf32>
    %cst_284 = arith.constant 1.000000e-01 : f32
    %297 = vector.broadcast %cst_284 : f32 to vector<16x128xf32>
    %298 = arith.mulf %297, %294 : vector<16x128xf32>
    %299 = arith.select %296, %294, %298 : vector<16x128xi1>, vector<16x128xf32>
    %c0_285 = arith.constant 0 : index
    %c0_286 = arith.constant 0 : index
    %c0_287 = arith.constant 0 : index
    %300 = vector.load %arg15[%c0_285, %c0_286, %c0_287] : memref<1x16x128xf32, #tpu.memory_space<vmem>>, vector<1x16x128xf32>
    %301 = vector.shape_cast %300 : vector<1x16x128xf32> to vector<16x128xf32>
    %302 = vector.shape_cast %299 : vector<16x128xf32> to vector<1x16x128xf32>
    tpu.vector_store %arg15[%c0_285, %c0_286, %c0_287], %302 {strides = array<i32>} : memref<1x16x128xf32, #tpu.memory_space<vmem>>, vector<1x16x128xf32>,
    %c0_288 = arith.constant 0 : index
    %c0_289 = arith.constant 0 : index
    %303 = vector.load %arg12[%c0_288, %c0_289] : memref<16x128xf32, #tpu.memory_space<vmem>>, vector<16x128xf32>
    %304 = arith.mulf %299, %303 : vector<16x128xf32>
    %cst_290 = arith.constant dense<0.000000e+00> : vector<16xf32>
    %305 = vector.multi_reduction <add>, %304, %cst_290 [1] : vector<16x128xf32> to vector<16xf32>
    %306 = vector.shape_cast %305 : vector<16xf32> to vector<16x1xf32>
    %cst_291 = arith.constant dense<0.000000e+00> : vector<1xf32>
    %307 = vector.multi_reduction <add>, %306, %cst_291 [0] : vector<16x1xf32> to vector<1xf32>
    %308 = vector.shape_cast %307 : vector<1xf32> to vector<1x1xf32>
    %c0_292 = arith.constant 0 : index
    %c0_293 = arith.constant 0 : index
    %309 = vector.load %arg13[%c0_292, %c0_293] : memref<1x1xf32, #tpu.memory_space<vmem>>, vector<1x1xf32>
    %310 = arith.addf %308, %309 : vector<1x1xf32>
    %c0_294 = arith.constant 0 : index
    %c0_295 = arith.constant 0 : index
    %c0_296 = arith.constant 0 : index
    %311 = vector.load %arg14[%c0_294, %c0_295, %c0_296] : memref<1x1x1xf32, #tpu.memory_space<vmem>>, vector<1x1x1xf32>
    %312 = vector.shape_cast %311 : vector<1x1x1xf32> to vector<1x1xf32>
    %313 = vector.shape_cast %310 : vector<1x1xf32> to vector<1x1x1xf32>
    tpu.vector_store %arg14[%c0_294, %c0_295, %c0_296], %313 {strides = array<i32>} : memref<1x1x1xf32, #tpu.memory_space<vmem>>, vector<1x1x1xf32>,
    return
  }
  func.func @transform_0(%arg0: i32) -> (i32, i32, i32) {
    %c0_i32 = arith.constant 0 : i32
    %c0_i32_0 = arith.constant 0 : i32
    %c0_i32_1 = arith.constant 0 : i32
    return %arg0, %c0_i32, %c0_i32_0 : i32, i32, i32
  }
  func.func @transform_1(%arg0: i32) -> (i32, i32) {
    %c0_i32 = arith.constant 0 : i32
    %c0_i32_0 = arith.constant 0 : i32
    %c0_i32_1 = arith.constant 0 : i32
    return %c0_i32, %c0_i32_0 : i32, i32
  }
  func.func @transform_2(%arg0: i32) -> (i32, i32) {
    %c0_i32 = arith.constant 0 : i32
    %c0_i32_0 = arith.constant 0 : i32
    %c0_i32_1 = arith.constant 0 : i32
    return %c0_i32, %c0_i32_0 : i32, i32
  }
  func.func @transform_3(%arg0: i32) -> (i32, i32, i32) {
    %c0_i32 = arith.constant 0 : i32
    %c0_i32_0 = arith.constant 0 : i32
    %c0_i32_1 = arith.constant 0 : i32
    %c0_i32_2 = arith.constant 0 : i32
    return %c0_i32, %c0_i32_0, %c0_i32_1 : i32, i32, i32
  }
  func.func @transform_4(%arg0: i32) -> (i32, i32) {
    %c0_i32 = arith.constant 0 : i32
    %c0_i32_0 = arith.constant 0 : i32
    %c0_i32_1 = arith.constant 0 : i32
    return %c0_i32, %c0_i32_0 : i32, i32
  }
  func.func @transform_5(%arg0: i32) -> (i32, i32, i32) {
    %c0_i32 = arith.constant 0 : i32
    %c0_i32_0 = arith.constant 0 : i32
    %c0_i32_1 = arith.constant 0 : i32
    %c0_i32_2 = arith.constant 0 : i32
    return %c0_i32, %c0_i32_0, %c0_i32_1 : i32, i32, i32
  }
  func.func @transform_6(%arg0: i32) -> (i32, i32, i32) {
    %c0_i32 = arith.constant 0 : i32
    %c0_i32_0 = arith.constant 0 : i32
    %c0_i32_1 = arith.constant 0 : i32
    %c0_i32_2 = arith.constant 0 : i32
    return %c0_i32, %c0_i32_0, %c0_i32_1 : i32, i32, i32
  }
  func.func @transform_7(%arg0: i32) -> (i32, i32) {
    %c0_i32 = arith.constant 0 : i32
    %c0_i32_0 = arith.constant 0 : i32
    %c0_i32_1 = arith.constant 0 : i32
    return %c0_i32, %c0_i32_0 : i32, i32
  }
  func.func @transform_8(%arg0: i32) -> (i32, i32, i32) {
    %c0_i32 = arith.constant 0 : i32
    %c0_i32_0 = arith.constant 0 : i32
    %c0_i32_1 = arith.constant 0 : i32
    %c0_i32_2 = arith.constant 0 : i32
    return %c0_i32, %c0_i32_0, %c0_i32_1 : i32, i32, i32
  }
  func.func @transform_9(%arg0: i32) -> (i32, i32, i32) {
    %c0_i32 = arith.constant 0 : i32
    %c0_i32_0 = arith.constant 0 : i32
    %c0_i32_1 = arith.constant 0 : i32
    %c0_i32_2 = arith.constant 0 : i32
    return %c0_i32, %c0_i32_0, %c0_i32_1 : i32, i32, i32
  }
  func.func @transform_10(%arg0: i32) -> (i32, i32) {
    %c0_i32 = arith.constant 0 : i32
    %c0_i32_0 = arith.constant 0 : i32
    %c0_i32_1 = arith.constant 0 : i32
    return %c0_i32, %c0_i32_0 : i32, i32
  }
  func.func @transform_11(%arg0: i32) -> (i32, i32) {
    %c0_i32 = arith.constant 0 : i32
    %c0_i32_0 = arith.constant 0 : i32
    %c0_i32_1 = arith.constant 0 : i32
    return %c0_i32, %c0_i32_0 : i32, i32
  }
  func.func @transform_12(%arg0: i32) -> (i32, i32) {
    %c0_i32 = arith.constant 0 : i32
    %c0_i32_0 = arith.constant 0 : i32
    %c0_i32_1 = arith.constant 0 : i32
    return %c0_i32, %c0_i32_0 : i32, i32
  }
  func.func @transform_13(%arg0: i32) -> (i32, i32, i32) {
    %c0_i32 = arith.constant 0 : i32
    %c0_i32_0 = arith.constant 0 : i32
    %c0_i32_1 = arith.constant 0 : i32
    return %arg0, %c0_i32, %c0_i32_0 : i32, i32, i32
  }
  func.func @transform_14(%arg0: i32) -> (i32, i32, i32) {
    %c0_i32 = arith.constant 0 : i32
    %c0_i32_0 = arith.constant 0 : i32
    %c0_i32_1 = arith.constant 0 : i32
    return %arg0, %c0_i32, %c0_i32_0 : i32, i32, i32
  }
}

</mosaic_0001>

<bundles_post_ra>
// kernel: discriminator_forward.1
= control target key start
LH: loop header
LB: loop body
LE: loop exit
PB: predicated region body
PF: predicated region fallthrough
CT: control target
= control target key end

     0   :  { %s9939_s15 = smov 0   ;;  %s13980_s0 = inlined_call_operand.vmem [shape: f32[2,1024,16], index: 0, kind: input, shape index: {}]   ;;  %s13981_s1 = inlined_call_operand.vmem [shape: f32[16,16], index: 1, kind: input, shape index: {}]   ;;  %s13982_s2 = inlined_call_operand.vmem [shape: f32[1,16], index: 2, kind: input, shape index: {}]   ;;  %s13983_s3 = inlined_call_operand.vmem [shape: f32[4,64,32], index: 3, kind: input, shape index: {}]   ;;  %s13984_s4 = inlined_call_operand.vmem [shape: f32[1,32], index: 4, kind: input, shape index: {}]   ;;  %s13985_s5 = inlined_call_operand.vmem [shape: f32[4,64,256], index: 5, kind: input, shape index: {}]   ;;  %s13986_s6 = inlined_call_operand.vmem [shape: f32[4,128,64], index: 6, kind: input, shape index: {}]   ;;  %s13987_s7 = inlined_call_operand.vmem [shape: f32[1,64], index: 7, kind: input, shape index: {}]   ;;  %s13988_s8 = inlined_call_operand.vmem [shape: f32[4,16,64], index: 8, kind: input, shape index: {}]   ;;  %s13989_s9 = inlined_call_operand.vmem [shape: f32[4,256,128], index: 9, kind: input, shape index: {}]   ;;  %s13990_s10 = inlined_call_operand.vmem [shape: f32[1,128], index: 10, kind: input, shape index: {}]   ;;  %s13991_s11 = inlined_call_operand.vmem [shape: f32[16,128], index: 11, kind: input, shape index: {}]   ;;  %s13992_s12 = inlined_call_operand.<no memory space> [shape: f32[1,1], index: 12, kind: input, shape index: {}]   ;;  %s13993_s13 = inlined_call_operand.vmem [shape: f32[2,1,1], index: 13, kind: output, shape index: {0}]   ;;  %s13994_s14 = inlined_call_operand.vmem [shape: f32[2,16,128], index: 14, kind: output, shape index: {1}]  }
   0x1   :  { %v20_v0 = vstv %s13992_s12 }
   0x2   :  { %21 = vst [vmem:[#allocation5] sm:$0x1] %v20_v0 }
   0x3 LB: > { %s7652_s16 = sadd.s32 4294967295, %s9853_s15   ;;  %p7656_p0 = scmp.ge.s32.totalorder %s9853_s15, 1  ;;  %s9853_s15 = sphi %s9939_s15, %s27_s15  }
   0x4   : > { %p417_p1 = scmp.lt.s32.totalorder %s9853_s15, 3 }
   0x6   : > { %p418_p2 = pnand %p7656_p0, %p417_p1 }
   0x8   : > { %421 = sbr.rel (%p418_p2) target bundleno = 2274 (0x8e2), region = 72 }
   0xd   : > { %v9950_v1 = vld [vmem:[%s13981_s1 + $0x8] sm:$0xff]  ;;  %v9955_v2 = vld [vmem:[%s13981_s1] sm:$0xff]  ;;  %p9959_p3 = scmp.lt.s32.totalorder %s7652_s16, 1  ;;  %vm479_vm0 = vcmask 130048   ;;  %v13995_v3 = vmov 0.0   ;;  %vm482_vm1 = vcmask 122880  }
   0xe   : > { %8979 = vmatprep.subr.mxu0 %v9950_v1  ;;  %9031 = vmatprep.subr.mxu1 %v9950_v1  ;;  %532 = vst.msk [vmem:[#allocation2 + $0x198] sm:$0xff] %vm479_vm0, %v13995_v3  ;;  %480 = vst.msk [vmem:[#allocation2] sm:$0xff] %vm479_vm0, %v13995_v3  ;;  %s9856_s25 = smov 16   ;;  %s9857_s26 = smov 48   ;;  %vm3517_vm2 = vcmask 261120  }
   0xf   : > { %481 = vst.msk [vmem:[#allocation2 + $0x8] sm:$0xff] %vm479_vm0, %v13995_v3  ;;  %484 = vst.msk [vmem:[#allocation2 + $0x18] sm:$0xff] %vm479_vm0, %v13995_v3  ;;  %8980 = vmatpush3.msra.mxu0 %v9950_v1  ;;  %9032 = vmatpush3.msra.mxu1 %v9950_v1  ;;  %s14173_s16 = smov (!%p9959_p3, %s7652_s16), 1  ;;  %s9858_s19 = smov 32  }
  0x10   : > { %485 = vst.msk [vmem:[#allocation2 + $0x20] sm:$0xff] %vm479_vm0, %v13995_v3  ;;  %487 = vst.msk [vmem:[#allocation2 + $0x30] sm:$0xff] %vm479_vm0, %v13995_v3  ;;  %8981 = vmatprep.subr.mxu0 %v9955_v2  ;;  %9033 = vmatprep.subr.mxu1 %v9955_v2  ;;  %s8169_s21 = sshll.u32 %s14173_s16, 10  ;;  %s9859_s27 = smov 64  }
  0x11   : > { %488 = vst.msk [vmem:[#allocation2 + $0x38] sm:$0xff] %vm479_vm0, %v13995_v3  ;;  %490 = vst.msk [vmem:[#allocation2 + $0x48] sm:$0xff] %vm479_vm0, %v13995_v3  ;;  %8982 = vmatpush3.msra.mxu0 %v9955_v2  ;;  %9034 = vmatpush3.msra.mxu1 %v9955_v2  ;;  %s10389_s24 = scalar_lea.vmem %s13980_s0, %s8169_s21  ;;  %s9860_s28 = smov 96  }
  0x12   : > { %491 = vst.msk [vmem:[#allocation2 + $0x50] sm:$0xff] %vm479_vm0, %v13995_v3  ;;  %493 = vst.msk [vmem:[#allocation2 + $0x60] sm:$0xff] %vm479_vm0, %v13995_v3  ;;  %9135 = vmatprep.subr.mxu1 %v9950_v1  ;;  %9083 = vmatprep.subr.mxu0 %v9950_v1  ;;  %v685_v4 = vld [vmem:[%s10389_s24] sm:$0xff]  ;;  %v686_v6 = vld [vmem:[%s10389_s24 + $0x8] sm:$0xff] }
  0x13   : > { %494 = vst.msk [vmem:[#allocation2 + $0x68] sm:$0xff] %vm479_vm0, %v13995_v3  ;;  %496 = vst.msk [vmem:[#allocation2 + $0x78] sm:$0xff] %vm479_vm0, %v13995_v3  ;;  %v1176_v5 = vld [vmem:[%s10389_s24 + $0x100] sm:$0xff]  ;;  %8983 = vmatprep.mubr.msk.f32.mxu0 %vm479_vm0, %v685_v4  ;;  %v1177_v7 = vld [vmem:[%s10389_s24 + $0x108] sm:$0xff] }
  0x14   : > { %497 = vst.msk [vmem:[#allocation2 + $0x80] sm:$0xff] %vm479_vm0, %v13995_v3  ;;  %499 = vst.msk [vmem:[#allocation2 + $0x90] sm:$0xff] %vm479_vm0, %v13995_v3  ;;  %9035 = vmatprep.mubr.msk.f32.mxu1 %vm479_vm0, %v1176_v5  ;;  %v1178_v8 = vld [vmem:[%s10389_s24 + $0x110] sm:$0xff]  ;;  %8984 = vmatmul.mubr.msk.f32.vlgmr.msra.gmra.mxu0 %vm479_vm0, %v686_v6  ;;  %v1179_v10 = vld [vmem:[%s10389_s24 + $0x118] sm:$0xff] }
  0x15   : > { %500 = vst.msk [vmem:[#allocation2 + $0x98] sm:$0xff] %vm479_vm0, %v13995_v3  ;;  %502 = vst.msk [vmem:[#allocation2 + $0xa8] sm:$0xff] %vm479_vm0, %v13995_v3  ;;  %9036 = vmatmul.mubr.msk.f32.vlgmr.msra.gmra.mxu1 %vm479_vm0, %v1177_v7  ;;  %v687_v9 = vld [vmem:[%s10389_s24 + $0x10] sm:$0xff]  ;;  %v688_v11 = vld [vmem:[%s10389_s24 + $0x18] sm:$0xff]  ;;  %9084 = vmatpush3.msra.mxu0 %v9950_v1 }
  0x16   : > { %503 = vst.msk [vmem:[#allocation2 + $0xb0] sm:$0xff] %vm479_vm0, %v13995_v3  ;;  %505 = vst.msk [vmem:[#allocation2 + $0xc0] sm:$0xff] %vm479_vm0, %v13995_v3  ;;  %9038 = vmatprep.mubr.msk.f32.mxu1 %vm479_vm0, %v1178_v8  ;;  %8986 = vmatprep.mubr.msk.f32.mxu0 %vm479_vm0, %v687_v9  ;;  %v1180_v12 = vld [vmem:[%s10389_s24 + $0x120] sm:$0xff]  ;;  %v1181_v14 = vld [vmem:[%s10389_s24 + $0x128] sm:$0xff] }
  0x17   : > { %506 = vst.msk [vmem:[#allocation2 + $0xc8] sm:$0xff] %vm479_vm0, %v13995_v3  ;;  %508 = vst.msk [vmem:[#allocation2 + $0xd8] sm:$0xff] %vm479_vm0, %v13995_v3  ;;  %v689_v13 = vld [vmem:[%s10389_s24 + $0x20] sm:$0xff]  ;;  %9136 = vmatpush3.msra.mxu1 %v9950_v1  ;;  %9085 = vmatprep.subr.mxu0 %v9955_v2  ;;  %v690_v15 = vld [vmem:[%s10389_s24 + $0x28] sm:$0xff] }
  0x18   : > { %509 = vst.msk [vmem:[#allocation2 + $0xe0] sm:$0xff] %vm479_vm0, %v13995_v3  ;;  %511 = vst.msk [vmem:[#allocation2 + $0xf0] sm:$0xff] %vm479_vm0, %v13995_v3  ;;  %9137 = vmatprep.subr.mxu1 %v9955_v2  ;;  %8987 = vmatmul.mubr.msk.f32.gmra.mxu0 %vm479_vm0, %v688_v11  ;;  %v1182_v16 = vld [vmem:[%s10389_s24 + $0x130] sm:$0xff]  ;;  %v1183_v18 = vld [vmem:[%s10389_s24 + $0x138] sm:$0xff] }
  0x19   : > { %512 = vst.msk [vmem:[#allocation2 + $0xf8] sm:$0xff] %vm479_vm0, %v13995_v3  ;;  %514 = vst.msk [vmem:[#allocation2 + $0x108] sm:$0xff] %vm479_vm0, %v13995_v3  ;;  %9039 = vmatmul.mubr.msk.f32.gmra.mxu1 %vm479_vm0, %v1179_v10  ;;  %8989 = vmatprep.mubr.msk.f32.mxu0 %vm479_vm0, %v689_v13  ;;  %v691_v17 = vld [vmem:[%s10389_s24 + $0x30] sm:$0xff]  ;;  %v692_v19 = vld [vmem:[%s10389_s24 + $0x38] sm:$0xff] }
  0x1a   : > { %515 = vst.msk [vmem:[#allocation2 + $0x110] sm:$0xff] %vm479_vm0, %v13995_v3  ;;  %517 = vst.msk [vmem:[#allocation2 + $0x120] sm:$0xff] %vm479_vm0, %v13995_v3  ;;  %9041 = vmatprep.mubr.msk.f32.mxu1 %vm479_vm0, %v1180_v12  ;;  %9138 = vmatpush3.msra.mxu1 %v9955_v2  ;;  %v1184_v20 = vld [vmem:[%s10389_s24 + $0x140] sm:$0xff]  ;;  %v1185_v22 = vld [vmem:[%s10389_s24 + $0x148] sm:$0xff] }
  0x1b   : > { %518 = vst.msk [vmem:[#allocation2 + $0x128] sm:$0xff] %vm479_vm0, %v13995_v3  ;;  %520 = vst.msk [vmem:[#allocation2 + $0x138] sm:$0xff] %vm479_vm0, %v13995_v3  ;;  %9086 = vmatpush3.msra.mxu0 %v9955_v2  ;;  %v693_v21 = vld [vmem:[%s10389_s24 + $0x40] sm:$0xff]  ;;  %v694_v23 = vld [vmem:[%s10389_s24 + $0x48] sm:$0xff] }
  0x1c   : > { %521 = vst.msk [vmem:[#allocation2 + $0x140] sm:$0xff] %vm479_vm0, %v13995_v3  ;;  %523 = vst.msk [vmem:[#allocation2 + $0x150] sm:$0xff] %vm479_vm0, %v13995_v3  ;;  %8990 = vmatmul.mubr.msk.f32.gmra.mxu0 %vm479_vm0, %v690_v15  ;;  %v1186_v24 = vld [vmem:[%s10389_s24 + $0x150] sm:$0xff]  ;;  %v1187_v26 = vld [vmem:[%s10389_s24 + $0x158] sm:$0xff] }
  0x1d   : > { %524 = vst.msk [vmem:[#allocation2 + $0x158] sm:$0xff] %vm479_vm0, %v13995_v3  ;;  %526 = vst.msk [vmem:[#allocation2 + $0x168] sm:$0xff] %vm479_vm0, %v13995_v3  ;;  %9042 = vmatmul.mubr.msk.f32.gmra.mxu1 %vm479_vm0, %v1181_v14  ;;  %8992 = vmatprep.mubr.msk.f32.mxu0 %vm479_vm0, %v691_v17  ;;  %v695_v25 = vld [vmem:[%s10389_s24 + $0x50] sm:$0xff]  ;;  %v696_v27 = vld [vmem:[%s10389_s24 + $0x58] sm:$0xff] }
  0x1e   : > { %527 = vst.msk [vmem:[#allocation2 + $0x170] sm:$0xff] %vm479_vm0, %v13995_v3  ;;  %529 = vst.msk [vmem:[#allocation2 + $0x180] sm:$0xff] %vm479_vm0, %v13995_v3  ;;  %9044 = vmatprep.mubr.msk.f32.mxu1 %vm479_vm0, %v1182_v16  ;;  %v1188_v28 = vld [vmem:[%s10389_s24 + $0x160] sm:$0xff]  ;;  %v1189_v30 = vld [vmem:[%s10389_s24 + $0x168] sm:$0xff] }
  0x1f   : > { %530 = vst.msk [vmem:[#allocation2 + $0x188] sm:$0xff] %vm479_vm0, %v13995_v3  ;;  %533 = vst.msk [vmem:[#allocation2 + $0x1a0] sm:$0xff] %vm479_vm0, %v13995_v3  ;;  %v697_v29 = vld [vmem:[%s10389_s24 + $0x60] sm:$0xff]  ;;  %v698_v31 = vld [vmem:[%s10389_s24 + $0x68] sm:$0xff] }
  0x20   : > { %535 = vst.msk [vmem:[#allocation2 + $0x1b0] sm:$0xff] %vm479_vm0, %v13995_v3  ;;  %536 = vst.msk [vmem:[#allocation2 + $0x1b8] sm:$0xff] %vm479_vm0, %v13995_v3  ;;  %8993 = vmatmul.mubr.msk.f32.gmra.mxu0 %vm479_vm0, %v692_v19  ;;  %v1190_v32 = vld [vmem:[%s10389_s24 + $0x170] sm:$0xff]  ;;  %v1191_v34 = vld [vmem:[%s10389_s24 + $0x178] sm:$0xff] }
  0x21   : > { %538 = vst.msk [vmem:[#allocation2 + $0x1c8] sm:$0xff] %vm479_vm0, %v13995_v3  ;;  %539 = vst.msk [vmem:[#allocation2 + $0x1d0] sm:$0xff] %vm479_vm0, %v13995_v3  ;;  %9045 = vmatmul.mubr.msk.f32.gmra.mxu1 %vm479_vm0, %v1183_v18  ;;  %8995 = vmatprep.mubr.msk.f32.mxu0 %vm479_vm0, %v693_v21  ;;  %v699_v33 = vld [vmem:[%s10389_s24 + $0x70] sm:$0xff]  ;;  %v700_v35 = vld [vmem:[%s10389_s24 + $0x78] sm:$0xff] }
  0x22   : > { %541 = vst.msk [vmem:[#allocation2 + $0x1e0] sm:$0xff] %vm479_vm0, %v13995_v3  ;;  %542 = vst.msk [vmem:[#allocation2 + $0x1e8] sm:$0xff] %vm479_vm0, %v13995_v3  ;;  %9047 = vmatprep.mubr.msk.f32.mxu1 %vm479_vm0, %v1184_v20  ;;  %v1192_v36 = vld [vmem:[%s10389_s24 + $0x180] sm:$0xff]  ;;  %v2701_v38 = vld [vmem:[#allocation2 + $0x198] sm:$0xff] }
  0x23   : > { %544 = vst.msk [vmem:[#allocation2 + $0x1f8] sm:$0xff] %vm479_vm0, %v13995_v3  ;;  %545 = vst.msk [vmem:[#allocation2 + $0x200] sm:$0xff] %vm479_vm0, %v13995_v3  ;;  %v701_v37 = vld [vmem:[%s10389_s24 + $0x80] sm:$0xff]  ;;  %v1193_v39 = vld [vmem:[%s10389_s24 + $0x188] sm:$0xff]  ;;  %2905 = vrot.lane.b32.xlu0 %v2701_v38, %s9856_s25 }
  0x24   : > { %547 = vst.msk [vmem:[#allocation2 + $0x210] sm:$0xff] %vm479_vm0, %v13995_v3  ;;  %548 = vst.msk [vmem:[#allocation2 + $0x218] sm:$0xff] %vm479_vm0, %v13995_v3  ;;  %8996 = vmatmul.mubr.msk.f32.gmra.mxu0 %vm479_vm0, %v694_v23  ;;  %v702_v40 = vld [vmem:[%s10389_s24 + $0x88] sm:$0xff]  ;;  %v1194_v42 = vld [vmem:[%s10389_s24 + $0x190] sm:$0xff] }
  0x25   : > { %550 = vst.msk [vmem:[#allocation2 + $0x228] sm:$0xff] %vm479_vm0, %v13995_v3  ;;  %551 = vst.msk [vmem:[#allocation2 + $0x230] sm:$0xff] %vm479_vm0, %v13995_v3  ;;  %9048 = vmatmul.mubr.msk.f32.gmra.mxu1 %vm479_vm0, %v1185_v22  ;;  %8998 = vmatprep.mubr.msk.f32.mxu0 %vm479_vm0, %v695_v25  ;;  %v703_v43 = vld [vmem:[%s10389_s24 + $0x90] sm:$0xff]  ;;  %v1195_v46 = vld [vmem:[%s10389_s24 + $0x198] sm:$0xff] }
  0x26   : > { %553 = vst.msk [vmem:[#allocation2 + $0x240] sm:$0xff] %vm479_vm0, %v13995_v3  ;;  %554 = vst.msk [vmem:[#allocation2 + $0x248] sm:$0xff] %vm479_vm0, %v13995_v3  ;;  %9050 = vmatprep.mubr.msk.f32.mxu1 %vm479_vm0, %v1186_v24  ;;  %v2702_v44 = vld [vmem:[#allocation2 + $0x1a0] sm:$0xff]  ;;  %v704_v47 = vld [vmem:[%s10389_s24 + $0x98] sm:$0xff] }
  0x27   : > { %556 = vst.msk [vmem:[#allocation2 + $0x258] sm:$0xff] %vm479_vm0, %v13995_v3  ;;  %557 = vst.msk [vmem:[#allocation2 + $0x260] sm:$0xff] %vm479_vm0, %v13995_v3  ;;  %v1196_v48 = vld [vmem:[%s10389_s24 + $0x1a0] sm:$0xff]  ;;  %2907 = vrot.lane.b32.xlu0 %v2702_v44, %s9856_s25  ;;  %v1197_v52 = vld [vmem:[%s10389_s24 + $0x1a8] sm:$0xff] }
  0x28   : > { %559 = vst.msk [vmem:[#allocation2 + $0x270] sm:$0xff] %vm479_vm0, %v13995_v3  ;;  %560 = vst.msk [vmem:[#allocation2 + $0x278] sm:$0xff] %vm479_vm0, %v13995_v3  ;;  %8999 = vmatmul.mubr.msk.f32.gmra.mxu0 %vm479_vm0, %v696_v27  ;;  %v705_v49 = vld [vmem:[%s10389_s24 + $0xa0] sm:$0xff]  ;;  %v706_v53 = vld [vmem:[%s10389_s24 + $0xa8] sm:$0xff] }
  0x29   : > { %562 = vst.msk [vmem:[#allocation2 + $0x288] sm:$0xff] %vm479_vm0, %v13995_v3  ;;  %563 = vst.msk [vmem:[#allocation2 + $0x290] sm:$0xff] %vm479_vm0, %v13995_v3  ;;  %9051 = vmatmul.mubr.msk.f32.gmra.mxu1 %vm479_vm0, %v1187_v26  ;;  %9001 = vmatprep.mubr.msk.f32.mxu0 %vm479_vm0, %v697_v29  ;;  %v1198_v54 = vld [vmem:[%s10389_s24 + $0x1b0] sm:$0xff]  ;;  %v1199_v58 = vld [vmem:[%s10389_s24 + $0x1b8] sm:$0xff] }
  0x2a   : > { %565 = vst.msk [vmem:[#allocation2 + $0x2a0] sm:$0xff] %vm479_vm0, %v13995_v3  ;;  %566 = vst.msk [vmem:[#allocation2 + $0x2a8] sm:$0xff] %vm479_vm0, %v13995_v3  ;;  %9053 = vmatprep.mubr.msk.f32.mxu1 %vm479_vm0, %v1188_v28  ;;  %v707_v55 = vld [vmem:[%s10389_s24 + $0xb0] sm:$0xff]  ;;  %v708_v59 = vld [vmem:[%s10389_s24 + $0xb8] sm:$0xff] }
  0x2b   : > { %568 = vst.msk [vmem:[#allocation2 + $0x2b8] sm:$0xff] %vm479_vm0, %v13995_v3  ;;  %569 = vst.msk [vmem:[#allocation2 + $0x2c0] sm:$0xff] %vm479_vm0, %v13995_v3  ;;  %v1200_v60 = vld [vmem:[%s10389_s24 + $0x1c0] sm:$0xff]  ;;  %v1201_v0 = vld [vmem:[%s10389_s24 + $0x1c8] sm:$0xff] }
  0x2c   : > { %571 = vst.msk [vmem:[#allocation2 + $0x2d0] sm:$0xff] %vm479_vm0, %v13995_v3  ;;  %572 = vst.msk [vmem:[#allocation2 + $0x2d8] sm:$0xff] %vm479_vm0, %v13995_v3  ;;  %9002 = vmatmul.mubr.msk.f32.gmra.mxu0 %vm479_vm0, %v698_v31  ;;  %v709_v61 = vld [vmem:[%s10389_s24 + $0xc0] sm:$0xff]  ;;  %v710_v1 = vld [vmem:[%s10389_s24 + $0xc8] sm:$0xff] }
  0x2d   : > { %574 = vst.msk [vmem:[#allocation2 + $0x2e8] sm:$0xff] %vm479_vm0, %v13995_v3  ;;  %575 = vst.msk [vmem:[#allocation2 + $0x2f0] sm:$0xff] %vm479_vm0, %v13995_v3  ;;  %9054 = vmatmul.mubr.msk.f32.gmra.mxu1 %vm479_vm0, %v1189_v30  ;;  %9004 = vmatprep.mubr.msk.f32.mxu0 %vm479_vm0, %v699_v33  ;;  %v1202_v2 = vld [vmem:[%s10389_s24 + $0x1d0] sm:$0xff]  ;;  %v1203_v7 = vld [vmem:[%s10389_s24 + $0x1d8] sm:$0xff] }
  0x2e   : > { %577 = vst.msk [vmem:[#allocation2 + $0x300] sm:$0xff] %vm479_vm0, %v13995_v3  ;;  %578 = vst.msk [vmem:[#allocation2 + $0x308] sm:$0xff] %vm479_vm0, %v13995_v3  ;;  %9056 = vmatprep.mubr.msk.f32.mxu1 %vm479_vm0, %v1190_v32  ;;  %v711_v4 = vld [vmem:[%s10389_s24 + $0xd0] sm:$0xff]  ;;  %v712_v8 = vld [vmem:[%s10389_s24 + $0xd8] sm:$0xff] }
  0x2f   : > { %580 = vst.msk [vmem:[#allocation2 + $0x318] sm:$0xff] %vm479_vm0, %v13995_v3  ;;  %581 = vst.msk [vmem:[#allocation2 + $0x320] sm:$0xff] %vm479_vm0, %v13995_v3  ;;  %v1204_v9 = vld [vmem:[%s10389_s24 + $0x1e0] sm:$0xff]  ;;  %v1205_v13 = vld [vmem:[%s10389_s24 + $0x1e8] sm:$0xff] }
  0x30   : > { %583 = vst.msk [vmem:[#allocation2 + $0x330] sm:$0xff] %vm479_vm0, %v13995_v3  ;;  %584 = vst.msk [vmem:[#allocation2 + $0x338] sm:$0xff] %vm479_vm0, %v13995_v3  ;;  %9005 = vmatmul.mubr.msk.f32.gmra.mxu0 %vm479_vm0, %v700_v35  ;;  %v713_v10 = vld [vmem:[%s10389_s24 + $0xe0] sm:$0xff]  ;;  %v714_v14 = vld [vmem:[%s10389_s24 + $0xe8] sm:$0xff] }
  0x31   : > { %586 = vst.msk [vmem:[#allocation2 + $0x348] sm:$0xff] %vm479_vm0, %v13995_v3  ;;  %587 = vst.msk [vmem:[#allocation2 + $0x350] sm:$0xff] %vm479_vm0, %v13995_v3  ;;  %9057 = vmatmul.mubr.msk.f32.gmra.mxu1 %vm479_vm0, %v1191_v34  ;;  %9007 = vmatprep.mubr.msk.f32.mxu0 %vm479_vm0, %v701_v37  ;;  %v1206_v15 = vld [vmem:[%s10389_s24 + $0x1f0] sm:$0xff]  ;;  %v1207_v19 = vld [vmem:[%s10389_s24 + $0x1f8] sm:$0xff] }
  0x32   : > { %589 = vst.msk [vmem:[#allocation2 + $0x360] sm:$0xff] %vm479_vm0, %v13995_v3  ;;  %590 = vst.msk [vmem:[#allocation2 + $0x368] sm:$0xff] %vm479_vm0, %v13995_v3  ;;  %9059 = vmatprep.mubr.msk.f32.mxu1 %vm479_vm0, %v1192_v36  ;;  %v715_v16 = vld [vmem:[%s10389_s24 + $0xf0] sm:$0xff]  ;;  %v716_v20 = vld [vmem:[%s10389_s24 + $0xf8] sm:$0xff] }
  0x33   : > { %592 = vst.msk [vmem:[#allocation2 + $0x378] sm:$0xff] %vm479_vm0, %v13995_v3  ;;  %593 = vst.msk [vmem:[#allocation2 + $0x380] sm:$0xff] %vm479_vm0, %v13995_v3  ;;  %v2158_v21 = vld [vmem:[%s10389_s24 + $0x300] sm:$0xff]  ;;  %v2159_v25 = vld [vmem:[%s10389_s24 + $0x308] sm:$0xff] }
  0x34   : > { %595 = vst.msk [vmem:[#allocation2 + $0x390] sm:$0xff] %vm479_vm0, %v13995_v3  ;;  %596 = vst.msk [vmem:[#allocation2 + $0x398] sm:$0xff] %vm479_vm0, %v13995_v3  ;;  %9008 = vmatmul.mubr.msk.f32.gmra.mxu0 %vm479_vm0, %v702_v40  ;;  %v1667_v22 = vld [vmem:[%s10389_s24 + $0x200] sm:$0xff]  ;;  %v1668_v26 = vld [vmem:[%s10389_s24 + $0x208] sm:$0xff] }
  0x35   : > { %598 = vst.msk [vmem:[#allocation2 + $0x3a8] sm:$0xff] %vm479_vm0, %v13995_v3  ;;  %599 = vst.msk [vmem:[#allocation2 + $0x3b0] sm:$0xff] %vm479_vm0, %v13995_v3  ;;  %9060 = vmatmul.mubr.msk.f32.gmra.mxu1 %vm479_vm0, %v1193_v39  ;;  %9010 = vmatprep.mubr.msk.f32.mxu0 %vm479_vm0, %v703_v43  ;;  %v2160_v27 = vld [vmem:[%s10389_s24 + $0x310] sm:$0xff]  ;;  %v2161_v31 = vld [vmem:[%s10389_s24 + $0x318] sm:$0xff] }
  0x36   : > { %601 = vst.msk [vmem:[#allocation2 + $0x3c0] sm:$0xff] %vm479_vm0, %v13995_v3  ;;  %602 = vst.msk [vmem:[#allocation2 + $0x3c8] sm:$0xff] %vm479_vm0, %v13995_v3  ;;  %9062 = vmatprep.mubr.msk.f32.mxu1 %vm479_vm0, %v1194_v42  ;;  %v1669_v28 = vld [vmem:[%s10389_s24 + $0x210] sm:$0xff]  ;;  %v1670_v32 = vld [vmem:[%s10389_s24 + $0x218] sm:$0xff] }
  0x37   : > { %604 = vst.msk [vmem:[#allocation2 + $0x3d8] sm:$0xff] %vm479_vm0, %v13995_v3  ;;  %605 = vst.msk [vmem:[#allocation2 + $0x3e0] sm:$0xff] %vm479_vm0, %v13995_v3  ;;  %v2162_v33 = vld [vmem:[%s10389_s24 + $0x320] sm:$0xff]  ;;  %v2163_v37 = vld [vmem:[%s10389_s24 + $0x328] sm:$0xff] }
  0x38   : > { %607 = vst.msk [vmem:[#allocation2 + $0x3f0] sm:$0xff] %vm479_vm0, %v13995_v3  ;;  %608 = vst.msk [vmem:[#allocation2 + $0x3f8] sm:$0xff] %vm479_vm0, %v13995_v3  ;;  %9011 = vmatmul.mubr.msk.f32.gmra.mxu0 %vm479_vm0, %v704_v47  ;;  %v1671_v34 = vld [vmem:[%s10389_s24 + $0x220] sm:$0xff]  ;;  %v1672_v38 = vld [vmem:[%s10389_s24 + $0x228] sm:$0xff] }
  0x39   : > { %610 = vst.msk [vmem:[#allocation2 + $0x408] sm:$0xff] %vm479_vm0, %v13995_v3  ;;  %611 = vst.msk [vmem:[#allocation2 + $0x410] sm:$0xff] %vm479_vm0, %v13995_v3  ;;  %9063 = vmatmul.mubr.msk.f32.gmra.mxu1 %vm479_vm0, %v1195_v46  ;;  %9013 = vmatprep.mubr.msk.f32.mxu0 %vm479_vm0, %v705_v49  ;;  %v2164_v39 = vld [vmem:[%s10389_s24 + $0x330] sm:$0xff]  ;;  %v2165_v43 = vld [vmem:[%s10389_s24 + $0x338] sm:$0xff] }
  0x3a   : > { %613 = vst.msk [vmem:[#allocation2 + $0x420] sm:$0xff] %vm479_vm0, %v13995_v3  ;;  %614 = vst.msk [vmem:[#allocation2 + $0x428] sm:$0xff] %vm479_vm0, %v13995_v3  ;;  %9065 = vmatprep.mubr.msk.f32.mxu1 %vm479_vm0, %v1196_v48  ;;  %v1673_v40 = vld [vmem:[%s10389_s24 + $0x230] sm:$0xff]  ;;  %v1674_v44 = vld [vmem:[%s10389_s24 + $0x238] sm:$0xff] }
  0x3b   : > { %616 = vst.msk [vmem:[#allocation2 + $0x438] sm:$0xff] %vm479_vm0, %v13995_v3  ;;  %617 = vst.msk [vmem:[#allocation2 + $0x440] sm:$0xff] %vm479_vm0, %v13995_v3  ;;  %v1675_v46 = vld [vmem:[%s10389_s24 + $0x240] sm:$0xff]  ;;  %v2167_v49 = vld [vmem:[%s10389_s24 + $0x348] sm:$0xff] }
  0x3c   : > { %619 = vst.msk [vmem:[#allocation2 + $0x450] sm:$0xff] %vm479_vm0, %v13995_v3  ;;  %620 = vst.msk [vmem:[#allocation2 + $0x458] sm:$0xff] %vm479_vm0, %v13995_v3  ;;  %9014 = vmatmul.mubr.msk.f32.gmra.mxu0 %vm479_vm0, %v706_v53 }
  0x3d   : > { %622 = vst.msk [vmem:[#allocation2 + $0x468] sm:$0xff] %vm479_vm0, %v13995_v3  ;;  %623 = vst.msk [vmem:[#allocation2 + $0x470] sm:$0xff] %vm479_vm0, %v13995_v3  ;;  %9066 = vmatmul.mubr.msk.f32.gmra.mxu1 %vm479_vm0, %v1197_v52  ;;  %9016 = vmatprep.mubr.msk.f32.mxu0 %vm479_vm0, %v707_v55  ;;  %v1677_v52 = vld [vmem:[%s10389_s24 + $0x250] sm:$0xff]  ;;  %v2169_v55 = vld [vmem:[%s10389_s24 + $0x358] sm:$0xff] }
  0x3e   : > { %625 = vst.msk [vmem:[#allocation2 + $0x480] sm:$0xff] %vm479_vm0, %v13995_v3  ;;  %626 = vst.msk [vmem:[#allocation2 + $0x488] sm:$0xff] %vm479_vm0, %v13995_v3  ;;  %9068 = vmatprep.mubr.msk.f32.mxu1 %vm479_vm0, %v1198_v54 }
  0x3f   : > { %628 = vst.msk [vmem:[#allocation2 + $0x498] sm:$0xff] %vm479_vm0, %v13995_v3  ;;  %629 = vst.msk [vmem:[#allocation2 + $0x4a0] sm:$0xff] %vm479_vm0, %v13995_v3 }
  0x40   : > { %631 = vst.msk [vmem:[#allocation2 + $0x4b0] sm:$0xff] %vm479_vm0, %v13995_v3  ;;  %632 = vst.msk [vmem:[#allocation2 + $0x4b8] sm:$0xff] %vm479_vm0, %v13995_v3  ;;  %9017 = vmatmul.mubr.msk.f32.gmra.mxu0 %vm479_vm0, %v708_v59 }
  0x41   : > { %634 = vst.msk [vmem:[#allocation2 + $0x4c8] sm:$0xff] %vm479_vm0, %v13995_v3  ;;  %635 = vst.msk [vmem:[#allocation2 + $0x4d0] sm:$0xff] %vm479_vm0, %v13995_v3  ;;  %9069 = vmatmul.mubr.msk.f32.gmra.mxu1 %vm479_vm0, %v1199_v58  ;;  %9019 = vmatprep.mubr.msk.f32.mxu0 %vm479_vm0, %v709_v61  ;;  %v1679_v58 = vld [vmem:[%s10389_s24 + $0x260] sm:$0xff]  ;;  %v2171_v61 = vld [vmem:[%s10389_s24 + $0x368] sm:$0xff] }
  0x42   : > { %637 = vst.msk [vmem:[#allocation2 + $0x4e0] sm:$0xff] %vm479_vm0, %v13995_v3  ;;  %638 = vst.msk [vmem:[#allocation2 + $0x4e8] sm:$0xff] %vm479_vm0, %v13995_v3  ;;  %9071 = vmatprep.mubr.msk.f32.mxu1 %vm479_vm0, %v1200_v60 }
  0x43   : > { %640 = vst.msk [vmem:[#allocation2 + $0x4f8] sm:$0xff] %vm479_vm0, %v13995_v3  ;;  %641 = vst.msk [vmem:[#allocation2 + $0x500] sm:$0xff] %vm479_vm0, %v13995_v3 }
  0x44   : > { %643 = vst.msk [vmem:[#allocation2 + $0x510] sm:$0xff] %vm479_vm0, %v13995_v3  ;;  %644 = vst.msk [vmem:[#allocation2 + $0x518] sm:$0xff] %vm479_vm0, %v13995_v3  ;;  %9020 = vmatmul.mubr.msk.f32.gmra.mxu0 %vm479_vm0, %v710_v1 }
  0x45   : > { %646 = vst.msk [vmem:[#allocation2 + $0x528] sm:$0xff] %vm479_vm0, %v13995_v3  ;;  %647 = vst.msk [vmem:[#allocation2 + $0x530] sm:$0xff] %vm479_vm0, %v13995_v3  ;;  %9072 = vmatmul.mubr.msk.f32.gmra.mxu1 %vm479_vm0, %v1201_v0  ;;  %9022 = vmatprep.mubr.msk.f32.mxu0 %vm479_vm0, %v711_v4  ;;  %v1681_v0 = vld [vmem:[%s10389_s24 + $0x270] sm:$0xff]  ;;  %v2173_v4 = vld [vmem:[%s10389_s24 + $0x378] sm:$0xff] }
  0x46   : > { %649 = vst.msk [vmem:[#allocation2 + $0x540] sm:$0xff] %vm479_vm0, %v13995_v3  ;;  %650 = vst.msk [vmem:[#allocation2 + $0x548] sm:$0xff] %vm479_vm0, %v13995_v3  ;;  %9074 = vmatprep.mubr.msk.f32.mxu1 %vm479_vm0, %v1202_v2 }
  0x47   : > { %652 = vst.msk [vmem:[#allocation2 + $0x558] sm:$0xff] %vm479_vm0, %v13995_v3  ;;  %653 = vst.msk [vmem:[#allocation2 + $0x560] sm:$0xff] %vm479_vm0, %v13995_v3 }
  0x48   : > { %655 = vst.msk [vmem:[#allocation2 + $0x570] sm:$0xff] %vm479_vm0, %v13995_v3  ;;  %656 = vst.msk [vmem:[#allocation2 + $0x578] sm:$0xff] %vm479_vm0, %v13995_v3  ;;  %9023 = vmatmul.mubr.msk.f32.gmra.mxu0 %vm479_vm0, %v712_v8 }
  0x49   : > { %658 = vst.msk [vmem:[#allocation2 + $0x588] sm:$0xff] %vm479_vm0, %v13995_v3  ;;  %659 = vst.msk [vmem:[#allocation2 + $0x590] sm:$0xff] %vm479_vm0, %v13995_v3  ;;  %9075 = vmatmul.mubr.msk.f32.gmra.mxu1 %vm479_vm0, %v1203_v7  ;;  %9025 = vmatprep.mubr.msk.f32.mxu0 %vm479_vm0, %v713_v10  ;;  %v1683_v7 = vld [vmem:[%s10389_s24 + $0x280] sm:$0xff]  ;;  %v1684_v10 = vld [vmem:[%s10389_s24 + $0x288] sm:$0xff] }
  0x4a   : > { %661 = vst.msk [vmem:[#allocation2 + $0x5a0] sm:$0xff] %vm479_vm0, %v13995_v3  ;;  %662 = vst.msk [vmem:[#allocation2 + $0x5a8] sm:$0xff] %vm479_vm0, %v13995_v3  ;;  %9077 = vmatprep.mubr.msk.f32.mxu1 %vm479_vm0, %v1204_v9  ;;  %v2175_v9 = vld [vmem:[%s10389_s24 + $0x388] sm:$0xff] }
  0x4b   : > { %664 = vst.msk [vmem:[#allocation2 + $0x5b8] sm:$0xff] %vm479_vm0, %v13995_v3  ;;  %665 = vst.msk [vmem:[#allocation2 + $0x5c0] sm:$0xff] %vm479_vm0, %v13995_v3 }
  0x4c   : > { %667 = vst.msk [vmem:[#allocation2 + $0x5d0] sm:$0xff] %vm479_vm0, %v13995_v3  ;;  %668 = vst.msk [vmem:[#allocation2 + $0x5d8] sm:$0xff] %vm479_vm0, %v13995_v3  ;;  %9026 = vmatmul.mubr.msk.f32.gmra.mxu0 %vm479_vm0, %v714_v14  ;;  %v1686_v14 = vld [vmem:[%s10389_s24 + $0x298] sm:$0xff] }
  0x4d   : > { %670 = vst.msk [vmem:[#allocation2 + $0x5e8] sm:$0xff] %vm479_vm0, %v13995_v3  ;;  %671 = vst.msk [vmem:[#allocation2 + $0x5f0] sm:$0xff] %vm479_vm0, %v13995_v3  ;;  %9078 = vmatmul.mubr.msk.f32.gmra.mxu1 %vm479_vm0, %v1205_v13  ;;  %9028 = vmatprep.mubr.msk.f32.mxu0 %vm479_vm0, %v715_v16  ;;  %v2177_v13 = vld [vmem:[%s10389_s24 + $0x398] sm:$0xff]  ;;  %v1687_v16 = vld [vmem:[%s10389_s24 + $0x2a0] sm:$0xff] }
  0x4e   : > { %673 = vst.msk [vmem:[#allocation2 + $0x600] sm:$0xff] %vm479_vm0, %v13995_v3  ;;  %674 = vst.msk [vmem:[#allocation2 + $0x608] sm:$0xff] %vm479_vm0, %v13995_v3  ;;  %9080 = vmatprep.mubr.msk.f32.mxu1 %vm479_vm0, %v1206_v15  ;;  %v2178_v15 = vld [vmem:[%s10389_s24 + $0x3a0] sm:$0xff] }
  0x4f   : > { %676 = vst.msk [vmem:[#allocation2 + $0x618] sm:$0xff] %vm479_vm0, %v13995_v3  ;;  %677 = vst.msk [vmem:[#allocation2 + $0x620] sm:$0xff] %vm479_vm0, %v13995_v3 }
  0x50   : > { %679 = vst.msk [vmem:[#allocation2 + $0x630] sm:$0xff] %vm479_vm0, %v13995_v3  ;;  %680 = vst.msk [vmem:[#allocation2 + $0x638] sm:$0xff] %vm479_vm0, %v13995_v3  ;;  %9029 = vmatmul.mubr.msk.f32.gmra.mxu0 %vm479_vm0, %v716_v20  ;;  %v1689_v20 = vld [vmem:[%s10389_s24 + $0x2b0] sm:$0xff] }
  0x51   : > { %682 = vst.msk [vmem:[#allocation2 + $0x648] sm:$0xff] %vm479_vm0, %v13995_v3  ;;  %683 = vst.msk [vmem:[#allocation2 + $0x650] sm:$0xff] %vm479_vm0, %v13995_v3  ;;  %9081 = vmatmul.mubr.msk.f32.gmra.mxu1 %vm479_vm0, %v1207_v19  ;;  %9087 = vmatprep.mubr.msk.f32.mxu0 %vm479_vm0, %v1667_v22  ;;  %v2180_v19 = vld [vmem:[%s10389_s24 + $0x3b0] sm:$0xff]  ;;  %v1690_v22 = vld [vmem:[%s10389_s24 + $0x2b8] sm:$0xff] }
  0x52   : > { %534 = vst.msk [vmem:[#allocation2 + $0x1a8] sm:$0x1] %vm482_vm1, %v13995_v3  ;;  %483 = vst.msk [vmem:[#allocation2 + $0x10] sm:$0x1] %vm482_vm1, %v13995_v3  ;;  %9139 = vmatprep.mubr.msk.f32.mxu1 %vm479_vm0, %v2158_v21  ;;  %v2181_v21 = vld [vmem:[%s10389_s24 + $0x3b8] sm:$0xff] }
  0x53   : > { %486 = vst.msk [vmem:[#allocation2 + $0x28] sm:$0x1] %vm482_vm1, %v13995_v3  ;;  %489 = vst.msk [vmem:[#allocation2 + $0x40] sm:$0x1] %vm482_vm1, %v13995_v3 }
  0x54   : > { %492 = vst.msk [vmem:[#allocation2 + $0x58] sm:$0x1] %vm482_vm1, %v13995_v3  ;;  %495 = vst.msk [vmem:[#allocation2 + $0x70] sm:$0x1] %vm482_vm1, %v13995_v3  ;;  %9088 = vmatmul.mubr.msk.f32.vlgmr.msra.gmra.mxu0 %vm479_vm0, %v1668_v26  ;;  %v1692_v26 = vld [vmem:[%s10389_s24 + $0x2c8] sm:$0xff] }
  0x55   : > { %498 = vst.msk [vmem:[#allocation2 + $0x88] sm:$0x1] %vm482_vm1, %v13995_v3  ;;  %501 = vst.msk [vmem:[#allocation2 + $0xa0] sm:$0x1] %vm482_vm1, %v13995_v3  ;;  %9140 = vmatmul.mubr.msk.f32.vlgmr.msra.gmra.mxu1 %vm479_vm0, %v2159_v25  ;;  %9090 = vmatprep.mubr.msk.f32.mxu0 %vm479_vm0, %v1669_v28  ;;  %v2183_v25 = vld [vmem:[%s10389_s24 + $0x3c8] sm:$0xff]  ;;  %v1693_v28 = vld [vmem:[%s10389_s24 + $0x2d0] sm:$0xff] }
  0x56   : > { %504 = vst.msk [vmem:[#allocation2 + $0xb8] sm:$0x1] %vm482_vm1, %v13995_v3  ;;  %507 = vst.msk [vmem:[#allocation2 + $0xd0] sm:$0x1] %vm482_vm1, %v13995_v3  ;;  %9142 = vmatprep.mubr.msk.f32.mxu1 %vm479_vm0, %v2160_v27  ;;  %v2184_v27 = vld [vmem:[%s10389_s24 + $0x3d0] sm:$0xff] }
  0x57   : > { %510 = vst.msk [vmem:[#allocation2 + $0xe8] sm:$0x1] %vm482_vm1, %v13995_v3  ;;  %513 = vst.msk [vmem:[#allocation2 + $0x100] sm:$0x1] %vm482_vm1, %v13995_v3 }
  0x58   : > { %516 = vst.msk [vmem:[#allocation2 + $0x118] sm:$0x1] %vm482_vm1, %v13995_v3  ;;  %519 = vst.msk [vmem:[#allocation2 + $0x130] sm:$0x1] %vm482_vm1, %v13995_v3  ;;  %9091 = vmatmul.mubr.msk.f32.gmra.mxu0 %vm479_vm0, %v1670_v32  ;;  %v1695_v32 = vld [vmem:[%s10389_s24 + $0x2e0] sm:$0xff] }
  0x59   : > { %522 = vst.msk [vmem:[#allocation2 + $0x148] sm:$0x1] %vm482_vm1, %v13995_v3  ;;  %525 = vst.msk [vmem:[#allocation2 + $0x160] sm:$0x1] %vm482_vm1, %v13995_v3  ;;  %v2703_v41 = vld [vmem:[#allocation2 + $0x1a8] sm:$0x1]  ;;  %9143 = vmatmul.mubr.msk.f32.gmra.mxu1 %vm479_vm0, %v2161_v31  ;;  %9093 = vmatprep.mubr.msk.f32.mxu0 %vm479_vm0, %v1671_v34 }
  0x5a   : > { %528 = vst.msk [vmem:[#allocation2 + $0x178] sm:$0x1] %vm482_vm1, %v13995_v3  ;;  %531 = vst.msk [vmem:[#allocation2 + $0x190] sm:$0x1] %vm482_vm1, %v13995_v3  ;;  %2909 = vrot.lane.b32.xlu1 %v2703_v41, %s9856_s25  ;;  %9145 = vmatprep.mubr.msk.f32.mxu1 %vm479_vm0, %v2162_v33  ;;  %v2186_v31 = vld [vmem:[%s10389_s24 + $0x3e0] sm:$0xff]  ;;  %v2187_v33 = vld [vmem:[%s10389_s24 + $0x3e8] sm:$0xff] }
  0x5b   : > { %537 = vst.msk [vmem:[#allocation2 + $0x1c0] sm:$0x1] %vm482_vm1, %v13995_v3  ;;  %540 = vst.msk [vmem:[#allocation2 + $0x1d8] sm:$0x1] %vm482_vm1, %v13995_v3  ;;  %v1696_v34 = vld [vmem:[%s10389_s24 + $0x2e8] sm:$0xff] }
  0x5c   : > { %543 = vst.msk [vmem:[#allocation2 + $0x1f0] sm:$0x1] %vm482_vm1, %v13995_v3  ;;  %546 = vst.msk [vmem:[#allocation2 + $0x208] sm:$0x1] %vm482_vm1, %v13995_v3  ;;  %9094 = vmatmul.mubr.msk.f32.gmra.mxu0 %vm479_vm0, %v1672_v38  ;;  %v10690_v38 = vld [vmem:[%s13982_s2] ss:$0 sm:$0xff] }
  0x5d   : > { %549 = vst.msk [vmem:[#allocation2 + $0x220] sm:$0x1] %vm482_vm1, %v13995_v3  ;;  %552 = vst.msk [vmem:[#allocation2 + $0x238] sm:$0x1] %vm482_vm1, %v13995_v3  ;;  %9146 = vmatmul.mubr.msk.f32.gmra.mxu1 %vm479_vm0, %v2163_v37  ;;  %9096 = vmatprep.mubr.msk.f32.mxu0 %vm479_vm0, %v1673_v40  ;;  %v3628_v37 = vld [vmem:[%s13983_s3 + $0x38] sm:$0xff] }
  0x5e   : > { %555 = vst.msk [vmem:[#allocation2 + $0x250] sm:$0x1] %vm482_vm1, %v13995_v3  ;;  %558 = vst.msk [vmem:[#allocation2 + $0x268] sm:$0x1] %vm482_vm1, %v13995_v3  ;;  %9148 = vmatprep.mubr.msk.f32.mxu1 %vm479_vm0, %v2164_v39  ;;  %9251 = vmatprep.subr.mxu1 %v3628_v37  ;;  %v3627_v39 = vld [vmem:[%s13983_s3 + $0x30] sm:$0xff]  ;;  %v7800_v40 = vld [vmem:[%s13983_s3 + $0x78] sm:$0xff] }
  0x5f   : > { %561 = vst.msk [vmem:[#allocation2 + $0x280] sm:$0x1] %vm482_vm1, %v13995_v3  ;;  %564 = vst.msk [vmem:[#allocation2 + $0x298] sm:$0x1] %vm482_vm1, %v13995_v3  ;;  %9252 = vmatpush3.msra.mxu1 %v3628_v37  ;;  %9187 = vmatprep.subr.mxu0 %v7800_v40 }
  0x60   : > { %567 = vst.msk [vmem:[#allocation2 + $0x2b0] sm:$0x1] %vm482_vm1, %v13995_v3  ;;  %570 = vst.msk [vmem:[#allocation2 + $0x2c8] sm:$0x1] %vm482_vm1, %v13995_v3  ;;  %9097 = vmatmul.mubr.msk.f32.gmra.mxu0 %vm479_vm0, %v1674_v44  ;;  %9253 = vmatprep.subr.mxu1 %v3627_v39 }
  0x61   : > { %573 = vst.msk [vmem:[#allocation2 + $0x2e0] sm:$0x1] %vm482_vm1, %v13995_v3  ;;  %576 = vst.msk [vmem:[#allocation2 + $0x2f8] sm:$0x1] %vm482_vm1, %v13995_v3  ;;  %9149 = vmatmul.mubr.msk.f32.gmra.mxu1 %vm479_vm0, %v2165_v43  ;;  %9099 = vmatprep.mubr.msk.f32.mxu0 %vm479_vm0, %v1675_v46  ;;  %v3626_v43 = vld [vmem:[%s13983_s3 + $0x28] sm:$0xff]  ;;  %v7799_v46 = vld [vmem:[%s13983_s3 + $0x70] sm:$0xff] }
  0x62   : > { %579 = vst.msk [vmem:[#allocation2 + $0x310] sm:$0x1] %vm482_vm1, %v13995_v3  ;;  %582 = vst.msk [vmem:[#allocation2 + $0x328] sm:$0x1] %vm482_vm1, %v13995_v3  ;;  %v2706_v45 = vld [vmem:[#allocation2 + $0x1c0] sm:$0x1]  ;;  %9254 = vmatpush3.msra.mxu1 %v3627_v39  ;;  %9188 = vmatpush3.msra.mxu0 %v7800_v40 }
  0x63   : > { %585 = vst.msk [vmem:[#allocation2 + $0x340] sm:$0x1] %vm482_vm1, %v13995_v3  ;;  %588 = vst.msk [vmem:[#allocation2 + $0x358] sm:$0x1] %vm482_vm1, %v13995_v3  ;;  %2915 = vrot.lane.b32.xlu1 %v2706_v45, %s9856_s25  ;;  %v2709_v56 = vld [vmem:[#allocation2 + $0x1d8] sm:$0x1]  ;;  %9255 = vmatprep.subr.mxu1 %v3626_v43 }
  0x64   : > { %591 = vst.msk [vmem:[#allocation2 + $0x370] sm:$0x1] %vm482_vm1, %v13995_v3  ;;  %594 = vst.msk [vmem:[#allocation2 + $0x388] sm:$0x1] %vm482_vm1, %v13995_v3  ;;  %v2712_v57 = vld [vmem:[#allocation2 + $0x1f0] sm:$0x1]  ;;  %9189 = vmatprep.subr.mxu0 %v7799_v46  ;;  %9256 = vmatpush3.msra.mxu1 %v3626_v43 }
  0x65   : > { %597 = vst.msk [vmem:[#allocation2 + $0x3a0] sm:$0x1] %vm482_vm1, %v13995_v3  ;;  %600 = vst.msk [vmem:[#allocation2 + $0x3b8] sm:$0x1] %vm482_vm1, %v13995_v3  ;;  %v2715_v5 = vld [vmem:[#allocation2 + $0x208] sm:$0x1]  ;;  %9190 = vmatpush3.msra.mxu0 %v7799_v46 }
  0x66   : > { %603 = vst.msk [vmem:[#allocation2 + $0x3d0] sm:$0x1] %vm482_vm1, %v13995_v3  ;;  %606 = vst.msk [vmem:[#allocation2 + $0x3e8] sm:$0x1] %vm482_vm1, %v13995_v3  ;;  %v2718_v6 = vld [vmem:[#allocation2 + $0x220] sm:$0x1] }
  0x67   : > { %609 = vst.msk [vmem:[#allocation2 + $0x400] sm:$0x1] %vm482_vm1, %v13995_v3  ;;  %612 = vst.msk [vmem:[#allocation2 + $0x418] sm:$0x1] %vm482_vm1, %v13995_v3  ;;  %v2721_v17 = vld [vmem:[#allocation2 + $0x238] sm:$0x1] }
  0x68   : > { %615 = vst.msk [vmem:[#allocation2 + $0x430] sm:$0x1] %vm482_vm1, %v13995_v3  ;;  %618 = vst.msk [vmem:[#allocation2 + $0x448] sm:$0x1] %vm482_vm1, %v13995_v3  ;;  %v2724_v18 = vld [vmem:[#allocation2 + $0x250] sm:$0x1] }
  0x69   : > { %621 = vst.msk [vmem:[#allocation2 + $0x460] sm:$0x1] %vm482_vm1, %v13995_v3  ;;  %624 = vst.msk [vmem:[#allocation2 + $0x478] sm:$0x1] %vm482_vm1, %v13995_v3  ;;  %v2727_v29 = vld [vmem:[#allocation2 + $0x268] sm:$0x1] }
  0x6a   : > { %627 = vst.msk [vmem:[#allocation2 + $0x490] sm:$0x1] %vm482_vm1, %v13995_v3  ;;  %630 = vst.msk [vmem:[#allocation2 + $0x4a8] sm:$0x1] %vm482_vm1, %v13995_v3  ;;  %v2730_v30 = vld [vmem:[#allocation2 + $0x280] sm:$0x1] }
  0x6b   : > { %633 = vst.msk [vmem:[#allocation2 + $0x4c0] sm:$0x1] %vm482_vm1, %v13995_v3  ;;  %636 = vst.msk [vmem:[#allocation2 + $0x4d8] sm:$0x1] %vm482_vm1, %v13995_v3  ;;  %v2733_v41 = vld [vmem:[#allocation2 + $0x298] sm:$0x1] }
  0x6c   : > { %639 = vst.msk [vmem:[#allocation2 + $0x4f0] sm:$0x1] %vm482_vm1, %v13995_v3  ;;  %642 = vst.msk [vmem:[#allocation2 + $0x508] sm:$0x1] %vm482_vm1, %v13995_v3  ;;  %v2736_v42 = vld [vmem:[#allocation2 + $0x2b0] sm:$0x1] }
  0x6d   : > { %645 = vst.msk [vmem:[#allocation2 + $0x520] sm:$0x1] %vm482_vm1, %v13995_v3  ;;  %648 = vst.msk [vmem:[#allocation2 + $0x538] sm:$0x1] %vm482_vm1, %v13995_v3  ;;  %v2166_v45 = vld [vmem:[%s10389_s24 + $0x340] sm:$0xff] }
  0x6e   : > { %651 = vst.msk [vmem:[#allocation2 + $0x550] sm:$0x1] %vm482_vm1, %v13995_v3  ;;  %654 = vst.msk [vmem:[#allocation2 + $0x568] sm:$0x1] %vm482_vm1, %v13995_v3  ;;  %9151 = vmatprep.mubr.msk.f32.mxu1 %vm479_vm0, %v2166_v45  ;;  %v2739_v53 = vld [vmem:[#allocation2 + $0x2c8] sm:$0x1] }
  0x6f   : > { %657 = vst.msk [vmem:[#allocation2 + $0x580] sm:$0x1] %vm482_vm1, %v13995_v3  ;;  %660 = vst.msk [vmem:[#allocation2 + $0x598] sm:$0x1] %vm482_vm1, %v13995_v3  ;;  %v2742_v54 = vld [vmem:[#allocation2 + $0x2e0] sm:$0x1]  ;;  %9152 = vmatmul.mubr.msk.f32.gmra.mxu1 %vm479_vm0, %v2167_v49 }
  0x70   : > { %663 = vst.msk [vmem:[#allocation2 + $0x5b0] sm:$0x1] %vm482_vm1, %v13995_v3  ;;  %666 = vst.msk [vmem:[#allocation2 + $0x5c8] sm:$0x1] %vm482_vm1, %v13995_v3  ;;  %v2745_v1 = vld [vmem:[#allocation2 + $0x2f8] sm:$0x1] }
  0x71   : > { %669 = vst.msk [vmem:[#allocation2 + $0x5e0] sm:$0x1] %vm482_vm1, %v13995_v3  ;;  %672 = vst.msk [vmem:[#allocation2 + $0x5f8] sm:$0x1] %vm482_vm1, %v13995_v3  ;;  %v2748_v2 = vld [vmem:[#allocation2 + $0x310] sm:$0x1] }
  0x72   : > { %675 = vst.msk [vmem:[#allocation2 + $0x610] sm:$0x1] %vm482_vm1, %v13995_v3  ;;  %678 = vst.msk [vmem:[#allocation2 + $0x628] sm:$0x1] %vm482_vm1, %v13995_v3  ;;  %v2805_v50 = vld [vmem:[#allocation2 + $0x4d8] sm:$0x1] }
  0x73   : > { %681 = vst.msk [vmem:[#allocation2 + $0x640] sm:$0x1] %vm482_vm1, %v13995_v3  ;;  %684 = vst.msk [vmem:[#allocation2 + $0x658] sm:$0x1] %vm482_vm1, %v13995_v3  ;;  %v2808_v51 = vld [vmem:[#allocation2 + $0x4f0] sm:$0x1]  ;;  %3317 = vrot.lane.b32.xlu0 %v2805_v50, %s9857_s26 }
  0x74   : > { %3323 = vrot.lane.b32.xlu1 %v2808_v51, %s9857_s26  ;;  %v2811_v62 = vld [vmem:[#allocation2 + $0x508] sm:$0x1]  ;;  %v2814_v63 = vld [vmem:[#allocation2 + $0x520] sm:$0x1]  ;;  %v2817_v11 = vld [vmem:[#allocation2 + $0x538] sm:$0x1] }
  0x75   : > { %v2820_v12 = vld [vmem:[#allocation2 + $0x550] sm:$0x1]  ;;  %v2823_v23 = vld [vmem:[#allocation2 + $0x568] sm:$0x1]  ;;  %5029 = vst.msk [vmem:[#allocation3] sm:$0xff] %vm3517_vm2, %v13995_v3  ;;  %5032 = vst.msk [vmem:[#allocation3 + $0x10] sm:$0xff] %vm3517_vm2, %v13995_v3 }
  0x76   : > { %v2826_v24 = vld [vmem:[#allocation2 + $0x580] sm:$0x1]  ;;  %v2829_v35 = vld [vmem:[#allocation2 + $0x598] sm:$0x1]  ;;  %v1676_v50 = vld [vmem:[%s10389_s24 + $0x248] sm:$0xff]  ;;  %5034 = vst.msk [vmem:[#allocation3 + $0x20] sm:$0xff] %vm3517_vm2, %v13995_v3 }
  0x77   : > { %2921 = vrot.lane.b32.xlu0 %v2709_v56, %s9856_s25  ;;  %v2832_v36 = vld [vmem:[#allocation2 + $0x5b0] sm:$0x1]  ;;  %v2835_v47 = vld [vmem:[#allocation2 + $0x5c8] sm:$0x1]  ;;  %9100 = vmatmul.mubr.msk.f32.gmra.mxu0 %vm479_vm0, %v1676_v50  ;;  %v1678_v56 = vld [vmem:[%s10389_s24 + $0x258] sm:$0xff]  ;;  %5036 = vst.msk [vmem:[#allocation3 + $0x30] sm:$0xff] %vm3517_vm2, %v13995_v3 }
  0x78   : > { %2927 = vrot.lane.b32.xlu1 %v2712_v57, %s9856_s25  ;;  %v2838_v48 = vld [vmem:[#allocation2 + $0x5e0] sm:$0x1]  ;;  %v2168_v51 = vld [vmem:[%s10389_s24 + $0x350] sm:$0xff]  ;;  %9102 = vmatprep.mubr.msk.f32.mxu0 %vm479_vm0, %v1677_v52  ;;  %v2841_v59 = vld [vmem:[#allocation2 + $0x5f8] sm:$0x1]  ;;  %5038 = vst.msk [vmem:[#allocation3 + $0x40] sm:$0xff] %vm3517_vm2, %v13995_v3 }
  0x79   : > { %9154 = vmatprep.mubr.msk.f32.mxu1 %vm479_vm0, %v2168_v51  ;;  %v2170_v57 = vld [vmem:[%s10389_s24 + $0x360] sm:$0xff]  ;;  %v2844_v60 = vld [vmem:[#allocation2 + $0x610] sm:$0x1]  ;;  %v2847_v8 = vld [vmem:[#allocation2 + $0x628] sm:$0x1]  ;;  %5040 = vst.msk [vmem:[#allocation3 + $0x50] sm:$0xff] %vm3517_vm2, %v13995_v3 }
  0x7a   : > { %9155 = vmatmul.mubr.msk.f32.gmra.mxu1 %vm479_vm0, %v2169_v55  ;;  %5042 = vst.msk [vmem:[#allocation3 + $0x60] sm:$0xff] %vm3517_vm2, %v13995_v3  ;;  %5044 = vst.msk [vmem:[#allocation3 + $0x70] sm:$0xff] %vm3517_vm2, %v13995_v3  ;;  %v3625_v49 = vld [vmem:[%s13983_s3 + $0x20] sm:$0xff] }
  0x7b   : > { %3329 = vrot.lane.b32.xlu0 %v2811_v62, %s9857_s26  ;;  %9103 = vmatmul.mubr.msk.f32.gmra.mxu0 %vm479_vm0, %v1678_v56  ;;  %v1680_v62 = vld [vmem:[%s10389_s24 + $0x268] sm:$0xff]  ;;  %5046 = vst.msk [vmem:[#allocation3 + $0x80] sm:$0xff] %vm3517_vm2, %v13995_v3  ;;  %5048 = vst.msk [vmem:[#allocation3 + $0x90] sm:$0xff] %vm3517_vm2, %v13995_v3  ;;  %v7793_v46 = vld [vmem:[%s13983_s3 + $0x40] sm:$0xff] }
  0x7c   : > { %3335 = vrot.lane.b32.xlu1 %v2814_v63, %s9857_s26  ;;  %9157 = vmatprep.mubr.msk.f32.mxu1 %vm479_vm0, %v2170_v57  ;;  %v2172_v63 = vld [vmem:[%s10389_s24 + $0x370] sm:$0xff]  ;;  %5050 = vst.msk [vmem:[#allocation3 + $0xa0] sm:$0xff] %vm3517_vm2, %v13995_v3  ;;  %5052 = vst.msk [vmem:[#allocation3 + $0xb0] sm:$0xff] %vm3517_vm2, %v13995_v3  ;;  %v7798_v56 = vld [vmem:[%s13983_s3 + $0x68] sm:$0xff] }
  0x7d   : > { %9105 = vmatprep.mubr.msk.f32.mxu0 %vm479_vm0, %v1679_v58  ;;  %5054 = vst.msk [vmem:[#allocation3 + $0xc0] sm:$0xff] %vm3517_vm2, %v13995_v3  ;;  %5056 = vst.msk [vmem:[#allocation3 + $0xd0] sm:$0xff] %vm3517_vm2, %v13995_v3  ;;  %9257 = vmatprep.subr.mxu1 %v3625_v49  ;;  %v3624_v57 = vld [vmem:[%s13983_s3 + $0x18] sm:$0xff] }
  0x7e   : > { %9158 = vmatmul.mubr.msk.f32.gmra.mxu1 %vm479_vm0, %v2171_v61  ;;  %5058 = vst.msk [vmem:[#allocation3 + $0xe0] sm:$0xff] %vm3517_vm2, %v13995_v3  ;;  %5060 = vst.msk [vmem:[#allocation3 + $0xf0] sm:$0xff] %vm3517_vm2, %v13995_v3  ;;  %9191 = vmatprep.subr.mxu0 %v7798_v56 }
  0x7f   : > { %2933 = vrot.lane.b32.xlu0 %v2715_v5, %s9856_s25  ;;  %9106 = vmatmul.mubr.msk.f32.gmra.mxu0 %vm479_vm0, %v1680_v62  ;;  %v1682_v5 = vld [vmem:[%s10389_s24 + $0x278] sm:$0xff]  ;;  %5062 = vst.msk [vmem:[#allocation3 + $0x100] sm:$0xff] %vm3517_vm2, %v13995_v3  ;;  %5064 = vst.msk [vmem:[#allocation3 + $0x110] sm:$0xff] %vm3517_vm2, %v13995_v3  ;;  %v7797_v62 = vld [vmem:[%s13983_s3 + $0x60] sm:$0xff] }
  0x80   : > { %2939 = vrot.lane.b32.xlu1 %v2718_v6, %s9856_s25  ;;  %9160 = vmatprep.mubr.msk.f32.mxu1 %vm479_vm0, %v2172_v63  ;;  %v2174_v6 = vld [vmem:[%s10389_s24 + $0x380] sm:$0xff]  ;;  %5066 = vst.msk [vmem:[#allocation3 + $0x120] sm:$0xff] %vm3517_vm2, %v13995_v3  ;;  %5068 = vst.msk [vmem:[#allocation3 + $0x130] sm:$0xff] %vm3517_vm2, %v13995_v3 }
  0x81   : > { %9108 = vmatprep.mubr.msk.f32.mxu0 %vm479_vm0, %v1681_v0  ;;  %5070 = vst.msk [vmem:[#allocation3 + $0x140] sm:$0xff] %vm3517_vm2, %v13995_v3  ;;  %5072 = vst.msk [vmem:[#allocation3 + $0x150] sm:$0xff] %vm3517_vm2, %v13995_v3  ;;  %9258 = vmatpush3.msra.mxu1 %v3625_v49 }
  0x82   : > { %9161 = vmatmul.mubr.msk.f32.gmra.mxu1 %vm479_vm0, %v2173_v4  ;;  %5074 = vst.msk [vmem:[#allocation3 + $0x160] sm:$0xff] %vm3517_vm2, %v13995_v3  ;;  %5076 = vst.msk [vmem:[#allocation3 + $0x170] sm:$0xff] %vm3517_vm2, %v13995_v3  ;;  %9192 = vmatpush3.msra.mxu0 %v7798_v56 }
  0x83   : > { %3341 = vrot.lane.b32.xlu0 %v2817_v11, %s9857_s26  ;;  %9109 = vmatmul.mubr.msk.f32.gmra.mxu0 %vm479_vm0, %v1682_v5  ;;  %v2176_v11 = vld [vmem:[%s10389_s24 + $0x390] sm:$0xff]  ;;  %5078 = vst.msk [vmem:[#allocation3 + $0x180] sm:$0xff] %vm3517_vm2, %v13995_v3  ;;  %5080 = vst.msk [vmem:[#allocation3 + $0x190] sm:$0xff] %vm3517_vm2, %v13995_v3 }
  0x84   : > { %3347 = vrot.lane.b32.xlu1 %v2820_v12, %s9857_s26  ;;  %9163 = vmatprep.mubr.msk.f32.mxu1 %vm479_vm0, %v2174_v6  ;;  %v1685_v12 = vld [vmem:[%s10389_s24 + $0x290] sm:$0xff]  ;;  %5082 = vst.msk [vmem:[#allocation3 + $0x1a0] sm:$0xff] %vm3517_vm2, %v13995_v3  ;;  %5084 = vst.msk [vmem:[#allocation3 + $0x1b0] sm:$0xff] %vm3517_vm2, %v13995_v3 }
  0x85   : > { %9111 = vmatprep.mubr.msk.f32.mxu0 %vm479_vm0, %v1683_v7  ;;  %5086 = vst.msk [vmem:[#allocation3 + $0x1c0] sm:$0xff] %vm3517_vm2, %v13995_v3  ;;  %5088 = vst.msk [vmem:[#allocation3 + $0x1d0] sm:$0xff] %vm3517_vm2, %v13995_v3  ;;  %9259 = vmatprep.subr.mxu1 %v3624_v57  ;;  %v3623_v6 = vld [vmem:[%s13983_s3 + $0x10] sm:$0xff] }
  0x86   : > { %9164 = vmatmul.mubr.msk.f32.gmra.mxu1 %vm479_vm0, %v2175_v9  ;;  %5090 = vst.msk [vmem:[#allocation3 + $0x1e0] sm:$0xff] %vm3517_vm2, %v13995_v3  ;;  %5092 = vst.msk [vmem:[#allocation3 + $0x1f0] sm:$0xff] %vm3517_vm2, %v13995_v3  ;;  %9193 = vmatprep.subr.mxu0 %v7797_v62  ;;  %v2188_v7 = vld [vmem:[%s10389_s24 + $0x3f0] sm:$0xff] }
  0x87   : > { %2945 = vrot.lane.b32.xlu0 %v2721_v17, %s9856_s25  ;;  %9112 = vmatmul.mubr.msk.f32.gmra.mxu0 %vm479_vm0, %v1684_v10  ;;  %v2179_v17 = vld [vmem:[%s10389_s24 + $0x3a8] sm:$0xff]  ;;  %5094 = vst.msk [vmem:[#allocation3 + $0x200] sm:$0xff] %vm3517_vm2, %v13995_v3  ;;  %5096 = vst.msk [vmem:[#allocation3 + $0x210] sm:$0xff] %vm3517_vm2, %v13995_v3 }
  0x88   : > { %2951 = vrot.lane.b32.xlu1 %v2724_v18, %s9856_s25  ;;  %9166 = vmatprep.mubr.msk.f32.mxu1 %vm479_vm0, %v2176_v11  ;;  %v1688_v18 = vld [vmem:[%s10389_s24 + $0x2a8] sm:$0xff]  ;;  %5098 = vst.msk [vmem:[#allocation3 + $0x220] sm:$0xff] %vm3517_vm2, %v13995_v3  ;;  %5100 = vst.msk [vmem:[#allocation3 + $0x230] sm:$0xff] %vm3517_vm2, %v13995_v3 }
  0x89   : > { %9114 = vmatprep.mubr.msk.f32.mxu0 %vm479_vm0, %v1685_v12  ;;  %9260 = vmatpush3.msra.mxu1 %v3624_v57 }
  0x8a   : > { %9167 = vmatmul.mubr.msk.f32.gmra.mxu1 %vm479_vm0, %v2177_v13  ;;  %9194 = vmatpush3.msra.mxu0 %v7797_v62 }
  0x8b   : > { %3353 = vrot.lane.b32.xlu0 %v2823_v23, %s9857_s26  ;;  %9115 = vmatmul.mubr.msk.f32.gmra.mxu0 %vm479_vm0, %v1686_v14  ;;  %v2182_v23 = vld [vmem:[%s10389_s24 + $0x3c0] sm:$0xff]  ;;  %v7796_v14 = vld [vmem:[%s13983_s3 + $0x58] sm:$0xff] }
  0x8c   : > { %3359 = vrot.lane.b32.xlu1 %v2826_v24, %s9857_s26  ;;  %9169 = vmatprep.mubr.msk.f32.mxu1 %vm479_vm0, %v2178_v15  ;;  %v1691_v24 = vld [vmem:[%s10389_s24 + $0x2c0] sm:$0xff]  ;;  %v2189_v15 = vld [vmem:[%s10389_s24 + $0x3f8] sm:$0xff] }
  0x8d   : > { %9117 = vmatprep.mubr.msk.f32.mxu0 %vm479_vm0, %v1687_v16  ;;  %9261 = vmatprep.subr.mxu1 %v3623_v6  ;;  %v3622_v16 = vld [vmem:[%s13983_s3 + $0x8] sm:$0xff] }
  0x8e   : > { %9170 = vmatmul.mubr.msk.f32.gmra.mxu1 %vm479_vm0, %v2179_v17  ;;  %9195 = vmatprep.subr.mxu0 %v7796_v14 }
  0x8f   : > { %2957 = vrot.lane.b32.xlu0 %v2727_v29, %s9856_s25  ;;  %9118 = vmatmul.mubr.msk.f32.gmra.mxu0 %vm479_vm0, %v1688_v18  ;;  %v2185_v29 = vld [vmem:[%s10389_s24 + $0x3d8] sm:$0xff] }
  0x90   : > { %2963 = vrot.lane.b32.xlu1 %v2730_v30, %s9856_s25  ;;  %9172 = vmatprep.mubr.msk.f32.mxu1 %vm479_vm0, %v2180_v19  ;;  %v1694_v30 = vld [vmem:[%s10389_s24 + $0x2d8] sm:$0xff] }
  0x91   : > { %9120 = vmatprep.mubr.msk.f32.mxu0 %vm479_vm0, %v1689_v20  ;;  %v7795_v20 = vld [vmem:[%s13983_s3 + $0x50] sm:$0xff]  ;;  %9262 = vmatpush3.msra.mxu1 %v3623_v6 }
  0x92   : > { %9173 = vmatmul.mubr.msk.f32.gmra.mxu1 %vm479_vm0, %v2181_v21  ;;  %9196 = vmatpush3.msra.mxu0 %v7796_v14 }
  0x93   : > { %3365 = vrot.lane.b32.xlu0 %v2829_v35, %s9857_s26  ;;  %9121 = vmatmul.mubr.msk.f32.gmra.mxu0 %vm479_vm0, %v1690_v22  ;;  %v1697_v35 = vld [vmem:[%s10389_s24 + $0x2f0] sm:$0xff] }
  0x94   : > { %3371 = vrot.lane.b32.xlu1 %v2832_v36, %s9857_s26  ;;  %9175 = vmatprep.mubr.msk.f32.mxu1 %vm479_vm0, %v2182_v23  ;;  %v1698_v36 = vld [vmem:[%s10389_s24 + $0x2f8] sm:$0xff] }
  0x95   : > { %9123 = vmatprep.mubr.msk.f32.mxu0 %vm479_vm0, %v1691_v24  ;;  %9263 = vmatprep.subr.mxu1 %v3622_v16 }
  0x96   : > { %9176 = vmatmul.mubr.msk.f32.gmra.mxu1 %vm479_vm0, %v2183_v25  ;;  %9197 = vmatprep.subr.mxu0 %v7795_v20 }
  0x97   : > { %2969 = vrot.lane.b32.xlu0 %v2733_v41, %s9856_s25  ;;  %9124 = vmatmul.mubr.msk.f32.gmra.mxu0 %vm479_vm0, %v1692_v26  ;;  %v3621_v26 = vld [vmem:[%s13983_s3] sm:$0xff] }
  0x98   : > { %2975 = vrot.lane.b32.xlu1 %v2736_v42, %s9856_s25  ;;  %9178 = vmatprep.mubr.msk.f32.mxu1 %vm479_vm0, %v2184_v27 }
  0x99   : > { %9126 = vmatprep.mubr.msk.f32.mxu0 %vm479_vm0, %v1693_v28  ;;  %9264 = vmatpush3.msra.mxu1 %v3622_v16 }
  0x9a   : > { %9179 = vmatmul.mubr.msk.f32.gmra.mxu1 %vm479_vm0, %v2185_v29  ;;  %9198 = vmatpush3.msra.mxu0 %v7795_v20 }
  0x9b   : > { %3377 = vrot.lane.b32.xlu0 %v2835_v47, %s9857_s26  ;;  %9127 = vmatmul.mubr.msk.f32.gmra.mxu0 %vm479_vm0, %v1694_v30  ;;  %v7794_v30 = vld [vmem:[%s13983_s3 + $0x48] sm:$0xff] }
  0x9c   : > { %3383 = vrot.lane.b32.xlu1 %v2838_v48, %s9857_s26  ;;  %9181 = vmatprep.mubr.msk.f32.mxu1 %vm479_vm0, %v2186_v31 }
  0x9d   : > { %9129 = vmatprep.mubr.msk.f32.mxu0 %vm479_vm0, %v1695_v32  ;;  %9265 = vmatprep.subr.mxu1 %v3621_v26 }
  0x9e   : > { %9182 = vmatmul.mubr.msk.f32.gmra.mxu1 %vm479_vm0, %v2187_v33  ;;  %9199 = vmatprep.subr.mxu0 %v7794_v30 }
  0x9f   : > { %2981 = vrot.lane.b32.xlu0 %v2739_v53, %s9856_s25  ;;  %9130 = vmatmul.mubr.msk.f32.gmra.mxu0 %vm479_vm0, %v1696_v34 }
  0xa0   : > { %2987 = vrot.lane.b32.xlu1 %v2742_v54, %s9856_s25  ;;  %9132 = vmatprep.mubr.msk.f32.mxu0 %vm479_vm0, %v1697_v35 }
  0xa1   : > { %9184 = vmatprep.mubr.msk.f32.mxu1 %vm479_vm0, %v2188_v7  ;;  %9266 = vmatpush3.msra.mxu1 %v3621_v26 }
  0xa2   : > { %9185 = vmatmul.mubr.msk.f32.gmra.mxu1 %vm479_vm0, %v2189_v15  ;;  %9200 = vmatpush3.msra.mxu0 %v7794_v30 }
  0xa3   : > { %3389 = vrot.lane.b32.xlu0 %v2841_v59, %s9857_s26  ;;  %9133 = vmatmul.mubr.msk.f32.gmra.mxu0 %vm479_vm0, %v1698_v36 }
  0xa4   : > { %3395 = vrot.lane.b32.xlu1 %v2844_v60, %s9857_s26  ;;  %9201 = vmatprep.subr.mxu0 %v7793_v46 }
  0xa5   : > { %9202 = vmatpush3.msra.mxu0 %v7793_v46 }
  0xa7   : > { %2993 = vrot.lane.b32.xlu0 %v2745_v1, %s9856_s25 }
  0xa8   : > { %2999 = vrot.lane.b32.xlu1 %v2748_v2, %s9856_s25 }
  0xab   : > { %3401 = vrot.lane.b32.xlu0 %v2847_v8, %s9857_s26 }
  0xd4   : > { %v8985_v41 = vpop.f32.mrf.mxu0 }
  0xd5   : > { %v9037_v42 = vpop.f32.mrf.mxu1  ;;  %v894_v44 = vadd.f32 %v8985_v41, %v10690_v38 }
  0xd6   : > { %v1385_v45 = vadd.f32 %v9037_v42, %v10690_v38  ;;  %v888_v47 = vpop.f32.mrf.mxu0 }
  0xd7   : > { %v1379_v48 = vpop.f32.mrf.mxu1  ;;  %vm1048_vm3 = vcmp.ge.f32.partialorder %v894_v44, 0.0  ;;  %v1080_v50 = vmul.f32 0.1, %v894_v44  ;;  %v889_v52 = vadd.f32 %v10690_v38, %v888_v47 }
  0xd8   : > { %vm1539_vm4 = vcmp.ge.f32.partialorder %v1385_v45, 0.0  ;;  %v1571_v51 = vmul.f32 0.1, %v1385_v45  ;;  %v1380_v53 = vadd.f32 %v10690_v38, %v1379_v48  ;;  %v8988_v55 = vpop.f32.mrf.mxu0 }
  0xd9   : > { %v9040_v54 = vpop.f32.mrf.mxu1  ;;  %v1112_v58 = vsel %vm1048_vm3, %v894_v44, %v1080_v50  ;;  %v904_v61 = vadd.f32 %v8988_v55, %v10690_v38  ;;  %vm1047_vm5 = vcmp.ge.f32.partialorder %v889_v52, 0.0  ;;  %v1079_v63 = vmul.f32 0.1, %v889_v52 }
  0xda   : > { %v1603_v59 = vsel %vm1539_vm4, %v1385_v45, %v1571_v51  ;;  %v1395_v60 = vadd.f32 %v9040_v54, %v10690_v38  ;;  %1145 = vst.msk [vmem:[#allocation2 + $0x4d0] sm:$0xff] %vm479_vm0, %v1112_v58  ;;  %vm1538_vm6 = vcmp.ge.f32.partialorder %v1380_v53, 0.0  ;;  %v1570_v0 = vmul.f32 0.1, %v1380_v53  ;;  %v898_v2 = vpop.f32.mrf.mxu0 }
  0xdb   : > { %1636 = vst.msk [vmem:[#allocation2 + $0x339] sm:$0xff] %vm479_vm0, %v1603_v59  ;;  %v1389_v1 = vpop.f32.mrf.mxu1  ;;  %vm1050_vm8 = vcmp.ge.f32.partialorder %v904_v61, 0.0  ;;  %v1111_v8 = vsel %vm1047_vm5, %v889_v52, %v1079_v63  ;;  %v1082_v11 = vmul.f32 0.1, %v904_v61  ;;  %v899_v12 = vadd.f32 %v10690_v38, %v898_v2 }
  0xdc   : > { %vm1541_vm7 = vcmp.ge.f32.partialorder %v1395_v60, 0.0  ;;  %v1573_v4 = vmul.f32 0.1, %v1395_v60  ;;  %v1390_v5 = vadd.f32 %v10690_v38, %v1389_v1  ;;  %v1602_v9 = vsel %vm1538_vm6, %v1380_v53, %v1570_v0  ;;  %v8991_v13 = vpop.f32.mrf.mxu0  ;;  %1144 = vst.msk [vmem:[#allocation2 + $0x4c8] sm:$0xff] %vm479_vm0, %v1111_v8 }
  0xdd   : > { %v9043_v10 = vpop.f32.mrf.mxu1  ;;  %1635 = vst.msk [vmem:[#allocation2 + $0x331] sm:$0xff] %vm479_vm0, %v1602_v9  ;;  %v1114_v21 = vsel %vm1050_vm8, %v904_v61, %v1082_v11  ;;  %vm1049_vm10 = vcmp.ge.f32.partialorder %v899_v12, 0.0  ;;  %v1081_v23 = vmul.f32 0.1, %v899_v12  ;;  %v914_v24 = vadd.f32 %v8991_v13, %v10690_v38 }
  0xde   : > { %v1605_v17 = vsel %vm1541_vm7, %v1395_v60, %v1573_v4  ;;  %vm1540_vm9 = vcmp.ge.f32.partialorder %v1390_v5, 0.0  ;;  %v1572_v18 = vmul.f32 0.1, %v1390_v5  ;;  %v1405_v19 = vadd.f32 %v9043_v10, %v10690_v38  ;;  %v908_v25 = vpop.f32.mrf.mxu0  ;;  %1147 = vst.msk [vmem:[#allocation2 + $0x4e8] sm:$0xff] %vm479_vm0, %v1114_v21 }
  0xdf   : > { %1638 = vst.msk [vmem:[#allocation2 + $0x351] sm:$0xff] %vm479_vm0, %v1605_v17  ;;  %v1399_v22 = vpop.f32.mrf.mxu1  ;;  %v1113_v31 = vsel %vm1049_vm10, %v899_v12, %v1081_v23  ;;  %vm1052_vm12 = vcmp.ge.f32.partialorder %v914_v24, 0.0  ;;  %v1084_v33 = vmul.f32 0.1, %v914_v24  ;;  %v909_v34 = vadd.f32 %v10690_v38, %v908_v25 }
  0xe0   : > { %v1604_v27 = vsel %vm1540_vm9, %v1390_v5, %v1572_v18  ;;  %vm1543_vm11 = vcmp.ge.f32.partialorder %v1405_v19, 0.0  ;;  %v1575_v28 = vmul.f32 0.1, %v1405_v19  ;;  %v1400_v29 = vadd.f32 %v10690_v38, %v1399_v22  ;;  %v8994_v35 = vpop.f32.mrf.mxu0  ;;  %1146 = vst.msk [vmem:[#allocation2 + $0x4e0] sm:$0xff] %vm479_vm0, %v1113_v31 }
  0xe1   : > { %1637 = vst.msk [vmem:[#allocation2 + $0x349] sm:$0xff] %vm479_vm0, %v1604_v27  ;;  %v9046_v32 = vpop.f32.mrf.mxu1  ;;  %v1116_v42 = vsel %vm1052_vm12, %v914_v24, %v1084_v33  ;;  %vm1051_vm14 = vcmp.ge.f32.partialorder %v909_v34, 0.0  ;;  %v1083_v43 = vmul.f32 0.1, %v909_v34  ;;  %v924_v44 = vadd.f32 %v8994_v35, %v10690_v38  ;;  %v2804_v59 = vld [vmem:[#allocation2 + $0x4d0] sm:$0xff] }
  0xe2   : > { %v1607_v36 = vsel %vm1543_vm11, %v1405_v19, %v1575_v28  ;;  %vm1542_vm13 = vcmp.ge.f32.partialorder %v1400_v29, 0.0  ;;  %v1574_v37 = vmul.f32 0.1, %v1400_v29  ;;  %v1415_v39 = vadd.f32 %v9046_v32, %v10690_v38  ;;  %v2754_v40 = vld [vmem:[#allocation2 + $0x340] sm:$0x1]  ;;  %v918_v45 = vpop.f32.mrf.mxu0  ;;  %1149 = vst.msk [vmem:[#allocation2 + $0x500] sm:$0xff] %vm479_vm0, %v1116_v42 }
  0xe3   : > { %1640 = vst.msk [vmem:[#allocation2 + $0x369] sm:$0xff] %vm479_vm0, %v1607_v36  ;;  %3113 = vrot.lane.b32.xlu1 %v2754_v40, %s9858_s19  ;;  %v1409_v41 = vpop.f32.mrf.mxu1  ;;  %v1115_v52 = vsel %vm1051_vm14, %v909_v34, %v1083_v43  ;;  %vm1054_vm1 = vcmp.ge.f32.partialorder %v924_v44, 0.0  ;;  %v1086_v53 = vmul.f32 0.1, %v924_v44  ;;  %v919_v54 = vadd.f32 %v10690_v38, %v918_v45  ;;  %v2803_v6 = vld [vmem:[#allocation2 + $0x4c8] sm:$0xff] }
  0xe4   : > { %v1606_v47 = vsel %vm1542_vm13, %v1400_v29, %v1574_v37  ;;  %vm1545_vm15 = vcmp.ge.f32.partialorder %v1415_v39, 0.0  ;;  %v1577_v48 = vmul.f32 0.1, %v1415_v39  ;;  %v1410_v49 = vadd.f32 %v10690_v38, %v1409_v41  ;;  %v2753_v51 = vld [vmem:[#allocation2 + $0x338] sm:$0xff]  ;;  %v8997_v55 = vpop.f32.mrf.mxu0  ;;  %1148 = vst.msk [vmem:[#allocation2 + $0x4f8] sm:$0xff] %vm479_vm0, %v1115_v52  ;;  %v2752_v14 = vld [vmem:[#allocation2 + $0x330] sm:$0xff]  ;;  %v10884_v52 = vpop.permute.xlu0 %2905 }
  0xe5   : > { %1639 = vst.msk [vmem:[#allocation2 + $0x361] sm:$0xff] %vm479_vm0, %v1606_v47  ;;  %v9049_v50 = vpop.f32.mrf.mxu1  ;;  %3111 = vrot.lane.b32.xlu0 %v2753_v51, %s9858_s19  ;;  %v1118_v61 = vsel %vm1054_vm1, %v924_v44, %v1086_v53  ;;  %vm1053_vm4 = vcmp.ge.f32.partialorder %v919_v54, 0.0  ;;  %v1085_v62 = vmul.f32 0.1, %v919_v54  ;;  %v934_v63 = vadd.f32 %v8997_v55, %v10690_v38  ;;  %v2807_v43 = vld [vmem:[#allocation2 + $0x4e8] sm:$0xff] }
  0xe6   : > { %v1609_v56 = vsel %vm1545_vm15, %v1415_v39, %v1577_v48  ;;  %vm1544_vm3 = vcmp.ge.f32.partialorder %v1410_v49, 0.0  ;;  %v1576_v57 = vmul.f32 0.1, %v1410_v49  ;;  %v1425_v58 = vadd.f32 %v9049_v50, %v10690_v38  ;;  %v928_v0 = vpop.f32.mrf.mxu0  ;;  %1151 = vst.msk [vmem:[#allocation2 + $0x518] sm:$0xff] %vm479_vm0, %v1118_v61  ;;  %v2757_v24 = vld [vmem:[#allocation2 + $0x358] sm:$0x1]  ;;  %v10891_v61 = vpop.permute.xlu1 %2909 }
  0xe7   : > { %1642 = vst.msk [vmem:[#allocation2 + $0x381] sm:$0xff] %vm479_vm0, %v1609_v56  ;;  %v1419_v60 = vpop.f32.mrf.mxu1  ;;  %3315 = vrot.lane.b32.xlu1 %v2804_v59, %s9857_s26  ;;  %v1117_v7 = vsel %vm1053_vm4, %v919_v54, %v1085_v62  ;;  %vm1056_vm6 = vcmp.ge.f32.partialorder %v934_v63, 0.0  ;;  %v1088_v8 = vmul.f32 0.1, %v934_v63  ;;  %v929_v9 = vadd.f32 %v10690_v38, %v928_v0  ;;  %v2806_v51 = vld [vmem:[#allocation2 + $0x4e0] sm:$0xff] }
  0xe8   : > { %v1608_v1 = vsel %vm1544_vm3, %v1410_v49, %v1576_v57  ;;  %vm1547_vm5 = vcmp.ge.f32.partialorder %v1425_v58, 0.0  ;;  %v1579_v2 = vmul.f32 0.1, %v1425_v58  ;;  %v1420_v4 = vadd.f32 %v10690_v38, %v1419_v60  ;;  %v9000_v10 = vpop.f32.mrf.mxu0  ;;  %1150 = vst.msk [vmem:[#allocation2 + $0x510] sm:$0xff] %vm479_vm0, %v1117_v7  ;;  %v2756_v32 = vld [vmem:[#allocation2 + $0x350] sm:$0xff] }
  0xe9   : > { %1641 = vst.msk [vmem:[#allocation2 + $0x379] sm:$0xff] %vm479_vm0, %v1608_v1  ;;  %v9052_v5 = vpop.f32.mrf.mxu1  ;;  %3313 = vrot.lane.b32.xlu0 %v2803_v6, %s9857_s26  ;;  %v1120_v16 = vsel %vm1056_vm6, %v934_v63, %v1088_v8  ;;  %vm1055_vm8 = vcmp.ge.f32.partialorder %v929_v9, 0.0  ;;  %v1087_v17 = vmul.f32 0.1, %v929_v9  ;;  %v944_v18 = vadd.f32 %v9000_v10, %v10690_v38  ;;  %v2755_v63 = vld [vmem:[#allocation2 + $0x348] sm:$0xff] }
  0xea   : > { %v1611_v11 = vsel %vm1547_vm5, %v1425_v58, %v1579_v2  ;;  %vm1546_vm7 = vcmp.ge.f32.partialorder %v1420_v4, 0.0  ;;  %v1578_v12 = vmul.f32 0.1, %v1420_v4  ;;  %v1435_v13 = vadd.f32 %v9052_v5, %v10690_v38  ;;  %v938_v19 = vpop.f32.mrf.mxu0  ;;  %1153 = vst.msk [vmem:[#allocation2 + $0x530] sm:$0xff] %vm479_vm0, %v1120_v16  ;;  %v2760_v8 = vld [vmem:[#allocation2 + $0x370] sm:$0x1] }
  0xeb   : > { %1644 = vst.msk [vmem:[#allocation2 + $0x399] sm:$0xff] %vm479_vm0, %v1611_v11  ;;  %v1429_v15 = vpop.f32.mrf.mxu1  ;;  %3109 = vrot.lane.b32.xlu1 %v2752_v14, %s9858_s19  ;;  %v1119_v25 = vsel %vm1055_vm8, %v929_v9, %v1087_v17  ;;  %vm1058_vm10 = vcmp.ge.f32.partialorder %v944_v18, 0.0  ;;  %v1090_v26 = vmul.f32 0.1, %v944_v18  ;;  %v939_v27 = vadd.f32 %v10690_v38, %v938_v19  ;;  %v10902_v17 = vpop.permute.xlu0 %2907 }
  0xec   : > { %v1610_v20 = vsel %vm1546_vm7, %v1420_v4, %v1578_v12  ;;  %vm1549_vm9 = vcmp.ge.f32.partialorder %v1435_v13, 0.0  ;;  %v1581_v21 = vmul.f32 0.1, %v1435_v13  ;;  %v1430_v22 = vadd.f32 %v10690_v38, %v1429_v15  ;;  %v9003_v28 = vpop.f32.mrf.mxu0  ;;  %1152 = vst.msk [vmem:[#allocation2 + $0x528] sm:$0xff] %vm479_vm0, %v1119_v25  ;;  %v2759_v19 = vld [vmem:[#allocation2 + $0x368] sm:$0xff] }
  0xed   : > { %1643 = vst.msk [vmem:[#allocation2 + $0x391] sm:$0xff] %vm479_vm0, %v1610_v20  ;;  %v9055_v23 = vpop.f32.mrf.mxu1  ;;  %3119 = vrot.lane.b32.xlu0 %v2757_v24, %s9858_s19  ;;  %v1122_v34 = vsel %vm1058_vm10, %v944_v18, %v1090_v26  ;;  %vm1057_vm12 = vcmp.ge.f32.partialorder %v939_v27, 0.0  ;;  %v1089_v35 = vmul.f32 0.1, %v939_v27  ;;  %v954_v36 = vadd.f32 %v9003_v28, %v10690_v38  ;;  %v10909_v28 = vpop.permute.xlu1 %2915 }
  0xee   : > { %v1613_v29 = vsel %vm1549_vm9, %v1435_v13, %v1581_v21  ;;  %vm1548_vm11 = vcmp.ge.f32.partialorder %v1430_v22, 0.0  ;;  %v1580_v30 = vmul.f32 0.1, %v1430_v22  ;;  %v1445_v31 = vadd.f32 %v9055_v23, %v10690_v38  ;;  %v948_v37 = vpop.f32.mrf.mxu0  ;;  %1155 = vst.msk [vmem:[#allocation2 + $0x548] sm:$0xff] %vm479_vm0, %v1122_v34 }
  0xef   : > { %1646 = vst.msk [vmem:[#allocation2 + $0x3b1] sm:$0xff] %vm479_vm0, %v1613_v29  ;;  %v1439_v33 = vpop.f32.mrf.mxu1  ;;  %3117 = vrot.lane.b32.xlu1 %v2756_v32, %s9858_s19  ;;  %v1121_v44 = vsel %vm1057_vm12, %v939_v27, %v1089_v35  ;;  %vm1060_vm14 = vcmp.ge.f32.partialorder %v954_v36, 0.0  ;;  %v1092_v45 = vmul.f32 0.1, %v954_v36  ;;  %v949_v46 = vadd.f32 %v10690_v38, %v948_v37  ;;  %v2810_v27 = vld [vmem:[#allocation2 + $0x500] sm:$0xff] }
  0xf0   : > { %v1612_v39 = vsel %vm1548_vm11, %v1430_v22, %v1580_v30  ;;  %vm1551_vm13 = vcmp.ge.f32.partialorder %v1445_v31, 0.0  ;;  %v1583_v40 = vmul.f32 0.1, %v1445_v31  ;;  %v1440_v41 = vadd.f32 %v10690_v38, %v1439_v33  ;;  %v9006_v47 = vpop.f32.mrf.mxu0  ;;  %1154 = vst.msk [vmem:[#allocation2 + $0x540] sm:$0xff] %vm479_vm0, %v1121_v44 }
  0xf1   : > { %1645 = vst.msk [vmem:[#allocation2 + $0x3a9] sm:$0xff] %vm479_vm0, %v1612_v39  ;;  %v9058_v42 = vpop.f32.mrf.mxu1  ;;  %3321 = vrot.lane.b32.xlu0 %v2807_v43, %s9857_s26  ;;  %v1124_v54 = vsel %vm1060_vm14, %v954_v36, %v1092_v45  ;;  %vm1059_vm1 = vcmp.ge.f32.partialorder %v949_v46, 0.0  ;;  %v1091_v55 = vmul.f32 0.1, %v949_v46  ;;  %v964_v56 = vadd.f32 %v9006_v47, %v10690_v38  ;;  %v2809_v39 = vld [vmem:[#allocation2 + $0x4f8] sm:$0xff]  ;;  %v2758_v47 = vld [vmem:[#allocation2 + $0x360] sm:$0xff] }
  0xf2   : > { %v1615_v48 = vsel %vm1551_vm13, %v1445_v31, %v1583_v40  ;;  %vm1550_vm15 = vcmp.ge.f32.partialorder %v1440_v41, 0.0  ;;  %v1582_v49 = vmul.f32 0.1, %v1440_v41  ;;  %v1455_v50 = vadd.f32 %v9058_v42, %v10690_v38  ;;  %v958_v57 = vpop.f32.mrf.mxu0  ;;  %1157 = vst.msk [vmem:[#allocation2 + $0x560] sm:$0xff] %vm479_vm0, %v1124_v54 }
  0xf3   : > { %1648 = vst.msk [vmem:[#allocation2 + $0x3c9] sm:$0xff] %vm479_vm0, %v1615_v48  ;;  %v1449_v53 = vpop.f32.mrf.mxu1  ;;  %3319 = vrot.lane.b32.xlu1 %v2806_v51, %s9857_s26  ;;  %v1123_v0 = vsel %vm1059_vm1, %v949_v46, %v1091_v55  ;;  %vm1062_vm4 = vcmp.ge.f32.partialorder %v964_v56, 0.0  ;;  %v1094_v1 = vmul.f32 0.1, %v964_v56  ;;  %v959_v2 = vadd.f32 %v10690_v38, %v958_v57  ;;  %v10921_v48 = vpop.permute.xlu0 %3317 }
  0xf4   : > { %v1614_v58 = vsel %vm1550_vm15, %v1440_v41, %v1582_v49  ;;  %vm1553_vm3 = vcmp.ge.f32.partialorder %v1455_v50, 0.0  ;;  %v1585_v59 = vmul.f32 0.1, %v1455_v50  ;;  %v1450_v60 = vadd.f32 %v10690_v38, %v1449_v53  ;;  %v9009_v4 = vpop.f32.mrf.mxu0  ;;  %1156 = vst.msk [vmem:[#allocation2 + $0x558] sm:$0xff] %vm479_vm0, %v1123_v0 }
  0xf5   : > { %1647 = vst.msk [vmem:[#allocation2 + $0x3c1] sm:$0xff] %vm479_vm0, %v1614_v58  ;;  %v9061_v62 = vpop.f32.mrf.mxu1  ;;  %3115 = vrot.lane.b32.xlu0 %v2755_v63, %s9858_s19  ;;  %v1126_v10 = vsel %vm1062_vm4, %v964_v56, %v1094_v1  ;;  %vm1061_vm6 = vcmp.ge.f32.partialorder %v959_v2, 0.0  ;;  %v1093_v11 = vmul.f32 0.1, %v959_v2  ;;  %v974_v12 = vadd.f32 %v9009_v4, %v10690_v38  ;;  %v10928_v58 = vpop.permute.xlu1 %3323 }
  0xf6   : > { %v1617_v5 = vsel %vm1553_vm3, %v1455_v50, %v1585_v59  ;;  %vm1552_vm5 = vcmp.ge.f32.partialorder %v1450_v60, 0.0  ;;  %v1584_v6 = vmul.f32 0.1, %v1450_v60  ;;  %v1465_v7 = vadd.f32 %v9061_v62, %v10690_v38  ;;  %v968_v13 = vpop.f32.mrf.mxu0  ;;  %1159 = vst.msk [vmem:[#allocation2 + $0x578] sm:$0xff] %vm479_vm0, %v1126_v10 }
  0xf7   : > { %1650 = vst.msk [vmem:[#allocation2 + $0x3e1] sm:$0xff] %vm479_vm0, %v1617_v5  ;;  %v1459_v9 = vpop.f32.mrf.mxu1  ;;  %3125 = vrot.lane.b32.xlu1 %v2760_v8, %s9858_s19  ;;  %v1125_v20 = vsel %vm1061_vm6, %v959_v2, %v1093_v11  ;;  %vm1064_vm8 = vcmp.ge.f32.partialorder %v974_v12, 0.0  ;;  %v1096_v21 = vmul.f32 0.1, %v974_v12  ;;  %v969_v22 = vadd.f32 %v10690_v38, %v968_v13 }
  0xf8   : > { %v1616_v14 = vsel %vm1552_vm5, %v1450_v60, %v1584_v6  ;;  %vm1555_vm7 = vcmp.ge.f32.partialorder %v1465_v7, 0.0  ;;  %v1587_v15 = vmul.f32 0.1, %v1465_v7  ;;  %v1460_v16 = vadd.f32 %v10690_v38, %v1459_v9  ;;  %v9012_v23 = vpop.f32.mrf.mxu0  ;;  %1158 = vst.msk [vmem:[#allocation2 + $0x570] sm:$0xff] %vm479_vm0, %v1125_v20  ;;  %v2763_v60 = vld [vmem:[#allocation2 + $0x388] sm:$0x1] }
  0xf9   : > { %1649 = vst.msk [vmem:[#allocation2 + $0x3d9] sm:$0xff] %vm479_vm0, %v1616_v14  ;;  %v9064_v18 = vpop.f32.mrf.mxu1  ;;  %3123 = vrot.lane.b32.xlu0 %v2759_v19, %s9858_s19  ;;  %v1128_v30 = vsel %vm1064_vm8, %v974_v12, %v1096_v21  ;;  %vm1063_vm10 = vcmp.ge.f32.partialorder %v969_v22, 0.0  ;;  %v1095_v31 = vmul.f32 0.1, %v969_v22  ;;  %v984_v32 = vadd.f32 %v9012_v23, %v10690_v38  ;;  %v2762_v6 = vld [vmem:[#allocation2 + $0x380] sm:$0xff] }
  0xfa   : > { %v1619_v24 = vsel %vm1555_vm7, %v1465_v7, %v1587_v15  ;;  %vm1554_vm9 = vcmp.ge.f32.partialorder %v1460_v16, 0.0  ;;  %v1586_v25 = vmul.f32 0.1, %v1460_v16  ;;  %v1475_v26 = vadd.f32 %v9064_v18, %v10690_v38  ;;  %v978_v33 = vpop.f32.mrf.mxu0  ;;  %1161 = vst.msk [vmem:[#allocation2 + $0x590] sm:$0xff] %vm479_vm0, %v1128_v30  ;;  %v10940_v15 = vpop.permute.xlu0 %2921  ;;  %v2813_v18 = vld [vmem:[#allocation2 + $0x518] sm:$0xff] }
  0xfb   : > { %1652 = vst.msk [vmem:[#allocation2 + $0x3f9] sm:$0xff] %vm479_vm0, %v1619_v24  ;;  %v1469_v29 = vpop.f32.mrf.mxu1  ;;  %3327 = vrot.lane.b32.xlu1 %v2810_v27, %s9857_s26  ;;  %v1127_v40 = vsel %vm1063_vm10, %v969_v22, %v1095_v31  ;;  %vm1066_vm12 = vcmp.ge.f32.partialorder %v984_v32, 0.0  ;;  %v1098_v41 = vmul.f32 0.1, %v984_v32  ;;  %v979_v42 = vadd.f32 %v10690_v38, %v978_v33  ;;  %v10947_v27 = vpop.permute.xlu1 %2927 }
  0xfc   : > { %v1618_v34 = vsel %vm1554_vm9, %v1460_v16, %v1586_v25  ;;  %vm1557_vm11 = vcmp.ge.f32.partialorder %v1475_v26, 0.0  ;;  %v1589_v35 = vmul.f32 0.1, %v1475_v26  ;;  %v1470_v36 = vadd.f32 %v10690_v38, %v1469_v29  ;;  %v9015_v43 = vpop.f32.mrf.mxu0  ;;  %1160 = vst.msk [vmem:[#allocation2 + $0x588] sm:$0xff] %vm479_vm0, %v1127_v40 }
  0xfd   : > { %1651 = vst.msk [vmem:[#allocation2 + $0x3f1] sm:$0xff] %vm479_vm0, %v1618_v34  ;;  %v9067_v37 = vpop.f32.mrf.mxu1  ;;  %3325 = vrot.lane.b32.xlu0 %v2809_v39, %s9857_s26  ;;  %v1130_v50 = vsel %vm1066_vm12, %v984_v32, %v1098_v41  ;;  %vm1065_vm14 = vcmp.ge.f32.partialorder %v979_v42, 0.0  ;;  %v1097_v51 = vmul.f32 0.1, %v979_v42  ;;  %v994_v53 = vadd.f32 %v9015_v43, %v10690_v38  ;;  %v2761_v39 = vld [vmem:[#allocation2 + $0x378] sm:$0xff] }
  0xfe   : > { %v1621_v44 = vsel %vm1557_vm11, %v1475_v26, %v1589_v35  ;;  %vm1556_vm13 = vcmp.ge.f32.partialorder %v1470_v36, 0.0  ;;  %v1588_v45 = vmul.f32 0.1, %v1470_v36  ;;  %v1485_v46 = vadd.f32 %v9067_v37, %v10690_v38  ;;  %v988_v54 = vpop.f32.mrf.mxu0  ;;  %1163 = vst.msk [vmem:[#allocation2 + $0x5a8] sm:$0xff] %vm479_vm0, %v1130_v50  ;;  %v2812_v26 = vld [vmem:[#allocation2 + $0x510] sm:$0xff] }
  0xff   : > { %1654 = vst.msk [vmem:[#allocation2 + $0x411] sm:$0xff] %vm479_vm0, %v1621_v44  ;;  %v1479_v49 = vpop.f32.mrf.mxu1  ;;  %3121 = vrot.lane.b32.xlu1 %v2758_v47, %s9858_s19  ;;  %v1129_v62 = vsel %vm1065_vm14, %v979_v42, %v1097_v51  ;;  %vm1068_vm1 = vcmp.ge.f32.partialorder %v994_v53, 0.0  ;;  %v1100_v63 = vmul.f32 0.1, %v994_v53  ;;  %v989_v0 = vadd.f32 %v10690_v38, %v988_v54  ;;  %v2766_v47 = vld [vmem:[#allocation2 + $0x3a0] sm:$0x1] }
 0x100   : > { %v1620_v55 = vsel %vm1556_vm13, %v1470_v36, %v1588_v45  ;;  %vm1559_vm15 = vcmp.ge.f32.partialorder %v1485_v46, 0.0  ;;  %v1591_v56 = vmul.f32 0.1, %v1485_v46  ;;  %v1480_v57 = vadd.f32 %v10690_v38, %v1479_v49  ;;  %v9018_v1 = vpop.f32.mrf.mxu0  ;;  %1162 = vst.msk [vmem:[#allocation2 + $0x5a0] sm:$0xff] %vm479_vm0, %v1129_v62  ;;  %v10959_v49 = vpop.permute.xlu0 %3329 }
 0x101   : > { %1653 = vst.msk [vmem:[#allocation2 + $0x409] sm:$0xff] %vm479_vm0, %v1620_v55  ;;  %v9070_v59 = vpop.f32.mrf.mxu1  ;;  %3131 = vrot.lane.b32.xlu0 %v2763_v60, %s9858_s19  ;;  %v1132_v8 = vsel %vm1068_vm1, %v994_v53, %v1100_v63  ;;  %vm1067_vm4 = vcmp.ge.f32.partialorder %v989_v0, 0.0  ;;  %v1099_v9 = vmul.f32 0.1, %v989_v0  ;;  %v1004_v10 = vadd.f32 %v9018_v1, %v10690_v38  ;;  %v10966_v60 = vpop.permute.xlu1 %3335  ;;  %v2765_v63 = vld [vmem:[#allocation2 + $0x398] sm:$0xff] }
 0x102   : > { %v1623_v2 = vsel %vm1559_vm15, %v1485_v46, %v1591_v56  ;;  %vm1558_vm3 = vcmp.ge.f32.partialorder %v1480_v57, 0.0  ;;  %v1590_v4 = vmul.f32 0.1, %v1480_v57  ;;  %v1495_v5 = vadd.f32 %v9070_v59, %v10690_v38  ;;  %v998_v11 = vpop.f32.mrf.mxu0  ;;  %1165 = vst.msk [vmem:[#allocation2 + $0x5c0] sm:$0xff] %vm479_vm0, %v1132_v8 }
 0x103   : > { %1656 = vst.msk [vmem:[#allocation2 + $0x429] sm:$0xff] %vm479_vm0, %v1623_v2  ;;  %v1489_v7 = vpop.f32.mrf.mxu1  ;;  %3129 = vrot.lane.b32.xlu1 %v2762_v6, %s9858_s19  ;;  %v1131_v19 = vsel %vm1067_vm4, %v989_v0, %v1099_v9  ;;  %vm1070_vm6 = vcmp.ge.f32.partialorder %v1004_v10, 0.0  ;;  %v1102_v20 = vmul.f32 0.1, %v1004_v10  ;;  %v999_v21 = vadd.f32 %v10690_v38, %v998_v11 }
 0x104   : > { %v1622_v12 = vsel %vm1558_vm3, %v1480_v57, %v1590_v4  ;;  %vm1561_vm5 = vcmp.ge.f32.partialorder %v1495_v5, 0.0  ;;  %v1593_v13 = vmul.f32 0.1, %v1495_v5  ;;  %v1490_v14 = vadd.f32 %v10690_v38, %v1489_v7  ;;  %v9021_v22 = vpop.f32.mrf.mxu0  ;;  %1164 = vst.msk [vmem:[#allocation2 + $0x5b8] sm:$0xff] %vm479_vm0, %v1131_v19  ;;  %v2816_v7 = vld [vmem:[#allocation2 + $0x530] sm:$0xff] }
 0x105   : > { %1655 = vst.msk [vmem:[#allocation2 + $0x421] sm:$0xff] %vm479_vm0, %v1622_v12  ;;  %v9073_v16 = vpop.f32.mrf.mxu1  ;;  %3333 = vrot.lane.b32.xlu0 %v2813_v18, %s9857_s26  ;;  %v1134_v30 = vsel %vm1070_vm6, %v1004_v10, %v1102_v20  ;;  %vm1069_vm8 = vcmp.ge.f32.partialorder %v999_v21, 0.0  ;;  %v1101_v31 = vmul.f32 0.1, %v999_v21  ;;  %v1014_v32 = vadd.f32 %v9021_v22, %v10690_v38  ;;  %v10978_v18 = vpop.permute.xlu0 %2933  ;;  %v2815_v20 = vld [vmem:[#allocation2 + $0x528] sm:$0xff] }
 0x106   : > { %v1625_v23 = vsel %vm1561_vm5, %v1495_v5, %v1593_v13  ;;  %vm1560_vm7 = vcmp.ge.f32.partialorder %v1490_v14, 0.0  ;;  %v1592_v24 = vmul.f32 0.1, %v1490_v14  ;;  %v1505_v25 = vadd.f32 %v9073_v16, %v10690_v38  ;;  %v1008_v33 = vpop.f32.mrf.mxu0  ;;  %1167 = vst.msk [vmem:[#allocation2 + $0x5d8] sm:$0xff] %vm479_vm0, %v1134_v30  ;;  %v10985_v30 = vpop.permute.xlu1 %2939 }
 0x107   : > { %1658 = vst.msk [vmem:[#allocation2 + $0x441] sm:$0xff] %vm479_vm0, %v1625_v23  ;;  %v1499_v29 = vpop.f32.mrf.mxu1  ;;  %3331 = vrot.lane.b32.xlu1 %v2812_v26, %s9857_s26  ;;  %v1133_v40 = vsel %vm1069_vm8, %v999_v21, %v1101_v31  ;;  %vm1072_vm10 = vcmp.ge.f32.partialorder %v1014_v32, 0.0  ;;  %v1104_v41 = vmul.f32 0.1, %v1014_v32  ;;  %v1009_v42 = vadd.f32 %v10690_v38, %v1008_v33 }
 0x108   : > { %v1624_v34 = vsel %vm1560_vm7, %v1490_v14, %v1592_v24  ;;  %vm1563_vm9 = vcmp.ge.f32.partialorder %v1505_v25, 0.0  ;;  %v1595_v35 = vmul.f32 0.1, %v1505_v25  ;;  %v1500_v36 = vadd.f32 %v10690_v38, %v1499_v29  ;;  %v9024_v43 = vpop.f32.mrf.mxu0  ;;  %1166 = vst.msk [vmem:[#allocation2 + $0x5d0] sm:$0xff] %vm479_vm0, %v1133_v40  ;;  %v2764_v29 = vld [vmem:[#allocation2 + $0x390] sm:$0xff] }
 0x109   : > { %1657 = vst.msk [vmem:[#allocation2 + $0x439] sm:$0xff] %vm479_vm0, %v1624_v34  ;;  %v9076_v37 = vpop.f32.mrf.mxu1  ;;  %3127 = vrot.lane.b32.xlu0 %v2761_v39, %s9858_s19  ;;  %v1136_v51 = vsel %vm1072_vm10, %v1014_v32, %v1104_v41  ;;  %vm1071_vm12 = vcmp.ge.f32.partialorder %v1009_v42, 0.0  ;;  %v1103_v53 = vmul.f32 0.1, %v1009_v42  ;;  %v1024_v54 = vadd.f32 %v9024_v43, %v10690_v38  ;;  %v10999_v40 = vld [vmem:[%s13982_s2] ss:$0 sm:$0xff] }
 0x10a   : > { %v1627_v44 = vsel %vm1563_vm9, %v1505_v25, %v1595_v35  ;;  %vm1562_vm11 = vcmp.ge.f32.partialorder %v1500_v36, 0.0  ;;  %v1594_v45 = vmul.f32 0.1, %v1500_v36  ;;  %v1515_v46 = vadd.f32 %v9076_v37, %v10690_v38  ;;  %v1018_v55 = vpop.f32.mrf.mxu0  ;;  %1169 = vst.msk [vmem:[#allocation2 + $0x5f0] sm:$0xff] %vm479_vm0, %v1136_v51 }
 0x10b   : > { %1660 = vst.msk [vmem:[#allocation2 + $0x459] sm:$0xff] %vm479_vm0, %v1627_v44  ;;  %v1509_v50 = vpop.f32.mrf.mxu1  ;;  %3137 = vrot.lane.b32.xlu1 %v2766_v47, %s9858_s19  ;;  %v1135_v0 = vsel %vm1071_vm12, %v1009_v42, %v1103_v53  ;;  %vm1074_vm14 = vcmp.ge.f32.partialorder %v1024_v54, 0.0  ;;  %v1106_v1 = vmul.f32 0.1, %v1024_v54  ;;  %v1019_v10 = vadd.f32 %v10690_v38, %v1018_v55  ;;  %v2769_v42 = vld [vmem:[#allocation2 + $0x3b8] sm:$0x1]  ;;  %v11007_v55 = vpop.permute.xlu0 %3341 }
 0x10c   : > { %v1626_v56 = vsel %vm1562_vm11, %v1500_v36, %v1594_v45  ;;  %vm1565_vm13 = vcmp.ge.f32.partialorder %v1515_v46, 0.0  ;;  %v1597_v57 = vmul.f32 0.1, %v1515_v46  ;;  %v1510_v59 = vadd.f32 %v10690_v38, %v1509_v50  ;;  %v9027_v2 = vpop.f32.mrf.mxu0  ;;  %1168 = vst.msk [vmem:[#allocation2 + $0x5e8] sm:$0xff] %vm479_vm0, %v1135_v0 }
 0x10d   : > { %1659 = vst.msk [vmem:[#allocation2 + $0x451] sm:$0xff] %vm479_vm0, %v1626_v56  ;;  %v9079_v62 = vpop.f32.mrf.mxu1  ;;  %3135 = vrot.lane.b32.xlu0 %v2765_v63, %s9858_s19  ;;  %v1138_v9 = vsel %vm1074_vm14, %v1024_v54, %v1106_v1  ;;  %v1034_v11 = vadd.f32 %v9027_v2, %v10690_v38  ;;  %vm1073_vm3 = vcmp.ge.f32.partialorder %v1019_v10, 0.0  ;;  %v1105_v21 = vmul.f32 0.1, %v1019_v10  ;;  %v2768_v54 = vld [vmem:[#allocation2 + $0x3b0] sm:$0xff]  ;;  %v11016_v2 = vpop.permute.xlu1 %3347 }
 0x10e   : > { %v1629_v4 = vsel %vm1565_vm13, %v1515_v46, %v1597_v57  ;;  %vm1564_vm15 = vcmp.ge.f32.partialorder %v1510_v59, 0.0  ;;  %v1596_v5 = vmul.f32 0.1, %v1510_v59  ;;  %v1525_v6 = vadd.f32 %v9079_v62, %v10690_v38  ;;  %v1028_v12 = vpop.f32.mrf.mxu0  ;;  %1171 = vst.msk [vmem:[#allocation2 + $0x608] sm:$0xff] %vm479_vm0, %v1138_v9 }
 0x10f   : > { %1662 = vst.msk [vmem:[#allocation2 + $0x471] sm:$0xff] %vm479_vm0, %v1629_v4  ;;  %v1519_v8 = vpop.f32.mrf.mxu1  ;;  %3339 = vrot.lane.b32.xlu1 %v2816_v7, %s9857_s26  ;;  %vm1076_vm4 = vcmp.ge.f32.partialorder %v1034_v11, 0.0  ;;  %v1029_v22 = vadd.f32 %v10690_v38, %v1028_v12  ;;  %v1137_v32 = vsel %vm1073_vm3, %v1019_v10, %v1105_v21  ;;  %v1108_v33 = vmul.f32 0.1, %v1034_v11 }
 0x110   : > { %v1628_v13 = vsel %vm1564_vm15, %v1510_v59, %v1596_v5  ;;  %vm1567_vm1 = vcmp.ge.f32.partialorder %v1525_v6, 0.0  ;;  %v1599_v14 = vmul.f32 0.1, %v1525_v6  ;;  %v1520_v16 = vadd.f32 %v10690_v38, %v1519_v8  ;;  %v9030_v23 = vpop.f32.mrf.mxu0  ;;  %1170 = vst.msk [vmem:[#allocation2 + $0x600] sm:$0xff] %vm479_vm0, %v1137_v32  ;;  %v2819_v5 = vld [vmem:[#allocation2 + $0x548] sm:$0xff] }
 0x111   : > { %1661 = vst.msk [vmem:[#allocation2 + $0x469] sm:$0xff] %vm479_vm0, %v1628_v13  ;;  %v9082_v19 = vpop.f32.mrf.mxu1  ;;  %3337 = vrot.lane.b32.xlu0 %v2815_v20, %s9857_s26  ;;  %vm1075_vm6 = vcmp.ge.f32.partialorder %v1029_v22, 0.0  ;;  %v1107_v34 = vmul.f32 0.1, %v1029_v22  ;;  %v1140_v43 = vsel %vm1076_vm4, %v1034_v11, %v1108_v33  ;;  %v2818_v13 = vld [vmem:[#allocation2 + $0x540] sm:$0xff] }
 0x112   : > { %v1631_v24 = vsel %vm1567_vm1, %v1525_v6, %v1599_v14  ;;  %vm1566_vm5 = vcmp.ge.f32.partialorder %v1520_v16, 0.0  ;;  %v1598_v25 = vmul.f32 0.1, %v1520_v16  ;;  %v1535_v26 = vadd.f32 %v9082_v19, %v10690_v38  ;;  %v1038_v35 = vpop.f32.mrf.mxu0  ;;  %v10992_v38 = vld [vmem:[%s13982_s2] ss:$0 sm:$0xff]  ;;  %1173 = vst.msk [vmem:[#allocation2 + $0x620] sm:$0xff] %vm479_vm0, %v1140_v43 }
 0x113   : > { %1664 = vst.msk [vmem:[#allocation2 + $0x489] sm:$0xff] %vm479_vm0, %v1631_v24  ;;  %v1529_v31 = vpop.f32.mrf.mxu1  ;;  %3133 = vrot.lane.b32.xlu1 %v2764_v29, %s9858_s19  ;;  %v1139_v44 = vsel %vm1075_vm6, %v1029_v22, %v1107_v34  ;;  %v1044_v45 = vadd.f32 %v10992_v38, %v9030_v23  ;;  %v1039_v46 = vadd.f32 %v10992_v38, %v1038_v35  ;;  %v11028_v29 = vpop.permute.xlu0 %2945 }
 0x114   : > { %v1630_v36 = vsel %vm1566_vm5, %v1520_v16, %v1598_v25  ;;  %vm1569_vm7 = vcmp.ge.f32.partialorder %v1535_v26, 0.0  ;;  %v1601_v37 = vmul.f32 0.1, %v1535_v26  ;;  %v1530_v39 = vadd.f32 %v10992_v38, %v1529_v31  ;;  %v9089_v47 = vpop.f32.mrf.mxu0  ;;  %1172 = vst.msk [vmem:[#allocation2 + $0x618] sm:$0xff] %vm479_vm0, %v1139_v44 }
 0x115   : > { %1663 = vst.msk [vmem:[#allocation2 + $0x481] sm:$0xff] %vm479_vm0, %v1630_v36  ;;  %v9141_v41 = vpop.f32.mrf.mxu1  ;;  %3143 = vrot.lane.b32.xlu0 %v2769_v42, %s9858_s19  ;;  %vm1078_vm9 = vcmp.ge.f32.partialorder %v1044_v45, 0.0  ;;  %v1110_v57 = vmul.f32 0.1, %v1044_v45  ;;  %vm1077_vm10 = vcmp.ge.f32.partialorder %v1039_v46, 0.0  ;;  %v1876_v59 = vadd.f32 %v9089_v47, %v10999_v40 }
 0x116   : > { %v1633_v50 = vsel %vm1569_vm7, %v1535_v26, %v1601_v37  ;;  %vm1568_vm8 = vcmp.ge.f32.partialorder %v1530_v39, 0.0  ;;  %v1600_v51 = vmul.f32 0.1, %v1530_v39  ;;  %v2367_v53 = vadd.f32 %v10992_v38, %v9141_v41  ;;  %v1870_v62 = vpop.f32.mrf.mxu0  ;;  %v2767_v26 = vld [vmem:[#allocation2 + $0x3a8] sm:$0xff]  ;;  %v11035_v41 = vpop.permute.xlu1 %2951 }
 0x117   : > { %1666 = vst.msk [vmem:[#allocation2 + $0x4a1] sm:$0xff] %vm479_vm0, %v1633_v50  ;;  %v2361_v56 = vpop.f32.mrf.mxu1  ;;  %3141 = vrot.lane.b32.xlu1 %v2768_v54, %s9858_s19  ;;  %v1142_v6 = vsel %vm1078_vm9, %v1044_v45, %v1110_v57  ;;  %v1109_v7 = vmul.f32 0.1, %v1039_v46  ;;  %vm2030_vm12 = vcmp.ge.f32.partialorder %v1876_v59, 0.0  ;;  %v2062_v8 = vmul.f32 0.1, %v1876_v59 }
 0x118   : > { %v1632_v63 = vsel %vm1568_vm8, %v1530_v39, %v1600_v51  ;;  %vm2521_vm11 = vcmp.ge.f32.partialorder %v2367_v53, 0.0  ;;  %v2553_v0 = vmul.f32 0.1, %v2367_v53  ;;  %v2362_v1 = vadd.f32 %v10992_v38, %v2361_v56  ;;  %v9092_v9 = vpop.f32.mrf.mxu0  ;;  %1175 = vst.msk [vmem:[#allocation2 + $0x638] sm:$0xff] %vm479_vm0, %v1142_v6  ;;  %v2772_v39 = vld [vmem:[#allocation2 + $0x3d0] sm:$0x1] }
 0x119   : > { %1665 = vst.msk [vmem:[#allocation2 + $0x499] sm:$0xff] %vm479_vm0, %v1632_v63  ;;  %v9144_v4 = vpop.f32.mrf.mxu1  ;;  %3345 = vrot.lane.b32.xlu0 %v2819_v5, %s9857_s26  ;;  %v1141_v16 = vsel %vm1077_vm10, %v1039_v46, %v1109_v7  ;;  %v2094_v19 = vsel %vm2030_vm12, %v1876_v59, %v2062_v8  ;;  %v1871_v20 = vadd.f32 %v10999_v40, %v1870_v62  ;;  %v2771_v54 = vld [vmem:[#allocation2 + $0x3c8] sm:$0xff]  ;;  %v11047_v5 = vpop.permute.xlu0 %3353 }
 0x11a   : > { %v2585_v10 = vsel %vm2521_vm11, %v2367_v53, %v2553_v0  ;;  %vm2520_vm13 = vcmp.ge.f32.partialorder %v2362_v1, 0.0  ;;  %v2552_v11 = vmul.f32 0.1, %v2362_v1  ;;  %v2377_v12 = vadd.f32 %v10992_v38, %v9144_v4  ;;  %v1880_v22 = vpop.f32.mrf.mxu0  ;;  %1174 = vst.msk [vmem:[#allocation2 + $0x630] sm:$0xff] %vm479_vm0, %v1141_v16  ;;  %2127 = vst.msk [vmem:[#allocation2 + $0x1b8] sm:$0xff] %vm479_vm0, %v2094_v19  ;;  %v2822_v4 = vld [vmem:[#allocation2 + $0x560] sm:$0xff] }
 0x11b   : > { %2618 = vst.msk [vmem:[#allocation2 + $0x21] sm:$0xff] %vm479_vm0, %v2585_v10  ;;  %v2371_v14 = vpop.f32.mrf.mxu1  ;;  %3343 = vrot.lane.b32.xlu1 %v2818_v13, %s9857_s26  ;;  %v1886_v21 = vadd.f32 %v9092_v9, %v10999_v40  ;;  %vm2029_vm15 = vcmp.ge.f32.partialorder %v1871_v20, 0.0  ;;  %v2061_v32 = vmul.f32 0.1, %v1871_v20  ;;  %v1881_v45 = vadd.f32 %v10999_v40, %v1880_v22  ;;  %v2821_v19 = vld [vmem:[#allocation2 + $0x558] sm:$0xff] }
 0x11c   : > { %v2584_v23 = vsel %vm2520_vm13, %v2362_v1, %v2552_v11  ;;  %vm2523_vm14 = vcmp.ge.f32.partialorder %v2377_v12, 0.0  ;;  %v2555_v24 = vmul.f32 0.1, %v2377_v12  ;;  %v2372_v25 = vadd.f32 %v10992_v38, %v2371_v14  ;;  %v9095_v34 = vpop.f32.mrf.mxu0  ;;  %v11053_v14 = vpop.permute.xlu1 %3359 }
 0x11d   : > { %2617 = vst.msk [vmem:[#allocation2 + $0x19] sm:$0xff] %vm479_vm0, %v2584_v23  ;;  %v9147_v31 = vpop.f32.mrf.mxu1  ;;  %vm2032_vm1 = vcmp.ge.f32.partialorder %v1886_v21, 0.0  ;;  %v2064_v33 = vmul.f32 0.1, %v1886_v21  ;;  %3139 = vrot.lane.b32.xlu0 %v2767_v26, %s9858_s19  ;;  %v2093_v43 = vsel %vm2029_vm15, %v1871_v20, %v2061_v32  ;;  %v1896_v46 = vadd.f32 %v9095_v34, %v10999_v40 }
 0x11e   : > { %v2587_v35 = vsel %vm2523_vm14, %v2377_v12, %v2555_v24  ;;  %vm2522_vm3 = vcmp.ge.f32.partialorder %v2372_v25, 0.0  ;;  %v2554_v36 = vmul.f32 0.1, %v2372_v25  ;;  %v2387_v37 = vadd.f32 %v10992_v38, %v9147_v31  ;;  %v1890_v47 = vpop.f32.mrf.mxu0  ;;  %2126 = vst.msk [vmem:[#allocation2 + $0x1b0] sm:$0xff] %vm479_vm0, %v2093_v43  ;;  %v2770_v31 = vld [vmem:[#allocation2 + $0x3c0] sm:$0xff] }
 0x11f   : > { %2620 = vst.msk [vmem:[#allocation2 + $0x39] sm:$0xff] %vm479_vm0, %v2587_v35  ;;  %v2381_v42 = vpop.f32.mrf.mxu1  ;;  %3149 = vrot.lane.b32.xlu1 %v2772_v39, %s9858_s19  ;;  %v2096_v44 = vsel %vm2032_vm1, %v1886_v21, %v2064_v33  ;;  %vm2031_vm5 = vcmp.ge.f32.partialorder %v1881_v45, 0.0  ;;  %v2063_v57 = vmul.f32 0.1, %v1881_v45  ;;  %vm2034_vm6 = vcmp.ge.f32.partialorder %v1896_v46, 0.0 }
 0x120   : > { %v2586_v50 = vsel %vm2522_vm3, %v2372_v25, %v2554_v36  ;;  %vm2525_vm4 = vcmp.ge.f32.partialorder %v2387_v37, 0.0  ;;  %v2557_v51 = vmul.f32 0.1, %v2387_v37  ;;  %v2382_v53 = vadd.f32 %v10992_v38, %v2381_v42  ;;  %2129 = vst.msk [vmem:[#allocation2 + $0x1d0] sm:$0xff] %vm479_vm0, %v2096_v44  ;;  %v9098_v62 = vpop.f32.mrf.mxu0  ;;  %v11065_v42 = vpop.permute.xlu0 %2957  ;;  %v2775_v44 = vld [vmem:[#allocation2 + $0x3e8] sm:$0x1] }
 0x121   : > { %2619 = vst.msk [vmem:[#allocation2 + $0x31] sm:$0xff] %vm479_vm0, %v2586_v50  ;;  %v9150_v56 = vpop.f32.mrf.mxu1  ;;  %v2066_v59 = vmul.f32 0.1, %v1896_v46  ;;  %3147 = vrot.lane.b32.xlu0 %v2771_v54, %s9858_s19  ;;  %v2095_v7 = vsel %vm2031_vm5, %v1881_v45, %v2063_v57  ;;  %v1891_v9 = vadd.f32 %v10999_v40, %v1890_v47  ;;  %v1906_v21 = vadd.f32 %v9098_v62, %v10999_v40  ;;  %v11072_v57 = vpop.permute.xlu1 %2963 }
 0x122   : > { %v2589_v63 = vsel %vm2525_vm4, %v2387_v37, %v2557_v51  ;;  %vm2524_vm7 = vcmp.ge.f32.partialorder %v2382_v53, 0.0  ;;  %v2556_v0 = vmul.f32 0.1, %v2382_v53  ;;  %v2397_v1 = vadd.f32 %v10992_v38, %v9150_v56  ;;  %v1900_v10 = vpop.f32.mrf.mxu0  ;;  %2128 = vst.msk [vmem:[#allocation2 + $0x1c8] sm:$0xff] %vm479_vm0, %v2095_v7  ;;  %v2774_v56 = vld [vmem:[#allocation2 + $0x3e0] sm:$0xff]  ;;  %14005 = vst [vmem:[#allocation6_spill] sm:$0xff] %v11072_v57 }
 0x123   : > { %2622 = vst.msk [vmem:[#allocation2 + $0x51] sm:$0xff] %vm479_vm0, %v2589_v63  ;;  %v2391_v6 = vpop.f32.mrf.mxu1  ;;  %3351 = vrot.lane.b32.xlu1 %v2822_v4, %s9857_s26  ;;  %v2098_v8 = vsel %vm2034_vm6, %v1896_v46, %v2066_v59  ;;  %vm2033_vm9 = vcmp.ge.f32.partialorder %v1891_v9, 0.0  ;;  %v2065_v20 = vmul.f32 0.1, %v1891_v9  ;;  %v1901_v22 = vadd.f32 %v10999_v40, %v1900_v10 }
 0x124   : > { %v2588_v11 = vsel %vm2524_vm7, %v2382_v53, %v2556_v0  ;;  %vm2527_vm8 = vcmp.ge.f32.partialorder %v2397_v1, 0.0  ;;  %v2559_v12 = vmul.f32 0.1, %v2397_v1  ;;  %v2392_v13 = vadd.f32 %v10992_v38, %v2391_v6  ;;  %2131 = vst.msk [vmem:[#allocation2 + $0x1e8] sm:$0xff] %vm479_vm0, %v2098_v8  ;;  %v2825_v8 = vld [vmem:[#allocation2 + $0x578] sm:$0xff] }
 0x125   : > { %2621 = vst.msk [vmem:[#allocation2 + $0x49] sm:$0xff] %vm479_vm0, %v2588_v11  ;;  %3349 = vrot.lane.b32.xlu0 %v2821_v19, %s9857_s26  ;;  %v2097_v33 = vsel %vm2033_vm9, %v1891_v9, %v2065_v20  ;;  %vm2036_vm11 = vcmp.ge.f32.partialorder %v1906_v21, 0.0  ;;  %v2068_v34 = vmul.f32 0.1, %v1906_v21  ;;  %vm2035_vm13 = vcmp.ge.f32.partialorder %v1901_v22, 0.0 }
 0x126   : > { %v2591_v24 = vsel %vm2527_vm8, %v2397_v1, %v2559_v12  ;;  %vm2526_vm10 = vcmp.ge.f32.partialorder %v2392_v13, 0.0  ;;  %v2558_v25 = vmul.f32 0.1, %v2392_v13  ;;  %2130 = vst.msk [vmem:[#allocation2 + $0x1e0] sm:$0xff] %vm479_vm0, %v2097_v33  ;;  %v2067_v46 = vmul.f32 0.1, %v1901_v22  ;;  %v11091_v33 = vpop.permute.xlu1 %3371 }
 0x127   : > { %2624 = vst.msk [vmem:[#allocation2 + $0x69] sm:$0xff] %vm479_vm0, %v2591_v24  ;;  %3145 = vrot.lane.b32.xlu1 %v2770_v31, %s9858_s19  ;;  %v2100_v45 = vsel %vm2036_vm11, %v1906_v21, %v2068_v34  ;;  %v2824_v21 = vld [vmem:[#allocation2 + $0x570] sm:$0xff]  ;;  %14007 = vst [vmem:[#allocation8_spill] sm:$0xff] %v11091_v33 }
 0x128   : > { %v2590_v36 = vsel %vm2526_vm10, %v2392_v13, %v2558_v25  ;;  %2133 = vst.msk [vmem:[#allocation2 + $0x200] sm:$0xff] %vm479_vm0, %v2100_v45  ;;  %v2099_v62 = vsel %vm2035_vm13, %v1901_v22, %v2067_v46  ;;  %v11085_v22 = vpop.permute.xlu0 %3365 }
 0x129   : > { %2623 = vst.msk [vmem:[#allocation2 + $0x61] sm:$0xff] %vm479_vm0, %v2590_v36  ;;  %3155 = vrot.lane.b32.xlu0 %v2775_v44, %s9858_s19  ;;  %2132 = vst.msk [vmem:[#allocation2 + $0x1f8] sm:$0xff] %vm479_vm0, %v2099_v62 }
 0x12a   : > { %14006 = vst [vmem:[#allocation7_spill] sm:$0xff] %v11085_v22  ;;  %v2652_v22 = vld [vmem:[#allocation2 + $0x18] sm:$0xff] }
 0x12b   : > { %3153 = vrot.lane.b32.xlu1 %v2774_v56, %s9858_s19  ;;  %v2660_v57 = vld [vmem:[#allocation2 + $0x58] sm:$0x1] }
 0x12d   : > { %3357 = vrot.lane.b32.xlu0 %v2825_v8, %s9857_s26 }
 0x12f   : > { %v9153_v16 = vpop.f32.mrf.mxu1  ;;  %3355 = vrot.lane.b32.xlu1 %v2824_v21, %s9857_s26 }
 0x130   : > { %v2407_v26 = vadd.f32 %v10992_v38, %v9153_v16 }
 0x131   : > { %v2401_v32 = vpop.f32.mrf.mxu1 }
 0x132   : > { %vm2529_vm12 = vcmp.ge.f32.partialorder %v2407_v26, 0.0  ;;  %v2561_v37 = vmul.f32 0.1, %v2407_v26  ;;  %v2402_v39 = vadd.f32 %v10992_v38, %v2401_v32 }
 0x134   : > { %v2593_v51 = vsel %vm2529_vm12, %v2407_v26, %v2561_v37  ;;  %vm2528_vm14 = vcmp.ge.f32.partialorder %v2402_v39, 0.0  ;;  %v2560_v53 = vmul.f32 0.1, %v2402_v39 }
 0x135   : > { %2626 = vst.msk [vmem:[#allocation2 + $0x81] sm:$0xff] %vm479_vm0, %v2593_v51 }
 0x136   : > { %v2592_v1 = vsel %vm2528_vm14, %v2402_v39, %v2560_v53 }
 0x137   : > { %v9101_v23 = vpop.f32.mrf.mxu0  ;;  %2625 = vst.msk [vmem:[#allocation2 + $0x79] sm:$0xff] %vm479_vm0, %v2592_v1 }
 0x138   : > { %v1916_v47 = vadd.f32 %v9101_v23, %v10999_v40 }
 0x139   : > { %v1910_v35 = vpop.f32.mrf.mxu0 }
 0x13a   : > { %v9156_v43 = vpop.f32.mrf.mxu1  ;;  %vm2038_vm15 = vcmp.ge.f32.partialorder %v1916_v47, 0.0  ;;  %v2070_v63 = vmul.f32 0.1, %v1916_v47  ;;  %v1911_v10 = vadd.f32 %v10999_v40, %v1910_v35  ;;  %v2773_v35 = vld [vmem:[#allocation2 + $0x3d8] sm:$0xff] }
 0x13b   : > { %v9104_v50 = vpop.f32.mrf.mxu0  ;;  %v2417_v54 = vadd.f32 %v10992_v38, %v9156_v43  ;;  %3151 = vrot.lane.b32.xlu0 %v2773_v35, %s9858_s19 }
 0x13c   : > { %v2411_v59 = vpop.f32.mrf.mxu1  ;;  %v2102_v9 = vsel %vm2038_vm15, %v1916_v47, %v2070_v63  ;;  %v1926_v11 = vadd.f32 %v9104_v50, %v10999_v40  ;;  %vm2037_vm4 = vcmp.ge.f32.partialorder %v1911_v10, 0.0  ;;  %v2069_v24 = vmul.f32 0.1, %v1911_v10  ;;  %v2778_v47 = vld [vmem:[#allocation2 + $0x400] sm:$0x1] }
 0x13d   : > { %v1920_v0 = vpop.f32.mrf.mxu0  ;;  %vm2531_vm1 = vcmp.ge.f32.partialorder %v2417_v54, 0.0  ;;  %v2563_v4 = vmul.f32 0.1, %v2417_v54  ;;  %v2412_v6 = vadd.f32 %v10992_v38, %v2411_v59  ;;  %2135 = vst.msk [vmem:[#allocation2 + $0x218] sm:$0xff] %vm479_vm0, %v2102_v9  ;;  %3161 = vrot.lane.b32.xlu1 %v2778_v47, %s9858_s19 }
 0x13e   : > { %v9159_v7 = vpop.f32.mrf.mxu1  ;;  %v1921_v12 = vadd.f32 %v10999_v40, %v1920_v0  ;;  %vm2040_vm5 = vcmp.ge.f32.partialorder %v1926_v11, 0.0  ;;  %v2101_v36 = vsel %vm2037_vm4, %v1911_v10, %v2069_v24  ;;  %v2072_v37 = vmul.f32 0.1, %v1926_v11  ;;  %v11102_v0 = vpop.permute.xlu0 %2969 }
 0x13f   : > { %v9107_v13 = vpop.f32.mrf.mxu0  ;;  %v2595_v16 = vsel %vm2531_vm1, %v2417_v54, %v2563_v4  ;;  %vm2530_vm3 = vcmp.ge.f32.partialorder %v2412_v6, 0.0  ;;  %v2562_v19 = vmul.f32 0.1, %v2412_v6  ;;  %v2427_v20 = vadd.f32 %v10992_v38, %v9159_v7  ;;  %2134 = vst.msk [vmem:[#allocation2 + $0x210] sm:$0xff] %vm479_vm0, %v2101_v36  ;;  %14008 = vst [vmem:[#allocation9_spill] sm:$0xff] %v11102_v0  ;;  %v2777_v4 = vld [vmem:[#allocation2 + $0x3f8] sm:$0xff] }
 0x140   : > { %2628 = vst.msk [vmem:[#allocation2 + $0x99] sm:$0xff] %vm479_vm0, %v2595_v16  ;;  %v2421_v23 = vpop.f32.mrf.mxu1  ;;  %vm2039_vm7 = vcmp.ge.f32.partialorder %v1921_v12, 0.0  ;;  %v2071_v39 = vmul.f32 0.1, %v1921_v12  ;;  %v2104_v51 = vsel %vm2040_vm5, %v1926_v11, %v2072_v37  ;;  %v1936_v54 = vadd.f32 %v9107_v13, %v10999_v40  ;;  %3159 = vrot.lane.b32.xlu0 %v2777_v4, %s9858_s19  ;;  %v2828_v13 = vld [vmem:[#allocation2 + $0x590] sm:$0xff]  ;;  %v11111_v16 = vpop.permute.xlu1 %2975 }
 0x141   : > { %v1930_v25 = vpop.f32.mrf.mxu0  ;;  %v2594_v26 = vsel %vm2530_vm3, %v2412_v6, %v2562_v19  ;;  %vm2533_vm6 = vcmp.ge.f32.partialorder %v2427_v20, 0.0  ;;  %v2565_v31 = vmul.f32 0.1, %v2427_v20  ;;  %v2422_v32 = vadd.f32 %v10992_v38, %v2421_v23  ;;  %2137 = vst.msk [vmem:[#allocation2 + $0x230] sm:$0xff] %vm479_vm0, %v2104_v51  ;;  %14009 = vst [vmem:[#allocation10_spill] sm:$0xff] %v11111_v16  ;;  %3363 = vrot.lane.b32.xlu1 %v2828_v13, %s9857_s26 }
 0x142   : > { %2627 = vst.msk [vmem:[#allocation2 + $0x91] sm:$0xff] %vm479_vm0, %v2594_v26  ;;  %v9162_v34 = vpop.f32.mrf.mxu1  ;;  %v2103_v53 = vsel %vm2039_vm7, %v1921_v12, %v2071_v39  ;;  %vm2042_vm10 = vcmp.ge.f32.partialorder %v1936_v54, 0.0  ;;  %v2074_v6 = vmul.f32 0.1, %v1936_v54  ;;  %v1931_v7 = vadd.f32 %v10999_v40, %v1930_v25 }
 0x143   : > { %v9110_v43 = vpop.f32.mrf.mxu0  ;;  %v2597_v44 = vsel %vm2533_vm6, %v2427_v20, %v2565_v31  ;;  %vm2532_vm8 = vcmp.ge.f32.partialorder %v2422_v32, 0.0  ;;  %v2564_v45 = vmul.f32 0.1, %v2422_v32  ;;  %v2437_v46 = vadd.f32 %v10992_v38, %v9162_v34  ;;  %2136 = vst.msk [vmem:[#allocation2 + $0x228] sm:$0xff] %vm479_vm0, %v2103_v53 }
 0x144   : > { %2630 = vst.msk [vmem:[#allocation2 + $0xb1] sm:$0xff] %vm479_vm0, %v2597_v44  ;;  %v2431_v50 = vpop.f32.mrf.mxu1  ;;  %v1946_v8 = vadd.f32 %v9110_v43, %v10999_v40  ;;  %v2106_v20 = vsel %vm2042_vm10, %v1936_v54, %v2074_v6  ;;  %vm2041_vm12 = vcmp.ge.f32.partialorder %v1931_v7, 0.0  ;;  %v2073_v21 = vmul.f32 0.1, %v1931_v7 }
 0x145   : > { %v1940_v56 = vpop.f32.mrf.mxu0  ;;  %v2596_v59 = vsel %vm2532_vm8, %v2422_v32, %v2564_v45  ;;  %vm2535_vm9 = vcmp.ge.f32.partialorder %v2437_v46, 0.0  ;;  %v2567_v62 = vmul.f32 0.1, %v2437_v46  ;;  %v2432_v63 = vadd.f32 %v10992_v38, %v2431_v50  ;;  %2139 = vst.msk [vmem:[#allocation2 + $0x248] sm:$0xff] %vm479_vm0, %v2106_v20  ;;  %v2827_v32 = vld [vmem:[#allocation2 + $0x588] sm:$0xff]  ;;  %v2776_v45 = vld [vmem:[#allocation2 + $0x3f0] sm:$0xff] }
 0x146   : > { %2629 = vst.msk [vmem:[#allocation2 + $0xa9] sm:$0xff] %vm479_vm0, %v2596_v59  ;;  %v9165_v1 = vpop.f32.mrf.mxu1  ;;  %v2105_v34 = vsel %vm2041_vm12, %v1931_v7, %v2073_v21  ;;  %vm2044_vm14 = vcmp.ge.f32.partialorder %v1946_v8, 0.0  ;;  %v2076_v35 = vmul.f32 0.1, %v1946_v8  ;;  %v1941_v36 = vadd.f32 %v10999_v40, %v1940_v56  ;;  %3361 = vrot.lane.b32.xlu0 %v2827_v32, %s9857_s26  ;;  %3157 = vrot.lane.b32.xlu1 %v2776_v45, %s9858_s19  ;;  %v2831_v32 = vld [vmem:[#allocation2 + $0x5a8] sm:$0xff]  ;;  %v2830_v45 = vld [vmem:[#allocation2 + $0x5a0] sm:$0xff] }
 0x147   : > { %v9113_v9 = vpop.f32.mrf.mxu0  ;;  %v2599_v10 = vsel %vm2535_vm9, %v2437_v46, %v2567_v62  ;;  %vm2534_vm11 = vcmp.ge.f32.partialorder %v2432_v63, 0.0  ;;  %v2566_v11 = vmul.f32 0.1, %v2432_v63  ;;  %v2447_v12 = vadd.f32 %v10992_v38, %v9165_v1  ;;  %v11121_v46 = vpop.permute.xlu0 %3377  ;;  %2138 = vst.msk [vmem:[#allocation2 + $0x240] sm:$0xff] %vm479_vm0, %v2105_v34  ;;  %v2781_v1 = vld [vmem:[#allocation2 + $0x418] sm:$0x1] }
 0x148   : > { %2632 = vst.msk [vmem:[#allocation2 + $0xc9] sm:$0xff] %vm479_vm0, %v2599_v10  ;;  %v2441_v19 = vpop.f32.mrf.mxu1  ;;  %14010 = vst [vmem:[#allocation11_spill] sm:$0xff] %v11121_v46  ;;  %v2108_v50 = vsel %vm2044_vm14, %v1946_v8, %v2076_v35  ;;  %vm2043_vm1 = vcmp.ge.f32.partialorder %v1941_v36, 0.0  ;;  %v2075_v51 = vmul.f32 0.1, %v1941_v36  ;;  %v11127_v62 = vpop.permute.xlu1 %3383  ;;  %v1956_v6 = vadd.f32 %v9113_v9, %v10999_v40 }
 0x149   : > { %v1950_v23 = vpop.f32.mrf.mxu0  ;;  %v2598_v24 = vsel %vm2534_vm11, %v2432_v63, %v2566_v11  ;;  %vm2537_vm13 = vcmp.ge.f32.partialorder %v2447_v12, 0.0  ;;  %v2569_v25 = vmul.f32 0.1, %v2447_v12  ;;  %v2442_v26 = vadd.f32 %v10992_v38, %v2441_v19  ;;  %14011 = vst [vmem:[#allocation12_spill] sm:$0xff] %v11127_v62  ;;  %2141 = vst.msk [vmem:[#allocation2 + $0x260] sm:$0xff] %vm479_vm0, %v2108_v50  ;;  %v2780_v19 = vld [vmem:[#allocation2 + $0x410] sm:$0xff] }
 0x14a   : > { %2631 = vst.msk [vmem:[#allocation2 + $0xc1] sm:$0xff] %vm479_vm0, %v2598_v24  ;;  %v9168_v31 = vpop.f32.mrf.mxu1  ;;  %v2107_v4 = vsel %vm2043_vm1, %v1941_v36, %v2075_v51  ;;  %v1951_v7 = vadd.f32 %v10999_v40, %v1950_v23  ;;  %3167 = vrot.lane.b32.xlu0 %v2781_v1, %s9858_s19  ;;  %3165 = vrot.lane.b32.xlu1 %v2780_v19, %s9858_s19  ;;  %vm2046_vm5 = vcmp.ge.f32.partialorder %v1956_v6, 0.0  ;;  %v2078_v9 = vmul.f32 0.1, %v1956_v6 }
 0x14b   : > { %v9116_v37 = vpop.f32.mrf.mxu0  ;;  %v2601_v39 = vsel %vm2537_vm13, %v2447_v12, %v2569_v25  ;;  %vm2536_vm15 = vcmp.ge.f32.partialorder %v2442_v26, 0.0  ;;  %v2568_v43 = vmul.f32 0.1, %v2442_v26  ;;  %v2457_v44 = vadd.f32 %v10992_v38, %v9168_v31  ;;  %2140 = vst.msk [vmem:[#allocation2 + $0x258] sm:$0xff] %vm479_vm0, %v2107_v4 }
 0x14c   : > { %2634 = vst.msk [vmem:[#allocation2 + $0xe1] sm:$0xff] %vm479_vm0, %v2601_v39  ;;  %v2451_v47 = vpop.f32.mrf.mxu1  ;;  %v1966_v8 = vadd.f32 %v9116_v37, %v10999_v40  ;;  %vm2045_vm6 = vcmp.ge.f32.partialorder %v1951_v7, 0.0  ;;  %v2110_v34 = vsel %vm2046_vm5, %v1956_v6, %v2078_v9  ;;  %v2077_v35 = vmul.f32 0.1, %v1951_v7  ;;  %v2784_v9 = vld [vmem:[#allocation2 + $0x430] sm:$0x1] }
 0x14d   : > { %v1960_v53 = vpop.f32.mrf.mxu0  ;;  %v2600_v54 = vsel %vm2536_vm15, %v2442_v26, %v2568_v43  ;;  %vm2539_vm3 = vcmp.ge.f32.partialorder %v2457_v44, 0.0  ;;  %v2571_v56 = vmul.f32 0.1, %v2457_v44  ;;  %v2452_v59 = vadd.f32 %v10992_v38, %v2451_v47  ;;  %v11140_v26 = vpop.permute.xlu0 %2981  ;;  %2143 = vst.msk [vmem:[#allocation2 + $0x278] sm:$0xff] %vm479_vm0, %v2110_v34  ;;  %v2723_v3 = vld [vmem:[#allocation2 + $0x248] sm:$0xff] }
 0x14e   : > { %2633 = vst.msk [vmem:[#allocation2 + $0xd9] sm:$0xff] %vm479_vm0, %v2600_v54  ;;  %v9171_v63 = vpop.f32.mrf.mxu1  ;;  %14012 = vst [vmem:[#allocation13_spill] sm:$0xff] %v11140_v26  ;;  %vm2048_vm8 = vcmp.ge.f32.partialorder %v1966_v8, 0.0  ;;  %v2080_v36 = vmul.f32 0.1, %v1966_v8  ;;  %3369 = vrot.lane.b32.xlu0 %v2831_v32, %s9857_s26  ;;  %v11145_v47 = vpop.permute.xlu1 %2987  ;;  %3367 = vrot.lane.b32.xlu1 %v2830_v45, %s9857_s26  ;;  %v2109_v51 = vsel %vm2045_vm6, %v1951_v7, %v2077_v35 }
 0x14f   : > { %v9119_v10 = vpop.f32.mrf.mxu0  ;;  %v2603_v11 = vsel %vm2539_vm3, %v2457_v44, %v2571_v56  ;;  %vm2538_vm4 = vcmp.ge.f32.partialorder %v2452_v59, 0.0  ;;  %v2570_v12 = vmul.f32 0.1, %v2452_v59  ;;  %v2467_v13 = vadd.f32 %v10992_v38, %v9171_v63  ;;  %14013 = vst [vmem:[#allocation14_spill] sm:$0xff] %v11145_v47  ;;  %2142 = vst.msk [vmem:[#allocation2 + $0x270] sm:$0xff] %vm479_vm0, %v2109_v51  ;;  %v7912_v47 = vld [vmem:[%s13983_s3 + $0xf8] sm:$0xff] }
 0x150   : > { %2636 = vst.msk [vmem:[#allocation2 + $0xf9] sm:$0xff] %vm479_vm0, %v2603_v11  ;;  %v2461_v20 = vpop.f32.mrf.mxu1  ;;  %v2112_v54 = vsel %vm2048_vm8, %v1966_v8, %v2080_v36  ;;  %v1961_v56 = vadd.f32 %v10999_v40, %v1960_v53  ;;  %v2779_v11 = vld [vmem:[#allocation2 + $0x408] sm:$0xff]  ;;  %v1976_v8 = vadd.f32 %v9119_v10, %v10999_v40  ;;  %9379 = vmatprep.subr.mxu1 %v7912_v47 }
 0x151   : > { %v1970_v21 = vpop.f32.mrf.mxu0  ;;  %v2602_v23 = vsel %vm2538_vm4, %v2452_v59, %v2570_v12  ;;  %vm2541_vm7 = vcmp.ge.f32.partialorder %v2467_v13, 0.0  ;;  %v2573_v24 = vmul.f32 0.1, %v2467_v13  ;;  %v2462_v25 = vadd.f32 %v10992_v38, %v2461_v20  ;;  %2145 = vst.msk [vmem:[#allocation2 + $0x290] sm:$0xff] %vm479_vm0, %v2112_v54 }
 0x152   : > { %2635 = vst.msk [vmem:[#allocation2 + $0xf1] sm:$0xff] %vm479_vm0, %v2602_v23  ;;  %v9174_v31 = vpop.f32.mrf.mxu1  ;;  %vm2047_vm11 = vcmp.ge.f32.partialorder %v1961_v56, 0.0  ;;  %v2079_v7 = vmul.f32 0.1, %v1961_v56  ;;  %v1971_v53 = vadd.f32 %v10999_v40, %v1970_v21  ;;  %3163 = vrot.lane.b32.xlu0 %v2779_v11, %s9858_s19  ;;  %v11162_v23 = vpop.permute.xlu0 %3389  ;;  %3173 = vrot.lane.b32.xlu1 %v2784_v9, %s9858_s19  ;;  %vm2050_vm13 = vcmp.ge.f32.partialorder %v1976_v8, 0.0 }
 0x153   : > { %v9122_v37 = vpop.f32.mrf.mxu0  ;;  %v2605_v39 = vsel %vm2541_vm7, %v2467_v13, %v2573_v24  ;;  %vm2540_vm9 = vcmp.ge.f32.partialorder %v2462_v25, 0.0  ;;  %v2572_v43 = vmul.f32 0.1, %v2462_v25  ;;  %v2477_v44 = vadd.f32 %v10992_v38, %v9174_v31  ;;  %14014 = vst [vmem:[#allocation15_spill] sm:$0xff] %v11162_v23  ;;  %v11167_v35 = vpop.permute.xlu1 %3395 }
 0x154   : > { %2638 = vst.msk [vmem:[#allocation2 + $0x111] sm:$0xff] %vm479_vm0, %v2605_v39  ;;  %v2471_v50 = vpop.f32.mrf.mxu1  ;;  %v2082_v10 = vmul.f32 0.1, %v1976_v8  ;;  %14015 = vst [vmem:[#allocation16_spill] sm:$0xff] %v11167_v35  ;;  %v2783_v39 = vld [vmem:[#allocation2 + $0x428] sm:$0xff]  ;;  %vm2049_vm15 = vcmp.ge.f32.partialorder %v1971_v53, 0.0  ;;  %v1986_v45 = vadd.f32 %v9122_v37, %v10999_v40 }
 0x155   : > { %v11152_v59 = vpop.f32.mrf.mxu0  ;;  %v2604_v63 = vsel %vm2540_vm9, %v2462_v25, %v2572_v43  ;;  %vm2543_vm10 = vcmp.ge.f32.partialorder %v2477_v44, 0.0  ;;  %v2575_v1 = vmul.f32 0.1, %v2477_v44  ;;  %v2472_v4 = vadd.f32 %v10992_v38, %v2471_v50 }
 0x156   : > { %2637 = vst.msk [vmem:[#allocation2 + $0x109] sm:$0xff] %vm479_vm0, %v2604_v63  ;;  %v9177_v6 = vpop.f32.mrf.mxu1  ;;  %v2111_v25 = vsel %vm2047_vm11, %v1961_v56, %v2079_v7  ;;  %v2114_v43 = vsel %vm2050_vm13, %v1976_v8, %v2082_v10  ;;  %3171 = vrot.lane.b32.xlu0 %v2783_v39, %s9858_s19  ;;  %v2834_v63 = vld [vmem:[#allocation2 + $0x5c0] sm:$0xff]  ;;  %vm2052_vm3 = vcmp.ge.f32.partialorder %v1986_v45, 0.0  ;;  %v2728_v46 = vld [vmem:[#allocation2 + $0x270] sm:$0xff] }
 0x157   : > { %v9125_v12 = vpop.f32.mrf.mxu0  ;;  %v2607_v13 = vsel %vm2543_vm10, %v2477_v44, %v2575_v1  ;;  %vm2542_vm12 = vcmp.ge.f32.partialorder %v2472_v4, 0.0  ;;  %v2574_v19 = vmul.f32 0.1, %v2472_v4  ;;  %v2487_v20 = vadd.f32 %v10992_v38, %v9177_v6  ;;  %2144 = vst.msk [vmem:[#allocation2 + $0x288] sm:$0xff] %vm479_vm0, %v2111_v25  ;;  %2147 = vst.msk [vmem:[#allocation2 + $0x2a8] sm:$0xff] %vm479_vm0, %v2114_v43  ;;  %3375 = vrot.lane.b32.xlu1 %v2834_v63, %s9857_s26  ;;  %v2786_v63 = vld [vmem:[#allocation2 + $0x440] sm:$0xff] }
 0x158   : > { %2640 = vst.msk [vmem:[#allocation2 + $0x129] sm:$0xff] %vm479_vm0, %v2607_v13  ;;  %v2481_v24 = vpop.f32.mrf.mxu1  ;;  %v2081_v44 = vmul.f32 0.1, %v1971_v53  ;;  %v2084_v6 = vmul.f32 0.1, %v1986_v45  ;;  %v11178_v13 = vpop.permute.xlu0 %2993 }
 0x159   : > { %v1990_v21 = vpop.f32.mrf.mxu0  ;;  %v2606_v31 = vsel %vm2542_vm12, %v2472_v4, %v2574_v19  ;;  %vm2545_vm14 = vcmp.ge.f32.partialorder %v2487_v20, 0.0  ;;  %v2577_v32 = vmul.f32 0.1, %v2487_v20  ;;  %v2482_v34 = vadd.f32 %v10992_v38, %v2481_v24  ;;  %14016 = vst [vmem:[#allocation17_spill] sm:$0xff] %v11178_v13  ;;  %v2725_v13 = vld [vmem:[#allocation2 + $0x258] sm:$0xff] }
 0x15a   : > { %2639 = vst.msk [vmem:[#allocation2 + $0x121] sm:$0xff] %vm479_vm0, %v2606_v31  ;;  %v9180_v36 = vpop.f32.mrf.mxu1  ;;  %v2113_v4 = vsel %vm2049_vm15, %v1971_v53, %v2081_v44  ;;  %v2116_v9 = vsel %vm2052_vm3, %v1986_v45, %v2084_v6  ;;  %v1981_v53 = vadd.f32 %v10999_v40, %v11152_v59  ;;  %v1996_v24 = vadd.f32 %v9125_v12, %v10999_v40  ;;  %v11191_v59 = vpop.permute.xlu1 %2999 }
 0x15b   : > { %v9128_v50 = vpop.f32.mrf.mxu0  ;;  %v2609_v51 = vsel %vm2545_vm14, %v2487_v20, %v2577_v32  ;;  %vm2544_vm1 = vcmp.ge.f32.partialorder %v2482_v34, 0.0  ;;  %v2576_v54 = vmul.f32 0.1, %v2482_v34  ;;  %v2497_v56 = vadd.f32 %v10992_v38, %v9180_v36  ;;  %2146 = vst.msk [vmem:[#allocation2 + $0x2a0] sm:$0xff] %vm479_vm0, %v2113_v4  ;;  %v2833_v20 = vld [vmem:[#allocation2 + $0x5b8] sm:$0xff]  ;;  %2149 = vst.msk [vmem:[#allocation2 + $0x2c0] sm:$0xff] %vm479_vm0, %v2116_v9 }
 0x15c   : > { %2642 = vst.msk [vmem:[#allocation2 + $0x141] sm:$0xff] %vm479_vm0, %v2609_v51  ;;  %v2491_v1 = vpop.f32.mrf.mxu1  ;;  %v1991_v25 = vadd.f32 %v10999_v40, %v1990_v21  ;;  %3373 = vrot.lane.b32.xlu0 %v2833_v20, %s9857_s26  ;;  %14017 = vst [vmem:[#allocation18_spill] sm:$0xff] %v11191_v59  ;;  %vm2051_vm6 = vcmp.ge.f32.partialorder %v1981_v53, 0.0  ;;  %v2083_v12 = vmul.f32 0.1, %v1981_v53  ;;  %vm2054_vm7 = vcmp.ge.f32.partialorder %v1996_v24, 0.0 }
 0x15d   : > { %v2000_v37 = vpop.f32.mrf.mxu0  ;;  %v2608_v11 = vsel %vm2544_vm1, %v2482_v34, %v2576_v54  ;;  %vm2547_vm4 = vcmp.ge.f32.partialorder %v2497_v56, 0.0  ;;  %v2579_v7 = vmul.f32 0.1, %v2497_v56  ;;  %v2492_v8 = vadd.f32 %v10992_v38, %v2491_v1  ;;  %v2782_v34 = vld [vmem:[#allocation2 + $0x420] sm:$0xff]  ;;  %v2650_v20 = vld [vmem:[#allocation2 + $0x8] sm:$0xff]  ;;  %v2837_v9 = vld [vmem:[#allocation2 + $0x5d8] sm:$0xff] }
 0x15e   : > { %2641 = vst.msk [vmem:[#allocation2 + $0x139] sm:$0xff] %vm479_vm0, %v2608_v11  ;;  %v9183_v19 = vpop.f32.mrf.mxu1  ;;  %3169 = vrot.lane.b32.xlu1 %v2782_v34, %s9858_s19  ;;  %v2086_v43 = vmul.f32 0.1, %v1996_v24  ;;  %v2115_v44 = vsel %vm2051_vm6, %v1981_v53, %v2083_v12  ;;  %vm2053_vm9 = vcmp.ge.f32.partialorder %v1991_v25, 0.0  ;;  %v2085_v45 = vmul.f32 0.1, %v1991_v25 }
 0x15f   : > { %v2611_v10 = vsel %vm2547_vm4, %v2497_v56, %v2579_v7  ;;  %vm2546_vm5 = vcmp.ge.f32.partialorder %v2492_v8, 0.0  ;;  %v2578_v31 = vmul.f32 0.1, %v2492_v8  ;;  %v2507_v32 = vadd.f32 %v10992_v38, %v9183_v19  ;;  %v9131_v36 = vpop.f32.mrf.mxu0  ;;  %v2787_v38 = vld [vmem:[#allocation2 + $0x448] sm:$0x1]  ;;  %v11196_v56 = vpop.permute.xlu0 %3401  ;;  %2148 = vst.msk [vmem:[#allocation2 + $0x2b8] sm:$0xff] %vm479_vm0, %v2115_v44 }
 0x160   : > { %2644 = vst.msk [vmem:[#allocation2 + $0x159] sm:$0xff] %vm479_vm0, %v2611_v10  ;;  %v2006_v51 = vadd.f32 %v9128_v50, %v10999_v40  ;;  %3179 = vrot.lane.b32.xlu0 %v2787_v38, %s9858_s19  ;;  %14018 = vst [vmem:[#allocation19_spill] sm:$0xff] %v11196_v56  ;;  %v2118_v1 = vsel %vm2054_vm7, %v1996_v24, %v2086_v43  ;;  %v2001_v4 = vadd.f32 %v10999_v40, %v2000_v37  ;;  %v3114_v37 = vpop.permute.xlu1 %3113  ;;  %v2836_v10 = vld [vmem:[#allocation2 + $0x5d0] sm:$0xff]  ;;  %v2785_v43 = vld [vmem:[#allocation2 + $0x438] sm:$0xff]  ;;  %vm3569_vm14 = vcmask 392192   ;;  %v2501_v59 = vpop.f32.mrf.mxu1 }
 0x161   : > { %v2610_v21 = vsel %vm2546_vm5, %v2492_v8, %v2578_v31  ;;  %vm2549_vm8 = vcmp.ge.f32.partialorder %v2507_v32, 0.0  ;;  %v2581_v39 = vmul.f32 0.1, %v2507_v32  ;;  %v2016_v6 = vadd.f32 %v9131_v36, %v10999_v40  ;;  %v2010_v11 = vpop.f32.mrf.mxu0  ;;  %2151 = vst.msk [vmem:[#allocation2 + $0x2d8] sm:$0xff] %vm479_vm0, %v2118_v1  ;;  %v2649_v44 = vld [vmem:[#allocation2] sm:$0xff] }
 0x162   : > { %2643 = vst.msk [vmem:[#allocation2 + $0x151] sm:$0xff] %vm479_vm0, %v2610_v21  ;;  %3177 = vrot.lane.b32.xlu1 %v2786_v63, %s9858_s19  ;;  %v2117_v50 = vsel %vm2053_vm9, %v1991_v25, %v2085_v45  ;;  %vm2056_vm10 = vcmp.ge.f32.partialorder %v2006_v51, 0.0  ;;  %v2088_v7 = vmul.f32 0.1, %v2006_v51  ;;  %vm2055_vm11 = vcmp.ge.f32.partialorder %v2001_v4, 0.0 }
 0x163   : > { %v2613_v54 = vsel %vm2549_vm8, %v2507_v32, %v2581_v39  ;;  %2150 = vst.msk [vmem:[#allocation2 + $0x2d0] sm:$0xff] %vm479_vm0, %v2117_v50  ;;  %v2087_v8 = vmul.f32 0.1, %v2001_v4  ;;  %vm2058_vm12 = vcmp.ge.f32.partialorder %v2016_v6, 0.0  ;;  %v2090_v19 = vmul.f32 0.1, %v2016_v6  ;;  %v3112_v12 = vpop.permute.xlu0 %3111 }
 0x164   : > { %2646 = vst.msk [vmem:[#allocation2 + $0x171] sm:$0xff] %vm479_vm0, %v2613_v54  ;;  %v2120_v53 = vsel %vm2056_vm10, %v2006_v51, %v2088_v7  ;;  %v2011_v24 = vadd.f32 %v10999_v40, %v2010_v11  ;;  %3381 = vrot.lane.b32.xlu0 %v2837_v9, %s9857_s26  ;;  %v2651_v32 = vld [vmem:[#allocation2 + $0x10] sm:$0x1]  ;;  %v3467_v36 = vsel %vm479_vm0, %v2650_v20, %v10902_v17  ;;  %v3316_v39 = vpop.permute.xlu1 %3315  ;;  %v2790_v51 = vld [vmem:[#allocation2 + $0x460] sm:$0x1]  ;;  %vm3767_vm15 = vcmask 523264   ;;  %v9134_v20 = vpop.f32.mrf.mxu0 }
 0x165   : > { %2153 = vst.msk [vmem:[#allocation2 + $0x2f0] sm:$0xff] %vm479_vm0, %v2120_v53  ;;  %v2119_v25 = vsel %vm2055_vm11, %v2001_v4, %v2087_v8  ;;  %v2122_v31 = vsel %vm2058_vm12, %v2016_v6, %v2090_v19  ;;  %v3519_v21 = vsel %vm3517_vm2, %v3467_v36, %v3112_v12  ;;  %v3468_v45 = vsel %vm479_vm0, %v2651_v32, %v10891_v61  ;;  %v2789_v6 = vld [vmem:[#allocation2 + $0x458] sm:$0xff]  ;;  %v2840_v50 = vld [vmem:[#allocation2 + $0x5f0] sm:$0xff] }
 0x166   : > { %3379 = vrot.lane.b32.xlu1 %v2836_v10, %s9857_s26  ;;  %2152 = vst.msk [vmem:[#allocation2 + $0x2e8] sm:$0xff] %vm479_vm0, %v2119_v25  ;;  %2155 = vst.msk [vmem:[#allocation2 + $0x308] sm:$0xff] %vm479_vm0, %v2122_v31  ;;  %vm2057_vm13 = vcmp.ge.f32.partialorder %v2011_v24, 0.0  ;;  %v2089_v34 = vmul.f32 0.1, %v2011_v24  ;;  %v3520_v54 = vsel %vm3517_vm2, %v3468_v45, %v3114_v37  ;;  %v3571_v17 = vsel %vm3569_vm14, %v3519_v21, %v3316_v39  ;;  %v2020_v25 = vpop.f32.mrf.mxu0 }
 0x167   : > { %v3314_v63 = vpop.permute.xlu0 %3313  ;;  %v3466_v1 = vsel %vm479_vm0, %v2649_v44, %v10884_v52  ;;  %v3572_v61 = vsel %vm3569_vm14, %v3520_v54, %v10921_v48  ;;  %v3679_v7 = vrot.slane %v3571_v17, 1  ;;  %vm3677_vm1 = vcmask 1046528   ;;  %v2839_v48 = vld [vmem:[#allocation2 + $0x5e8] sm:$0xff]  ;;  %v2793_v21 = vld [vmem:[#allocation2 + $0x478] sm:$0x1] }
 0x168   : > { %v2121_v38 = vsel %vm2057_vm13, %v2011_v24, %v2089_v34  ;;  %3175 = vrot.lane.b32.xlu0 %v2785_v43, %s9858_s19  ;;  %v3110_v4 = vpop.permute.xlu1 %3109  ;;  %v3681_v37 = vrot.slane %v3572_v61, 1  ;;  %v2026_v53 = vadd.f32 %v9134_v20, %v10999_v40  ;;  %v2788_v24 = vld [vmem:[#allocation2 + $0x450] sm:$0xff]  ;;  %v9845_v34 = vld [vmem:[%s13982_s2] ss:$0 sm:$0xff]  ;;  %v2843_v54 = vld [vmem:[#allocation2 + $0x608] sm:$0xff] }
 0x169   : > { %2154 = vst.msk [vmem:[#allocation2 + $0x300] sm:$0xff] %vm479_vm0, %v2121_v38  ;;  %v3518_v11 = vsel %vm3517_vm2, %v3466_v1, %v3110_v4  ;;  %v2021_v36 = vadd.f32 %v9845_v34, %v2020_v25  ;;  %v2792_v38 = vld [vmem:[#allocation2 + $0x470] sm:$0xff]  ;;  %v2791_v4 = vld [vmem:[#allocation2 + $0x468] sm:$0xff]  ;;  %v2845_v20 = vld [vmem:[#allocation2 + $0x618] sm:$0xff] }
 0x16a   : > { %3185 = vrot.lane.b32.xlu1 %v2790_v51, %s9858_s19  ;;  %v3570_v8 = vsel %vm3569_vm14, %v3518_v11, %v3314_v63  ;;  %v3682_v31 = vsel %vm3677_vm1, %v3679_v7, %v3681_v37  ;;  %vm2060_vm3 = vcmp.ge.f32.partialorder %v2026_v53, 0.0  ;;  %v2092_v32 = vmul.f32 0.1, %v2026_v53  ;;  %v2794_v37 = vld [vmem:[#allocation2 + $0x480] sm:$0xff]  ;;  %v2848_v34 = vld [vmem:[#allocation2 + $0x630] sm:$0xff] }
 0x16b   : > { %v11230_v19 = vpop.permute.xlu0 %3119  ;;  %v3678_v52 = vrot.slane %v3570_v8, 1  ;;  %9267 = vmatprep.mubr.msk.f32.mxu1 %vm3767_vm15, %v3570_v8  ;;  %vm2059_vm4 = vcmp.ge.f32.partialorder %v2021_v36, 0.0  ;;  %v2091_v43 = vmul.f32 0.1, %v2021_v36 }
 0x16c   : > { %3183 = vrot.lane.b32.xlu0 %v2789_v6, %s9858_s19  ;;  %v11233_v9 = vpop.permute.xlu1 %3117  ;;  %9268 = vmatmul.mubr.msk.f32.vlgmr.msra.gmra.mxu1 %vm3767_vm15, %v3571_v17  ;;  %v2124_v39 = vsel %vm2060_vm3, %v2026_v53, %v2092_v32  ;;  %v2842_v17 = vld [vmem:[#allocation2 + $0x600] sm:$0xff]  ;;  %v2796_v6 = vld [vmem:[#allocation2 + $0x490] sm:$0x1]  ;;  %v2797_v32 = vld [vmem:[#allocation2 + $0x498] sm:$0xff] }
 0x16d   : > { %v3680_v10 = vsel %vm3677_vm1, %v3678_v52, %v3679_v7  ;;  %2157 = vst.msk [vmem:[#allocation2 + $0x320] sm:$0xff] %vm479_vm0, %v2124_v39  ;;  %v2123_v44 = vsel %vm2059_vm4, %v2021_v36, %v2091_v43  ;;  %v2846_v7 = vld [vmem:[#allocation2 + $0x620] sm:$0xff]  ;;  %v2705_v39 = vld [vmem:[#allocation2 + $0x1b8] sm:$0xff]  ;;  %v2704_v43 = vld [vmem:[#allocation2 + $0x1b0] sm:$0xff]  ;;  %9380 = vmatpush3.msra.mxu1 %v7912_v47 }
 0x16e   : > { %3387 = vrot.lane.b32.xlu1 %v2840_v50, %s9857_s26  ;;  %9203 = vmatprep.mubr.msk.f32.mxu0 %vm3767_vm15, %v3680_v10  ;;  %2156 = vst.msk [vmem:[#allocation2 + $0x318] sm:$0xff] %vm479_vm0, %v2123_v44  ;;  %v2795_v50 = vld [vmem:[#allocation2 + $0x488] sm:$0xff]  ;;  %v2798_v10 = vld [vmem:[#allocation2 + $0x4a0] sm:$0xff] }
 0x16f   : > { %v11245_v40 = vpop.permute.xlu0 %3321  ;;  %9204 = vmatmul.mubr.msk.f32.vlgmr.msra.gmra.mxu0 %vm3767_vm15, %v3682_v31 }
 0x170   : > { %3385 = vrot.lane.b32.xlu0 %v2839_v48, %s9857_s26  ;;  %v11248_v12 = vpop.permute.xlu1 %3319 }
 0x172   : > { %3181 = vrot.lane.b32.xlu1 %v2788_v24, %s9858_s19  ;;  %v2799_v24 = vld [vmem:[#allocation2 + $0x4a8] sm:$0x1] }
 0x173   : > { %v11253_v45 = vpop.permute.xlu0 %3115 }
 0x174   : > { %3191 = vrot.lane.b32.xlu0 %v2793_v21, %s9858_s19  ;;  %v11256_v51 = vpop.permute.xlu1 %3125 }
 0x176   : > { %3189 = vrot.lane.b32.xlu1 %v2792_v38, %s9858_s19 }
 0x177   : > { %v11260_v63 = vpop.permute.xlu0 %3123 }
 0x178   : > { %3393 = vrot.lane.b32.xlu0 %v2843_v54, %s9857_s26  ;;  %v11262_v1 = vpop.permute.xlu1 %3327  ;;  %v2707_v54 = vld [vmem:[#allocation2 + $0x1c8] sm:$0xff] }
 0x17a   : > { %3391 = vrot.lane.b32.xlu1 %v2842_v17, %s9857_s26  ;;  %v2708_v17 = vld [vmem:[#allocation2 + $0x1d0] sm:$0xff] }
 0x17b   : > { %v11266_v61 = vpop.permute.xlu0 %3325 }
 0x17c   : > { %3187 = vrot.lane.b32.xlu0 %v2791_v4, %s9858_s19  ;;  %v11268_v11 = vpop.permute.xlu1 %3121 }
 0x17e   : > { %3197 = vrot.lane.b32.xlu1 %v2796_v6, %s9858_s19 }
 0x17f   : > { %v11272_v8 = vpop.permute.xlu0 %3131 }
 0x180   : > { %3195 = vrot.lane.b32.xlu0 %v2795_v50, %s9858_s19  ;;  %v11274_v52 = vpop.permute.xlu1 %3129  ;;  %v2711_v50 = vld [vmem:[#allocation2 + $0x1e8] sm:$0xff] }
 0x182   : > { %3399 = vrot.lane.b32.xlu1 %v2846_v7, %s9857_s26  ;;  %v2710_v7 = vld [vmem:[#allocation2 + $0x1e0] sm:$0xff] }
 0x183   : > { %v11278_v48 = vpop.permute.xlu0 %3333 }
 0x184   : > { %3397 = vrot.lane.b32.xlu0 %v2845_v20, %s9857_s26  ;;  %v11280_v53 = vpop.permute.xlu1 %3331 }
 0x186   : > { %3193 = vrot.lane.b32.xlu1 %v2794_v37, %s9858_s19 }
 0x187   : > { %v11284_v25 = vpop.permute.xlu0 %3127 }
 0x188   : > { %3203 = vrot.lane.b32.xlu0 %v2799_v24, %s9858_s19  ;;  %v11286_v31 = vpop.permute.xlu1 %3137  ;;  %v2713_v24 = vld [vmem:[#allocation2 + $0x1f8] sm:$0xff] }
 0x18a   : > { %3201 = vrot.lane.b32.xlu1 %v2798_v10, %s9858_s19  ;;  %v2714_v10 = vld [vmem:[#allocation2 + $0x200] sm:$0xff] }
 0x18b   : > { %v11290_v36 = vpop.permute.xlu0 %3135 }
 0x18c   : > { %3199 = vrot.lane.b32.xlu0 %v2797_v32, %s9858_s19  ;;  %v11292_v21 = vpop.permute.xlu1 %3339 }
 0x18e   : > { %3403 = vrot.lane.b32.xlu1 %v2848_v34, %s9857_s26 }
 0x18f   : > { %v11296_v38 = vpop.permute.xlu0 %3337 }
 0x190   : > { %2913 = vrot.lane.b32.xlu0 %v2705_v39, %s9856_s25  ;;  %v11298_v44 = vpop.permute.xlu1 %3133  ;;  %v2717_v39 = vld [vmem:[#allocation2 + $0x218] sm:$0xff] }
 0x192   : > { %2911 = vrot.lane.b32.xlu1 %v2704_v43, %s9856_s25  ;;  %v2716_v43 = vld [vmem:[#allocation2 + $0x210] sm:$0xff] }
 0x193   : > { %v11302_v4 = vpop.permute.xlu0 %3143 }
 0x194   : > { %2917 = vrot.lane.b32.xlu0 %v2707_v54, %s9856_s25  ;;  %v11304_v6 = vpop.permute.xlu1 %3141 }
 0x196   : > { %2919 = vrot.lane.b32.xlu1 %v2708_v17, %s9856_s25 }
 0x197   : > { %v11308_v20 = vpop.permute.xlu0 %3345 }
 0x198   : > { %2925 = vrot.lane.b32.xlu0 %v2711_v50, %s9856_s25  ;;  %v11310_v37 = vpop.permute.xlu1 %3343  ;;  %v2719_v50 = vld [vmem:[#allocation2 + $0x228] sm:$0xff] }
 0x19a   : > { %2923 = vrot.lane.b32.xlu1 %v2710_v7, %s9856_s25  ;;  %v2720_v7 = vld [vmem:[#allocation2 + $0x230] sm:$0xff] }
 0x19b   : > { %v11314_v32 = vpop.permute.xlu0 %3139 }
 0x19c   : > { %2929 = vrot.lane.b32.xlu0 %v2713_v24, %s9856_s25  ;;  %v11316_v34 = vpop.permute.xlu1 %3149 }
 0x19e   : > { %2931 = vrot.lane.b32.xlu1 %v2714_v10, %s9856_s25 }
 0x19f   : > { %v11320_v54 = vpop.permute.xlu0 %3147 }
 0x1a0   : > { %2937 = vrot.lane.b32.xlu0 %v2717_v39, %s9856_s25  ;;  %v11322_v17 = vpop.permute.xlu1 %3351  ;;  %v2722_v39 = vld [vmem:[#allocation2 + $0x240] sm:$0xff] }
 0x1a2   : > { %2935 = vrot.lane.b32.xlu1 %v2716_v43, %s9856_s25  ;;  %v7872_v43 = vld [vmem:[%s13983_s3 + $0xb8] sm:$0xff] }
 0x1a3   : > { %v11326_v24 = vpop.permute.xlu0 %3349  ;;  %9315 = vmatprep.subr.mxu0 %v7872_v43 }
 0x1a4   : > { %2941 = vrot.lane.b32.xlu0 %v2719_v50, %s9856_s25  ;;  %v11328_v10 = vpop.permute.xlu1 %3145  ;;  %v9846_v50 = vld [vmem:[%s13982_s2] ss:$0 sm:$0xff]  ;;  %9316 = vmatpush3.msra.mxu0 %v7872_v43  ;;  %v2729_v43 = vld [vmem:[#allocation2 + $0x278] sm:$0xff] }
 0x1a6   : > { %2943 = vrot.lane.b32.xlu1 %v2720_v7, %s9856_s25  ;;  %v2502_v7 = vadd.f32 %v9846_v50, %v2501_v59  ;;  %v9186_v59 = vpop.f32.mrf.mxu1 }
 0x1a7   : > { %v11335_v56 = vpop.permute.xlu0 %3155 }
 0x1a8   : > { %2949 = vrot.lane.b32.xlu0 %v2723_v3, %s9856_s25  ;;  %v11340_v35 = vpop.permute.xlu1 %3153  ;;  %v2726_v3 = vld [vmem:[#allocation2 + $0x260] sm:$0xff]  ;;  %vm2548_vm5 = vcmp.ge.f32.partialorder %v2502_v7, 0.0  ;;  %v2511_v16 = vpop.f32.mrf.mxu1 }
 0x1a9   : > { %v2512_v33 = vadd.f32 %v9846_v50, %v2511_v16  ;;  %v7911_v16 = vld [vmem:[%s13983_s3 + $0xf0] sm:$0xff] }
 0x1aa   : > { %2947 = vrot.lane.b32.xlu1 %v2722_v39, %s9856_s25  ;;  %v2580_v39 = vmul.f32 0.1, %v2502_v7  ;;  %9381 = vmatprep.subr.mxu1 %v7911_v16 }
 0x1ab   : > { %v11347_v23 = vpop.permute.xlu0 %3357  ;;  %vm2550_vm7 = vcmp.ge.f32.partialorder %v2512_v33, 0.0  ;;  %9382 = vmatpush3.msra.mxu1 %v7911_v16  ;;  %v7909_v16 = vld [vmem:[%s13983_s3 + $0xe0] sm:$0xff] }
 0x1ac   : > { %2953 = vrot.lane.b32.xlu0 %v2725_v13, %s9856_s25  ;;  %v2612_v62 = vsel %vm2548_vm5, %v2502_v7, %v2580_v39  ;;  %v11349_v26 = vpop.permute.xlu1 %3355  ;;  %v2517_v13 = vadd.f32 %v9846_v50, %v9186_v59  ;;  %v7871_v7 = vld [vmem:[%s13983_s3 + $0xb0] sm:$0xff] }
 0x1ad   : > { %14019 = vst [vmem:[#allocation20_spill] sm:$0xff] %v11349_v26  ;;  %2645 = vst.msk [vmem:[#allocation2 + $0x169] sm:$0xff] %vm479_vm0, %v2612_v62  ;;  %9317 = vmatprep.subr.mxu0 %v7871_v7  ;;  %v2731_v62 = vld [vmem:[#allocation2 + $0x288] sm:$0xff]  ;;  %v2655_v26 = vld [vmem:[#allocation2 + $0x30] sm:$0xff] }
 0x1ae   : > { %2955 = vrot.lane.b32.xlu1 %v2726_v3, %s9856_s25  ;;  %vm2551_vm6 = vcmp.ge.f32.partialorder %v2517_v13, 0.0  ;;  %v2583_v3 = vmul.f32 0.1, %v2517_v13  ;;  %9318 = vmatpush3.msra.mxu0 %v7871_v7  ;;  %v2734_v7 = vld [vmem:[#allocation2 + $0x2a0] sm:$0xff] }
 0x1af   : > { %v11357_v47 = vpop.permute.xlu0 %3151 }
 0x1b0   : > { %2961 = vrot.lane.b32.xlu0 %v2729_v43, %s9856_s25  ;;  %v11359_v39 = vpop.permute.xlu1 %3161  ;;  %v2615_v59 = vsel %vm2551_vm6, %v2517_v13, %v2583_v3  ;;  %v2582_v43 = vmul.f32 0.1, %v2512_v33  ;;  %v2735_v3 = vld [vmem:[#allocation2 + $0x2a8] sm:$0xff] }
 0x1b1   : > { %2648 = vst.msk [vmem:[#allocation2 + $0x189] sm:$0xff] %vm479_vm0, %v2615_v59 }
 0x1b2   : > { %2959 = vrot.lane.b32.xlu1 %v2728_v46, %s9856_s25  ;;  %v2732_v46 = vld [vmem:[#allocation2 + $0x290] sm:$0xff]  ;;  %v2614_v50 = vsel %vm2550_vm7, %v2512_v33, %v2582_v43  ;;  %v7910_v33 = vld [vmem:[%s13983_s3 + $0xe8] sm:$0xff] }
 0x1b3   : > { %v11367_v0 = vpop.permute.xlu0 %3159  ;;  %2647 = vst.msk [vmem:[#allocation2 + $0x181] sm:$0xff] %vm479_vm0, %v2614_v50  ;;  %9383 = vmatprep.subr.mxu1 %v7910_v33  ;;  %v2738_v50 = vld [vmem:[#allocation2 + $0x2c0] sm:$0xff] }
 0x1b4   : > { %2965 = vrot.lane.b32.xlu0 %v2731_v62, %s9856_s25  ;;  %14020 = vst [vmem:[#allocation21_spill] sm:$0xff] %v11367_v0  ;;  %v11370_v13 = vpop.permute.xlu1 %3363  ;;  %v7870_v62 = vld [vmem:[%s13983_s3 + $0xa8] sm:$0xff]  ;;  %9384 = vmatpush3.msra.mxu1 %v7910_v33  ;;  %v2741_v33 = vld [vmem:[#allocation2 + $0x2d8] sm:$0xff]  ;;  %v7905_v0 = vld [vmem:[%s13983_s3 + $0xc0] sm:$0xff] }
 0x1b5   : > { %14021 = vst [vmem:[#allocation22_spill] sm:$0xff] %v11370_v13  ;;  %9319 = vmatprep.subr.mxu0 %v7870_v62  ;;  %9385 = vmatprep.subr.mxu1 %v7909_v16 }
 0x1b6   : > { %2967 = vrot.lane.b32.xlu1 %v2732_v46, %s9856_s25  ;;  %v2737_v46 = vld [vmem:[#allocation2 + $0x2b8] sm:$0xff]  ;;  %9320 = vmatpush3.msra.mxu0 %v7870_v62 }
 0x1b7   : > { %9386 = vmatpush3.msra.mxu1 %v7909_v16  ;;  %v2740_v16 = vld [vmem:[#allocation2 + $0x2d0] sm:$0xff] }
 0x1b8   : > { %2973 = vrot.lane.b32.xlu0 %v2735_v3, %s9856_s25  ;;  %v11380_v59 = vpop.permute.xlu0 %3361  ;;  %v11382_v43 = vpop.permute.xlu1 %3157  ;;  %v7908_v3 = vld [vmem:[%s13983_s3 + $0xd8] sm:$0xff] }
 0x1b9   : > { %14022 = vst [vmem:[#allocation23_spill] sm:$0xff] %v11380_v59  ;;  %14023 = vst [vmem:[#allocation24_spill] sm:$0xff] %v11382_v43  ;;  %9387 = vmatprep.subr.mxu1 %v7908_v3 }
 0x1ba   : > { %2971 = vrot.lane.b32.xlu1 %v2734_v7, %s9856_s25  ;;  %9388 = vmatpush3.msra.mxu1 %v7908_v3  ;;  %v7906_v3 = vld [vmem:[%s13983_s3 + $0xc8] sm:$0xff] }
 0x1bc   : > { %2977 = vrot.lane.b32.xlu0 %v2737_v46, %s9856_s25  ;;  %v11392_v7 = vpop.permute.xlu0 %3167  ;;  %v11394_v62 = vpop.permute.xlu1 %3165  ;;  %v7869_v46 = vld [vmem:[%s13983_s3 + $0xa0] sm:$0xff] }
 0x1bd   : > { %14024 = vst [vmem:[#allocation25_spill] sm:$0xff] %v11392_v7  ;;  %14025 = vst [vmem:[#allocation26_spill] sm:$0xff] %v11394_v62  ;;  %9321 = vmatprep.subr.mxu0 %v7869_v46  ;;  %v7868_v62 = vld [vmem:[%s13983_s3 + $0x98] sm:$0xff]  ;;  %v2744_v7 = vld [vmem:[#allocation2 + $0x2f0] sm:$0xff] }
 0x1be   : > { %2979 = vrot.lane.b32.xlu1 %v2738_v50, %s9856_s25  ;;  %v7907_v50 = vld [vmem:[%s13983_s3 + $0xd0] sm:$0xff]  ;;  %9322 = vmatpush3.msra.mxu0 %v7869_v46  ;;  %v7866_v46 = vld [vmem:[%s13983_s3 + $0x88] sm:$0xff] }
 0x1bf   : > { %9389 = vmatprep.subr.mxu1 %v7907_v50  ;;  %9323 = vmatprep.subr.mxu0 %v7868_v62 }
 0x1c0   : > { %2985 = vrot.lane.b32.xlu0 %v2741_v33, %s9856_s25  ;;  %v11410_v13 = vpop.permute.xlu0 %3369  ;;  %9390 = vmatpush3.msra.mxu1 %v7907_v50  ;;  %v11412_v59 = vpop.permute.xlu1 %3367  ;;  %v2743_v33 = vld [vmem:[#allocation2 + $0x2e8] sm:$0xff] }
 0x1c1   : > { %14026 = vst [vmem:[#allocation27_spill] sm:$0xff] %v11410_v13  ;;  %14027 = vst [vmem:[#allocation28_spill] sm:$0xff] %v11412_v59  ;;  %9391 = vmatprep.subr.mxu1 %v7906_v3  ;;  %9324 = vmatpush3.msra.mxu0 %v7868_v62  ;;  %v2747_v13 = vld [vmem:[#allocation2 + $0x308] sm:$0xff]  ;;  %v7865_v62 = vld [vmem:[%s13983_s3 + $0x80] sm:$0xff] }
 0x1c2   : > { %2983 = vrot.lane.b32.xlu1 %v2740_v16, %s9856_s25  ;;  %v7867_v16 = vld [vmem:[%s13983_s3 + $0x90] sm:$0xff]  ;;  %9392 = vmatpush3.msra.mxu1 %v7906_v3 }
 0x1c3   : > { %9325 = vmatprep.subr.mxu0 %v7867_v16  ;;  %9393 = vmatprep.subr.mxu1 %v7905_v0 }
 0x1c4   : > { %2989 = vrot.lane.b32.xlu0 %v2743_v33, %s9856_s25  ;;  %v11425_v50 = vpop.permute.xlu0 %3163  ;;  %v11427_v59 = vpop.permute.xlu1 %3173  ;;  %9326 = vmatpush3.msra.mxu0 %v7867_v16  ;;  %v2850_v33 = vld [vmem:[#allocation2 + $0x640] sm:$0x1] }
 0x1c5   : > { %14028 = vst [vmem:[#allocation29_spill] sm:$0xff] %v11425_v50  ;;  %14029 = vst [vmem:[#allocation30_spill] sm:$0xff] %v11427_v59  ;;  %9394 = vmatpush3.msra.mxu1 %v7905_v0  ;;  %9327 = vmatprep.subr.mxu0 %v7866_v46  ;;  %v2849_v59 = vld [vmem:[#allocation2 + $0x638] sm:$0xff]  ;;  %v2751_v0 = vld [vmem:[#allocation2 + $0x328] sm:$0x1] }
 0x1c6   : > { %2991 = vrot.lane.b32.xlu1 %v2744_v7, %s9856_s25  ;;  %v2746_v7 = vld [vmem:[#allocation2 + $0x300] sm:$0xff]  ;;  %9328 = vmatpush3.msra.mxu0 %v7866_v46  ;;  %v2801_v46 = vld [vmem:[#allocation2 + $0x4b8] sm:$0xff] }
 0x1c7   : > { %9329 = vmatprep.subr.mxu0 %v7865_v62 }
 0x1c8   : > { %2997 = vrot.lane.b32.xlu0 %v2747_v13, %s9856_s25  ;;  %v11434_v3 = vpop.permute.xlu0 %3171  ;;  %9330 = vmatpush3.msra.mxu0 %v7865_v62  ;;  %v2800_v13 = vld [vmem:[#allocation2 + $0x4b0] sm:$0xff] }
 0x1c9   : > { %14030 = vst [vmem:[#allocation31_spill] sm:$0xff] %v11434_v3  ;;  %v11436_v50 = vpop.permute.xlu1 %3375 }
 0x1ca   : > { %2995 = vrot.lane.b32.xlu1 %v2746_v7, %s9856_s25  ;;  %14031 = vst [vmem:[#allocation32_spill] sm:$0xff] %v11436_v50  ;;  %v2802_v50 = vld [vmem:[#allocation2 + $0x4c0] sm:$0x1] }
 0x1cc   : > { %3405 = vrot.lane.b32.xlu0 %v2849_v59, %s9857_s26  ;;  %v2851_v59 = vld [vmem:[#allocation2 + $0x648] sm:$0xff] }
 0x1ce   : > { %3407 = vrot.lane.b32.xlu1 %v2850_v33, %s9857_s26  ;;  %v11440_v16 = vpop.permute.xlu0 %3373  ;;  %v2750_v33 = vld [vmem:[#allocation2 + $0x320] sm:$0xff] }
 0x1cf   : > { %14032 = vst [vmem:[#allocation33_spill] sm:$0xff] %v11440_v16 }
 0x1d0   : > { %v11442_v43 = vpop.permute.xlu1 %3169  ;;  %3005 = vrot.lane.b32.xlu0 %v2751_v0, %s9856_s25  ;;  %v2749_v0 = vld [vmem:[#allocation2 + $0x318] sm:$0xff] }
 0x1d1   : > { %14033 = vst [vmem:[#allocation34_spill] sm:$0xff] %v11442_v43 }
 0x1d2   : > { %3205 = vrot.lane.b32.xlu1 %v2800_v13, %s9858_s19  ;;  %v11446_v7 = vpop.permute.xlu0 %3179 }
 0x1d3   : > { %14034 = vst [vmem:[#allocation35_spill] sm:$0xff] %v11446_v7  ;;  %v2852_v7 = vld [vmem:[#allocation2 + $0x650] sm:$0xff] }
 0x1d4   : > { %v11448_v3 = vpop.permute.xlu1 %3177  ;;  %3207 = vrot.lane.b32.xlu0 %v2801_v46, %s9858_s19 }
 0x1d5   : > { %14035 = vst [vmem:[#allocation36_spill] sm:$0xff] %v11448_v3 }
 0x1d6   : > { %3209 = vrot.lane.b32.xlu1 %v2802_v50, %s9858_s19  ;;  %v11452_v62 = vpop.permute.xlu0 %3381  ;;  %v2853_v50 = vld [vmem:[#allocation2 + $0x658] sm:$0x1] }
 0x1d7   : > { %14036 = vst [vmem:[#allocation37_spill] sm:$0xff] %v11452_v62 }
 0x1d8   : > { %v11454_v16 = vpop.permute.xlu1 %3379  ;;  %3409 = vrot.lane.b32.xlu0 %v2851_v59, %s9857_s26 }
 0x1d9   : > { %14037 = vst [vmem:[#allocation38_spill] sm:$0xff] %v11454_v16 }
 0x1da   : > { %3003 = vrot.lane.b32.xlu1 %v2750_v33, %s9856_s25  ;;  %v11458_v13 = vpop.permute.xlu0 %3175 }
 0x1db   : > { %14038 = vst [vmem:[#allocation39_spill] sm:$0xff] %v11458_v13 }
 0x1dc   : > { %v11460_v43 = vpop.permute.xlu1 %3185  ;;  %3001 = vrot.lane.b32.xlu0 %v2749_v0, %s9856_s25 }
 0x1dd   : > { %14039 = vst [vmem:[#allocation40_spill] sm:$0xff] %v11460_v43 }
 0x1de   : > { %3411 = vrot.lane.b32.xlu1 %v2852_v7, %s9857_s26  ;;  %v11464_v46 = vpop.permute.xlu0 %3183 }
 0x1df   : > { %14040 = vst [vmem:[#allocation41_spill] sm:$0xff] %v11464_v46 }
 0x1e0   : > { %v11466_v62 = vpop.permute.xlu1 %3387  ;;  %3413 = vrot.lane.b32.xlu0 %v2853_v50, %s9857_s26  ;;  %s8170_s26 = sshll.u32 %s14173_s16, 4 }
 0x1e1   : > { %14041 = vst [vmem:[#allocation42_spill] sm:$0xff] %v11466_v62  ;;  %s478_s24 = scalar_lea.vmem %s13994_s14, %s8170_s26 }
 0x1e2   : > { %v11469_v59 = vpop.permute.xlu0 %3385 }
 0x1e3   : > { %14042 = vst [vmem:[#allocation43_spill] sm:$0xff] %v11469_v59 }
 0x1e4   : > { %v11471_v33 = vpop.permute.xlu1 %3181 }
 0x1e5   : > { %14043 = vst [vmem:[#allocation44_spill] sm:$0xff] %v11471_v33 }
 0x1e6   : > { %v11473_v16 = vpop.permute.xlu0 %3191 }
 0x1e7   : > { %14044 = vst [vmem:[#allocation45_spill] sm:$0xff] %v11473_v16 }
 0x1e8   : > { %v11475_v13 = vpop.permute.xlu1 %3189 }
 0x1e9   : > { %14045 = vst [vmem:[#allocation46_spill] sm:$0xff] %v11475_v13  ;;  %v2654_v13 = vld [vmem:[#allocation2 + $0x28] sm:$0x1] }
 0x1ea   : > { %v11477_v3 = vpop.permute.xlu0 %3393 }
 0x1eb   : > { %14046 = vst [vmem:[#allocation47_spill] sm:$0xff] %v11477_v3 }
 0x1ec   : > { %v11479_v0 = vpop.permute.xlu1 %3391 }
 0x1ed   : > { %14047 = vst [vmem:[#allocation48_spill] sm:$0xff] %v11479_v0 }
 0x1ee   : > { %v11481_v7 = vpop.permute.xlu0 %3187 }
 0x1ef   : > { %14048 = vst [vmem:[#allocation49_spill] sm:$0xff] %v11481_v7  ;;  %v2653_v7 = vld [vmem:[#allocation2 + $0x20] sm:$0xff] }
 0x1f0   : > { %v11483_v43 = vpop.permute.xlu1 %3197 }
 0x1f1   : > { %14049 = vst [vmem:[#allocation50_spill] sm:$0xff] %v11483_v43  ;;  %v3471_v43 = vsel %vm479_vm0, %v2654_v13, %v10909_v28 }
 0x1f2   : > { %v11485_v46 = vpop.permute.xlu0 %3195 }
 0x1f3   : > { %14050 = vst [vmem:[#allocation51_spill] sm:$0xff] %v11485_v46  ;;  %v2657_v46 = vld [vmem:[#allocation2 + $0x40] sm:$0x1] }
 0x1f4   : > { %v11487_v62 = vpop.permute.xlu1 %3399 }
 0x1f5   : > { %14051 = vst [vmem:[#allocation52_spill] sm:$0xff] %v11487_v62  ;;  %v3523_v62 = vsel %vm3517_vm2, %v3471_v43, %v11230_v19 }
 0x1f6   : > { %v11489_v50 = vpop.permute.xlu0 %3397  ;;  %v3575_v28 = vsel %vm3569_vm14, %v3523_v62, %v10928_v58  ;;  %v3477_v58 = vsel %vm479_vm0, %v2660_v57, %v10947_v27  ;;  %v2663_v62 = vld [vmem:[#allocation2 + $0x70] sm:$0x1] }
 0x1f7   : > { %14052 = vst [vmem:[#allocation53_spill] sm:$0xff] %v11489_v50  ;;  %v2659_v27 = vld [vmem:[#allocation2 + $0x50] sm:$0xff]  ;;  %v3529_v57 = vsel %vm3517_vm2, %v3477_v58, %v11272_v8 }
 0x1f8   : > { %v11491_v59 = vpop.permute.xlu1 %3193 }
 0x1f9   : > { %14053 = vst [vmem:[#allocation54_spill] sm:$0xff] %v11491_v59 }
 0x1fa   : > { %v11493_v33 = vpop.permute.xlu0 %3203 }
 0x1fb   : > { %14054 = vst [vmem:[#allocation55_spill] sm:$0xff] %v11493_v33 }
 0x1fc   : > { %v11495_v16 = vpop.permute.xlu1 %3201 }
 0x1fd   : > { %14055 = vst [vmem:[#allocation56_spill] sm:$0xff] %v11495_v16  ;;  %v3474_v16 = vsel %vm479_vm0, %v2657_v46, %v10940_v15 }
 0x1fe   : > { %v11497_v3 = vpop.permute.xlu0 %3199  ;;  %v3526_v19 = vsel %vm3517_vm2, %v3474_v16, %v11256_v51  ;;  %v2656_v16 = vld [vmem:[#allocation2 + $0x38] sm:$0xff] }
 0x1ff   : > { %14056 = vst [vmem:[#allocation57_spill] sm:$0xff] %v11497_v3 }
 0x200   : > { %v11499_v0 = vpop.permute.xlu1 %3403 }
 0x201   : > { %14057 = vst [vmem:[#allocation58_spill] sm:$0xff] %v11499_v0 }
 0x202   : > { %v2914_v50 = vpop.permute.xlu0 %2913 }
 0x203   : > { %v3470_v59 = vsel %vm479_vm0, %v2653_v7, %v2914_v50 }
 0x204   : > { %v2912_v33 = vpop.permute.xlu1 %2911  ;;  %v3522_v0 = vsel %vm3517_vm2, %v3470_v59, %v11233_v9 }
 0x205   : > { %v3469_v3 = vsel %vm479_vm0, %v2652_v22, %v2912_v33  ;;  %v11519_v13 = vsel %vm3569_vm14, %v3522_v0, %v11245_v40  ;;  %v3686_v40 = vrot.slane %v3575_v28, 1 }
 0x206   : > { %v3521_v43 = vsel %vm3517_vm2, %v3469_v3, %v11253_v45  ;;  %v2918_v15 = vpop.permute.xlu0 %2917  ;;  %v3684_v22 = vrot.slane %v11519_v13, 1 }
 0x207   : > { %v11523_v9 = vsel %vm3569_vm14, %v3521_v43, %v11248_v12  ;;  %v3472_v51 = vsel %vm479_vm0, %v2655_v26, %v2918_v15  ;;  %v3578_v12 = vsel %vm3569_vm14, %v3526_v19, %v10959_v49  ;;  %v2666_v43 = vld [vmem:[#allocation2 + $0x88] sm:$0x1]  ;;  %v3581_v15 = vsel %vm3569_vm14, %v3529_v57, %v10966_v60 }
 0x208   : > { %v2920_v46 = vpop.permute.xlu1 %2919  ;;  %v3683_v45 = vrot.slane %v11523_v9, 1  ;;  %9270 = vmatprep.mubr.msk.f32.mxu1 %vm3767_vm15, %v11523_v9  ;;  %v3524_v3 = vsel %vm3517_vm2, %v3472_v51, %v11268_v11  ;;  %v3480_v11 = vsel %vm479_vm0, %v2663_v62, %v10978_v18  ;;  %v11557_v8 = vsel %vm3677_vm1, %v3684_v22, %v3686_v40  ;;  %v2658_v18 = vld [vmem:[#allocation2 + $0x48] sm:$0xff]  ;;  %v2661_v62 = vld [vmem:[#allocation2 + $0x60] sm:$0xff] }
 0x209   : > { %v3473_v59 = vsel %vm479_vm0, %v2656_v16, %v2920_v46  ;;  %9271 = vmatmul.mubr.msk.f32.gmra.mxu1 %vm3767_vm15, %v11519_v13  ;;  %v11545_v33 = vsel %vm3569_vm14, %v3524_v3, %v11266_v61  ;;  %v3691_v61 = vrot.slane %v3578_v12, 1  ;;  %v2669_v40 = vld [vmem:[#allocation2 + $0xa0] sm:$0x1]  ;;  %v2662_v3 = vld [vmem:[#allocation2 + $0x68] sm:$0xff] }
 0x20a   : > { %v3525_v26 = vsel %vm3517_vm2, %v3473_v59, %v11260_v63  ;;  %v11548_v49 = vsel %vm3677_vm1, %v3683_v45, %v3684_v22  ;;  %9273 = vmatprep.mubr.msk.f32.mxu1 %vm3767_vm15, %v11545_v33  ;;  %v2926_v0 = vpop.permute.xlu0 %2925  ;;  %v3688_v7 = vrot.slane %v11545_v33, 1  ;;  %v3483_v45 = vsel %vm479_vm0, %v2666_v43, %v10985_v30  ;;  %v2672_v43 = vld [vmem:[#allocation2 + $0xb8] sm:$0x1] }
 0x20b   : > { %9206 = vmatprep.mubr.msk.f32.mxu0 %vm3767_vm15, %v11548_v49  ;;  %v11561_v63 = vsel %vm3569_vm14, %v3525_v26, %v11262_v1  ;;  %v3476_v50 = vsel %vm479_vm0, %v2659_v27, %v2926_v0  ;;  %v3532_v1 = vsel %vm3517_vm2, %v3480_v11, %v11286_v31  ;;  %v2665_v26 = vld [vmem:[#allocation2 + $0x80] sm:$0xff]  ;;  %v3535_v11 = vsel %vm3517_vm2, %v3483_v45, %v11302_v4  ;;  %v2675_v45 = vld [vmem:[#allocation2 + $0xd0] sm:$0x1] }
 0x20c   : > { %v2924_v28 = vpop.permute.xlu1 %2923  ;;  %9207 = vmatmul.mubr.msk.f32.gmra.mxu0 %vm3767_vm15, %v11557_v8  ;;  %v3689_v19 = vrot.slane %v11561_v63, 1  ;;  %v3528_v22 = vsel %vm3517_vm2, %v3476_v50, %v11274_v52  ;;  %v3584_v27 = vsel %vm3569_vm14, %v3532_v1, %v11007_v55 }
 0x20d   : > { %v3475_v58 = vsel %vm479_vm0, %v2658_v18, %v2924_v28  ;;  %9274 = vmatmul.mubr.msk.f32.gmra.mxu1 %vm3767_vm15, %v11561_v63  ;;  %v11587_v31 = vsel %vm3569_vm14, %v3528_v22, %v11278_v48 }
 0x20e   : > { %v3527_v51 = vsel %vm3517_vm2, %v3475_v58, %v11284_v25  ;;  %v11580_v16 = vsel %vm3677_vm1, %v3688_v7, %v3689_v19  ;;  %v11583_v60 = vsel %vm3677_vm1, %v3689_v19, %v3691_v61  ;;  %v2930_v52 = vpop.permute.xlu0 %2929  ;;  %v3694_v25 = vrot.slane %v11587_v31, 1  ;;  %v2667_v58 = vld [vmem:[#allocation2 + $0x90] sm:$0xff] }
 0x20f   : > { %9209 = vmatprep.mubr.msk.f32.mxu0 %vm3767_vm15, %v11580_v16  ;;  %v11593_v46 = vsel %vm3569_vm14, %v3527_v51, %v11280_v53  ;;  %v3478_v12 = vsel %vm479_vm0, %v2661_v62, %v2930_v52  ;;  %v3696_v53 = vrot.slane %v3581_v15, 1  ;;  %v3587_v15 = vsel %vm3569_vm14, %v3535_v11, %v11016_v2 }
 0x210   : > { %v2932_v59 = vpop.permute.xlu1 %2931  ;;  %9210 = vmatmul.mubr.msk.f32.gmra.mxu0 %vm3767_vm15, %v11583_v60  ;;  %v3693_v48 = vrot.slane %v11593_v46, 1  ;;  %9276 = vmatprep.mubr.msk.f32.mxu1 %vm3767_vm15, %v11593_v46  ;;  %v3530_v30 = vsel %vm3517_vm2, %v3478_v12, %v11298_v44  ;;  %v3486_v44 = vsel %vm479_vm0, %v2669_v40, %v11028_v29  ;;  %v2664_v29 = vld [vmem:[#allocation2 + $0x78] sm:$0xff] }
 0x211   : > { %v3479_v57 = vsel %vm479_vm0, %v2662_v3, %v2932_v59  ;;  %9277 = vmatmul.mubr.msk.f32.gmra.mxu1 %vm3767_vm15, %v11587_v31  ;;  %v11617_v61 = vsel %vm3569_vm14, %v3530_v30, %v11296_v38  ;;  %v11629_v4 = vsel %vm3677_vm1, %v3694_v25, %v3696_v53  ;;  %v3701_v38 = vrot.slane %v3584_v27, 1  ;;  %v2668_v12 = vld [vmem:[#allocation2 + $0x98] sm:$0xff]  ;;  %v2671_v53 = vld [vmem:[#allocation2 + $0xb0] sm:$0xff] }
 0x212   : > { %v3531_v0 = vsel %vm3517_vm2, %v3479_v57, %v11290_v36  ;;  %v11620_v55 = vsel %vm3677_vm1, %v3693_v48, %v3694_v25  ;;  %9279 = vmatprep.mubr.msk.f32.mxu1 %vm3767_vm15, %v11617_v61  ;;  %v2938_v7 = vpop.permute.xlu0 %2937  ;;  %v3698_v50 = vrot.slane %v11617_v61, 1  ;;  %v3489_v25 = vsel %vm479_vm0, %v2672_v43, %v11035_v41 }
 0x213   : > { %9212 = vmatprep.mubr.msk.f32.mxu0 %vm3767_vm15, %v11620_v55  ;;  %v11633_v36 = vsel %vm3569_vm14, %v3531_v0, %v11292_v21  ;;  %v3482_v18 = vsel %vm479_vm0, %v2665_v26, %v2938_v7  ;;  %v3538_v21 = vsel %vm3517_vm2, %v3486_v44, %v11316_v34  ;;  %v3541_v27 = vsel %vm3517_vm2, %v3489_v25, %v11335_v56 }
 0x214   : > { %v2936_v28 = vpop.permute.xlu1 %2935  ;;  %9213 = vmatmul.mubr.msk.f32.gmra.mxu0 %vm3767_vm15, %v11629_v4  ;;  %v3699_v19 = vrot.slane %v11633_v36, 1  ;;  %v3534_v1 = vsel %vm3517_vm2, %v3482_v18, %v11304_v6  ;;  %v3590_v59 = vsel %vm3569_vm14, %v3538_v21, %v11047_v5 }
 0x215   : > { %v3481_v22 = vsel %vm479_vm0, %v2664_v29, %v2936_v28  ;;  %9280 = vmatmul.mubr.msk.f32.gmra.mxu1 %vm3767_vm15, %v11633_v36  ;;  %v11659_v34 = vsel %vm3569_vm14, %v3534_v1, %v11308_v20  ;;  %v2673_v28 = vld [vmem:[#allocation2 + $0xc0] sm:$0xff] }
 0x216   : > { %v3533_v62 = vsel %vm3517_vm2, %v3481_v22, %v11314_v32  ;;  %v11652_v51 = vsel %vm3677_vm1, %v3698_v50, %v3699_v19  ;;  %v11655_v2 = vsel %vm3677_vm1, %v3699_v19, %v3701_v38  ;;  %v2942_v6 = vpop.permute.xlu0 %2941  ;;  %v3704_v32 = vrot.slane %v11659_v34, 1  ;;  %v2678_v38 = vld [vmem:[#allocation2 + $0xe8] sm:$0x1] }
 0x217   : > { %9215 = vmatprep.mubr.msk.f32.mxu0 %vm3767_vm15, %v11652_v51  ;;  %v11665_v52 = vsel %vm3569_vm14, %v3533_v62, %v11310_v37  ;;  %v3484_v40 = vsel %vm479_vm0, %v2667_v58, %v2942_v6  ;;  %v3706_v37 = vrot.slane %v3587_v15, 1  ;;  %v3593_v50 = vsel %vm3569_vm14, %v3541_v27, %v11053_v14  ;;  %v14058_v15 = vld [vmem:[#allocation20_spill] sm:$0xff]  ;;  %v14059_v1 = vld [vmem:[#allocation6_spill] sm:$0xff]  ;;  %v2681_v58 = vld [vmem:[#allocation2 + $0x100] sm:$0x1] }
 0x218   : > { %v2944_v3 = vpop.permute.xlu1 %2943  ;;  %9216 = vmatmul.mubr.msk.f32.gmra.mxu0 %vm3767_vm15, %v11655_v2  ;;  %v3703_v20 = vrot.slane %v11665_v52, 1  ;;  %9282 = vmatprep.mubr.msk.f32.mxu1 %vm3767_vm15, %v11665_v52  ;;  %v3536_v41 = vsel %vm3517_vm2, %v3484_v40, %v11328_v10  ;;  %v3492_v10 = vsel %vm479_vm0, %v2675_v45, %v11065_v42  ;;  %v2670_v42 = vld [vmem:[#allocation2 + $0xa8] sm:$0xff]  ;;  %v3495_v22 = vsel %vm479_vm0, %v2678_v38, %v14059_v1 }
 0x219   : > { %v3485_v48 = vsel %vm479_vm0, %v2668_v12, %v2944_v3  ;;  %9283 = vmatmul.mubr.msk.f32.gmra.mxu1 %vm3767_vm15, %v11659_v34  ;;  %v11689_v57 = vsel %vm3569_vm14, %v3536_v41, %v11326_v24  ;;  %v11701_v56 = vsel %vm3677_vm1, %v3704_v32, %v3706_v37  ;;  %v3711_v24 = vrot.slane %v3590_v59, 1  ;;  %v2674_v6 = vld [vmem:[#allocation2 + $0xc8] sm:$0xff]  ;;  %v14061_v12 = vld [vmem:[#allocation24_spill] sm:$0xff]  ;;  %v2677_v37 = vld [vmem:[#allocation2 + $0xe0] sm:$0xff] }
 0x21a   : > { %v3537_v30 = vsel %vm3517_vm2, %v3485_v48, %v11320_v54  ;;  %v11692_v5 = vsel %vm3677_vm1, %v3703_v20, %v3704_v32  ;;  %9285 = vmatprep.mubr.msk.f32.mxu1 %vm3767_vm15, %v11689_v57  ;;  %v2950_v26 = vpop.permute.xlu0 %2949  ;;  %v3708_v11 = vrot.slane %v11689_v57, 1  ;;  %v3716_v25 = vrot.slane %v3593_v50, 1  ;;  %v14060_v45 = vld [vmem:[#allocation7_spill] sm:$0xff]  ;;  %v14062_v59 = vld [vmem:[#allocation25_spill] sm:$0xff]  ;;  %v14069_v1 = vld [vmem:[#allocation26_spill] sm:$0xff] }
 0x21b   : > { %9218 = vmatprep.mubr.msk.f32.mxu0 %vm3767_vm15, %v11692_v5  ;;  %v11705_v54 = vsel %vm3569_vm14, %v3537_v30, %v11322_v17  ;;  %v3488_v0 = vsel %vm479_vm0, %v2671_v53, %v2950_v26  ;;  %v3544_v17 = vsel %vm3517_vm2, %v3492_v10, %v11359_v39  ;;  %v3547_v41 = vsel %vm3517_vm2, %v3495_v22, %v14062_v59  ;;  %v14063_v48 = vld [vmem:[#allocation21_spill] sm:$0xff]  ;;  %v14064_v27 = vld [vmem:[#allocation23_spill] sm:$0xff]  ;;  %v14073_v59 = vld [vmem:[#allocation10_spill] sm:$0xff] }
 0x21c   : > { %v2948_v44 = vpop.permute.xlu1 %2947  ;;  %9219 = vmatmul.mubr.msk.f32.gmra.mxu0 %vm3767_vm15, %v11701_v56  ;;  %v3709_v7 = vrot.slane %v11705_v54, 1  ;;  %v3540_v18 = vsel %vm3517_vm2, %v3488_v0, %v11340_v35  ;;  %v3596_v40 = vsel %vm3569_vm14, %v3544_v17, %v14060_v45  ;;  %v14065_v26 = vld [vmem:[#allocation9_spill] sm:$0xff]  ;;  %v14071_v45 = vld [vmem:[#allocation27_spill] sm:$0xff] }
 0x21d   : > { %v3487_v29 = vsel %vm479_vm0, %v2670_v42, %v2948_v44  ;;  %9286 = vmatmul.mubr.msk.f32.gmra.mxu1 %vm3767_vm15, %v11705_v54  ;;  %v11731_v39 = vsel %vm3569_vm14, %v3540_v18, %v11347_v23  ;;  %v14066_v42 = vld [vmem:[#allocation22_spill] sm:$0xff]  ;;  %v2676_v17 = vld [vmem:[#allocation2 + $0xd8] sm:$0xff] }
 0x21e   : > { %v3539_v19 = vsel %vm3517_vm2, %v3487_v29, %v11357_v47  ;;  %v11724_v43 = vsel %vm3677_vm1, %v3708_v11, %v3709_v7  ;;  %v11727_v14 = vsel %vm3677_vm1, %v3709_v7, %v3711_v24  ;;  %v2954_v35 = vpop.permute.xlu0 %2953  ;;  %v3714_v47 = vrot.slane %v11731_v39, 1 }
 0x21f   : > { %9221 = vmatprep.mubr.msk.f32.mxu0 %vm3767_vm15, %v11724_v43  ;;  %v11737_v21 = vsel %vm3569_vm14, %v3539_v19, %v14058_v15  ;;  %v3490_v62 = vsel %vm479_vm0, %v2673_v28, %v2954_v35  ;;  %v3498_v24 = vsel %vm479_vm0, %v2681_v58, %v14065_v26  ;;  %v3721_v7 = vrot.slane %v3596_v40, 1  ;;  %v2684_v28 = vld [vmem:[#allocation2 + $0x118] sm:$0x1]  ;;  %v14068_v15 = vld [vmem:[#allocation30_spill] sm:$0xff] }
 0x220   : > { %v2956_v32 = vpop.permute.xlu1 %2955  ;;  %9222 = vmatmul.mubr.msk.f32.gmra.mxu0 %vm3767_vm15, %v11727_v14  ;;  %v3713_v23 = vrot.slane %v11737_v21, 1  ;;  %9288 = vmatprep.mubr.msk.f32.mxu1 %vm3767_vm15, %v11737_v21  ;;  %v3542_v3 = vsel %vm3517_vm2, %v3490_v62, %v14061_v12  ;;  %v11773_v0 = vsel %vm3677_vm1, %v3714_v47, %v3716_v25  ;;  %v14067_v19 = vld [vmem:[#allocation8_spill] sm:$0xff] }
 0x221   : > { %v3491_v20 = vsel %vm479_vm0, %v2674_v6, %v2956_v32  ;;  %9289 = vmatmul.mubr.msk.f32.gmra.mxu1 %vm3767_vm15, %v11731_v39  ;;  %v11761_v30 = vsel %vm3569_vm14, %v3542_v3, %v14064_v27  ;;  %v3599_v35 = vsel %vm3569_vm14, %v3547_v41, %v14067_v19  ;;  %v2679_v62 = vld [vmem:[#allocation2 + $0xf0] sm:$0xff]  ;;  %v14070_v6 = vld [vmem:[#allocation29_spill] sm:$0xff]  ;;  %v3501_v41 = vsel %vm479_vm0, %v2684_v28, %v14073_v59 }
 0x222   : > { %v3543_v53 = vsel %vm3517_vm2, %v3491_v20, %v14063_v48  ;;  %v11764_v10 = vsel %vm3677_vm1, %v3713_v23, %v3714_v47  ;;  %9291 = vmatprep.mubr.msk.f32.mxu1 %vm3767_vm15, %v11761_v30  ;;  %v2962_v11 = vpop.permute.xlu0 %2961  ;;  %v3718_v38 = vrot.slane %v11761_v30, 1  ;;  %v3550_v47 = vsel %vm3517_vm2, %v3498_v24, %v14068_v15  ;;  %v14072_v3 = vld [vmem:[#allocation28_spill] sm:$0xff]  ;;  %v2687_v48 = vld [vmem:[#allocation2 + $0x130] sm:$0x1] }
 0x223   : > { %9224 = vmatprep.mubr.msk.f32.mxu0 %vm3767_vm15, %v11764_v10  ;;  %v11777_v44 = vsel %vm3569_vm14, %v3543_v53, %v14066_v42  ;;  %v3494_v50 = vsel %vm479_vm0, %v2677_v37, %v2962_v11  ;;  %v2680_v27 = vld [vmem:[#allocation2 + $0xf8] sm:$0xff]  ;;  %v3726_v11 = vrot.slane %v3599_v35, 1  ;;  %v14074_v42 = vld [vmem:[#allocation11_spill] sm:$0xff] }
 0x224   : > { %v2960_v18 = vpop.permute.xlu1 %2959  ;;  %9225 = vmatmul.mubr.msk.f32.gmra.mxu0 %vm3767_vm15, %v11773_v0  ;;  %v3719_v29 = vrot.slane %v11777_v44, 1  ;;  %v3546_v22 = vsel %vm3517_vm2, %v3494_v50, %v14069_v1  ;;  %v14077_v19 = vld [vmem:[#allocation31_spill] sm:$0xff]  ;;  %v14078_v1 = vld [vmem:[#allocation33_spill] sm:$0xff] }
 0x225   : > { %v3493_v58 = vsel %vm479_vm0, %v2676_v17, %v2960_v18  ;;  %9292 = vmatmul.mubr.msk.f32.gmra.mxu1 %vm3767_vm15, %v11777_v44  ;;  %v11803_v40 = vsel %vm3569_vm14, %v3546_v22, %v14071_v45  ;;  %v2683_v18 = vld [vmem:[#allocation2 + $0x110] sm:$0xff]  ;;  %v14079_v22 = vld [vmem:[#allocation13_spill] sm:$0xff] }
 0x226   : > { %v3545_v32 = vsel %vm3517_vm2, %v3493_v58, %v14070_v6  ;;  %v11796_v23 = vsel %vm3677_vm1, %v3718_v38, %v3719_v29  ;;  %v11799_v25 = vsel %vm3677_vm1, %v3719_v29, %v3721_v7  ;;  %v2966_v12 = vpop.permute.xlu0 %2965  ;;  %v3724_v37 = vrot.slane %v11803_v40, 1  ;;  %v14075_v38 = vld [vmem:[#allocation34_spill] sm:$0xff]  ;;  %v14076_v29 = vld [vmem:[#allocation35_spill] sm:$0xff] }
 0x227   : > { %9227 = vmatprep.mubr.msk.f32.mxu0 %vm3767_vm15, %v11796_v23  ;;  %v11809_v20 = vsel %vm3569_vm14, %v3545_v32, %v14072_v3  ;;  %v3496_v53 = vsel %vm479_vm0, %v2679_v62, %v2966_v12  ;;  %v3602_v7 = vsel %vm3569_vm14, %v3550_v47, %v14074_v42  ;;  %v3553_v28 = vsel %vm3517_vm2, %v3501_v41, %v14076_v29  ;;  %v14080_v32 = vld [vmem:[#allocation32_spill] sm:$0xff]  ;;  %v2682_v41 = vld [vmem:[#allocation2 + $0x108] sm:$0xff] }
 0x228   : > { %v2968_v26 = vpop.permute.xlu1 %2967  ;;  %9228 = vmatmul.mubr.msk.f32.gmra.mxu0 %vm3767_vm15, %v11799_v25  ;;  %v3723_v24 = vrot.slane %v11809_v20, 1  ;;  %9294 = vmatprep.mubr.msk.f32.mxu1 %vm3767_vm15, %v11809_v20  ;;  %v3548_v50 = vsel %vm3517_vm2, %v3496_v53, %v14075_v38  ;;  %v3504_v58 = vsel %vm479_vm0, %v2687_v48, %v14079_v22  ;;  %v11845_v6 = vsel %vm3677_vm1, %v3724_v37, %v3726_v11  ;;  %v14083_v11 = vld [vmem:[#allocation36_spill] sm:$0xff]  ;;  %v2685_v38 = vld [vmem:[#allocation2 + $0x120] sm:$0xff] }
 0x229   : > { %v3497_v17 = vsel %vm479_vm0, %v2680_v27, %v2968_v26  ;;  %9295 = vmatmul.mubr.msk.f32.gmra.mxu1 %vm3767_vm15, %v11803_v40  ;;  %v11833_v35 = vsel %vm3569_vm14, %v3548_v50, %v14078_v1  ;;  %v3731_v12 = vrot.slane %v3602_v7, 1  ;;  %v14081_v27 = vld [vmem:[#allocation12_spill] sm:$0xff]  ;;  %v2690_v50 = vld [vmem:[#allocation2 + $0x148] sm:$0x1] }
 0x22a   : > { %v3549_v15 = vsel %vm3517_vm2, %v3497_v17, %v14077_v19  ;;  %v11836_v47 = vsel %vm3677_vm1, %v3723_v24, %v3724_v37  ;;  %9297 = vmatprep.mubr.msk.f32.mxu1 %vm3767_vm15, %v11833_v35  ;;  %v2974_v62 = vpop.permute.xlu0 %2973  ;;  %v3728_v3 = vrot.slane %v11833_v35, 1  ;;  %v3605_v37 = vsel %vm3569_vm14, %v3553_v28, %v14081_v27  ;;  %v14082_v26 = vld [vmem:[#allocation40_spill] sm:$0xff]  ;;  %v14084_v17 = vld [vmem:[#allocation39_spill] sm:$0xff]  ;;  %v14085_v19 = vld [vmem:[#allocation37_spill] sm:$0xff] }
 0x22b   : > { %9230 = vmatprep.mubr.msk.f32.mxu0 %vm3767_vm15, %v11836_v47  ;;  %v11849_v45 = vsel %vm3569_vm14, %v3549_v15, %v14080_v32  ;;  %v3500_v59 = vsel %vm479_vm0, %v2683_v18, %v2974_v62  ;;  %v3556_v24 = vsel %vm3517_vm2, %v3504_v58, %v14082_v26  ;;  %v14087_v22 = vld [vmem:[#allocation38_spill] sm:$0xff]  ;;  %v14088_v32 = vld [vmem:[#allocation15_spill] sm:$0xff]  ;;  %v3736_v26 = vrot.slane %v3605_v37, 1 }
 0x22c   : > { %v2972_v48 = vpop.permute.xlu1 %2971  ;;  %9231 = vmatmul.mubr.msk.f32.gmra.mxu0 %vm3767_vm15, %v11845_v6  ;;  %v3729_v53 = vrot.slane %v11849_v45, 1  ;;  %v3552_v42 = vsel %vm3517_vm2, %v3500_v59, %v14083_v11  ;;  %v2686_v59 = vld [vmem:[#allocation2 + $0x128] sm:$0xff]  ;;  %v14090_v11 = vld [vmem:[#allocation44_spill] sm:$0xff] }
 0x22d   : > { %v3499_v7 = vsel %vm479_vm0, %v2682_v41, %v2972_v48  ;;  %9298 = vmatmul.mubr.msk.f32.gmra.mxu1 %vm3767_vm15, %v11849_v45  ;;  %v11875_v15 = vsel %vm3569_vm14, %v3552_v42, %v14085_v19  ;;  %v14092_v19 = vld [vmem:[#allocation41_spill] sm:$0xff] }
 0x22e   : > { %v3551_v18 = vsel %vm3517_vm2, %v3499_v7, %v14084_v17  ;;  %v11868_v29 = vsel %vm3677_vm1, %v3728_v3, %v3729_v53  ;;  %v11871_v28 = vsel %vm3677_vm1, %v3729_v53, %v3731_v12  ;;  %14086 = vst [vmem:[#allocation20_spill] sm:$0xff] %v11875_v15  ;;  %v2978_v1 = vpop.permute.xlu0 %2977  ;;  %v3734_v62 = vrot.slane %v11875_v15, 1  ;;  %v14089_v53 = vld [vmem:[#allocation14_spill] sm:$0xff]  ;;  %v14091_v17 = vld [vmem:[#allocation45_spill] sm:$0xff] }
 0x22f   : > { %9233 = vmatprep.mubr.msk.f32.mxu0 %vm3767_vm15, %v11868_v29  ;;  %v11881_v58 = vsel %vm3569_vm14, %v3551_v18, %v14087_v22  ;;  %v3608_v3 = vsel %vm3569_vm14, %v3556_v24, %v14088_v32  ;;  %v3502_v12 = vsel %vm479_vm0, %v2685_v38, %v2978_v1  ;;  %v3507_v27 = vsel %vm479_vm0, %v2690_v50, %v14089_v53  ;;  %v2689_v7 = vld [vmem:[#allocation2 + $0x140] sm:$0xff]  ;;  %v9269_v22 = vpop.f32.mrf.mxu1  ;;  %v14093_v32 = vld [vmem:[#allocation43_spill] sm:$0xff] }
 0x230   : > { %v2980_v41 = vpop.permute.xlu1 %2979  ;;  %9234 = vmatmul.mubr.msk.f32.gmra.mxu0 %vm3767_vm15, %v11871_v28  ;;  %v3733_v48 = vrot.slane %v11881_v58, 1  ;;  %9300 = vmatprep.mubr.msk.f32.mxu1 %vm3767_vm15, %v11881_v58  ;;  %v3554_v42 = vsel %vm3517_vm2, %v3502_v12, %v14090_v11  ;;  %v2693_v38 = vld [vmem:[#allocation2 + $0x160] sm:$0x1]  ;;  %v3559_v18 = vsel %vm3517_vm2, %v3507_v27, %v14091_v17  ;;  %v3741_v12 = vrot.slane %v3608_v3, 1  ;;  %v14095_v27 = vld [vmem:[#allocation42_spill] sm:$0xff] }
 0x231   : > { %v3503_v24 = vsel %vm479_vm0, %v2686_v59, %v2980_v41  ;;  %9301 = vmatmul.mubr.msk.f32.gmra.mxu1 %vm3767_vm15, %v11875_v15  ;;  %v11905_v37 = vsel %vm3569_vm14, %v3554_v42, %v14093_v32  ;;  %v9205_v41 = vpop.f32.mrf.mxu0  ;;  %v11915_v53 = vsel %vm3677_vm1, %v3734_v62, %v3736_v26  ;;  %v14098_v32 = vld [vmem:[#allocation17_spill] sm:$0xff]  ;;  %v14099_v26 = vld [vmem:[#allocation16_spill] sm:$0xff] }
 0x232   : > { %v3555_v1 = vsel %vm3517_vm2, %v3503_v24, %v14092_v19  ;;  %14094 = vst [vmem:[#allocation6_spill] sm:$0xff] %v11905_v37  ;;  %v11908_v50 = vsel %vm3677_vm1, %v3733_v48, %v3734_v62  ;;  %9303 = vmatprep.mubr.msk.f32.mxu1 %vm3767_vm15, %v11905_v37  ;;  %v2986_v59 = vpop.permute.xlu0 %2985  ;;  %v3738_v42 = vrot.slane %v11905_v37, 1  ;;  %v11923_v3 = vadd.f32 %v9269_v22, %v9205_v41  ;;  %v2688_v24 = vld [vmem:[#allocation2 + $0x138] sm:$0xff]  ;;  %v2691_v22 = vld [vmem:[#allocation2 + $0x150] sm:$0xff] }
 0x233   : > { %9236 = vmatprep.mubr.msk.f32.mxu0 %vm3767_vm15, %v11908_v50  ;;  %v11919_v11 = vsel %vm3569_vm14, %v3555_v1, %v14095_v27  ;;  %v3506_v48 = vsel %vm479_vm0, %v2689_v7, %v2986_v59  ;;  %v3510_v62 = vsel %vm479_vm0, %v2693_v38, %v14098_v32  ;;  %v3611_v1 = vsel %vm3569_vm14, %v3559_v18, %v14099_v26  ;;  %v14100_v27 = vld [vmem:[#allocation46_spill] sm:$0xff]  ;;  %v2692_v26 = vld [vmem:[#allocation2 + $0x158] sm:$0xff] }
 0x234   : > { %14096 = vst [vmem:[#allocation7_spill] sm:$0xff] %v11919_v11  ;;  %14097 = vst [vmem:[#allocation24_spill] sm:$0xff] %v11923_v3  ;;  %v2984_v17 = vpop.permute.xlu1 %2983  ;;  %9237 = vmatmul.mubr.msk.f32.gmra.mxu0 %vm3767_vm15, %v11915_v53  ;;  %v3739_v19 = vrot.slane %v11919_v11, 1  ;;  %v3558_v37 = vsel %vm3517_vm2, %v3506_v48, %v14100_v27  ;;  %v14101_v59 = vld [vmem:[#allocation50_spill] sm:$0xff]  ;;  %v14102_v3 = vld [vmem:[#allocation49_spill] sm:$0xff] }
 0x235   : > { %v3505_v7 = vsel %vm479_vm0, %v2688_v24, %v2984_v17  ;;  %9304 = vmatmul.mubr.msk.f32.gmra.mxu1 %vm3767_vm15, %v11919_v11  ;;  %v3562_v41 = vsel %vm3517_vm2, %v3510_v62, %v14101_v59  ;;  %v14103_v48 = vld [vmem:[#allocation48_spill] sm:$0xff]  ;;  %v14105_v17 = vld [vmem:[#allocation47_spill] sm:$0xff]  ;;  %v14110_v11 = vld [vmem:[#allocation53_spill] sm:$0xff] }
 0x236   : > { %v3557_v15 = vsel %vm3517_vm2, %v3505_v7, %v14102_v3  ;;  %v11942_v38 = vsel %vm3677_vm1, %v3738_v42, %v3739_v19  ;;  %v11945_v18 = vsel %vm3677_vm1, %v3739_v19, %v3741_v12  ;;  %v2990_v32 = vpop.permute.xlu0 %2989  ;;  %v11955_v62 = vsel %vm3569_vm14, %v3558_v37, %v14105_v17  ;;  %v14107_v27 = vld [vmem:[#allocation19_spill] sm:$0xff]  ;;  %v14108_v37 = vld [vmem:[#allocation54_spill] sm:$0xff] }
 0x237   : > { %9239 = vmatprep.mubr.msk.f32.mxu0 %vm3767_vm15, %v11942_v38  ;;  %v11951_v24 = vsel %vm3569_vm14, %v3557_v15, %v14103_v48  ;;  %14106 = vst [vmem:[#allocation21_spill] sm:$0xff] %v11955_v62  ;;  %v3508_v3 = vsel %vm479_vm0, %v2691_v22, %v2990_v32  ;;  %v3744_v19 = vrot.slane %v11955_v62, 1  ;;  %v3746_v15 = vrot.slane %v3611_v1, 1  ;;  %v2695_v32 = vld [vmem:[#allocation2 + $0x170] sm:$0xff] }
 0x238   : > { %14104 = vst [vmem:[#allocation25_spill] sm:$0xff] %v11951_v24  ;;  %v2992_v42 = vpop.permute.xlu1 %2991  ;;  %9240 = vmatmul.mubr.msk.f32.gmra.mxu0 %vm3767_vm15, %v11945_v18  ;;  %v3743_v12 = vrot.slane %v11951_v24, 1  ;;  %9306 = vmatprep.mubr.msk.f32.mxu1 %vm3767_vm15, %v11951_v24  ;;  %v3614_v7 = vsel %vm3569_vm14, %v3562_v41, %v14107_v27  ;;  %v3560_v59 = vsel %vm3517_vm2, %v3508_v3, %v14108_v37  ;;  %v14109_v48 = vld [vmem:[#allocation51_spill] sm:$0xff]  ;;  %v2696_v27 = vld [vmem:[#allocation2 + $0x178] sm:$0x1] }
 0x239   : > { %v3509_v22 = vsel %vm479_vm0, %v2692_v26, %v2992_v42  ;;  %9307 = vmatmul.mubr.msk.f32.gmra.mxu1 %vm3767_vm15, %v11955_v62  ;;  %v11975_v24 = vsel %vm3569_vm14, %v3560_v59, %v14110_v11  ;;  %v11985_v3 = vsel %vm3677_vm1, %v3744_v19, %v3746_v15  ;;  %v14113_v26 = vld [vmem:[#allocation52_spill] sm:$0xff]  ;;  %v3751_v11 = vrot.slane %v3614_v7, 1  ;;  %v2694_v59 = vld [vmem:[#allocation2 + $0x168] sm:$0xff]  ;;  %v14114_v15 = vld [vmem:[#allocation57_spill] sm:$0xff] }
 0x23a   : > { %v3561_v17 = vsel %vm3517_vm2, %v3509_v22, %v14109_v48  ;;  %14111 = vst [vmem:[#allocation23_spill] sm:$0xff] %v11975_v24  ;;  %v11978_v1 = vsel %vm3677_vm1, %v3743_v12, %v3744_v19  ;;  %9309 = vmatprep.mubr.msk.f32.mxu1 %vm3767_vm15, %v11975_v24  ;;  %v2998_v41 = vpop.permute.xlu0 %2997  ;;  %14112 = vst [vmem:[#allocation9_spill] sm:$0xff] %v11985_v3  ;;  %v3748_v37 = vrot.slane %v11975_v24, 1  ;;  %v14116_v24 = vld [vmem:[#allocation56_spill] sm:$0xff] }
 0x23b   : > { %9242 = vmatprep.mubr.msk.f32.mxu0 %vm3767_vm15, %v11978_v1  ;;  %v11989_v42 = vsel %vm3569_vm14, %v3561_v17, %v14113_v26  ;;  %v3512_v12 = vsel %vm479_vm0, %v2695_v32, %v2998_v41  ;;  %v14115_v41 = vld [vmem:[#allocation18_spill] sm:$0xff] }
 0x23c   : > { %v2996_v22 = vpop.permute.xlu1 %2995  ;;  %9243 = vmatmul.mubr.msk.f32.gmra.mxu0 %vm3767_vm15, %v11985_v3  ;;  %v3749_v48 = vrot.slane %v11989_v42, 1  ;;  %v3513_v26 = vsel %vm479_vm0, %v2696_v27, %v14115_v41  ;;  %v3564_v62 = vsel %vm3517_vm2, %v3512_v12, %v14116_v24 }
 0x23d   : > { %v3511_v19 = vsel %vm479_vm0, %v2694_v59, %v2996_v22  ;;  %9310 = vmatmul.mubr.msk.f32.gmra.mxu1 %vm3767_vm15, %v11989_v42  ;;  %v14117_v59 = vld [vmem:[#allocation58_spill] sm:$0xff] }
 0x23e   : > { %v3563_v17 = vsel %vm3517_vm2, %v3511_v19, %v14114_v15  ;;  %v12002_v7 = vsel %vm3677_vm1, %v3748_v37, %v3749_v48  ;;  %v12005_v32 = vsel %vm3677_vm1, %v3749_v48, %v3751_v11  ;;  %v3406_v3 = vpop.permute.xlu0 %3405  ;;  %v14118_v19 = vld [vmem:[#allocation55_spill] sm:$0xff] }
 0x23f   : > { %9245 = vmatprep.mubr.msk.f32.mxu0 %vm3767_vm15, %v12002_v7  ;;  %v12015_v22 = vsel %vm3569_vm14, %v3563_v17, %v14117_v59  ;;  %v3565_v37 = vsel %vm3517_vm2, %v3513_v26, %v14118_v19  ;;  %v12020_v11 = vsel %vm3569_vm14, %v3564_v62, %v3406_v3 }
 0x240   : > { %v3408_v48 = vpop.permute.xlu1 %3407  ;;  %9246 = vmatmul.mubr.msk.f32.gmra.mxu0 %vm3767_vm15, %v12005_v32  ;;  %v3753_v24 = vrot.slane %v12015_v22, 1  ;;  %9312 = vmatprep.mubr.msk.f32.mxu1 %vm3767_vm15, %v12015_v22  ;;  %v3754_v27 = vrot.slane %v12020_v11, 1 }
 0x241   : > { %v3617_v12 = vsel %vm3569_vm14, %v3565_v37, %v3408_v48  ;;  %9313 = vmatmul.mubr.msk.f32.gmra.mxu1 %vm3767_vm15, %v12020_v11 }
 0x242   : > { %v3756_v15 = vrot.slane %v3617_v12, 1  ;;  %9395 = vmatprep.mubr.msk.f32.mxu1 %vm3767_vm15, %v11548_v49  ;;  %v12034_v62 = vsel %vm3677_vm1, %v3753_v24, %v3754_v27 }
 0x243   : > { %9248 = vmatprep.mubr.msk.f32.mxu0 %vm3767_vm15, %v12034_v62 }
 0x244   : > { %v12039_v3 = vsel %vm3677_vm1, %v3754_v27, %v3756_v15 }
 0x245   : > { %9249 = vmatmul.mubr.msk.f32.gmra.mxu0 %vm3767_vm15, %v12039_v3  ;;  %9396 = vmatmul.mubr.msk.f32.vlgmr.msra.gmra.mxu1 %vm3767_vm15, %v11557_v8 }
 0x246   : > { %9331 = vmatprep.mubr.msk.f32.mxu0 %vm3767_vm15, %v11523_v9  ;;  %9398 = vmatprep.mubr.msk.f32.mxu1 %vm3767_vm15, %v11580_v16  ;;  %v3206_v9 = vpop.permute.xlu1 %3205  ;;  %v2698_v16 = vld [vmem:[#allocation2 + $0x188] sm:$0xff] }
 0x249   : > { %9332 = vmatmul.mubr.msk.f32.vlgmr.msra.gmra.mxu0 %vm3767_vm15, %v11519_v13  ;;  %9399 = vmatmul.mubr.msk.f32.gmra.mxu1 %vm3767_vm15, %v11583_v60  ;;  %v3006_v13 = vpop.permute.xlu0 %3005 }
 0x24a   : > { %9334 = vmatprep.mubr.msk.f32.mxu0 %vm3767_vm15, %v11545_v33  ;;  %9401 = vmatprep.mubr.msk.f32.mxu1 %vm3767_vm15, %v11620_v55  ;;  %v3210_v49 = vpop.permute.xlu1 %3209  ;;  %v14119_v55 = vld [vmem:[#allocation20_spill] sm:$0xff] }
 0x24d   : > { %9335 = vmatmul.mubr.msk.f32.gmra.mxu0 %vm3767_vm15, %v11561_v63  ;;  %9402 = vmatmul.mubr.msk.f32.gmra.mxu1 %vm3767_vm15, %v11629_v4  ;;  %v3208_v33 = vpop.permute.xlu0 %3207  ;;  %v2697_v63 = vld [vmem:[#allocation2 + $0x180] sm:$0xff] }
 0x24e   : > { %9337 = vmatprep.mubr.msk.f32.mxu0 %vm3767_vm15, %v11593_v46  ;;  %9404 = vmatprep.mubr.msk.f32.mxu1 %vm3767_vm15, %v11652_v51  ;;  %v3004_v60 = vpop.permute.xlu1 %3003  ;;  %v2699_v46 = vld [vmem:[#allocation2 + $0x190] sm:$0x1] }
 0x24f   : > { %v3515_v4 = vsel %vm479_vm0, %v2698_v16, %v3004_v60  ;;  %v3516_v51 = vsel %vm479_vm0, %v2699_v46, %v3006_v13 }
 0x251   : > { %9338 = vmatmul.mubr.msk.f32.gmra.mxu0 %vm3767_vm15, %v11587_v31  ;;  %9405 = vmatmul.mubr.msk.f32.gmra.mxu1 %vm3767_vm15, %v11655_v2  ;;  %v3410_v8 = vpop.permute.xlu0 %3409 }
 0x252   : > { %9340 = vmatprep.mubr.msk.f32.mxu0 %vm3767_vm15, %v11617_v61  ;;  %9407 = vmatprep.mubr.msk.f32.mxu1 %vm3767_vm15, %v11692_v5  ;;  %v14122_v5 = vld [vmem:[#allocation9_spill] sm:$0xff] }
 0x255   : > { %9341 = vmatmul.mubr.msk.f32.gmra.mxu0 %vm3767_vm15, %v11633_v36  ;;  %9408 = vmatmul.mubr.msk.f32.gmra.mxu1 %vm3767_vm15, %v11701_v56  ;;  %v3002_v31 = vpop.permute.xlu0 %3001  ;;  %v14120_v36 = vld [vmem:[#allocation6_spill] sm:$0xff]  ;;  %v3568_v56 = vsel %vm3517_vm2, %v3516_v51, %v3210_v49 }
 0x256   : > { %9343 = vmatprep.mubr.msk.f32.mxu0 %vm3767_vm15, %v11665_v52  ;;  %9410 = vmatprep.mubr.msk.f32.mxu1 %vm3767_vm15, %v11724_v43  ;;  %v3514_v61 = vsel %vm479_vm0, %v2697_v63, %v3002_v31  ;;  %v3567_v52 = vsel %vm3517_vm2, %v3515_v4, %v3208_v33 }
 0x257   : > { %v3566_v2 = vsel %vm3517_vm2, %v3514_v61, %v3206_v9 }
 0x259   : > { %9344 = vmatmul.mubr.msk.f32.gmra.mxu0 %vm3767_vm15, %v11659_v34  ;;  %9411 = vmatmul.mubr.msk.f32.gmra.mxu1 %vm3767_vm15, %v11727_v14  ;;  %v3412_v34 = vpop.permute.xlu1 %3411  ;;  %v3414_v43 = vpop.permute.xlu0 %3413  ;;  %v14123_v14 = vld [vmem:[#allocation25_spill] sm:$0xff] }
 0x25a   : > { %9346 = vmatprep.mubr.msk.f32.mxu0 %vm3767_vm15, %v11689_v57  ;;  %9413 = vmatprep.mubr.msk.f32.mxu1 %vm3767_vm15, %v11764_v10  ;;  %v14121_v57 = vld [vmem:[#allocation7_spill] sm:$0xff]  ;;  %v14124_v10 = vld [vmem:[#allocation21_spill] sm:$0xff] }
 0x25d   : > { %9347 = vmatmul.mubr.msk.f32.gmra.mxu0 %vm3767_vm15, %v11705_v54  ;;  %9414 = vmatmul.mubr.msk.f32.gmra.mxu1 %vm3767_vm15, %v11773_v0  ;;  %v3618_v54 = vsel %vm3569_vm14, %v3566_v2, %v3410_v8  ;;  %v14125_v0 = vld [vmem:[#allocation23_spill] sm:$0xff] }
 0x25e   : > { %9349 = vmatprep.mubr.msk.f32.mxu0 %vm3767_vm15, %v11737_v21  ;;  %9416 = vmatprep.mubr.msk.f32.mxu1 %vm3767_vm15, %v11796_v23  ;;  %v4619_v21 = vrot.slane %v3618_v54, 1 }
 0x261   : > { %9350 = vmatmul.mubr.msk.f32.gmra.mxu0 %vm3767_vm15, %v11731_v39  ;;  %9417 = vmatmul.mubr.msk.f32.gmra.mxu1 %vm3767_vm15, %v11799_v25  ;;  %v3619_v39 = vsel %vm3569_vm14, %v3567_v52, %v3412_v34 }
 0x262   : > { %9352 = vmatprep.mubr.msk.f32.mxu0 %vm3767_vm15, %v11761_v30  ;;  %9419 = vmatprep.mubr.msk.f32.mxu1 %vm3767_vm15, %v11836_v47  ;;  %v3620_v30 = vsel %vm3569_vm14, %v3568_v56, %v3414_v43  ;;  %v12178_v47 = vpop.f32.mrf.mxu0  ;;  %v5103_v56 = vld [vmem:[%s13985_s5 + $0x8] sm:$0xff] }
 0x263   : > { %v4622_v23 = vrot.slane %v3620_v30, 1 }
 0x265   : > { %9353 = vmatmul.mubr.msk.f32.gmra.mxu0 %vm3767_vm15, %v11777_v44  ;;  %9420 = vmatmul.mubr.msk.f32.gmra.mxu1 %vm3767_vm15, %v11845_v6  ;;  %v4620_v44 = vrot.slane %v3619_v39, 1 }
 0x266   : > { %9355 = vmatprep.mubr.msk.f32.mxu0 %vm3767_vm15, %v11809_v20  ;;  %9422 = vmatprep.mubr.msk.f32.mxu1 %vm3767_vm15, %v11868_v29  ;;  %v12176_v20 = vpop.f32.mrf.mxu1 }
 0x267   : > { %v4621_v25 = vsel %vm3677_vm1, %v4619_v21, %v4620_v44 }
 0x269   : > { %9356 = vmatmul.mubr.msk.f32.gmra.mxu0 %vm3767_vm15, %v11803_v40  ;;  %9423 = vmatmul.mubr.msk.f32.gmra.mxu1 %vm3767_vm15, %v11871_v28  ;;  %v4623_v40 = vsel %vm3677_vm1, %v4620_v44, %v4622_v23 }
 0x26a   : > { %9358 = vmatprep.mubr.msk.f32.mxu0 %vm3767_vm15, %v11833_v35  ;;  %9425 = vmatprep.mubr.msk.f32.mxu1 %vm3767_vm15, %v11908_v50 }
 0x26d   : > { %9359 = vmatmul.mubr.msk.f32.gmra.mxu0 %vm3767_vm15, %v11849_v45  ;;  %9426 = vmatmul.mubr.msk.f32.gmra.mxu1 %vm3767_vm15, %v11915_v53 }
 0x26e   : > { %9361 = vmatprep.mubr.msk.f32.mxu0 %vm3767_vm15, %v11881_v58  ;;  %9428 = vmatprep.mubr.msk.f32.mxu1 %vm3767_vm15, %v11942_v38 }
 0x271   : > { %9362 = vmatmul.mubr.msk.f32.gmra.mxu0 %vm3767_vm15, %v14119_v55  ;;  %9429 = vmatmul.mubr.msk.f32.gmra.mxu1 %vm3767_vm15, %v11945_v18 }
 0x272   : > { %9364 = vmatprep.mubr.msk.f32.mxu0 %vm3767_vm15, %v14120_v36  ;;  %9431 = vmatprep.mubr.msk.f32.mxu1 %vm3767_vm15, %v11978_v1 }
 0x275   : > { %9365 = vmatmul.mubr.msk.f32.gmra.mxu0 %vm3767_vm15, %v14121_v57  ;;  %9432 = vmatmul.mubr.msk.f32.gmra.mxu1 %vm3767_vm15, %v14122_v5 }
 0x276   : > { %9367 = vmatprep.mubr.msk.f32.mxu0 %vm3767_vm15, %v14123_v14  ;;  %9434 = vmatprep.mubr.msk.f32.mxu1 %vm3767_vm15, %v12002_v7  ;;  %v7947_v14 = vld [vmem:[%s13985_s5 + $0x88] sm:$0xff] }
 0x279   : > { %9368 = vmatmul.mubr.msk.f32.gmra.mxu0 %vm3767_vm15, %v14124_v10  ;;  %9435 = vmatmul.mubr.msk.f32.gmra.mxu1 %vm3767_vm15, %v12005_v32 }
 0x27a   : > { %9370 = vmatprep.mubr.msk.f32.mxu0 %vm3767_vm15, %v14125_v0  ;;  %9437 = vmatprep.mubr.msk.f32.mxu1 %vm3767_vm15, %v12034_v62 }
 0x27d   : > { %9371 = vmatmul.mubr.msk.f32.gmra.mxu0 %vm3767_vm15, %v11989_v42  ;;  %9438 = vmatmul.mubr.msk.f32.gmra.mxu1 %vm3767_vm15, %v12039_v3 }
 0x27e   : > { %9373 = vmatprep.mubr.msk.f32.mxu0 %vm3767_vm15, %v12015_v22  ;;  %9440 = vmatprep.mubr.msk.f32.mxu1 %vm3767_vm15, %v4621_v25 }
 0x281   : > { %9374 = vmatmul.mubr.msk.f32.gmra.mxu0 %vm3767_vm15, %v12020_v11  ;;  %9441 = vmatmul.mubr.msk.f32.gmra.mxu1 %vm3767_vm15, %v4623_v40 }
 0x282   : > { %9376 = vmatprep.mubr.msk.f32.mxu0 %vm3767_vm15, %v3618_v54  ;;  %5313 = vmatprep.mubr.f32.mxu1 %v7947_v14 }
 0x285   : > { %9377 = vmatmul.mubr.msk.f32.gmra.mxu0 %vm3767_vm15, %v3619_v39 }
 0x286   : > { %5182 = vmatprep.mubr.f32.mxu0 %v5103_v56  ;;  %v4188_v56 = vadd.f32 %v12176_v20, %v12178_v47 }
 0x2c9   : > { %v9272_v35 = vpop.f32.mrf.mxu1 }
 0x2cb   : > { %v12180_v6 = vpop.f32.mrf.mxu1 }
 0x2cc   : > { %v9208_v45 = vpop.f32.mrf.mxu0 }
 0x2cd   : > { %v12182_v29 = vadd.f32 %v9272_v35, %v9208_v45  ;;  %v9275_v28 = vpop.f32.mrf.mxu1 }
 0x2ce   : > { %v12184_v58 = vpop.f32.mrf.mxu0 }
 0x2cf   : > { %v12186_v50 = vpop.f32.mrf.mxu1 }
 0x2d0   : > { %v9211_v53 = vpop.f32.mrf.mxu0 }
 0x2d1   : > { %v12188_v38 = vadd.f32 %v9275_v28, %v9211_v53  ;;  %v9278_v18 = vpop.f32.mrf.mxu1 }
 0x2d2   : > { %v12190_v1 = vpop.f32.mrf.mxu0 }
 0x2d3   : > { %v12192_v42 = vpop.f32.mrf.mxu1 }
 0x2d4   : > { %v9214_v17 = vpop.f32.mrf.mxu0 }
 0x2d5   : > { %v12194_v7 = vadd.f32 %v9278_v18, %v9214_v17  ;;  %v9281_v32 = vpop.f32.mrf.mxu1 }
 0x2d6   : > { %v12196_v41 = vpop.f32.mrf.mxu0 }
 0x2d7   : > { %v12198_v26 = vpop.f32.mrf.mxu1 }
 0x2d8   : > { %v9217_v59 = vpop.f32.mrf.mxu0 }
 0x2d9   : > { %v12200_v22 = vadd.f32 %v9281_v32, %v9217_v59  ;;  %v9284_v19 = vpop.f32.mrf.mxu1 }
 0x2da   : > { %v12202_v37 = vpop.f32.mrf.mxu0 }
 0x2db   : > { %v12204_v11 = vpop.f32.mrf.mxu1 }
 0x2dc   : > { %v9220_v48 = vpop.f32.mrf.mxu0 }
 0x2dd   : > { %v12206_v24 = vadd.f32 %v9284_v19, %v9220_v48  ;;  %v9287_v27 = vpop.f32.mrf.mxu1 }
 0x2de   : > { %v12208_v12 = vpop.f32.mrf.mxu0 }
 0x2df   : > { %v4247_v15 = vpop.f32.mrf.mxu1 }
 0x2e0   : > { %v9223_v62 = vpop.f32.mrf.mxu0 }
 0x2e1   : > { %v12210_v3 = vadd.f32 %v9287_v27, %v9223_v62  ;;  %v9290_v13 = vpop.f32.mrf.mxu1 }
 0x2e2   : > { %v3958_v9 = vpop.f32.mrf.mxu0 }
 0x2e3   : > { %v12212_v33 = vadd.f32 %v4247_v15, %v3958_v9  ;;  %v4257_v49 = vpop.f32.mrf.mxu1 }
 0x2e4   : > { %v9226_v8 = vpop.f32.mrf.mxu0 }
 0x2e5   : > { %v12214_v63 = vadd.f32 %v9290_v13, %v9226_v8  ;;  %v9293_v16 = vpop.f32.mrf.mxu1 }
 0x2e6   : > { %v3968_v60 = vpop.f32.mrf.mxu0 }
 0x2e7   : > { %v12216_v31 = vadd.f32 %v4257_v49, %v3968_v60  ;;  %v4267_v46 = vpop.f32.mrf.mxu1 }
 0x2e8   : > { %v9229_v61 = vpop.f32.mrf.mxu0 }
 0x2e9   : > { %v12218_v55 = vadd.f32 %v9293_v16, %v9229_v61  ;;  %v9296_v4 = vpop.f32.mrf.mxu1 }
 0x2ea   : > { %v3978_v36 = vpop.f32.mrf.mxu0 }
 0x2eb   : > { %14126 = vst [vmem:[#allocation22_spill] sm:$0xff] %v12218_v55  ;;  %v12220_v51 = vadd.f32 %v4267_v46, %v3978_v36  ;;  %v4277_v2 = vpop.f32.mrf.mxu1 }
 0x2ec   : > { %v9232_v34 = vpop.f32.mrf.mxu0 }
 0x2ed   : > { %14127 = vst [vmem:[#allocation8_spill] sm:$0xff] %v12220_v51  ;;  %v12222_v52 = vadd.f32 %v9296_v4, %v9232_v34  ;;  %v9299_v57 = vpop.f32.mrf.mxu1 }
 0x2ee   : > { %v3988_v5 = vpop.f32.mrf.mxu0 }
 0x2ef   : > { %14128 = vst [vmem:[#allocation30_spill] sm:$0xff] %v12222_v52  ;;  %v12227_v54 = vadd.f32 %v4277_v2, %v3988_v5  ;;  %v4287_v43 = vpop.f32.mrf.mxu1 }
 0x2f0   : > { %v9235_v39 = vpop.f32.mrf.mxu0 }
 0x2f1   : > { %14129 = vst [vmem:[#allocation26_spill] sm:$0xff] %v12227_v54  ;;  %v12232_v21 = vadd.f32 %v9299_v57, %v9235_v39  ;;  %v9302_v30 = vpop.f32.mrf.mxu1  ;;  %v4238_v54 = vadd.f32 %v12204_v11, %v12208_v12  ;;  %v12341_v12 = vld [vmem:[%s13984_s4] ss:$0 sm:$0xff] }
 0x2f2   : > { %v3998_v10 = vpop.f32.mrf.mxu0 }
 0x2f3   : > { %v12234_v0 = vadd.f32 %v4287_v43, %v3998_v10  ;;  %v4297_v44 = vpop.f32.mrf.mxu1  ;;  %v14131_v43 = vld [vmem:[#allocation24_spill] sm:$0xff] }
 0x2f4   : > { %v9238_v23 = vpop.f32.mrf.mxu0 }
 0x2f5   : > { %14130 = vst [vmem:[#allocation29_spill] sm:$0xff] %v12234_v0  ;;  %v12236_v25 = vadd.f32 %v9302_v30, %v9238_v23  ;;  %v9305_v40 = vpop.f32.mrf.mxu1 }
 0x2f6   : > { %v4008_v35 = vpop.f32.mrf.mxu0 }
 0x2f7   : > { %v12238_v45 = vadd.f32 %v4297_v44, %v4008_v35  ;;  %v4307_v28 = vpop.f32.mrf.mxu1  ;;  %v4198_v35 = vadd.f32 %v12180_v6, %v12184_v58 }
 0x2f8   : > { %v9241_v53 = vpop.f32.mrf.mxu0 }
 0x2f9   : > { %v12240_v18 = vadd.f32 %v9305_v40, %v9241_v53  ;;  %v9308_v17 = vpop.f32.mrf.mxu1 }
 0x2fa   : > { %v4018_v32 = vpop.f32.mrf.mxu0 }
 0x2fb   : > { %v12242_v59 = vadd.f32 %v4307_v28, %v4018_v32  ;;  %v4317_v19 = vpop.f32.mrf.mxu1 }
 0x2fc   : > { %v9244_v48 = vpop.f32.mrf.mxu0 }
 0x2fd   : > { %v12244_v27 = vadd.f32 %v9308_v17, %v9244_v48  ;;  %v9311_v15 = vpop.f32.mrf.mxu1 }
 0x2fe   : > { %v4028_v62 = vpop.f32.mrf.mxu0 }
 0x2ff   : > { %v12246_v13 = vadd.f32 %v4317_v19, %v4028_v62  ;;  %v4327_v9 = vpop.f32.mrf.mxu1 }
 0x300   : > { %v9247_v49 = vpop.f32.mrf.mxu0 }
 0x301   : > { %v12248_v8 = vadd.f32 %v9311_v15, %v9247_v49  ;;  %v12250_v16 = vpop.f32.mrf.mxu1  ;;  %v4208_v15 = vadd.f32 %v12186_v50, %v12190_v1 }
 0x302   : > { %v4038_v60 = vpop.f32.mrf.mxu0 }
 0x303   : > { %v12252_v46 = vadd.f32 %v4327_v9, %v4038_v60  ;;  %v12254_v61 = vpop.f32.mrf.mxu1 }
 0x305   : > { %v12256_v4 = vpop.f32.mrf.mxu0  ;;  %v9397_v36 = vpop.f32.mrf.mxu1 }
 0x307   : > { %v12258_v2 = vpop.f32.mrf.mxu0  ;;  %v4703_v34 = vpop.f32.mrf.mxu1 }
 0x308   : > { %v4338_v11 = vadd.f32 %v12254_v61, %v12258_v2 }
 0x309   : > { %v9333_v57 = vpop.f32.mrf.mxu0  ;;  %v9400_v5 = vpop.f32.mrf.mxu1 }
 0x30a   : > { %v4587_v14 = vadd.f32 %v9333_v57, %v14131_v43 }
 0x30b   : > { %v4427_v39 = vpop.f32.mrf.mxu0  ;;  %v4713_v30 = vpop.f32.mrf.mxu1 }
 0x30c   : > { %v12263_v10 = vadd.f32 %v9397_v36, %v4587_v14  ;;  %v4586_v44 = vadd.f32 %v4427_v39, %v4188_v56 }
 0x30d   : > { %v9336_v23 = vpop.f32.mrf.mxu0  ;;  %v9403_v40 = vpop.f32.mrf.mxu1 }
 0x30e   : > { %14132 = vst [vmem:[#allocation27_spill] sm:$0xff] %v12263_v10  ;;  %v12267_v28 = vadd.f32 %v4703_v34, %v4586_v44  ;;  %v4589_v53 = vadd.f32 %v9336_v23, %v12182_v29  ;;  %v4218_v34 = vadd.f32 %v12192_v42, %v12196_v41 }
 0x30f   : > { %v4437_v17 = vpop.f32.mrf.mxu0  ;;  %v4723_v32 = vpop.f32.mrf.mxu1 }
 0x310   : > { %14133 = vst [vmem:[#allocation28_spill] sm:$0xff] %v12267_v28  ;;  %v12270_v19 = vadd.f32 %v9400_v5, %v4589_v53  ;;  %v4588_v20 = vadd.f32 %v4437_v17, %v4198_v35 }
 0x311   : > { %v9339_v47 = vpop.f32.mrf.mxu0  ;;  %v9406_v48 = vpop.f32.mrf.mxu1 }
 0x312   : > { %v12274_v62 = vadd.f32 %v4713_v30, %v4588_v20  ;;  %v4591_v9 = vadd.f32 %v9339_v47, %v12188_v38 }
 0x313   : > { %v4447_v49 = vpop.f32.mrf.mxu0  ;;  %v4733_v6 = vpop.f32.mrf.mxu1 }
 0x314   : > { %14134 = vst [vmem:[#allocation10_spill] sm:$0xff] %v12274_v62  ;;  %v12277_v58 = vadd.f32 %v9403_v40, %v4591_v9  ;;  %v4590_v60 = vadd.f32 %v4447_v49, %v4208_v15 }
 0x315   : > { %v9342_v29 = vpop.f32.mrf.mxu0  ;;  %v9409_v36 = vpop.f32.mrf.mxu1 }
 0x316   : > { %v12281_v57 = vadd.f32 %v4723_v32, %v4590_v60  ;;  %v4593_v5 = vadd.f32 %v9342_v29, %v12194_v7  ;;  %v12353_v61 = vadd.f32 %v12341_v12, %v12277_v58 }
 0x317   : > { %v4457_v56 = vpop.f32.mrf.mxu0  ;;  %v4743_v50 = vpop.f32.mrf.mxu1 }
 0x318   : > { %v12284_v1 = vadd.f32 %v9406_v48, %v4593_v5  ;;  %v4592_v43 = vadd.f32 %v4457_v56, %v4218_v34 }
 0x319   : > { %v9345_v38 = vpop.f32.mrf.mxu0  ;;  %v9412_v14 = vpop.f32.mrf.mxu1 }
 0x31a   : > { %v12286_v39 = vadd.f32 %v4733_v6, %v4592_v43 }
 0x31b   : > { %v4467_v30 = vpop.f32.mrf.mxu0  ;;  %v4753_v44 = vpop.f32.mrf.mxu1 }
 0x31c   : > { %v12369_v58 = vadd.f32 %v12341_v12, %v12286_v39 }
 0x31d   : > { %v9348_v23 = vpop.f32.mrf.mxu0  ;;  %v9415_v40 = vpop.f32.mrf.mxu1 }
 0x31e   : > { %v4597_v55 = vadd.f32 %v9348_v23, %v12206_v24  ;;  %v4343_v24 = vadd.f32 %v12250_v16, %v12256_v4 }
 0x31f   : > { %v4477_v35 = vpop.f32.mrf.mxu0  ;;  %v4763_v53 = vpop.f32.mrf.mxu1 }
 0x321   : > { %v9351_v42 = vpop.f32.mrf.mxu0  ;;  %v9418_v41 = vpop.f32.mrf.mxu1 }
 0x323   : > { %v4487_v17 = vpop.f32.mrf.mxu0  ;;  %v4773_v32 = vpop.f32.mrf.mxu1 }
 0x325   : > { %v9354_v7 = vpop.f32.mrf.mxu0  ;;  %v12288_v20 = vpop.f32.mrf.mxu1 }
 0x326   : > { %14135 = vst [vmem:[#allocation11_spill] sm:$0xff] %v12288_v20  ;;  %v4601_v0 = vadd.f32 %v9354_v7, %v12214_v63 }
 0x327   : > { %v4497_v47 = vpop.f32.mrf.mxu0  ;;  %v12290_v48 = vpop.f32.mrf.mxu1 }
 0x328   : > { %14136 = vst [vmem:[#allocation34_spill] sm:$0xff] %v12290_v48  ;;  %v4877_v16 = vadd.f32 %v9418_v41, %v4601_v0 }
 0x329   : > { %v12292_v15 = vpop.f32.mrf.mxu0  ;;  %v12294_v9 = vpop.f32.mrf.mxu1 }
 0x32a   : > { %14137 = vst [vmem:[#allocation35_spill] sm:$0xff] %v12292_v15  ;;  %14138 = vst [vmem:[#allocation31_spill] sm:$0xff] %v12294_v9  ;;  %v4595_v9 = vadd.f32 %v9345_v38, %v12200_v22  ;;  %v4228_v15 = vadd.f32 %v12198_v26, %v12202_v37  ;;  %v4596_v22 = vadd.f32 %v4477_v35, %v4238_v54 }
 0x32b   : > { %v12296_v49 = vpop.f32.mrf.mxu0  ;;  %v12298_v6 = vpop.f32.mrf.mxu1  ;;  %v4600_v38 = vadd.f32 %v4497_v47, %v12216_v31  ;;  %v4598_v37 = vadd.f32 %v4487_v17, %v12212_v33  ;;  %v12345_v31 = vadd.f32 %v12341_v12, %v12270_v19  ;;  %v12360_v19 = vadd.f32 %v12341_v12, %v12281_v57 }
 0x32c   : > { %14139 = vst [vmem:[#allocation33_spill] sm:$0xff] %v12296_v49  ;;  %14140 = vst [vmem:[#allocation13_spill] sm:$0xff] %v12298_v6 }
 0x32d   : > { %v12300_v60 = vpop.f32.mrf.mxu0  ;;  %v12302_v29 = vpop.f32.mrf.mxu1  ;;  %v4874_v0 = vadd.f32 %v4763_v53, %v4598_v37 }
 0x32e   : > { %14141 = vst [vmem:[#allocation32_spill] sm:$0xff] %v12300_v60  ;;  %14142 = vst [vmem:[#allocation12_spill] sm:$0xff] %v12302_v29  ;;  %v4594_v29 = vadd.f32 %v4467_v30, %v4228_v15  ;;  %v4599_v60 = vadd.f32 %v9351_v42, %v12210_v3 }
 0x32f   : > { %v12304_v34 = vpop.f32.mrf.mxu0  ;;  %v12306_v5 = vpop.f32.mrf.mxu1 }
 0x330   : > { %14143 = vst [vmem:[#allocation40_spill] sm:$0xff] %v12304_v34  ;;  %14144 = vst [vmem:[#allocation36_spill] sm:$0xff] %v12306_v5  ;;  %v4870_v3 = vadd.f32 %v4743_v50, %v4594_v29  ;;  %v4875_v63 = vadd.f32 %v9415_v40, %v4599_v60  ;;  %v4876_v50 = vadd.f32 %v4773_v32, %v4600_v38 }
 0x331   : > { %v12308_v56 = vpop.f32.mrf.mxu0  ;;  %v12310_v43 = vpop.f32.mrf.mxu1 }
 0x332   : > { %14145 = vst [vmem:[#allocation39_spill] sm:$0xff] %v12310_v43  ;;  %v4873_v43 = vadd.f32 %v9412_v14, %v4597_v55  ;;  %v12372_v30 = vadd.f32 %v12341_v12, %v4870_v3  ;;  %v4915_v42 = vadd.f32 %v12341_v12, %v4876_v50  ;;  %v14149_v50 = vld [vmem:[#allocation29_spill] sm:$0xff] }
 0x333   : > { %v12312_v28 = vpop.f32.mrf.mxu0  ;;  %v12314_v10 = vpop.f32.mrf.mxu1 }
 0x334   : > { %14146 = vst [vmem:[#allocation37_spill] sm:$0xff] %v12312_v28  ;;  %14147 = vst [vmem:[#allocation38_spill] sm:$0xff] %v12314_v10  ;;  %v4871_v28 = vadd.f32 %v9409_v36, %v4595_v9  ;;  %v12356_v2 = vadd.f32 %v12341_v12, %v4873_v43  ;;  %v4872_v36 = vadd.f32 %v4753_v44, %v4596_v22  ;;  %vm4947_vm9 = vcmp.ge.f32.partialorder %v4915_v42, 0.0 }
 0x335   : > { %v12316_v62 = vpop.f32.mrf.mxu0  ;;  %v12318_v48 = vpop.f32.mrf.mxu1  ;;  %v12375_v44 = vadd.f32 %v12341_v12, %v4875_v63  ;;  %v4979_v3 = vmul.f32 0.1, %v4915_v42 }
 0x336   : > { %v12348_v33 = vadd.f32 %v12341_v12, %v4871_v28  ;;  %v12364_v28 = vadd.f32 %v12341_v12, %v12284_v1  ;;  %v4916_v1 = vadd.f32 %v12341_v12, %v4877_v16  ;;  %v12383_v39 = vadd.f32 %v12341_v12, %v4872_v36 }
 0x337   : > { %v12320_v20 = vpop.f32.mrf.mxu0  ;;  %v12322_v6 = vpop.f32.mrf.mxu1  ;;  %v12388_v32 = vmul.f32 0.1, %v12356_v2  ;;  %vm4946_vm0 = vcmp.ge.f32.partialorder %v12375_v44, 0.0  ;;  %v4978_v60 = vmul.f32 0.1, %v12375_v44  ;;  %vm4944_vm11 = vcmp.ge.f32.partialorder %v12356_v2, 0.0 }
 0x338   : > { %vm4948_vm8 = vcmp.ge.f32.partialorder %v4916_v1, 0.0  ;;  %v4608_v63 = vadd.f32 %v12320_v20, %v12238_v45  ;;  %vm4942_vm3 = vcmp.ge.f32.partialorder %v12348_v33, 0.0  ;;  %v4607_v20 = vadd.f32 %v12308_v56, %v12232_v21 }
 0x339   : > { %v9369_v49 = vpop.f32.mrf.mxu0  ;;  %v9436_v51 = vpop.f32.mrf.mxu1  ;;  %v14148_v16 = vld [vmem:[#allocation39_spill] sm:$0xff]  ;;  %vm4943_vm6 = vcmp.ge.f32.partialorder %v12383_v39, 0.0  ;;  %vm4940_vm7 = vcmp.ge.f32.partialorder %v12364_v28, 0.0 }
 0x33a   : > { %v4611_v47 = vadd.f32 %v9369_v49, %v12240_v18  ;;  %v4609_v49 = vadd.f32 %v12316_v62, %v12236_v25 }
 0x33b   : > { %v4547_v5 = vpop.f32.mrf.mxu0  ;;  %v4833_v34 = vpop.f32.mrf.mxu1 }
 0x33c   : > { %v4610_v22 = vadd.f32 %v4547_v5, %v12242_v59 }
 0x33d   : > { %v9372_v52 = vpop.f32.mrf.mxu0  ;;  %v9439_v10 = vpop.f32.mrf.mxu1 }
 0x33e   : > { %v4613_v57 = vadd.f32 %v9372_v52, %v12244_v27  ;;  %v12391_v52 = vadd.f32 %v12341_v12, %v4874_v0  ;;  %v4886_v25 = vadd.f32 %v12322_v6, %v4610_v22  ;;  %v12428_v6 = vsel %vm4947_vm9, %v4915_v42, %v4979_v3 }
 0x33f   : > { %v4557_v26 = vpop.f32.mrf.mxu0  ;;  %v4843_v55 = vpop.f32.mrf.mxu1  ;;  %vm4941_vm9 = vcmp.ge.f32.partialorder %v12372_v30, 0.0 }
 0x340   : > { %v4612_v41 = vadd.f32 %v4557_v26, %v12246_v13  ;;  %v4889_v15 = vadd.f32 %v9436_v51, %v4613_v57  ;;  %v4980_v26 = vmul.f32 0.1, %v4916_v1  ;;  %vm4945_vm14 = vcmp.ge.f32.partialorder %v12391_v52, 0.0  ;;  %v14151_v57 = vld [vmem:[#allocation38_spill] sm:$0xff] }
 0x341   : > { %v9375_v54 = vpop.f32.mrf.mxu0  ;;  %v9442_v23 = vpop.f32.mrf.mxu1 }
 0x342   : > { %v4615_v4 = vadd.f32 %v9375_v54, %v12248_v8  ;;  %v4888_v38 = vadd.f32 %v4833_v34, %v4612_v41  ;;  %v4977_v54 = vmul.f32 0.1, %v12391_v52 }
 0x343   : > { %v4567_v14 = vpop.f32.mrf.mxu0  ;;  %v4853_v9 = vpop.f32.mrf.mxu1 }
 0x344   : > { %v4614_v8 = vadd.f32 %v4567_v14, %v12252_v46  ;;  %v4891_v35 = vadd.f32 %v9439_v10, %v4615_v4  ;;  %v12380_v46 = vmul.f32 0.1, %v12348_v33  ;;  %v4927_v62 = vadd.f32 %v12341_v12, %v4888_v38  ;;  %v14150_v14 = vld [vmem:[#allocation37_spill] sm:$0xff] }
 0x345   : > { %v9378_v40 = vpop.f32.mrf.mxu0  ;;  %v4885_v4 = vadd.f32 %v14148_v16, %v4609_v49  ;;  %v4606_v0 = vadd.f32 %v14150_v14, %v14149_v50  ;;  %v12463_v41 = vsel %vm4945_vm14, %v12391_v52, %v4977_v54  ;;  %v12481_v52 = vsel %vm4944_vm11, %v12356_v2, %v12388_v32  ;;  %v14160_v49 = vld [vmem:[#allocation31_spill] sm:$0xff] }
 0x346   : > { %v4617_v53 = vadd.f32 %v9378_v40, %v4343_v24  ;;  %v4890_v27 = vadd.f32 %v4843_v55, %v4614_v8  ;;  %v4930_v13 = vadd.f32 %v12341_v12, %v4891_v35  ;;  %v4887_v24 = vadd.f32 %v12318_v48, %v4611_v47 }
 0x347   : > { %v4577_v17 = vpop.f32.mrf.mxu0  ;;  %v12413_v55 = vsel %vm4948_vm8, %v4916_v1, %v4980_v26  ;;  %v12445_v8 = vsel %vm4946_vm0, %v12375_v44, %v4978_v60  ;;  %v4925_v40 = vadd.f32 %v12341_v12, %v4886_v25  ;;  %v4991_v35 = vmul.f32 0.1, %v4927_v62  ;;  %v14153_v44 = vld [vmem:[#allocation32_spill] sm:$0xff] }
 0x348   : > { %v4893_v10 = vadd.f32 %v9442_v23, %v4617_v53  ;;  %v4616_v7 = vadd.f32 %v4577_v17, %v4338_v11  ;;  %v4929_v37 = vadd.f32 %v12341_v12, %v4890_v27  ;;  %v4928_v11 = vadd.f32 %v12341_v12, %v4889_v15  ;;  %v14152_v53 = vld [vmem:[#allocation30_spill] sm:$0xff]  ;;  %v14154_v27 = vld [vmem:[#allocation12_spill] sm:$0xff] }
 0x349   : > { %v4994_v5 = vmul.f32 0.1, %v4930_v13  ;;  %vm4962_vm13 = vcmp.ge.f32.partialorder %v4930_v13, 0.0  ;;  %v4926_v36 = vadd.f32 %v12341_v12, %v4887_v24  ;;  %v4884_v23 = vadd.f32 %v14151_v57, %v4608_v63  ;;  %v14156_v60 = vld [vmem:[#allocation40_spill] sm:$0xff]  ;;  %v14162_v63 = vld [vmem:[#allocation33_spill] sm:$0xff] }
 0x34a   : > { %v4932_v29 = vadd.f32 %v12341_v12, %v4893_v10  ;;  %v4892_v43 = vadd.f32 %v4853_v9, %v4616_v7  ;;  %v4993_v45 = vmul.f32 0.1, %v4929_v37  ;;  %vm4961_vm4 = vcmp.ge.f32.partialorder %v4929_v37, 0.0  ;;  %v14155_v9 = vld [vmem:[#allocation26_spill] sm:$0xff] }
 0x34b   : > { %v12436_v21 = vsel %vm4962_vm13, %v4930_v13, %v4994_v5  ;;  %v4992_v56 = vmul.f32 0.1, %v4928_v11  ;;  %vm4960_vm5 = vcmp.ge.f32.partialorder %v4928_v11, 0.0  ;;  %v4605_v42 = vadd.f32 %v14153_v44, %v14152_v53  ;;  %v14161_v5 = vld [vmem:[#allocation8_spill] sm:$0xff] }
 0x34c   : > { %v4931_v51 = vadd.f32 %v12341_v12, %v4892_v43  ;;  %vm4964_vm10 = vcmp.ge.f32.partialorder %v4932_v29, 0.0  ;;  %v4996_v18 = vmul.f32 0.1, %v4932_v29  ;;  %v12453_v1 = vsel %vm4961_vm4, %v4929_v37, %v4993_v45  ;;  %v14158_v37 = vld [vmem:[#allocation22_spill] sm:$0xff]  ;;  %v14163_v45 = vld [vmem:[#allocation13_spill] sm:$0xff] }
 0x34d   : > { %vm4959_vm0 = vcmp.ge.f32.partialorder %v4927_v62, 0.0  ;;  %v4975_v17 = vmul.f32 0.1, %v12383_v39  ;;  %v4883_v10 = vadd.f32 %v14154_v27, %v4607_v20  ;;  %v4924_v7 = vadd.f32 %v12341_v12, %v4885_v4 }
 0x34e   : > { %v12406_v59 = vsel %vm4964_vm10, %v4932_v29, %v4996_v18  ;;  %vm4963_vm12 = vcmp.ge.f32.partialorder %v4931_v51, 0.0  ;;  %v4995_v34 = vmul.f32 0.1, %v4931_v51  ;;  %v12471_v47 = vsel %vm4960_vm5, %v4928_v11, %v4992_v56  ;;  %v14157_v29 = vld [vmem:[#allocation36_spill] sm:$0xff] }
 0x34f   : > { %8467 = vmatprep.subr.mxu0 %v12406_v59  ;;  %8523 = vmatprep.subr.mxu1 %v12406_v59  ;;  %v4990_v15 = vmul.f32 0.1, %v4926_v36  ;;  %v4604_v13 = vadd.f32 %v14156_v60, %v14155_v9  ;;  %vm4958_vm8 = vcmp.ge.f32.partialorder %v4926_v36, 0.0  ;;  %v4882_v43 = vadd.f32 %v14157_v29, %v4606_v0  ;;  %v14167_v9 = vld [vmem:[#allocation27_spill] sm:$0xff] }
 0x350   : > { %8468 = vmatpush3.msra.mxu0 %v12413_v55  ;;  %8524 = vmatpush3.msra.mxu1 %v12413_v55  ;;  %v12420_v48 = vsel %vm4963_vm12, %v4931_v51, %v4995_v34  ;;  %v4923_v22 = vadd.f32 %v12341_v12, %v4884_v23  ;;  %v12489_v38 = vsel %vm4959_vm0, %v4927_v62, %v4991_v35  ;;  %v4989_v26 = vmul.f32 0.1, %v4925_v40  ;;  %v14159_v51 = vld [vmem:[#allocation35_spill] sm:$0xff]  ;;  %v14165_v23 = vld [vmem:[#allocation34_spill] sm:$0xff] }
 0x351   : > { %8469 = vmatprep.subr.mxu0 %v12420_v48  ;;  %8525 = vmatprep.subr.mxu1 %v12420_v48  ;;  %v4603_v18 = vadd.f32 %v14159_v51, %v14158_v37  ;;  %v12498_v2 = vsel %vm4943_vm6, %v12383_v39, %v4975_v17  ;;  %vm4957_vm10 = vcmp.ge.f32.partialorder %v4925_v40, 0.0  ;;  %v4973_v32 = vmul.f32 0.1, %v12372_v30 }
 0x352   : > { %8470 = vmatpush3.msra.mxu0 %v12428_v6  ;;  %8526 = vmatpush3.msra.mxu1 %v12428_v6  ;;  %v4881_v24 = vadd.f32 %v14160_v49, %v4605_v42  ;;  %v4922_v11 = vadd.f32 %v12341_v12, %v4883_v10  ;;  %v12506_v3 = vsel %vm4958_vm8, %v4926_v36, %v4990_v15  ;;  %v4988_v34 = vmul.f32 0.1, %v4924_v7  ;;  %v14164_v36 = vld [vmem:[#allocation11_spill] sm:$0xff]  ;;  %v14166_v42 = vld [vmem:[#allocation10_spill] sm:$0xff] }
 0x353   : > { %8471 = vmatprep.subr.mxu0 %v12436_v21  ;;  %8527 = vmatprep.subr.mxu1 %v12436_v21  ;;  %v4602_v25 = vadd.f32 %v14162_v63, %v14161_v5  ;;  %v12516_v39 = vsel %vm4942_vm3, %v12348_v33, %v12380_v46  ;;  %vm4956_vm11 = vcmp.ge.f32.partialorder %v4924_v7, 0.0  ;;  %v4972_v62 = vmul.f32 0.1, %v12364_v28 }
 0x354   : > { %8472 = vmatpush3.msra.mxu0 %v12445_v8  ;;  %8528 = vmatpush3.msra.mxu1 %v12445_v8  ;;  %v4880_v20 = vadd.f32 %v14163_v45, %v4604_v13  ;;  %v4921_v54 = vadd.f32 %v12341_v12, %v4882_v43  ;;  %v12524_v16 = vsel %vm4957_vm10, %v4925_v40, %v4989_v26  ;;  %v4987_v4 = vmul.f32 0.1, %v4923_v22  ;;  %v14168_v26 = vld [vmem:[#allocation28_spill] sm:$0xff]  ;;  %v7946_v45 = vld [vmem:[%s13985_s5 + $0x80] sm:$0xff] }
 0x355   : > { %8473 = vmatprep.subr.mxu0 %v12453_v1  ;;  %8529 = vmatprep.subr.mxu1 %v12453_v1  ;;  %v12531_v33 = vsel %vm4941_vm9, %v12372_v30, %v4973_v32  ;;  %vm4955_vm12 = vcmp.ge.f32.partialorder %v4923_v22, 0.0  ;;  %vm4939_vm13 = vcmp.ge.f32.partialorder %v12369_v58, 0.0  ;;  %v4971_v46 = vmul.f32 0.1, %v12369_v58 }
 0x356   : > { %8474 = vmatpush3.msra.mxu0 %v12463_v41  ;;  %8530 = vmatpush3.msra.mxu1 %v12463_v41  ;;  %v4879_v56 = vadd.f32 %v14164_v36, %v4603_v18  ;;  %v4920_v50 = vadd.f32 %v12341_v12, %v4881_v24  ;;  %v12540_v14 = vsel %vm4956_vm11, %v4924_v7, %v4988_v34  ;;  %v4986_v0 = vmul.f32 0.1, %v4922_v11  ;;  %v5117_v36 = vld [vmem:[%s13985_s5 + $0x78] sm:$0xff] }
 0x357   : > { %8475 = vmatprep.subr.mxu0 %v12471_v47  ;;  %8531 = vmatprep.subr.mxu1 %v12471_v47  ;;  %v12547_v30 = vsel %vm4940_vm7, %v12364_v28, %v4972_v62  ;;  %vm4954_vm14 = vcmp.ge.f32.partialorder %v4922_v11, 0.0  ;;  %vm4938_vm3 = vcmp.ge.f32.partialorder %v12353_v61, 0.0  ;;  %v4970_v57 = vmul.f32 0.1, %v12353_v61 }
 0x358   : > { %8476 = vmatpush3.msra.mxu0 %v12481_v52  ;;  %8532 = vmatpush3.msra.mxu1 %v12481_v52  ;;  %v4878_v40 = vadd.f32 %v14165_v23, %v4602_v25  ;;  %v4919_v35 = vadd.f32 %v12341_v12, %v4880_v20  ;;  %v12556_v53 = vsel %vm4955_vm12, %v4923_v22, %v4987_v4  ;;  %v4985_v44 = vmul.f32 0.1, %v4921_v54  ;;  %v5102_v25 = vld [vmem:[%s13985_s5] sm:$0xff]  ;;  %v5105_v20 = vld [vmem:[%s13985_s5 + $0x18] sm:$0xff] }
 0x359   : > { %8477 = vmatprep.subr.mxu0 %v12489_v38  ;;  %8533 = vmatprep.subr.mxu1 %v12489_v38  ;;  %v4903_v28 = vadd.f32 %v12341_v12, %v14166_v42  ;;  %v12565_v17 = vsel %vm4939_vm13, %v12369_v58, %v4971_v46  ;;  %vm4953_vm4 = vcmp.ge.f32.partialorder %v4921_v54, 0.0  ;;  %v4969_v27 = vmul.f32 0.1, %v12360_v19  ;;  %v5114_v4 = vld [vmem:[%s13985_s5 + $0x60] sm:$0xff]  ;;  %v7967_v42 = vld [vmem:[%s13985_s5 + $0x128] sm:$0xff] }
 0x35a   : > { %8478 = vmatpush3.msra.mxu0 %v12498_v2  ;;  %8534 = vmatpush3.msra.mxu1 %v12498_v2  ;;  %v4918_v10 = vadd.f32 %v12341_v12, %v4879_v56  ;;  %v12572_v7 = vsel %vm4954_vm14, %v4922_v11, %v4986_v0  ;;  %vm4937_vm5 = vcmp.ge.f32.partialorder %v12360_v19, 0.0  ;;  %v4984_v15 = vmul.f32 0.1, %v4920_v50  ;;  %v7954_v46 = vld [vmem:[%s13985_s5 + $0xc0] sm:$0xff]  ;;  %v5116_v56 = vld [vmem:[%s13985_s5 + $0x70] sm:$0xff]  ;;  %v7963_v0 = vld [vmem:[%s13985_s5 + $0x108] sm:$0xff] }
 0x35b   : > { %8479 = vmatprep.subr.mxu0 %v12506_v3  ;;  %8535 = vmatprep.subr.mxu1 %v12506_v3  ;;  %v4902_v60 = vadd.f32 %v12341_v12, %v14167_v9  ;;  %v12582_v58 = vsel %vm4938_vm3, %v12353_v61, %v4970_v57  ;;  %vm4952_vm6 = vcmp.ge.f32.partialorder %v4920_v50, 0.0  ;;  %v4968_v13 = vmul.f32 0.1, %v12345_v31  ;;  %v7962_v57 = vld [vmem:[%s13985_s5 + $0x100] sm:$0xff]  ;;  %v7980_v9 = vld [vmem:[%s13985_s5 + $0x190] sm:$0xff] }
 0x35c   : > { %8480 = vmatpush3.msra.mxu0 %v12516_v39  ;;  %8536 = vmatpush3.msra.mxu1 %v12516_v39  ;;  %v4917_v29 = vadd.f32 %v12341_v12, %v4878_v40  ;;  %v12589_v43 = vsel %vm4953_vm4, %v4921_v54, %v4985_v44  ;;  %vm4936_vm7 = vcmp.ge.f32.partialorder %v12345_v31, 0.0  ;;  %v4983_v22 = vmul.f32 0.1, %v4919_v35  ;;  %v5104_v54 = vld [vmem:[%s13985_s5 + $0x10] sm:$0xff]  ;;  %v7958_v23 = vld [vmem:[%s13985_s5 + $0xe0] sm:$0xff]  ;;  %v7965_v40 = vld [vmem:[%s13985_s5 + $0x118] sm:$0xff] }
 0x35d   : > { %8481 = vmatprep.subr.mxu0 %v12524_v16  ;;  %8537 = vmatprep.subr.mxu1 %v12524_v16  ;;  %v4901_v37 = vadd.f32 %v12341_v12, %v14168_v26  ;;  %v12599_v61 = vsel %vm4937_vm5, %v12360_v19, %v4969_v27  ;;  %vm4951_vm0 = vcmp.ge.f32.partialorder %v4919_v35, 0.0  ;;  %v4967_v51 = vmul.f32 0.1, %v4903_v28  ;;  %v7960_v44 = vld [vmem:[%s13985_s5 + $0xf0] sm:$0xff]  ;;  %v7978_v27 = vld [vmem:[%s13985_s5 + $0x180] sm:$0xff] }
 0x35e   : > { %8482 = vmatpush3.msra.mxu0 %v12531_v33  ;;  %8538 = vmatpush3.msra.mxu1 %v12531_v33  ;;  %v12604_v18 = vsel %vm4952_vm6, %v4920_v50, %v4984_v15  ;;  %vm4935_vm8 = vcmp.ge.f32.partialorder %v4903_v28, 0.0  ;;  %v4982_v12 = vmul.f32 0.1, %v4918_v10  ;;  %v12609_v32 = vsel %vm4936_vm7, %v12345_v31, %v4968_v13  ;;  %v7957_v50 = vld [vmem:[%s13985_s5 + $0xd8] sm:$0xff]  ;;  %v7968_v15 = vld [vmem:[%s13985_s5 + $0x130] sm:$0xff]  ;;  %v7970_v13 = vld [vmem:[%s13985_s5 + $0x140] sm:$0xff] }
 0x35f   : > { %8483 = vmatprep.subr.mxu0 %v12540_v14  ;;  %8539 = vmatprep.subr.mxu1 %v12540_v14  ;;  %vm4950_vm9 = vcmp.ge.f32.partialorder %v4918_v10, 0.0  ;;  %v4966_v19 = vmul.f32 0.1, %v4902_v60  ;;  %v12613_v49 = vsel %vm4951_vm0, %v4919_v35, %v4983_v22  ;;  %vm4934_vm10 = vcmp.ge.f32.partialorder %v4902_v60, 0.0  ;;  %v7961_v35 = vld [vmem:[%s13985_s5 + $0xf8] sm:$0xff]  ;;  %v7972_v26 = vld [vmem:[%s13985_s5 + $0x150] sm:$0xff] }
 0x360   : > { %8484 = vmatpush3.msra.mxu0 %v12547_v30  ;;  %8540 = vmatpush3.msra.mxu1 %v12547_v30  ;;  %v4981_v24 = vmul.f32 0.1, %v4917_v29  ;;  %v12617_v11 = vsel %vm4935_vm8, %v4903_v28, %v4967_v51  ;;  %vm4949_vm11 = vcmp.ge.f32.partialorder %v4917_v29, 0.0  ;;  %v4965_v34 = vmul.f32 0.1, %v4901_v37  ;;  %v7979_v28 = vld [vmem:[%s13985_s5 + $0x188] sm:$0xff] }
 0x361   : > { %8485 = vmatprep.subr.mxu0 %v12556_v53  ;;  %8541 = vmatprep.subr.mxu1 %v12556_v53  ;;  %v12621_v31 = vsel %vm4950_vm9, %v4918_v10, %v4982_v12  ;;  %vm4933_vm12 = vcmp.ge.f32.partialorder %v4901_v37, 0.0  ;;  %v12625_v5 = vsel %vm4934_vm10, %v4902_v60, %v4966_v19  ;;  %v7969_v10 = vld [vmem:[%s13985_s5 + $0x138] sm:$0xff]  ;;  %v7971_v60 = vld [vmem:[%s13985_s5 + $0x148] sm:$0xff]  ;;  %v7986_v12 = vld [vmem:[%s13985_s5 + $0x1c0] sm:$0xff]  ;;  %vm5030_vm13 = vcmask 253952  }
 0x362   : > { %8486 = vmatpush3.msra.mxu0 %v12565_v17  ;;  %8542 = vmatpush3.msra.mxu1 %v12565_v17  ;;  %v12629_v63 = vsel %vm4949_vm11, %v4917_v29, %v4981_v24  ;;  %v12636_v62 = vsel %vm4933_vm12, %v4901_v37, %v4965_v34  ;;  %v7982_v29 = vld [vmem:[%s13985_s5 + $0x1a0] sm:$0xff]  ;;  %v7985_v22 = vld [vmem:[%s13985_s5 + $0x1b8] sm:$0xff]  ;;  %v7984_v37 = vld [vmem:[%s13985_s5 + $0x1b0] sm:$0xff]  ;;  %vm5950_vm14 = vcmask 785408   ;;  %vm6670_vm9 = vcmask 519168  }
 0x363   : > { %8487 = vmatprep.subr.mxu0 %v12572_v7  ;;  %8543 = vmatprep.subr.mxu1 %v12572_v7  ;;  %v7987_v51 = vld [vmem:[%s13985_s5 + $0x1c8] sm:$0xff]  ;;  %v7989_v19 = vld [vmem:[%s13985_s5 + $0x1d8] sm:$0xff]  ;;  %v7988_v24 = vld [vmem:[%s13985_s5 + $0x1d0] sm:$0xff]  ;;  %vm6673_vm10 = vcmask 523268   ;;  %vm7074_vm11 = vcmask 1042432   ;;  %vm7075_vm12 = vcmask 1046532  }
 0x364   : > { %8488 = vmatpush3.msra.mxu0 %v12582_v58  ;;  %8544 = vmatpush3.msra.mxu1 %v12582_v58  ;;  %v7990_v34 = vld [vmem:[%s13985_s5 + $0x1e0] sm:$0xff] }
 0x365   : > { %8489 = vmatprep.subr.mxu0 %v12589_v43  ;;  %8545 = vmatprep.subr.mxu1 %v12589_v43 }
 0x366   : > { %8490 = vmatpush3.msra.mxu0 %v12599_v61  ;;  %8546 = vmatpush3.msra.mxu1 %v12599_v61 }
 0x367   : > { %8491 = vmatprep.subr.mxu0 %v12604_v18  ;;  %8547 = vmatprep.subr.mxu1 %v12604_v18 }
 0x368   : > { %8492 = vmatpush3.msra.mxu0 %v12609_v32  ;;  %8548 = vmatpush3.msra.mxu1 %v12609_v32 }
 0x369   : > { %8493 = vmatprep.subr.mxu0 %v12613_v49  ;;  %8549 = vmatprep.subr.mxu1 %v12613_v49 }
 0x36a   : > { %8494 = vmatpush3.msra.mxu0 %v12617_v11  ;;  %8550 = vmatpush3.msra.mxu1 %v12617_v11 }
 0x36b   : > { %8495 = vmatprep.subr.mxu0 %v12621_v31  ;;  %8551 = vmatprep.subr.mxu1 %v12621_v31 }
 0x36c   : > { %8496 = vmatpush3.msra.mxu0 %v12625_v5  ;;  %8552 = vmatpush3.msra.mxu1 %v12625_v5 }
 0x36d   : > { %8497 = vmatprep.subr.mxu0 %v12629_v63  ;;  %8553 = vmatprep.subr.mxu1 %v12629_v63 }
 0x36e   : > { %8498 = vmatpush3.msra.mxu0 %v12636_v62  ;;  %8554 = vmatpush3.msra.mxu1 %v12636_v62 }
 0x36f   : > { %5183 = vmatmul.mubr.f32.vlgmr.msra.gmra.mxu0 %v5102_v25  ;;  %8579 = vmatprep.subr.mxu0 %v12406_v59  ;;  %v5644_v25 = vld [vmem:[#allocation3 + $0x90] sm:$0xff] }
 0x370   : > { %8635 = vmatprep.subr.mxu1 %v12406_v59  ;;  %5314 = vmatmul.mubr.f32.vlgmr.msra.gmra.mxu1 %v7946_v45  ;;  %v5107_v59 = vld [vmem:[%s13985_s5 + $0x28] sm:$0xff] }
 0x371   : > { %8580 = vmatpush3.msra.mxu0 %v12413_v55  ;;  %8636 = vmatpush3.msra.mxu1 %v12413_v55  ;;  %v5106_v55 = vld [vmem:[%s13985_s5 + $0x20] sm:$0xff] }
 0x372   : > { %8581 = vmatprep.subr.mxu0 %v12420_v48  ;;  %8637 = vmatprep.subr.mxu1 %v12420_v48  ;;  %v5109_v48 = vld [vmem:[%s13985_s5 + $0x38] sm:$0xff] }
 0x373   : > { %5187 = vmatprep.mubr.f32.mxu0 %v5105_v20  ;;  %8582 = vmatpush3.msra.mxu0 %v12428_v6  ;;  %v5984_v20 = vld [vmem:[%s13986_s6 + $0x78] sm:$0xff] }
 0x374   : > { %8638 = vmatpush3.msra.mxu1 %v12428_v6  ;;  %5188 = vmatmul.mubr.f32.gmra.mxu0 %v5104_v54  ;;  %v5108_v6 = vld [vmem:[%s13985_s5 + $0x30] sm:$0xff] }
 0x375   : > { %8583 = vmatprep.subr.mxu0 %v12436_v21  ;;  %8639 = vmatprep.subr.mxu1 %v12436_v21  ;;  %v7949_v21 = vld [vmem:[%s13985_s5 + $0x98] sm:$0xff]  ;;  %v5983_v54 = vld [vmem:[%s13986_s6 + $0x70] sm:$0xff] }
 0x376   : > { %8584 = vmatpush3.msra.mxu0 %v12445_v8  ;;  %8640 = vmatpush3.msra.mxu1 %v12445_v8  ;;  %v7948_v8 = vld [vmem:[%s13985_s5 + $0x90] sm:$0xff] }
 0x377   : > { %8585 = vmatprep.subr.mxu0 %v12453_v1  ;;  %8641 = vmatprep.subr.mxu1 %v12453_v1  ;;  %v5111_v1 = vld [vmem:[%s13985_s5 + $0x48] sm:$0xff] }
 0x378   : > { %5192 = vmatprep.mubr.f32.mxu0 %v5107_v59  ;;  %8586 = vmatpush3.msra.mxu0 %v12463_v41 }
 0x379   : > { %8642 = vmatpush3.msra.mxu1 %v12463_v41  ;;  %5193 = vmatmul.mubr.f32.gmra.mxu0 %v5106_v55  ;;  %v5110_v41 = vld [vmem:[%s13985_s5 + $0x40] sm:$0xff] }
 0x37a   : > { %8587 = vmatprep.subr.mxu0 %v12471_v47  ;;  %8643 = vmatprep.subr.mxu1 %v12471_v47  ;;  %v7951_v47 = vld [vmem:[%s13985_s5 + $0xa8] sm:$0xff] }
 0x37b   : > { %8588 = vmatpush3.msra.mxu0 %v12481_v52  ;;  %8644 = vmatpush3.msra.mxu1 %v12481_v52  ;;  %v7950_v52 = vld [vmem:[%s13985_s5 + $0xa0] sm:$0xff] }
 0x37c   : > { %8589 = vmatprep.subr.mxu0 %v12489_v38  ;;  %8645 = vmatprep.subr.mxu1 %v12489_v38  ;;  %v5113_v38 = vld [vmem:[%s13985_s5 + $0x58] sm:$0xff] }
 0x37d   : > { %5197 = vmatprep.mubr.f32.mxu0 %v5109_v48  ;;  %8590 = vmatpush3.msra.mxu0 %v12498_v2 }
 0x37e   : > { %8646 = vmatpush3.msra.mxu1 %v12498_v2  ;;  %5198 = vmatmul.mubr.f32.gmra.mxu0 %v5108_v6  ;;  %v5112_v2 = vld [vmem:[%s13985_s5 + $0x50] sm:$0xff] }
 0x37f   : > { %5318 = vmatprep.mubr.f32.mxu1 %v7949_v21  ;;  %8591 = vmatprep.subr.mxu0 %v12506_v3 }
 0x380   : > { %8647 = vmatprep.subr.mxu1 %v12506_v3  ;;  %5319 = vmatmul.mubr.f32.gmra.mxu1 %v7948_v8  ;;  %v7953_v3 = vld [vmem:[%s13985_s5 + $0xb8] sm:$0xff] }
 0x381   : > { %8592 = vmatpush3.msra.mxu0 %v12516_v39  ;;  %8648 = vmatpush3.msra.mxu1 %v12516_v39  ;;  %v7952_v39 = vld [vmem:[%s13985_s5 + $0xb0] sm:$0xff] }
 0x382   : > { %8593 = vmatprep.subr.mxu0 %v12524_v16  ;;  %8649 = vmatprep.subr.mxu1 %v12524_v16  ;;  %v5115_v16 = vld [vmem:[%s13985_s5 + $0x68] sm:$0xff] }
 0x383   : > { %5202 = vmatprep.mubr.f32.mxu0 %v5111_v1  ;;  %8594 = vmatpush3.msra.mxu0 %v12531_v33 }
 0x384   : > { %8650 = vmatpush3.msra.mxu1 %v12531_v33  ;;  %5203 = vmatmul.mubr.f32.gmra.mxu0 %v5110_v41  ;;  %v7955_v33 = vld [vmem:[%s13985_s5 + $0xc8] sm:$0xff]  ;;  %v8009_v41 = vld [vmem:[%s13986_s6 + $0xf8] sm:$0xff] }
 0x385   : > { %5323 = vmatprep.mubr.f32.mxu1 %v7951_v47  ;;  %8595 = vmatprep.subr.mxu0 %v12540_v14  ;;  %v5982_v47 = vld [vmem:[%s13986_s6 + $0x68] sm:$0xff] }
 0x386   : > { %8651 = vmatprep.subr.mxu1 %v12540_v14  ;;  %5324 = vmatmul.mubr.f32.gmra.mxu1 %v7950_v52  ;;  %v7956_v14 = vld [vmem:[%s13985_s5 + $0xd0] sm:$0xff] }
 0x387   : > { %8596 = vmatpush3.msra.mxu0 %v12547_v30  ;;  %8652 = vmatpush3.msra.mxu1 %v12547_v30  ;;  %v7959_v30 = vld [vmem:[%s13985_s5 + $0xe8] sm:$0xff]  ;;  %v8008_v52 = vld [vmem:[%s13986_s6 + $0xf0] sm:$0xff] }
 0x388   : > { %8597 = vmatprep.subr.mxu0 %v12556_v53  ;;  %8653 = vmatprep.subr.mxu1 %v12556_v53  ;;  %v7964_v53 = vld [vmem:[%s13985_s5 + $0x110] sm:$0xff] }
 0x389   : > { %5207 = vmatprep.mubr.f32.mxu0 %v5113_v38  ;;  %8598 = vmatpush3.msra.mxu0 %v12565_v17  ;;  %v5981_v38 = vld [vmem:[%s13986_s6 + $0x60] sm:$0xff] }
 0x38a   : > { %8654 = vmatpush3.msra.mxu1 %v12565_v17  ;;  %5208 = vmatmul.mubr.f32.gmra.mxu0 %v5112_v2  ;;  %v7966_v17 = vld [vmem:[%s13985_s5 + $0x120] sm:$0xff] }
 0x38b   : > { %5328 = vmatprep.mubr.f32.mxu1 %v7953_v3  ;;  %8599 = vmatprep.subr.mxu0 %v12572_v7  ;;  %v8007_v3 = vld [vmem:[%s13986_s6 + $0xe8] sm:$0xff] }
 0x38c   : > { %8655 = vmatprep.subr.mxu1 %v12572_v7  ;;  %5329 = vmatmul.mubr.f32.gmra.mxu1 %v7952_v39  ;;  %v7981_v7 = vld [vmem:[%s13985_s5 + $0x198] sm:$0xff] }
 0x38d   : > { %8600 = vmatpush3.msra.mxu0 %v12582_v58  ;;  %8656 = vmatpush3.msra.mxu1 %v12582_v58  ;;  %v7983_v58 = vld [vmem:[%s13985_s5 + $0x1a8] sm:$0xff] }
 0x38e   : > { %8601 = vmatprep.subr.mxu0 %v12589_v43  ;;  %8657 = vmatprep.subr.mxu1 %v12589_v43  ;;  %v7973_v43 = vld [vmem:[%s13985_s5 + $0x158] sm:$0xff] }
 0x38f   : > { %5212 = vmatprep.mubr.f32.mxu0 %v5115_v16  ;;  %8602 = vmatpush3.msra.mxu0 %v12599_v61  ;;  %v5980_v16 = vld [vmem:[%s13986_s6 + $0x58] sm:$0xff] }
 0x390   : > { %8658 = vmatpush3.msra.mxu1 %v12599_v61  ;;  %5213 = vmatmul.mubr.f32.gmra.mxu0 %v5114_v4  ;;  %v7975_v61 = vld [vmem:[%s13985_s5 + $0x168] sm:$0xff]  ;;  %v8006_v4 = vld [vmem:[%s13986_s6 + $0xe0] sm:$0xff] }
 0x391   : > { %5333 = vmatprep.mubr.f32.mxu1 %v7955_v33  ;;  %8603 = vmatprep.subr.mxu0 %v12604_v18  ;;  %v5979_v33 = vld [vmem:[%s13986_s6 + $0x50] sm:$0xff] }
 0x392   : > { %8659 = vmatprep.subr.mxu1 %v12604_v18  ;;  %5334 = vmatmul.mubr.f32.gmra.mxu1 %v7954_v46  ;;  %v7974_v18 = vld [vmem:[%s13985_s5 + $0x160] sm:$0xff] }
 0x393   : > { %8604 = vmatpush3.msra.mxu0 %v12609_v32  ;;  %8660 = vmatpush3.msra.mxu1 %v12609_v32  ;;  %v7977_v32 = vld [vmem:[%s13985_s5 + $0x178] sm:$0xff] }
 0x394   : > { %8605 = vmatprep.subr.mxu0 %v12613_v49  ;;  %8661 = vmatprep.subr.mxu1 %v12613_v49  ;;  %v7976_v49 = vld [vmem:[%s13985_s5 + $0x170] sm:$0xff] }
 0x395   : > { %5217 = vmatprep.mubr.f32.mxu0 %v5117_v36  ;;  %8606 = vmatpush3.msra.mxu0 %v12617_v11  ;;  %v8005_v36 = vld [vmem:[%s13986_s6 + $0xd8] sm:$0xff] }
 0x396   : > { %8662 = vmatpush3.msra.mxu1 %v12617_v11  ;;  %5218 = vmatmul.mubr.f32.gmra.mxu0 %v5116_v56  ;;  %v7991_v11 = vld [vmem:[%s13985_s5 + $0x1e8] sm:$0xff] }
 0x397   : > { %5338 = vmatprep.mubr.f32.mxu1 %v7957_v50  ;;  %8607 = vmatprep.subr.mxu0 %v12621_v31 }
 0x398   : > { %8663 = vmatprep.subr.mxu1 %v12621_v31  ;;  %5339 = vmatmul.mubr.f32.gmra.mxu1 %v7956_v14  ;;  %v7993_v31 = vld [vmem:[%s13985_s5 + $0x1f8] sm:$0xff] }
 0x399   : > { %8608 = vmatpush3.msra.mxu0 %v12625_v5  ;;  %8664 = vmatpush3.msra.mxu1 %v12625_v5  ;;  %v7992_v5 = vld [vmem:[%s13985_s5 + $0x1f0] sm:$0xff] }
 0x39a   : > { %8609 = vmatprep.subr.mxu0 %v12629_v63  ;;  %8665 = vmatprep.subr.mxu1 %v12629_v63  ;;  %v14169_v63 = vmov 0.0  }
 0x39b   : > { %8610 = vmatpush3.msra.mxu0 %v12636_v62  ;;  %5444 = vmatprep.mubr.f32.mxu0 %v7963_v0  ;;  %5067 = vst.msk [vmem:[#allocation3 + $0x128] sm:$0x1] %vm5030_vm13, %v14169_v63  ;;  %5031 = vst.msk [vmem:[#allocation3 + $0x8] sm:$0x1] %vm5030_vm13, %v14169_v63 }
 0x39c   : > { %8666 = vmatpush3.msra.mxu1 %v12636_v62  ;;  %5343 = vmatprep.mubr.f32.mxu1 %v7959_v30  ;;  %5033 = vst.msk [vmem:[#allocation3 + $0x18] sm:$0x1] %vm5030_vm13, %v14169_v63  ;;  %5035 = vst.msk [vmem:[#allocation3 + $0x28] sm:$0x1] %vm5030_vm13, %v14169_v63 }
 0x39d   : > { %5445 = vmatmul.mubr.f32.vlgmr.msra.gmra.mxu0 %v7962_v57  ;;  %5344 = vmatmul.mubr.f32.gmra.mxu1 %v7958_v23  ;;  %5037 = vst.msk [vmem:[#allocation3 + $0x38] sm:$0x1] %vm5030_vm13, %v14169_v63  ;;  %5039 = vst.msk [vmem:[#allocation3 + $0x48] sm:$0x1] %vm5030_vm13, %v14169_v63 }
 0x39e   : > { %5449 = vmatprep.mubr.f32.mxu0 %v7965_v40  ;;  %5348 = vmatprep.mubr.f32.mxu1 %v7961_v35  ;;  %5041 = vst.msk [vmem:[#allocation3 + $0x58] sm:$0x1] %vm5030_vm13, %v14169_v63  ;;  %5043 = vst.msk [vmem:[#allocation3 + $0x68] sm:$0x1] %vm5030_vm13, %v14169_v63 }
 0x39f   : > { %5045 = vst.msk [vmem:[#allocation3 + $0x78] sm:$0x1] %vm5030_vm13, %v14169_v63  ;;  %5047 = vst.msk [vmem:[#allocation3 + $0x88] sm:$0x1] %vm5030_vm13, %v14169_v63  ;;  %9487 = vmatprep.subr.mxu1 %v5984_v20  ;;  %9443 = vmatprep.subr.mxu0 %v8009_v41 }
 0x3a0   : > { %5049 = vst.msk [vmem:[#allocation3 + $0x98] sm:$0x1] %vm5030_vm13, %v14169_v63  ;;  %5051 = vst.msk [vmem:[#allocation3 + $0xa8] sm:$0x1] %vm5030_vm13, %v14169_v63  ;;  %9444 = vmatpush3.msra.mxu0 %v8009_v41  ;;  %v8000_v41 = vld [vmem:[%s13986_s6 + $0xb0] sm:$0xff] }
 0x3a1   : > { %5450 = vmatmul.mubr.f32.gmra.mxu0 %v7964_v53  ;;  %5349 = vmatmul.mubr.f32.gmra.mxu1 %v7960_v44  ;;  %5053 = vst.msk [vmem:[#allocation3 + $0xb8] sm:$0x1] %vm5030_vm13, %v14169_v63  ;;  %5055 = vst.msk [vmem:[#allocation3 + $0xc8] sm:$0x1] %vm5030_vm13, %v14169_v63 }
 0x3a2   : > { %5454 = vmatprep.mubr.f32.mxu0 %v7967_v42  ;;  %5575 = vmatprep.mubr.f32.mxu1 %v7979_v28  ;;  %5057 = vst.msk [vmem:[#allocation3 + $0xd8] sm:$0x1] %vm5030_vm13, %v14169_v63  ;;  %5059 = vst.msk [vmem:[#allocation3 + $0xe8] sm:$0x1] %vm5030_vm13, %v14169_v63 }
 0x3a3   : > { %5061 = vst.msk [vmem:[#allocation3 + $0xf8] sm:$0x1] %vm5030_vm13, %v14169_v63  ;;  %5063 = vst.msk [vmem:[#allocation3 + $0x108] sm:$0x1] %vm5030_vm13, %v14169_v63  ;;  %9445 = vmatprep.subr.mxu0 %v8008_v52 }
 0x3a4   : > { %5065 = vst.msk [vmem:[#allocation3 + $0x118] sm:$0x1] %vm5030_vm13, %v14169_v63  ;;  %5069 = vst.msk [vmem:[#allocation3 + $0x138] sm:$0x1] %vm5030_vm13, %v14169_v63  ;;  %9446 = vmatpush3.msra.mxu0 %v8008_v52 }
 0x3a5   : > { %5455 = vmatmul.mubr.f32.gmra.mxu0 %v7966_v17  ;;  %5576 = vmatmul.mubr.f32.vlgmr.msra.gmra.mxu1 %v7978_v27  ;;  %5071 = vst.msk [vmem:[#allocation3 + $0x148] sm:$0x1] %vm5030_vm13, %v14169_v63  ;;  %5073 = vst.msk [vmem:[#allocation3 + $0x158] sm:$0x1] %vm5030_vm13, %v14169_v63 }
 0x3a6   : > { %5459 = vmatprep.mubr.f32.mxu0 %v7969_v10  ;;  %5580 = vmatprep.mubr.f32.mxu1 %v7981_v7  ;;  %5075 = vst.msk [vmem:[#allocation3 + $0x168] sm:$0x1] %vm5030_vm13, %v14169_v63  ;;  %5077 = vst.msk [vmem:[#allocation3 + $0x178] sm:$0x1] %vm5030_vm13, %v14169_v63 }
 0x3a7   : > { %5079 = vst.msk [vmem:[#allocation3 + $0x188] sm:$0x1] %vm5030_vm13, %v14169_v63  ;;  %5081 = vst.msk [vmem:[#allocation3 + $0x198] sm:$0x1] %vm5030_vm13, %v14169_v63  ;;  %v5645_v62 = vld [vmem:[#allocation3 + $0x98] sm:$0x1]  ;;  %9488 = vmatpush3.msra.mxu1 %v5984_v20  ;;  %9447 = vmatprep.subr.mxu0 %v8007_v3 }
 0x3a8   : > { %5083 = vst.msk [vmem:[#allocation3 + $0x1a8] sm:$0x1] %vm5030_vm13, %v14169_v63  ;;  %5085 = vst.msk [vmem:[#allocation3 + $0x1b8] sm:$0x1] %vm5030_vm13, %v14169_v63  ;;  %v9709_v45 = vpack.i.bf16 %v5645_v62, %v5644_v25  ;;  %9489 = vmatprep.subr.mxu1 %v5983_v54  ;;  %9448 = vmatpush3.msra.mxu0 %v8007_v3 }
 0x3a9   : > { %5460 = vmatmul.mubr.f32.gmra.mxu0 %v7968_v15  ;;  %5581 = vmatmul.mubr.f32.gmra.mxu1 %v7980_v9  ;;  %5087 = vst.msk [vmem:[#allocation3 + $0x1c8] sm:$0x1] %vm5030_vm13, %v14169_v63  ;;  %5089 = vst.msk [vmem:[#allocation3 + $0x1d8] sm:$0x1] %vm5030_vm13, %v14169_v63 }
 0x3aa   : > { %5464 = vmatprep.mubr.f32.mxu0 %v7971_v60  ;;  %5585 = vmatprep.mubr.f32.mxu1 %v7983_v58  ;;  %5091 = vst.msk [vmem:[#allocation3 + $0x1e8] sm:$0x1] %vm5030_vm13, %v14169_v63  ;;  %5093 = vst.msk [vmem:[#allocation3 + $0x1f8] sm:$0x1] %vm5030_vm13, %v14169_v63  ;;  %v5978_v60 = vld [vmem:[%s13986_s6 + $0x48] sm:$0xff]  ;;  %v8004_v58 = vld [vmem:[%s13986_s6 + $0xd0] sm:$0xff] }
 0x3ab   : > { %5095 = vst.msk [vmem:[#allocation3 + $0x208] sm:$0x1] %vm5030_vm13, %v14169_v63  ;;  %5097 = vst.msk [vmem:[#allocation3 + $0x218] sm:$0x1] %vm5030_vm13, %v14169_v63  ;;  %9710 = vrot.lane.b32.xlu1 %v9709_v45, %s9858_s19  ;;  %9490 = vmatpush3.msra.mxu1 %v5983_v54 }
 0x3ac   : > { %5099 = vst.msk [vmem:[#allocation3 + $0x228] sm:$0x1] %vm5030_vm13, %v14169_v63  ;;  %5101 = vst.msk [vmem:[#allocation3 + $0x238] sm:$0x1] %vm5030_vm13, %v14169_v63  ;;  %9491 = vmatprep.subr.mxu1 %v5982_v47  ;;  %9449 = vmatprep.subr.mxu0 %v8006_v4 }
 0x3ad   : > { %5465 = vmatmul.mubr.f32.gmra.mxu0 %v7970_v13  ;;  %5586 = vmatmul.mubr.f32.gmra.mxu1 %v7982_v29  ;;  %v5977_v13 = vld [vmem:[%s13986_s6 + $0x40] sm:$0xff]  ;;  %vm13706_vm13 = vmor %vm7074_vm11, %vm7075_vm12 }
 0x3ae   : > { %5469 = vmatprep.mubr.f32.mxu0 %v7973_v43  ;;  %5590 = vmatprep.mubr.f32.mxu1 %v7985_v22  ;;  %v8003_v43 = vld [vmem:[%s13986_s6 + $0xc8] sm:$0xff] }
 0x3af   : > { %9492 = vmatpush3.msra.mxu1 %v5982_v47  ;;  %9450 = vmatpush3.msra.mxu0 %v8006_v4  ;;  %v5681_v40 = vld [vmem:[#allocation3 + $0x1b8] sm:$0x1]  ;;  %v5973_v47 = vld [vmem:[%s13986_s6 + $0x20] sm:$0xff] }
 0x3b0   : > { %9493 = vmatprep.subr.mxu1 %v5981_v38  ;;  %9451 = vmatprep.subr.mxu0 %v8005_v36 }
 0x3b1   : > { %5470 = vmatmul.mubr.f32.gmra.mxu0 %v7972_v26  ;;  %5591 = vmatmul.mubr.f32.gmra.mxu1 %v7984_v37 }
 0x3b2   : > { %5474 = vmatprep.mubr.f32.mxu0 %v7975_v61  ;;  %5595 = vmatprep.mubr.f32.mxu1 %v7987_v51 }
 0x3b3   : > { %9494 = vmatpush3.msra.mxu1 %v5981_v38  ;;  %9452 = vmatpush3.msra.mxu0 %v8005_v36  ;;  %v7999_v38 = vld [vmem:[%s13986_s6 + $0xa8] sm:$0xff] }
 0x3b4   : > { %9495 = vmatprep.subr.mxu1 %v5980_v16  ;;  %9453 = vmatprep.subr.mxu0 %v8004_v58 }
 0x3b5   : > { %5475 = vmatmul.mubr.f32.gmra.mxu0 %v7974_v18  ;;  %5596 = vmatmul.mubr.f32.gmra.mxu1 %v7986_v12  ;;  %v5976_v18 = vld [vmem:[%s13986_s6 + $0x38] sm:$0xff] }
 0x3b6   : > { %5479 = vmatprep.mubr.f32.mxu0 %v7977_v32  ;;  %5600 = vmatprep.mubr.f32.mxu1 %v7989_v19  ;;  %v8002_v19 = vld [vmem:[%s13986_s6 + $0xc0] sm:$0xff] }
 0x3b7   : > { %9496 = vmatpush3.msra.mxu1 %v5980_v16  ;;  %9454 = vmatpush3.msra.mxu0 %v8004_v58 }
 0x3b8   : > { %9497 = vmatprep.subr.mxu1 %v5979_v33  ;;  %9455 = vmatprep.subr.mxu0 %v8003_v43 }
 0x3b9   : > { %5480 = vmatmul.mubr.f32.gmra.mxu0 %v7976_v49  ;;  %5601 = vmatmul.mubr.f32.gmra.mxu1 %v7988_v24  ;;  %v5975_v49 = vld [vmem:[%s13986_s6 + $0x30] sm:$0xff]  ;;  %v8001_v24 = vld [vmem:[%s13986_s6 + $0xb8] sm:$0xff] }
 0x3ba   : > { %5605 = vmatprep.mubr.f32.mxu1 %v7991_v11  ;;  %9498 = vmatpush3.msra.mxu1 %v5979_v33 }
 0x3bb   : > { %9499 = vmatprep.subr.mxu1 %v5978_v60  ;;  %9456 = vmatpush3.msra.mxu0 %v8003_v43 }
 0x3bc   : > { %9500 = vmatpush3.msra.mxu1 %v5978_v60  ;;  %9457 = vmatprep.subr.mxu0 %v8002_v19 }
 0x3bd   : > { %5606 = vmatmul.mubr.f32.gmra.mxu1 %v7990_v34  ;;  %9501 = vmatprep.subr.mxu1 %v5977_v13 }
 0x3be   : > { %5610 = vmatprep.mubr.f32.mxu1 %v7993_v31  ;;  %9502 = vmatpush3.msra.mxu1 %v5977_v13  ;;  %v5683_v31 = vld [vmem:[#allocation3 + $0x1c8] sm:$0x1]  ;;  %v7997_v13 = vld [vmem:[%s13986_s6 + $0x98] sm:$0xff] }
 0x3bf   : > { %9503 = vmatprep.subr.mxu1 %v5976_v18  ;;  %9458 = vmatpush3.msra.mxu0 %v8002_v19 }
 0x3c0   : > { %9504 = vmatpush3.msra.mxu1 %v5976_v18  ;;  %9459 = vmatprep.subr.mxu0 %v8001_v24  ;;  %v7995_v18 = vld [vmem:[%s13986_s6 + $0x88] sm:$0xff] }
 0x3c1   : > { %5611 = vmatmul.mubr.f32.gmra.mxu1 %v7992_v5  ;;  %9505 = vmatprep.subr.mxu1 %v5975_v49 }
 0x3c2   : > { %9506 = vmatpush3.msra.mxu1 %v5975_v49  ;;  %9460 = vmatpush3.msra.mxu0 %v8001_v24  ;;  %v7994_v49 = vld [vmem:[%s13986_s6 + $0x80] sm:$0xff]  ;;  %v13086_v24 = vld [vmem:[%s13986_s6 + $0x1f8] sm:$0xff] }
 0x3c3   : > { %9461 = vmatprep.subr.mxu0 %v8000_v41 }
 0x3c4   : > { %9462 = vmatpush3.msra.mxu0 %v8000_v41 }
 0x3c5   : > { %9463 = vmatprep.subr.mxu0 %v7999_v38 }
 0x3c6   : > { %9464 = vmatpush3.msra.mxu0 %v7999_v38 }
 0x42f   : > { %v8499_v59 = vpop.f32.mrf.mxu0 }
 0x430   : > { %v8555_v55 = vpop.f32.mrf.mxu1 }
 0x431   : > { %v8500_v48 = vpop.f32.mrf.mxu0 }
 0x432   : > { %v8501_v6 = vadd.f32 %v8500_v48, %v8499_v59  ;;  %v8556_v21 = vpop.f32.mrf.mxu1 }
 0x433   : > { %v8557_v8 = vadd.f32 %v8556_v21, %v8555_v55  ;;  %v5685_v21 = vld [vmem:[#allocation3 + $0x1d8] sm:$0x1] }
 0x434   : > { %5224 = vst.msk [vmem:[#allocation3 + $0x1b0] sm:$0xff] %vm3517_vm2, %v8501_v6  ;;  %v8502_v1 = vpop.f32.mrf.mxu0 }
 0x435   : > { %5355 = vst.msk [vmem:[#allocation3 + $0x121] sm:$0xff] %vm3517_vm2, %v8557_v8 }
 0x436   : > { %v8503_v2 = vpop.f32.mrf.mxu0 }
 0x437   : > { %v8504_v39 = vadd.f32 %v8503_v2, %v8502_v1  ;;  %v5974_v1 = vld [vmem:[%s13986_s6 + $0x28] sm:$0xff] }
 0x438   : > { %9507 = vmatprep.subr.mxu1 %v5974_v1 }
 0x439   : > { %5225 = vst.msk [vmem:[#allocation3 + $0x1c0] sm:$0xff] %vm3517_vm2, %v8504_v39  ;;  %v8505_v46 = vpop.f32.mrf.mxu0  ;;  %9508 = vmatpush3.msra.mxu1 %v5974_v1 }
 0x43a   : > { %9509 = vmatprep.subr.mxu1 %v5973_v47 }
 0x43b   : > { %v8506_v56 = vpop.f32.mrf.mxu0  ;;  %v5680_v23 = vld [vmem:[#allocation3 + $0x1b0] sm:$0xff]  ;;  %9510 = vmatpush3.msra.mxu1 %v5973_v47 }
 0x43c   : > { %v8507_v50 = vadd.f32 %v8506_v56, %v8505_v46  ;;  %v5662_v14 = vld [vmem:[#allocation3 + $0x120] sm:$0xff]  ;;  %v5663_v0 = vld [vmem:[#allocation3 + $0x128] sm:$0x1]  ;;  %v9719_v42 = vpack.i.bf16 %v5681_v40, %v5680_v23  ;;  %v5972_v46 = vld [vmem:[%s13986_s6 + $0x18] sm:$0xff] }
 0x43d   : > { %v9714_v30 = vpack.i.bf16 %v5663_v0, %v5662_v14  ;;  %v5971_v14 = vld [vmem:[%s13986_s6 + $0x10] sm:$0xff]  ;;  %9511 = vmatprep.subr.mxu1 %v5972_v46 }
 0x43e   : > { %5226 = vst.msk [vmem:[#allocation3 + $0x1d0] sm:$0xff] %vm3517_vm2, %v8507_v50  ;;  %v8508_v57 = vpop.f32.mrf.mxu0  ;;  %v7998_v50 = vld [vmem:[%s13986_s6 + $0xa0] sm:$0xff]  ;;  %9512 = vmatpush3.msra.mxu1 %v5972_v46 }
 0x43f   : > { %9715 = vrot.lane.b32.xlu1 %v9714_v30, %s9859_s27  ;;  %9465 = vmatprep.subr.mxu0 %v7998_v50 }
 0x440   : > { %v8558_v35 = vpop.f32.mrf.mxu1  ;;  %v8509_v53 = vpop.f32.mrf.mxu0  ;;  %v5682_v34 = vld [vmem:[#allocation3 + $0x1c0] sm:$0xff]  ;;  %9466 = vmatpush3.msra.mxu0 %v7998_v50  ;;  %9513 = vmatprep.subr.mxu1 %v5971_v14 }
 0x441   : > { %v8510_v44 = vadd.f32 %v8509_v53, %v8508_v57  ;;  %v9729_v62 = vpack.i.bf16 %v5683_v31, %v5682_v34  ;;  %9514 = vmatpush3.msra.mxu1 %v5971_v14  ;;  %9467 = vmatprep.subr.mxu0 %v7997_v13 }
 0x442   : > { %v8559_v28 = vpop.f32.mrf.mxu1  ;;  %9468 = vmatpush3.msra.mxu0 %v7997_v13 }
 0x443   : > { %5227 = vst.msk [vmem:[#allocation3 + $0x1e0] sm:$0xff] %vm3517_vm2, %v8510_v44  ;;  %v8560_v17 = vadd.f32 %v8559_v28, %v8558_v35  ;;  %9720 = vrot.lane.b32.xlu1 %v9719_v42, %s9860_s28 }
 0x444   : > { %v8511_v27 = vpop.f32.mrf.mxu0 }
 0x445   : > { %5356 = vst.msk [vmem:[#allocation3 + $0x131] sm:$0xff] %vm3517_vm2, %v8560_v17  ;;  %v5684_v6 = vld [vmem:[#allocation3 + $0x1d0] sm:$0xff] }
 0x446   : > { %v8561_v10 = vpop.f32.mrf.mxu1  ;;  %v8512_v7 = vpop.f32.mrf.mxu0  ;;  %v9739_v3 = vpack.i.bf16 %v5685_v21, %v5684_v6  ;;  %v5687_v6 = vld [vmem:[#allocation3 + $0x1e8] sm:$0x1]  ;;  %v5649_v21 = vld [vmem:[#allocation3 + $0xb8] sm:$0x1] }
 0x447   : > { %v8513_v15 = vadd.f32 %v8512_v7, %v8511_v27 }
 0x448   : > { %v8562_v9 = vpop.f32.mrf.mxu1 }
 0x449   : > { %5228 = vst.msk [vmem:[#allocation3 + $0x1f0] sm:$0xff] %vm3517_vm2, %v8513_v15  ;;  %v8563_v29 = vadd.f32 %v8562_v9, %v8561_v10  ;;  %v5689_v10 = vld [vmem:[#allocation3 + $0x1f8] sm:$0x1] }
 0x44a   : > { %v8514_v22 = vpop.f32.mrf.mxu0 }
 0x44b   : > { %5357 = vst.msk [vmem:[#allocation3 + $0x141] sm:$0xff] %vm3517_vm2, %v8563_v29 }
 0x44c   : > { %v8564_v26 = vpop.f32.mrf.mxu1  ;;  %v8515_v37 = vpop.f32.mrf.mxu0  ;;  %v5664_v61 = vld [vmem:[#allocation3 + $0x130] sm:$0xff]  ;;  %v5665_v51 = vld [vmem:[#allocation3 + $0x138] sm:$0x1] }
 0x44d   : > { %v8516_v12 = vadd.f32 %v8515_v37, %v8514_v22  ;;  %v9724_v32 = vpack.i.bf16 %v5665_v51, %v5664_v61  ;;  %v5970_v22 = vld [vmem:[%s13986_s6 + $0x8] sm:$0xff]  ;;  %v7996_v61 = vld [vmem:[%s13986_s6 + $0x90] sm:$0xff]  ;;  %v5969_v51 = vld [vmem:[%s13986_s6] sm:$0xff] }
 0x44e   : > { %v8565_v11 = vpop.f32.mrf.mxu1  ;;  %9515 = vmatprep.subr.mxu1 %v5970_v22  ;;  %9469 = vmatprep.subr.mxu0 %v7996_v61 }
 0x44f   : > { %5229 = vst.msk [vmem:[#allocation3 + $0x200] sm:$0xff] %vm3517_vm2, %v8516_v12  ;;  %v8566_v5 = vadd.f32 %v8565_v11, %v8564_v26  ;;  %9725 = vrot.lane.b32.xlu0 %v9724_v32, %s9859_s27  ;;  %v5647_v32 = vld [vmem:[#allocation3 + $0xa8] sm:$0x1]  ;;  %9516 = vmatpush3.msra.mxu1 %v5970_v22 }
 0x450   : > { %v8517_v25 = vpop.f32.mrf.mxu0  ;;  %v5688_v27 = vld [vmem:[#allocation3 + $0x1f0] sm:$0xff]  ;;  %9470 = vmatpush3.msra.mxu0 %v7996_v61  ;;  %9517 = vmatprep.subr.mxu1 %v5969_v51 }
 0x451   : > { %5358 = vst.msk [vmem:[#allocation3 + $0x151] sm:$0xff] %vm3517_vm2, %v8566_v5  ;;  %v9769_v60 = vpack.i.bf16 %v5689_v10, %v5688_v27  ;;  %9471 = vmatprep.subr.mxu0 %v7995_v18  ;;  %9518 = vmatpush3.msra.mxu1 %v5969_v51 }
 0x452   : > { %v8567_v45 = vpop.f32.mrf.mxu1  ;;  %v8518_v20 = vpop.f32.mrf.mxu0  ;;  %v5666_v54 = vld [vmem:[#allocation3 + $0x140] sm:$0xff]  ;;  %v5667_v59 = vld [vmem:[#allocation3 + $0x148] sm:$0x1]  ;;  %9472 = vmatpush3.msra.mxu0 %v7995_v18  ;;  %9575 = vmatprep.subr.mxu1 %v13086_v24 }
 0x453   : > { %v8519_v55 = vadd.f32 %v8518_v20, %v8517_v25  ;;  %v9734_v48 = vpack.i.bf16 %v5667_v59, %v5666_v54  ;;  %9730 = vrot.lane.b32.xlu0 %v9729_v62, %s9860_s28  ;;  %9473 = vmatprep.subr.mxu0 %v7994_v49  ;;  %v13094_v59 = vld [vmem:[%s13986_s6 + $0x178] sm:$0xff] }
 0x454   : > { %v8568_v8 = vpop.f32.mrf.mxu1  ;;  %9474 = vmatpush3.msra.mxu0 %v7994_v49 }
 0x455   : > { %5230 = vst.msk [vmem:[#allocation3 + $0x210] sm:$0xff] %vm3517_vm2, %v8519_v55  ;;  %v8569_v52 = vadd.f32 %v8568_v8, %v8567_v45  ;;  %9735 = vrot.lane.b32.xlu1 %v9734_v48, %s9859_s27  ;;  %v5686_v48 = vld [vmem:[#allocation3 + $0x1e0] sm:$0xff]  ;;  %9531 = vmatprep.subr.mxu0 %v13094_v59 }
 0x456   : > { %v8520_v2 = vpop.f32.mrf.mxu0 }
 0x457   : > { %5359 = vst.msk [vmem:[#allocation3 + $0x161] sm:$0xff] %vm3517_vm2, %v8569_v52 }
 0x458   : > { %v8570_v39 = vpop.f32.mrf.mxu1  ;;  %v8521_v16 = vpop.f32.mrf.mxu0  ;;  %v5668_v4 = vld [vmem:[#allocation3 + $0x150] sm:$0xff]  ;;  %v5669_v33 = vld [vmem:[#allocation3 + $0x158] sm:$0x1] }
 0x459   : > { %v8522_v36 = vadd.f32 %v8521_v16, %v8520_v2  ;;  %9740 = vrot.lane.b32.xlu1 %v9739_v3, %s9860_s28  ;;  %v9744_v56 = vpack.i.bf16 %v5669_v33, %v5668_v4  ;;  %v9754_v2 = vpack.i.bf16 %v5687_v6, %v5686_v48  ;;  %v5659_v48 = vld [vmem:[#allocation3 + $0x108] sm:$0x1]  ;;  %v5661_v6 = vld [vmem:[#allocation3 + $0x118] sm:$0x1] }
 0x45a   : > { %v8571_v0 = vpop.f32.mrf.mxu1 }
 0x45b   : > { %5231 = vst.msk [vmem:[#allocation3 + $0x220] sm:$0xff] %vm3517_vm2, %v8522_v36  ;;  %v8572_v30 = vadd.f32 %v8571_v0, %v8570_v39  ;;  %9745 = vrot.lane.b32.xlu0 %v9744_v56, %s9859_s27 }
 0x45d   : > { %5360 = vst.msk [vmem:[#allocation3 + $0x171] sm:$0xff] %vm3517_vm2, %v8572_v30  ;;  %v8611_v57 = vpop.f32.mrf.mxu0  ;;  %v8573_v23 = vpop.f32.mrf.mxu1  ;;  %v5690_v30 = vld [vmem:[#allocation3 + $0x200] sm:$0xff] }
 0x45e   : > { %v5670_v40 = vld [vmem:[#allocation3 + $0x160] sm:$0xff]  ;;  %v5671_v35 = vld [vmem:[#allocation3 + $0x168] sm:$0x1] }
 0x45f   : > { %v8612_v53 = vpop.f32.mrf.mxu0  ;;  %v8574_v44 = vpop.f32.mrf.mxu1  ;;  %v9759_v42 = vpack.i.bf16 %v5671_v35, %v5670_v40 }
 0x460   : > { %v8613_v28 = vadd.f32 %v8612_v53, %v8611_v57  ;;  %v8575_v17 = vadd.f32 %v8574_v44, %v8573_v23  ;;  %v5691_v57 = vld [vmem:[#allocation3 + $0x208] sm:$0x1]  ;;  %v5653_v23 = vld [vmem:[#allocation3 + $0xd8] sm:$0x1] }
 0x461   : > { %v8614_v7 = vpop.f32.mrf.mxu0  ;;  %9760 = vrot.lane.b32.xlu1 %v9759_v42, %s9859_s27  ;;  %v8576_v15 = vpop.f32.mrf.mxu1 }
 0x462   : > { %5486 = vst.msk [vmem:[#allocation3 + $0xa0] sm:$0xff] %vm3517_vm2, %v8613_v28  ;;  %5361 = vst.msk [vmem:[#allocation3 + $0x181] sm:$0xff] %vm3517_vm2, %v8575_v17  ;;  %v9774_v17 = vpack.i.bf16 %v5691_v57, %v5690_v30  ;;  %v5625_v30 = vld [vmem:[#allocation3] sm:$0xff] }
 0x463   : > { %v8615_v9 = vpop.f32.mrf.mxu0  ;;  %v8577_v58 = vpop.f32.mrf.mxu1 }
 0x464   : > { %v8616_v29 = vadd.f32 %v8615_v9, %v8614_v7  ;;  %v8578_v43 = vadd.f32 %v8577_v58, %v8576_v15  ;;  %v5672_v16 = vld [vmem:[#allocation3 + $0x170] sm:$0xff]  ;;  %v5673_v4 = vld [vmem:[#allocation3 + $0x178] sm:$0x1] }
 0x465   : > { %v8617_v26 = vpop.f32.mrf.mxu0  ;;  %9770 = vrot.lane.b32.xlu1 %v9769_v60, %s9860_s28  ;;  %v8667_v37 = vpop.f32.mrf.mxu1  ;;  %v9764_v14 = vpack.i.bf16 %v5673_v4, %v5672_v16  ;;  %v5678_v4 = vld [vmem:[#allocation3 + $0x1a0] sm:$0xff] }
 0x466   : > { %5487 = vst.msk [vmem:[#allocation3 + $0xb0] sm:$0xff] %vm3517_vm2, %v8616_v29  ;;  %5362 = vst.msk [vmem:[#allocation3 + $0x191] sm:$0xff] %vm3517_vm2, %v8578_v43 }
 0x467   : > { %v8618_v12 = vpop.f32.mrf.mxu0  ;;  %v8668_v19 = vpop.f32.mrf.mxu1 }
 0x468   : > { %v8619_v11 = vadd.f32 %v8618_v12, %v8617_v26  ;;  %v8669_v34 = vadd.f32 %v8668_v19, %v8667_v37  ;;  %v5651_v26 = vld [vmem:[#allocation3 + $0xc8] sm:$0x1]  ;;  %v5657_v37 = vld [vmem:[#allocation3 + $0xf8] sm:$0x1] }
 0x469   : > { %v8620_v31 = vpop.f32.mrf.mxu0  ;;  %v5646_v5 = vld [vmem:[#allocation3 + $0xa0] sm:$0xff]  ;;  %v5675_v62 = vld [vmem:[#allocation3 + $0x188] sm:$0x1]  ;;  %v8670_v45 = vpop.f32.mrf.mxu1 }
 0x46a   : > { %v5674_v25 = vld [vmem:[#allocation3 + $0x180] sm:$0xff]  ;;  %5488 = vst.msk [vmem:[#allocation3 + $0xc0] sm:$0xff] %vm3517_vm2, %v8619_v11  ;;  %v9749_v20 = vpack.i.bf16 %v5647_v32, %v5646_v5  ;;  %5617 = vst.msk [vmem:[#allocation3 + $0x11] sm:$0xff] %vm3517_vm2, %v8669_v34  ;;  %v5693_v34 = vld [vmem:[#allocation3 + $0x218] sm:$0x1] }
 0x46b   : > { %v9779_v54 = vpack.i.bf16 %v5675_v62, %v5674_v25  ;;  %v8621_v55 = vpop.f32.mrf.mxu0  ;;  %v8671_v8 = vpop.f32.mrf.mxu1  ;;  %v5655_v5 = vld [vmem:[#allocation3 + $0xe8] sm:$0x1]  ;;  %v5692_v25 = vld [vmem:[#allocation3 + $0x210] sm:$0xff] }
 0x46c   : > { %v8622_v1 = vadd.f32 %v8621_v55, %v8620_v31  ;;  %9750 = vrot.lane.b32.xlu0 %v9749_v20, %s9858_s19  ;;  %v8672_v41 = vadd.f32 %v8671_v8, %v8670_v45 }
 0x46d   : > { %9780 = vrot.lane.b32.xlu1 %v9779_v54, %s9859_s27  ;;  %v8623_v47 = vpop.f32.mrf.mxu0  ;;  %v5648_v52 = vld [vmem:[#allocation3 + $0xb0] sm:$0xff]  ;;  %v8673_v38 = vpop.f32.mrf.mxu1  ;;  %v5677_v15 = vld [vmem:[#allocation3 + $0x198] sm:$0x1]  ;;  %v9814_v54 = vpack.i.bf16 %v5693_v34, %v5692_v25 }
 0x46e   : > { %5489 = vst.msk [vmem:[#allocation3 + $0xd0] sm:$0xff] %vm3517_vm2, %v8622_v1  ;;  %v9789_v3 = vpack.i.bf16 %v5649_v21, %v5648_v52  ;;  %5618 = vst.msk [vmem:[#allocation3 + $0x21] sm:$0xff] %vm3517_vm2, %v8672_v41  ;;  %v5676_v7 = vld [vmem:[#allocation3 + $0x190] sm:$0xff]  ;;  %v5697_v41 = vld [vmem:[#allocation3 + $0x238] sm:$0x1] }
 0x46f   : > { %v8624_v39 = vpop.f32.mrf.mxu0  ;;  %v8674_v33 = vpop.f32.mrf.mxu1  ;;  %v9784_v43 = vpack.i.bf16 %v5677_v15, %v5676_v7  ;;  %v5696_v1 = vld [vmem:[#allocation3 + $0x230] sm:$0xff] }
 0x470   : > { %v8625_v46 = vadd.f32 %v8624_v39, %v8623_v47  ;;  %9755 = vrot.lane.b32.xlu0 %v9754_v2, %s9860_s28  ;;  %v8675_v36 = vadd.f32 %v8674_v33, %v8673_v38  ;;  %v5694_v38 = vld [vmem:[#allocation3 + $0x220] sm:$0xff]  ;;  %v5695_v2 = vld [vmem:[#allocation3 + $0x228] sm:$0x1]  ;;  %v9839_v39 = vpack.i.bf16 %v5697_v41, %v5696_v1 }
 0x471   : > { %9790 = vrot.lane.b32.xlu1 %v9789_v3, %s9858_s19  ;;  %v8626_v56 = vpop.f32.mrf.mxu0  ;;  %v8676_v50 = vpop.f32.mrf.mxu1  ;;  %v5650_v22 = vld [vmem:[#allocation3 + $0xc0] sm:$0xff]  ;;  %v5679_v33 = vld [vmem:[#allocation3 + $0x1a8] sm:$0x1] }
 0x472   : > { %5490 = vst.msk [vmem:[#allocation3 + $0xe0] sm:$0xff] %vm3517_vm2, %v8625_v46  ;;  %5619 = vst.msk [vmem:[#allocation3 + $0x31] sm:$0xff] %vm3517_vm2, %v8675_v36  ;;  %v9794_v49 = vpack.i.bf16 %v5651_v26, %v5650_v22  ;;  %v9824_v46 = vpack.i.bf16 %v5695_v2, %v5694_v38  ;;  %v9829_v36 = vpack.i.bf16 %v5679_v33, %v5678_v4 }
 0x473   : > { %v8627_v0 = vpop.f32.mrf.mxu0  ;;  %v8677_v40 = vpop.f32.mrf.mxu1 }
 0x474   : > { %v8628_v35 = vadd.f32 %v8627_v0, %v8626_v56  ;;  %9765 = vrot.lane.b32.xlu0 %v9764_v14, %s9859_s27  ;;  %v8678_v53 = vadd.f32 %v8677_v40, %v8676_v50  ;;  %v9711_v56 = vpop.permute.xlu1 %9710  ;;  %v5626_v0 = vld [vmem:[#allocation3 + $0x8] sm:$0x1] }
 0x475   : > { %v8629_v44 = vpop.f32.mrf.mxu0  ;;  %v5652_v42 = vld [vmem:[#allocation3 + $0xd0] sm:$0xff]  ;;  %v8679_v28 = vpop.f32.mrf.mxu1  ;;  %v9713_v50 = vunpack.i.h.bf16 %v9711_v56  ;;  %v9712_v14 = vunpack.i.l.bf16 %v9711_v56 }
 0x476   : > { %5491 = vst.msk [vmem:[#allocation3 + $0xf0] sm:$0xff] %vm3517_vm2, %v8628_v35  ;;  %v9799_v27 = vpack.i.bf16 %v5653_v23, %v5652_v42  ;;  %5620 = vst.msk [vmem:[#allocation3 + $0x41] sm:$0xff] %vm3517_vm2, %v8678_v53 }
 0x477   : > { %v8630_v10 = vpop.f32.mrf.mxu0  ;;  %v8680_v9 = vpop.f32.mrf.mxu1  ;;  %v5915_v23 = vsel %vm3517_vm2, %v5626_v0, %v9713_v50  ;;  %v5914_v53 = vsel %vm3517_vm2, %v5625_v30, %v9712_v14  ;;  %v8039_v50 = vld [vmem:[%s13986_s6 + $0x1e8] sm:$0xff]  ;;  %v8024_v14 = vld [vmem:[%s13986_s6 + $0x170] sm:$0xff] }
 0x478   : > { %9775 = vrot.lane.b32.xlu0 %v9774_v17, %s9860_s28  ;;  %9800 = vrot.lane.b32.xlu1 %v9799_v27, %s9858_s19  ;;  %v8631_v60 = vadd.f32 %v8630_v10, %v8629_v44  ;;  %v8681_v58 = vadd.f32 %v8680_v9, %v8679_v28 }
 0x479   : > { %v8632_v13 = vpop.f32.mrf.mxu0  ;;  %v8682_v29 = vpop.f32.mrf.mxu1  ;;  %v5654_v31 = vld [vmem:[#allocation3 + $0xe0] sm:$0xff] }
 0x47a   : > { %5492 = vst.msk [vmem:[#allocation3 + $0x100] sm:$0xff] %vm3517_vm2, %v8631_v60  ;;  %5621 = vst.msk [vmem:[#allocation3 + $0x51] sm:$0xff] %vm3517_vm2, %v8681_v58  ;;  %v9804_v20 = vpack.i.bf16 %v5655_v5, %v5654_v31 }
 0x47b   : > { %v8633_v61 = vpop.f32.mrf.mxu0  ;;  %v8683_v51 = vpop.f32.mrf.mxu1 }
 0x47c   : > { %9785 = vrot.lane.b32.xlu0 %v9784_v43, %s9859_s27  ;;  %v8634_v18 = vadd.f32 %v8633_v61, %v8632_v13  ;;  %v8684_v12 = vadd.f32 %v8683_v51, %v8682_v29  ;;  %v5627_v61 = vld [vmem:[#allocation3 + $0x10] sm:$0xff]  ;;  %v5628_v51 = vld [vmem:[#allocation3 + $0x18] sm:$0x1] }
 0x47d   : > { %v5656_v32 = vld [vmem:[#allocation3 + $0xf0] sm:$0xff]  ;;  %v8685_v19 = vpop.f32.mrf.mxu1 }
 0x47e   : > { %v9809_v11 = vpack.i.bf16 %v5657_v37, %v5656_v32  ;;  %5493 = vst.msk [vmem:[#allocation3 + $0x110] sm:$0xff] %vm3517_vm2, %v8634_v18  ;;  %5622 = vst.msk [vmem:[#allocation3 + $0x61] sm:$0xff] %vm3517_vm2, %v8684_v12 }
 0x47f   : > { %v8686_v62 = vpop.f32.mrf.mxu1 }
 0x480   : > { %9795 = vrot.lane.b32.xlu0 %v9794_v49, %s9858_s19  ;;  %9810 = vrot.lane.b32.xlu1 %v9809_v11, %s9858_s19  ;;  %v8687_v45 = vadd.f32 %v8686_v62, %v8685_v19 }
 0x481   : > { %v5658_v55 = vld [vmem:[#allocation3 + $0x100] sm:$0xff]  ;;  %v8688_v21 = vpop.f32.mrf.mxu1 }
 0x482   : > { %5623 = vst.msk [vmem:[#allocation3 + $0x71] sm:$0xff] %vm3517_vm2, %v8687_v45  ;;  %v9819_v47 = vpack.i.bf16 %v5659_v48, %v5658_v55 }
 0x483   : > { %v8689_v3 = vpop.f32.mrf.mxu1 }
 0x484   : > { %9805 = vrot.lane.b32.xlu0 %v9804_v20, %s9858_s19  ;;  %9815 = vrot.lane.b32.xlu1 %v9814_v54, %s9860_s28  ;;  %v8690_v16 = vadd.f32 %v8689_v3, %v8688_v21  ;;  %v5630_v54 = vld [vmem:[#allocation3 + $0x28] sm:$0x1]  ;;  %v5629_v21 = vld [vmem:[#allocation3 + $0x20] sm:$0xff] }
 0x485   : > { %v5660_v8 = vld [vmem:[#allocation3 + $0x110] sm:$0xff] }
 0x486   : > { %v9834_v52 = vpack.i.bf16 %v5661_v6, %v5660_v8  ;;  %5624 = vst.msk [vmem:[#allocation3 + $0x81] sm:$0xff] %vm3517_vm2, %v8690_v16 }
 0x488   : > { %9820 = vrot.lane.b32.xlu0 %v9819_v47, %s9858_s19  ;;  %9835 = vrot.lane.b32.xlu1 %v9834_v52, %s9858_s19  ;;  %v8040_v52 = vld [vmem:[%s13986_s6 + $0x1f0] sm:$0xff]  ;;  %s473_s19 = scalar_lea.vmem %s13993_s13, %s14173_s16 }
 0x48c   : > { %9825 = vrot.lane.b32.xlu0 %v9824_v46, %s9860_s28  ;;  %9840 = vrot.lane.b32.xlu1 %v9839_v39, %s9860_s28 }
 0x490   : > { %9830 = vrot.lane.b32.xlu0 %v9829_v36, %s9859_s27 }
 0x4b1   : > { %v9716_v57 = vpop.permute.xlu1 %9715 }
 0x4b2   : > { %v9718_v40 = vunpack.i.h.bf16 %v9716_v57  ;;  %v9717_v35 = vunpack.i.l.bf16 %v9716_v57 }
 0x4b4   : > { %v5933_v44 = vsel %vm3767_vm15, %v5915_v23, %v9718_v40  ;;  %v5932_v28 = vsel %vm3767_vm15, %v5914_v53, %v9717_v35  ;;  %v8038_v23 = vld [vmem:[%s13986_s6 + $0x1e0] sm:$0xff]  ;;  %v8023_v40 = vld [vmem:[%s13986_s6 + $0x168] sm:$0xff] }
 0x4b5   : > { %v9721_v42 = vpop.permute.xlu1 %9720 }
 0x4b6   : > { %v9723_v17 = vunpack.i.h.bf16 %v9721_v42  ;;  %v9722_v27 = vunpack.i.l.bf16 %v9721_v42  ;;  %v5634_v42 = vld [vmem:[#allocation3 + $0x48] sm:$0x1] }
 0x4b8   : > { %v5952_v10 = vsel %vm5950_vm14, %v5933_v44, %v9723_v17  ;;  %v5951_v7 = vsel %vm5950_vm14, %v5932_v28, %v9722_v27  ;;  %v5633_v44 = vld [vmem:[#allocation3 + $0x40] sm:$0xff] }
 0x4b9   : > { %v6001_v15 = vrot.slane %v5951_v7, 1  ;;  %9519 = vmatprep.mubr.f32.mxu1 %v5951_v7  ;;  %v6002_v9 = vrot.slane %v5952_v10, 1  ;;  %v8022_v10 = vld [vmem:[%s13986_s6 + $0x160] sm:$0xff]  ;;  %v8036_v7 = vld [vmem:[%s13986_s6 + $0x1d0] sm:$0xff] }
 0x4bb   : > { %v6003_v60 = vsel %vm3677_vm1, %v6001_v15, %v6002_v9 }
 0x4bc   : > { %9475 = vmatprep.mubr.f32.mxu0 %v6003_v60 }
 0x4c1   : > { %v9726_v29 = vpop.permute.xlu0 %9725 }
 0x4c2   : > { %v9728_v49 = vunpack.i.h.bf16 %v9726_v29  ;;  %v9727_v11 = vunpack.i.l.bf16 %v9726_v29 }
 0x4c5   : > { %v9731_v22 = vpop.permute.xlu0 %9730 }
 0x4c6   : > { %v9733_v34 = vunpack.i.h.bf16 %v9731_v22  ;;  %v9732_v25 = vunpack.i.l.bf16 %v9731_v22  ;;  %v8035_v22 = vld [vmem:[%s13986_s6 + $0x1c8] sm:$0xff] }
 0x4c7   : > { %v9736_v58 = vpop.permute.xlu1 %9735 }
 0x4c8   : > { %v9738_v8 = vunpack.i.h.bf16 %v9736_v58  ;;  %v9737_v38 = vunpack.i.l.bf16 %v9736_v58 }
 0x4cb   : > { %v9741_v13 = vpop.permute.xlu1 %9740 }
 0x4cc   : > { %v9743_v39 = vunpack.i.h.bf16 %v9741_v13  ;;  %v9742_v16 = vunpack.i.l.bf16 %v9741_v13  ;;  %v8021_v13 = vld [vmem:[%s13986_s6 + $0x158] sm:$0xff] }
 0x4cd   : > { %v13135_v26 = vpop.permute.xlu0 %9745 }
 0x4d3   : > { %v13133_v43 = vpop.permute.xlu1 %9760 }
 0x4d4   : > { %v9762_v9 = vunpack.i.l.bf16 %v13133_v43  ;;  %v9763_v29 = vunpack.i.h.bf16 %v13133_v43 }
 0x4d7   : > { %v13137_v37 = vpop.permute.xlu1 %9770 }
 0x4d8   : > { %v9773_v43 = vunpack.i.h.bf16 %v13137_v37 }
 0x4de   : > { %v9751_v18 = vpop.permute.xlu0 %9750 }
 0x4df   : > { %v13139_v12 = vpop.permute.xlu1 %9780  ;;  %v9753_v32 = vunpack.i.h.bf16 %v9751_v18  ;;  %v9752_v19 = vunpack.i.l.bf16 %v9751_v18  ;;  %v8020_v18 = vld [vmem:[%s13986_s6 + $0x150] sm:$0xff] }
 0x4e1   : > { %v5917_v31 = vsel %vm3517_vm2, %v5628_v51, %v9753_v32  ;;  %v5916_v5 = vsel %vm3517_vm2, %v5627_v61, %v9752_v19  ;;  %v9748_v61 = vunpack.i.h.bf16 %v13135_v26  ;;  %v9747_v51 = vunpack.i.l.bf16 %v13135_v26  ;;  %v8034_v26 = vld [vmem:[%s13986_s6 + $0x1c0] sm:$0xff] }
 0x4e2   : > { %v5935_v62 = vsel %vm3767_vm15, %v5917_v31, %v9728_v49  ;;  %v5934_v45 = vsel %vm3767_vm15, %v5916_v5, %v9727_v11  ;;  %v13145_v20 = vpop.permute.xlu0 %9755  ;;  %v9772_v19 = vunpack.i.l.bf16 %v13137_v37  ;;  %v9783_v49 = vunpack.i.h.bf16 %v13139_v12  ;;  %v5638_v37 = vld [vmem:[#allocation3 + $0x68] sm:$0x1] }
 0x4e3   : > { %v9791_v55 = vpop.permute.xlu1 %9790  ;;  %v5954_v48 = vsel %vm5950_vm14, %v5935_v62, %v9733_v34  ;;  %v13149_v47 = vsel %vm5950_vm14, %v5934_v45, %v9732_v25  ;;  %v9782_v34 = vunpack.i.l.bf16 %v13139_v12  ;;  %v9758_v31 = vunpack.i.h.bf16 %v13145_v20  ;;  %v8030_v12 = vld [vmem:[%s13986_s6 + $0x1a0] sm:$0xff] }
 0x4e4   : > { %v9793_v6 = vunpack.i.h.bf16 %v9791_v55  ;;  %v6005_v1 = vrot.slane %v5954_v48, 1  ;;  %v9792_v41 = vunpack.i.l.bf16 %v9791_v55  ;;  %v6004_v3 = vrot.slane %v13149_v47, 1  ;;  %9520 = vmatmul.mubr.f32.vlgmr.msra.gmra.mxu1 %v13149_v47 }
 0x4e5   : > { %9576 = vmatpush3.msra.mxu1 %v13086_v24  ;;  %v9757_v5 = vunpack.i.l.bf16 %v13145_v20  ;;  %v8033_v20 = vld [vmem:[%s13986_s6 + $0x1b8] sm:$0xff] }
 0x4e6   : > { %v5919_v2 = vsel %vm3517_vm2, %v5630_v54, %v9793_v6  ;;  %v13158_v33 = vpop.permute.xlu0 %9765  ;;  %v5918_v46 = vsel %vm3517_vm2, %v5629_v21, %v9792_v41  ;;  %v13163_v36 = vsel %vm3677_vm1, %v6004_v3, %v6005_v1  ;;  %9577 = vmatprep.subr.mxu1 %v8040_v52  ;;  %v8019_v54 = vld [vmem:[%s13986_s6 + $0x148] sm:$0xff]  ;;  %v5631_v41 = vld [vmem:[#allocation3 + $0x30] sm:$0xff] }
 0x4e7   : > { %v5937_v4 = vsel %vm3767_vm15, %v5919_v2, %v9738_v8  ;;  %v5936_v56 = vsel %vm3767_vm15, %v5918_v46, %v9737_v38  ;;  %9476 = vmatmul.mubr.f32.vlgmr.msra.gmra.mxu0 %v13163_v36  ;;  %9578 = vmatpush3.msra.mxu1 %v8040_v52  ;;  %v9768_v25 = vunpack.i.h.bf16 %v13158_v33  ;;  %v9767_v8 = vunpack.i.l.bf16 %v13158_v33  ;;  %v5632_v52 = vld [vmem:[#allocation3 + $0x38] sm:$0x1]  ;;  %v8018_v2 = vld [vmem:[%s13986_s6 + $0x140] sm:$0xff] }
 0x4e8   : > { %v13174_v24 = vsel %vm5950_vm14, %v5936_v56, %v9742_v16  ;;  %v5956_v0 = vsel %vm5950_vm14, %v5937_v4, %v9743_v39  ;;  %9532 = vmatpush3.msra.mxu0 %v13094_v59  ;;  %9579 = vmatprep.subr.mxu1 %v8039_v50  ;;  %v8037_v59 = vld [vmem:[%s13986_s6 + $0x1d8] sm:$0xff]  ;;  %v8032_v56 = vld [vmem:[%s13986_s6 + $0x1b0] sm:$0xff] }
 0x4e9   : > { %v6007_v30 = vrot.slane %v13174_v24, 1  ;;  %9522 = vmatprep.mubr.f32.mxu1 %v13174_v24  ;;  %v6008_v57 = vrot.slane %v5956_v0, 1  ;;  %9533 = vmatprep.subr.mxu0 %v8024_v14 }
 0x4ea   : > { %v13186_v35 = vpop.permute.xlu0 %9775  ;;  %v9801_v53 = vpop.permute.xlu1 %9800  ;;  %9580 = vmatpush3.msra.mxu1 %v8039_v50  ;;  %9534 = vmatpush3.msra.mxu0 %v8024_v14  ;;  %v5637_v50 = vld [vmem:[#allocation3 + $0x60] sm:$0xff] }
 0x4eb   : > { %v9803_v28 = vunpack.i.h.bf16 %v9801_v53  ;;  %v9802_v17 = vunpack.i.l.bf16 %v9801_v53  ;;  %v13192_v27 = vsel %vm3677_vm1, %v6007_v30, %v6008_v57  ;;  %9581 = vmatprep.subr.mxu1 %v8038_v23  ;;  %9535 = vmatprep.subr.mxu0 %v8023_v40  ;;  %v9778_v1 = vunpack.i.h.bf16 %v13186_v35  ;;  %v8017_v53 = vld [vmem:[%s13986_s6 + $0x138] sm:$0xff] }
 0x4ec   : > { %9478 = vmatprep.mubr.f32.mxu0 %v13192_v27  ;;  %9582 = vmatpush3.msra.mxu1 %v8038_v23  ;;  %v9777_v39 = vunpack.i.l.bf16 %v13186_v35 }
 0x4ed   : > { %v5922_v15 = vsel %vm3517_vm2, %v5633_v44, %v9802_v17  ;;  %v5923_v60 = vsel %vm3517_vm2, %v5634_v42, %v9803_v28  ;;  %9536 = vmatpush3.msra.mxu0 %v8023_v40  ;;  %9583 = vmatprep.subr.mxu1 %v8037_v59 }
 0x4ee   : > { %v13204_v58 = vpop.permute.xlu0 %9785  ;;  %9537 = vmatprep.subr.mxu0 %v8022_v10  ;;  %9584 = vmatpush3.msra.mxu1 %v8037_v59  ;;  %v5940_v32 = vsel %vm3767_vm15, %v5922_v15, %v9762_v9  ;;  %v5941_v11 = vsel %vm3767_vm15, %v5923_v60, %v9763_v29  ;;  %v5635_v59 = vld [vmem:[#allocation3 + $0x50] sm:$0xff]  ;;  %v8031_v15 = vld [vmem:[%s13986_s6 + $0x1a8] sm:$0xff] }
 0x4ef   : > { %9538 = vmatpush3.msra.mxu0 %v8022_v10  ;;  %9585 = vmatprep.subr.mxu1 %v8036_v7  ;;  %v13237_v21 = vsel %vm5950_vm14, %v5940_v32, %v9772_v19  ;;  %v13245_v3 = vsel %vm5950_vm14, %v5941_v11, %v9773_v43  ;;  %v5636_v10 = vld [vmem:[#allocation3 + $0x58] sm:$0x1]  ;;  %v5639_v43 = vld [vmem:[#allocation3 + $0x70] sm:$0xff]  ;;  %v9788_v35 = vunpack.i.h.bf16 %v13204_v58 }
 0x4f0   : > { %9539 = vmatprep.subr.mxu0 %v8021_v13  ;;  %9586 = vmatpush3.msra.mxu1 %v8036_v7  ;;  %v6013_v40 = vrot.slane %v13237_v21, 1  ;;  %v6014_v60 = vrot.slane %v13245_v3, 1  ;;  %v5640_v19 = vld [vmem:[#allocation3 + $0x78] sm:$0x1] }
 0x4f1   : > { %9540 = vmatpush3.msra.mxu0 %v8021_v13  ;;  %9587 = vmatprep.subr.mxu1 %v8035_v22 }
 0x4f2   : > { %v9796_v62 = vpop.permute.xlu0 %9795  ;;  %v9811_v45 = vpop.permute.xlu1 %9810  ;;  %9541 = vmatprep.subr.mxu0 %v8020_v18  ;;  %9588 = vmatpush3.msra.mxu1 %v8035_v22 }
 0x4f3   : > { %v9798_v55 = vunpack.i.h.bf16 %v9796_v62  ;;  %v9797_v48 = vunpack.i.l.bf16 %v9796_v62  ;;  %v9813_v6 = vunpack.i.h.bf16 %v9811_v45  ;;  %v9812_v38 = vunpack.i.l.bf16 %v9811_v45  ;;  %9542 = vmatpush3.msra.mxu0 %v8020_v18  ;;  %9589 = vmatprep.subr.mxu1 %v8034_v26  ;;  %v8016_v18 = vld [vmem:[%s13986_s6 + $0x130] sm:$0xff] }
 0x4f4   : > { %9543 = vmatprep.subr.mxu0 %v8019_v54  ;;  %9590 = vmatpush3.msra.mxu1 %v8034_v26 }
 0x4f5   : > { %v5921_v16 = vsel %vm3517_vm2, %v5632_v52, %v9798_v55  ;;  %v5920_v4 = vsel %vm3517_vm2, %v5631_v41, %v9797_v48  ;;  %v5927_v46 = vsel %vm3517_vm2, %v5638_v37, %v9813_v6  ;;  %9544 = vmatpush3.msra.mxu0 %v8019_v54  ;;  %9591 = vmatprep.subr.mxu1 %v8033_v20  ;;  %v8015_v6 = vld [vmem:[%s13986_s6 + $0x128] sm:$0xff]  ;;  %v8029_v52 = vld [vmem:[%s13986_s6 + $0x198] sm:$0xff] }
 0x4f6   : > { %v5939_v14 = vsel %vm3767_vm15, %v5921_v16, %v9748_v61  ;;  %v9806_v0 = vpop.permute.xlu0 %9805  ;;  %v9816_v30 = vpop.permute.xlu1 %9815  ;;  %v5945_v57 = vsel %vm3767_vm15, %v5927_v46, %v9783_v49  ;;  %v5938_v23 = vsel %vm3767_vm15, %v5920_v4, %v9747_v51  ;;  %9545 = vmatprep.subr.mxu0 %v8018_v2  ;;  %9592 = vmatpush3.msra.mxu1 %v8033_v20 }
 0x4f7   : > { %v9808_v44 = vunpack.i.h.bf16 %v9806_v0  ;;  %v9807_v42 = vunpack.i.l.bf16 %v9806_v0  ;;  %v9818_v28 = vunpack.i.h.bf16 %v9816_v30  ;;  %v9817_v17 = vunpack.i.l.bf16 %v9816_v30  ;;  %9546 = vmatpush3.msra.mxu0 %v8018_v2  ;;  %9593 = vmatprep.subr.mxu1 %v8032_v56  ;;  %v8013_v30 = vld [vmem:[%s13986_s6 + $0x118] sm:$0xff] }
 0x4f8   : > { %v13262_v7 = vsel %vm5950_vm14, %v5938_v23, %v9757_v5  ;;  %v5958_v9 = vsel %vm5950_vm14, %v5939_v14, %v9758_v31  ;;  %v5926_v13 = vsel %vm3517_vm2, %v5637_v50, %v9812_v38  ;;  %9547 = vmatprep.subr.mxu0 %v8017_v53  ;;  %9594 = vmatpush3.msra.mxu1 %v8032_v56  ;;  %v8028_v56 = vld [vmem:[%s13986_s6 + $0x190] sm:$0xff] }
 0x4f9   : > { %v5925_v29 = vsel %vm3517_vm2, %v5636_v10, %v9808_v44  ;;  %v5924_v22 = vsel %vm3517_vm2, %v5635_v59, %v9807_v42  ;;  %v5964_v61 = vsel %vm5950_vm14, %v5945_v57, %v9818_v28  ;;  %v6010_v51 = vrot.slane %v13262_v7, 1  ;;  %9523 = vmatmul.mubr.f32.gmra.mxu1 %v13262_v7  ;;  %9548 = vmatpush3.msra.mxu0 %v8017_v53  ;;  %v8012_v53 = vld [vmem:[%s13986_s6 + $0x110] sm:$0xff]  ;;  %v5642_v59 = vld [vmem:[#allocation3 + $0x88] sm:$0x1]  ;;  %v8026_v10 = vld [vmem:[%s13986_s6 + $0x180] sm:$0xff] }
 0x4fa   : > { %v5943_v32 = vsel %vm3767_vm15, %v5925_v29, %v9768_v25  ;;  %9525 = vmatprep.mubr.f32.mxu1 %v13237_v21  ;;  %v9821_v49 = vpop.permute.xlu0 %9820  ;;  %v6011_v11 = vrot.slane %v5958_v9, 1  ;;  %v5942_v26 = vsel %vm3767_vm15, %v5924_v22, %v9767_v8  ;;  %v5944_v31 = vsel %vm3767_vm15, %v5926_v13, %v9782_v34  ;;  %9595 = vmatprep.subr.mxu1 %v8031_v15  ;;  %v9836_v14 = vpop.permute.xlu1 %9835  ;;  %v8011_v9 = vld [vmem:[%s13986_s6 + $0x108] sm:$0xff] }
 0x4fb   : > { %v9823_v5 = vunpack.i.h.bf16 %v9821_v49  ;;  %v9822_v62 = vunpack.i.l.bf16 %v9821_v49  ;;  %v13287_v33 = vsel %vm5950_vm14, %v5942_v26, %v9777_v39  ;;  %v13290_v25 = vsel %vm5950_vm14, %v5944_v31, %v9817_v17  ;;  %9549 = vmatprep.subr.mxu0 %v8016_v18  ;;  %9596 = vmatpush3.msra.mxu1 %v8031_v15  ;;  %v5641_v17 = vld [vmem:[#allocation3 + $0x80] sm:$0xff] }
 0x4fc   : > { %v13293_v37 = vsel %vm3677_vm1, %v6010_v51, %v6011_v11  ;;  %v6016_v45 = vrot.slane %v13287_v33, 1  ;;  %v5962_v34 = vsel %vm5950_vm14, %v5943_v32, %v9778_v1  ;;  %v13306_v48 = vsel %vm3677_vm1, %v6013_v40, %v6014_v60  ;;  %9550 = vmatpush3.msra.mxu0 %v8016_v18  ;;  %9597 = vmatprep.subr.mxu1 %v8030_v12  ;;  %v8027_v40 = vld [vmem:[%s13986_s6 + $0x188] sm:$0xff]  ;;  %v8010_v51 = vld [vmem:[%s13986_s6 + $0x100] sm:$0xff] }
 0x4fd   : > { %v5929_v54 = vsel %vm3517_vm2, %v5640_v19, %v9823_v5  ;;  %v5928_v55 = vsel %vm3517_vm2, %v5639_v43, %v9822_v62  ;;  %9479 = vmatmul.mubr.f32.gmra.mxu0 %v13293_v37  ;;  %9526 = vmatmul.mubr.f32.gmra.mxu1 %v13287_v33  ;;  %v6017_v20 = vrot.slane %v5962_v34, 1  ;;  %v9787_v8 = vunpack.i.l.bf16 %v13204_v58  ;;  %v8014_v58 = vld [vmem:[%s13986_s6 + $0x120] sm:$0xff] }
 0x4fe   : > { %9481 = vmatprep.mubr.f32.mxu0 %v13306_v48  ;;  %v6019_v1 = vrot.slane %v13290_v25, 1  ;;  %v9826_v41 = vpop.permute.xlu0 %9825  ;;  %v6020_v38 = vrot.slane %v5964_v61, 1  ;;  %9528 = vmatprep.mubr.f32.mxu1 %v13290_v25  ;;  %v5947_v16 = vsel %vm3767_vm15, %v5929_v54, %v9788_v35  ;;  %v9838_v44 = vunpack.i.h.bf16 %v9836_v14  ;;  %v9841_v29 = vpop.permute.xlu1 %9840 }
 0x4ff   : > { %v9828_v2 = vunpack.i.h.bf16 %v9826_v41  ;;  %v9827_v3 = vunpack.i.l.bf16 %v9826_v41  ;;  %v13321_v39 = vsel %vm3677_vm1, %v6016_v45, %v6017_v20  ;;  %9551 = vmatprep.subr.mxu0 %v8015_v6  ;;  %9598 = vmatpush3.msra.mxu1 %v8030_v12  ;;  %v5946_v4 = vsel %vm3767_vm15, %v5928_v55, %v9787_v8 }
 0x500   : > { %9552 = vmatpush3.msra.mxu0 %v8015_v6  ;;  %9599 = vmatprep.subr.mxu1 %v8029_v52  ;;  %v6021_v0 = vsel %vm3677_vm1, %v6019_v1, %v6020_v38  ;;  %v9837_v42 = vunpack.i.l.bf16 %v9836_v14  ;;  %v5931_v22 = vsel %vm3517_vm2, %v5642_v59, %v9838_v44  ;;  %v9843_v18 = vunpack.i.h.bf16 %v9841_v29 }
 0x501   : > { %v5966_v46 = vsel %vm5950_vm14, %v5947_v16, %v9828_v2  ;;  %v13333_v50 = vsel %vm5950_vm14, %v5946_v4, %v9827_v3  ;;  %9482 = vmatmul.mubr.f32.gmra.mxu0 %v13321_v39  ;;  %9553 = vmatprep.subr.mxu0 %v8014_v58  ;;  %v9842_v32 = vunpack.i.l.bf16 %v9841_v29  ;;  %v8042_v29 = vld [vmem:[%s13987_s7] ss:$0 sm:$0xff] }
 0x502   : > { %v6023_v57 = vrot.slane %v5966_v46, 1  ;;  %9600 = vmatpush3.msra.mxu1 %v8029_v52  ;;  %9484 = vmatprep.mubr.f32.mxu0 %v6021_v0  ;;  %v6022_v23 = vrot.slane %v13333_v50, 1  ;;  %v9831_v28 = vpop.permute.xlu0 %9830  ;;  %v5930_v61 = vsel %vm3517_vm2, %v5641_v17, %v9837_v42  ;;  %vm6565_vm2 = vcmask 520192  }
 0x503   : > { %9554 = vmatpush3.msra.mxu0 %v8014_v58  ;;  %9601 = vmatprep.subr.mxu1 %v8028_v56  ;;  %v9833_v60 = vunpack.i.h.bf16 %v9831_v28  ;;  %v9832_v13 = vunpack.i.l.bf16 %v9831_v28  ;;  %6583 = vst.msk [vmem:[#allocation4 + $0x88] sm:$0x1f] %vm6565_vm2, %v14169_v63  ;;  %6584 = vst.msk [vmem:[#allocation4 + $0x90] sm:$0x1f] %vm6565_vm2, %v14169_v63 }
 0x504   : > { %9555 = vmatprep.subr.mxu0 %v8013_v30  ;;  %9602 = vmatpush3.msra.mxu1 %v8028_v56  ;;  %v6024_v15 = vsel %vm3677_vm1, %v6022_v23, %v6023_v57  ;;  %6566 = vst.msk [vmem:[#allocation4] sm:$0x1f] %vm6565_vm2, %v14169_v63  ;;  %6567 = vst.msk [vmem:[#allocation4 + $0x8] sm:$0x1f] %vm6565_vm2, %v14169_v63 }
 0x505   : > { %9529 = vmatmul.mubr.f32.gmra.mxu1 %v13333_v50  ;;  %9556 = vmatpush3.msra.mxu0 %v8013_v30  ;;  %v5949_v43 = vsel %vm3767_vm15, %v5931_v22, %v9833_v60  ;;  %6568 = vst.msk [vmem:[#allocation4 + $0x10] sm:$0x1f] %vm6565_vm2, %v14169_v63  ;;  %6569 = vst.msk [vmem:[#allocation4 + $0x18] sm:$0x1f] %vm6565_vm2, %v14169_v63 }
 0x506   : > { %9603 = vmatprep.subr.mxu1 %v8027_v40  ;;  %9557 = vmatprep.subr.mxu0 %v8012_v53  ;;  %v5968_v19 = vsel %vm5950_vm14, %v5949_v43, %v9843_v18  ;;  %6570 = vst.msk [vmem:[#allocation4 + $0x20] sm:$0x1f] %vm6565_vm2, %v14169_v63  ;;  %6571 = vst.msk [vmem:[#allocation4 + $0x28] sm:$0x1f] %vm6565_vm2, %v14169_v63 }
 0x507   : > { %9604 = vmatpush3.msra.mxu1 %v8027_v40  ;;  %9607 = vmatprep.mubr.f32.mxu1 %v13163_v36  ;;  %v5948_v36 = vsel %vm3767_vm15, %v5930_v61, %v9832_v13  ;;  %v6393_v11 = vrot.slane %v5968_v19, 1  ;;  %6572 = vst.msk [vmem:[#allocation4 + $0x30] sm:$0x1f] %vm6565_vm2, %v14169_v63  ;;  %6573 = vst.msk [vmem:[#allocation4 + $0x38] sm:$0x1f] %vm6565_vm2, %v14169_v63 }
 0x508   : > { %9558 = vmatpush3.msra.mxu0 %v8012_v53  ;;  %9605 = vmatprep.subr.mxu1 %v8026_v10  ;;  %v5967_v49 = vsel %vm5950_vm14, %v5948_v36, %v9842_v32  ;;  %6574 = vst.msk [vmem:[#allocation4 + $0x40] sm:$0x1f] %vm6565_vm2, %v14169_v63  ;;  %6575 = vst.msk [vmem:[#allocation4 + $0x48] sm:$0x1f] %vm6565_vm2, %v14169_v63 }
 0x509   : > { %9485 = vmatmul.mubr.f32.gmra.mxu0 %v6024_v15  ;;  %9559 = vmatprep.subr.mxu0 %v8011_v9  ;;  %6576 = vst.msk [vmem:[#allocation4 + $0x50] sm:$0x1f] %vm6565_vm2, %v14169_v63  ;;  %6577 = vst.msk [vmem:[#allocation4 + $0x58] sm:$0x1f] %vm6565_vm2, %v14169_v63 }
 0x50a   : > { %9606 = vmatpush3.msra.mxu1 %v8026_v10  ;;  %9560 = vmatpush3.msra.mxu0 %v8011_v9  ;;  %6578 = vst.msk [vmem:[#allocation4 + $0x60] sm:$0x1f] %vm6565_vm2, %v14169_v63  ;;  %6579 = vst.msk [vmem:[#allocation4 + $0x68] sm:$0x1f] %vm6565_vm2, %v14169_v63 }
 0x50b   : > { %9563 = vmatprep.mubr.f32.mxu0 %v13149_v47  ;;  %9608 = vmatmul.mubr.f32.vlgmr.msra.gmra.mxu1 %v13192_v27  ;;  %v6392_v47 = vrot.slane %v5967_v49, 1  ;;  %6580 = vst.msk [vmem:[#allocation4 + $0x70] sm:$0x1f] %vm6565_vm2, %v14169_v63  ;;  %6581 = vst.msk [vmem:[#allocation4 + $0x78] sm:$0x1f] %vm6565_vm2, %v14169_v63 }
 0x50c   : > { %9561 = vmatprep.subr.mxu0 %v8010_v51  ;;  %9610 = vmatprep.mubr.f32.mxu1 %v13293_v37  ;;  %6582 = vst.msk [vmem:[#allocation4 + $0x80] sm:$0x1f] %vm6565_vm2, %v14169_v63  ;;  %6585 = vst.msk [vmem:[#allocation4 + $0x98] sm:$0x1f] %vm6565_vm2, %v14169_v63  ;;  %vm7570_vm2 = vcmask 0  }
 0x50d   : > { %9562 = vmatpush3.msra.mxu0 %v8010_v51  ;;  %v6394_v27 = vsel %vm3677_vm1, %v6392_v47, %v6393_v11 }
 0x50e   : > { %9564 = vmatmul.mubr.f32.vlgmr.msra.gmra.mxu0 %v13174_v24  ;;  %v6586_v24 = vld [vmem:[%s13988_s8] sm:$0xff] }
 0x50f   : > { %9566 = vmatprep.mubr.f32.mxu0 %v13262_v7  ;;  %9611 = vmatmul.mubr.f32.gmra.mxu1 %v13306_v48 }
 0x510   : > { %9613 = vmatprep.mubr.f32.mxu1 %v13321_v39 }
 0x512   : > { %9567 = vmatmul.mubr.f32.gmra.mxu0 %v13237_v21  ;;  %v8045_v21 = vld [vmem:[%s13988_s8 + $0x10] sm:$0xff] }
 0x513   : > { %9569 = vmatprep.mubr.f32.mxu0 %v13287_v33  ;;  %9614 = vmatmul.mubr.f32.gmra.mxu1 %v6021_v0 }
 0x514   : > { %9616 = vmatprep.mubr.f32.mxu1 %v6024_v15 }
 0x516   : > { %9570 = vmatmul.mubr.f32.gmra.mxu0 %v13290_v25 }
 0x517   : > { %9572 = vmatprep.mubr.f32.mxu0 %v13333_v50  ;;  %9617 = vmatmul.mubr.f32.gmra.mxu1 %v6394_v27 }
 0x518   : > { %9654 = vmatprep.mubr.msk.f32.mxu1 %vm3767_vm15, %v8045_v21 }
 0x51a   : > { %9573 = vmatmul.mubr.f32.gmra.mxu0 %v5967_v49 }
 0x51b   : > { %9635 = vmatprep.mubr.msk.f32.mxu0 %vm3767_vm15, %v6586_v24 }
 0x5a4   : > { %v9521_v7 = vpop.f32.mrf.mxu1 }
 0x5a6   : > { %v6221_v26 = vpop.f32.mrf.mxu1 }
 0x5a7   : > { %v9477_v31 = vpop.f32.mrf.mxu0 }
 0x5a8   : > { %v6227_v28 = vadd.f32 %v9521_v7, %v9477_v31 }
 0x5a9   : > { %v6116_v62 = vpop.f32.mrf.mxu0 }
 0x5aa   : > { %v6222_v60 = vadd.f32 %v6221_v26, %v6116_v62 }
 0x5b9   : > { %v9524_v5 = vpop.f32.mrf.mxu1 }
 0x5bb   : > { %v6231_v33 = vpop.f32.mrf.mxu1 }
 0x5bd   : > { %v9480_v25 = vpop.f32.mrf.mxu0  ;;  %v9527_v37 = vpop.f32.mrf.mxu1 }
 0x5be   : > { %v6237_v46 = vadd.f32 %v9524_v5, %v9480_v25 }
 0x5bf   : > { %v6126_v45 = vpop.f32.mrf.mxu0  ;;  %v6241_v12 = vpop.f32.mrf.mxu1 }
 0x5c0   : > { %v6232_v30 = vadd.f32 %v6231_v33, %v6126_v45 }
 0x5c1   : > { %v9483_v34 = vpop.f32.mrf.mxu0 }
 0x5c2   : > { %v6247_v39 = vadd.f32 %v9527_v37, %v9483_v34 }
 0x5c3   : > { %v6136_v55 = vpop.f32.mrf.mxu0 }
 0x5c4   : > { %v6242_v4 = vadd.f32 %v6241_v12, %v6136_v55 }
 0x5c5   : > { %v9530_v54 = vpop.f32.mrf.mxu1 }
 0x5c7   : > { %v6251_v48 = vpop.f32.mrf.mxu1 }
 0x5c9   : > { %v9486_v6 = vpop.f32.mrf.mxu0 }
 0x5ca   : > { %v6257_v14 = vadd.f32 %v9530_v54, %v9486_v6 }
 0x5cb   : > { %v9609_v20 = vpop.f32.mrf.mxu1  ;;  %v6146_v35 = vpop.f32.mrf.mxu0 }
 0x5cc   : > { %v6252_v53 = vadd.f32 %v6251_v48, %v6146_v35 }
 0x5cd   : > { %v6479_v8 = vpop.f32.mrf.mxu1 }
 0x5ce   : > { %v9565_v1 = vpop.f32.mrf.mxu0 }
 0x5cf   : > { %v9612_v63 = vpop.f32.mrf.mxu1  ;;  %v6383_v13 = vadd.f32 %v9565_v1, %v6227_v28  ;;  %v8046_v1 = vld [vmem:[%s13988_s8 + $0x18] sm:$0xff] }
 0x5d0   : > { %v6343_v41 = vpop.f32.mrf.mxu0  ;;  %v7049_v28 = vld [vmem:[%s13989_s9 + $0x58] sm:$0xff] }
 0x5d1   : > { %v6489_v52 = vpop.f32.mrf.mxu1  ;;  %v6382_v43 = vadd.f32 %v6343_v41, %v6222_v60  ;;  %v6519_v47 = vadd.f32 %v9609_v20, %v6383_v13  ;;  %v8050_v41 = vld [vmem:[%s13988_s8 + $0x28] sm:$0xff]  ;;  %v8071_v13 = vld [vmem:[%s13989_s9 + $0x150] sm:$0xff] }
 0x5d2   : > { %v9568_v38 = vpop.f32.mrf.mxu0  ;;  %v7063_v60 = vld [vmem:[%s13989_s9 + $0xc8] sm:$0xff] }
 0x5d3   : > { %v9615_v2 = vpop.f32.mrf.mxu1  ;;  %v6385_v57 = vadd.f32 %v9568_v38, %v6237_v46  ;;  %v6518_v26 = vadd.f32 %v6479_v8, %v6382_v43  ;;  %v6534_v33 = vadd.f32 %v8042_v29, %v6519_v47  ;;  %v6587_v8 = vld [vmem:[%s13988_s8 + $0x8] sm:$0xff]  ;;  %v8054_v38 = vld [vmem:[%s13988_s8 + $0x38] sm:$0xff] }
 0x5d4   : > { %v6353_v3 = vpop.f32.mrf.mxu0  ;;  %v7067_v46 = vld [vmem:[%s13989_s9 + $0xe8] sm:$0xff]  ;;  %v7061_v43 = vld [vmem:[%s13989_s9 + $0xb8] sm:$0xff] }
 0x5d5   : > { %v6499_v58 = vpop.f32.mrf.mxu1  ;;  %v6384_v17 = vadd.f32 %v6353_v3, %v6232_v30  ;;  %v6521_v22 = vadd.f32 %v9612_v63, %v6385_v57  ;;  %v6533_v45 = vadd.f32 %v8042_v29, %v6518_v26  ;;  %v6550_v54 = vmul.f32 0.1, %v6534_v33  ;;  %v8049_v63 = vld [vmem:[%s13988_s8 + $0x20] sm:$0xff]  ;;  %v7069_v3 = vld [vmem:[%s13989_s9 + $0xf8] sm:$0xff]  ;;  %v8090_v57 = vld [vmem:[%s13989_s9 + $0x1e8] sm:$0xff] }
 0x5d6   : > { %v9571_v16 = vpop.f32.mrf.mxu0  ;;  %vm6542_vm0 = vcmp.ge.f32.partialorder %v6534_v33, 0.0  ;;  %v7066_v30 = vld [vmem:[%s13989_s9 + $0xe0] sm:$0xff]  ;;  %v8068_v47 = vld [vmem:[%s13989_s9 + $0x138] sm:$0xff]  ;;  %v7043_v26 = vld [vmem:[%s13989_s9 + $0x28] sm:$0xff] }
 0x5d7   : > { %v6387_v56 = vadd.f32 %v9571_v16, %v6247_v39  ;;  %v9618_v40 = vpop.f32.mrf.mxu1  ;;  %v6520_v36 = vadd.f32 %v6489_v52, %v6384_v17  ;;  %v6536_v27 = vadd.f32 %v8042_v29, %v6521_v22  ;;  %v6549_v48 = vmul.f32 0.1, %v6533_v45  ;;  %v8053_v52 = vld [vmem:[%s13988_s8 + $0x30] sm:$0xff]  ;;  %v7053_v39 = vld [vmem:[%s13989_s9 + $0x78] sm:$0xff]  ;;  %v8086_v22 = vld [vmem:[%s13989_s9 + $0x1c8] sm:$0xff] }
 0x5d8   : > { %v6363_v50 = vpop.f32.mrf.mxu0  ;;  %vm6541_vm8 = vcmp.ge.f32.partialorder %v6533_v45, 0.0  ;;  %v6558_v20 = vsel %vm6542_vm0, %v6534_v33, %v6550_v54  ;;  %v7052_v16 = vld [vmem:[%s13989_s9 + $0x70] sm:$0xff]  ;;  %v8088_v17 = vld [vmem:[%s13989_s9 + $0x1d8] sm:$0xff] }
 0x5d9   : > { %v6386_v0 = vadd.f32 %v6363_v50, %v6242_v4  ;;  %v6523_v44 = vadd.f32 %v9615_v2, %v6387_v56  ;;  %v6509_v61 = vpop.f32.mrf.mxu1  ;;  %v6535_v31 = vadd.f32 %v8042_v29, %v6520_v36  ;;  %v6552_v25 = vmul.f32 0.1, %v6536_v27  ;;  %v6961_v2 = vld [vmem:[#allocation4 + $0x28] sm:$0x1f]  ;;  %v8092_v4 = vld [vmem:[%s13989_s9 + $0x1f8] sm:$0xff]  ;;  %v8069_v36 = vld [vmem:[%s13989_s9 + $0x140] sm:$0xff] }
 0x5da   : > { %v9574_v23 = vpop.f32.mrf.mxu0  ;;  %vm6544_vm6 = vcmp.ge.f32.partialorder %v6536_v27, 0.0  ;;  %v6557_v35 = vsel %vm6541_vm8, %v6533_v45, %v6549_v48  ;;  %6981 = vrot.lane.b32.xlu0 %v6961_v2, %s9859_s27  ;;  %v8076_v56 = vld [vmem:[%s13989_s9 + $0x178] sm:$0xff]  ;;  %v7051_v50 = vld [vmem:[%s13989_s9 + $0x68] sm:$0xff]  ;;  %v7056_v48 = vld [vmem:[%s13989_s9 + $0x90] sm:$0xff] }
 0x5db   : > { %v6389_v42 = vadd.f32 %v9574_v23, %v6257_v14  ;;  %v6522_v10 = vadd.f32 %v6499_v58, %v6386_v0  ;;  %v6538_v51 = vadd.f32 %v8042_v29, %v6523_v44  ;;  %v6551_v12 = vmul.f32 0.1, %v6535_v31  ;;  %v7068_v58 = vld [vmem:[%s13989_s9 + $0xf0] sm:$0xff]  ;;  %v7050_v23 = vld [vmem:[%s13989_s9 + $0x60] sm:$0xff]  ;;  %v7065_v44 = vld [vmem:[%s13989_s9 + $0xd8] sm:$0xff] }
 0x5dc   : > { %v6373_v59 = vpop.f32.mrf.mxu0  ;;  %vm6543_vm7 = vcmp.ge.f32.partialorder %v6535_v31, 0.0  ;;  %v6560_v55 = vsel %vm6544_vm6, %v6536_v27, %v6552_v25  ;;  %v8091_v14 = vld [vmem:[%s13989_s9 + $0x1f0] sm:$0xff]  ;;  %v7041_v54 = vld [vmem:[%s13989_s9 + $0x18] sm:$0xff] }
 0x5dd   : > { %v6388_v15 = vadd.f32 %v6373_v59, %v6252_v53  ;;  %v6525_v9 = vadd.f32 %v9618_v40, %v6389_v42  ;;  %v6537_v19 = vadd.f32 %v8042_v29, %v6522_v10  ;;  %v6554_v24 = vmul.f32 0.1, %v6538_v51  ;;  %v8075_v0 = vld [vmem:[%s13989_s9 + $0x170] sm:$0xff]  ;;  %v8074_v40 = vld [vmem:[%s13989_s9 + $0x168] sm:$0xff]  ;;  %v8089_v53 = vld [vmem:[%s13989_s9 + $0x1e0] sm:$0xff] }
 0x5de   : > { %vm6546_vm4 = vcmp.ge.f32.partialorder %v6538_v51, 0.0  ;;  %v6559_v6 = vsel %vm6543_vm7, %v6535_v31, %v6551_v12  ;;  %v8073_v42 = vld [vmem:[%s13989_s9 + $0x160] sm:$0xff]  ;;  %v7064_v59 = vld [vmem:[%s13989_s9 + $0xd0] sm:$0xff]  ;;  %v8072_v10 = vld [vmem:[%s13989_s9 + $0x158] sm:$0xff] }
 0x5df   : > { %v6540_v18 = vadd.f32 %v8042_v29, %v6525_v9  ;;  %v6524_v32 = vadd.f32 %v6509_v61, %v6388_v15  ;;  %v6553_v5 = vmul.f32 0.1, %v6537_v19  ;;  %vm6545_vm5 = vcmp.ge.f32.partialorder %v6537_v19, 0.0  ;;  %v7048_v15 = vld [vmem:[%s13989_s9 + $0x50] sm:$0xff]  ;;  %v7062_v61 = vld [vmem:[%s13989_s9 + $0xc0] sm:$0xff]  ;;  %v8064_v2 = vld [vmem:[%s13989_s9 + $0x118] sm:$0xff] }
 0x5e0   : > { %v6562_v37 = vsel %vm6546_vm4, %v6538_v51, %v6554_v24  ;;  %v8087_v9 = vld [vmem:[%s13989_s9 + $0x1d0] sm:$0xff]  ;;  %v8070_v51 = vld [vmem:[%s13989_s9 + $0x148] sm:$0xff]  ;;  %v7058_v31 = vld [vmem:[%s13989_s9 + $0xa0] sm:$0xff] }
 0x5e1   : > { %vm6548_vm1 = vcmp.ge.f32.partialorder %v6540_v18, 0.0  ;;  %v6556_v49 = vmul.f32 0.1, %v6540_v18  ;;  %v6539_v11 = vadd.f32 %v8042_v29, %v6524_v32  ;;  %v6561_v34 = vsel %vm6545_vm5, %v6537_v19, %v6553_v5  ;;  %v7047_v29 = vld [vmem:[%s13989_s9 + $0x48] sm:$0xff]  ;;  %v8085_v32 = vld [vmem:[%s13989_s9 + $0x1c0] sm:$0xff]  ;;  %v7045_v19 = vld [vmem:[%s13989_s9 + $0x38] sm:$0xff] }
 0x5e2   : > { %v7044_v27 = vld [vmem:[%s13989_s9 + $0x30] sm:$0xff]  ;;  %v7042_v5 = vld [vmem:[%s13989_s9 + $0x20] sm:$0xff] }
 0x5e3   : > { %v13428_v21 = vsel %vm6548_vm1, %v6540_v18, %v6556_v49  ;;  %vm6547_vm3 = vcmp.ge.f32.partialorder %v6539_v11, 0.0  ;;  %v6555_v7 = vmul.f32 0.1, %v6539_v11  ;;  %v7046_v18 = vld [vmem:[%s13989_s9 + $0x40] sm:$0xff]  ;;  %v8084_v49 = vld [vmem:[%s13989_s9 + $0x1b8] sm:$0xff]  ;;  %v8083_v24 = vld [vmem:[%s13989_s9 + $0x1b0] sm:$0xff] }
 0x5e4   : > { %9619 = vmatprep.subr.mxu0 %v13428_v21  ;;  %9638 = vmatprep.subr.mxu1 %v13428_v21 }
 0x5e5   : > { %v6563_v62 = vsel %vm6547_vm3, %v6539_v11, %v6555_v7  ;;  %9620 = vmatpush3.msra.mxu0 %v13428_v21  ;;  %9639 = vmatpush3.msra.mxu1 %v13428_v21  ;;  %v7060_v11 = vld [vmem:[%s13989_s9 + $0xb0] sm:$0xff] }
 0x5e6   : > { %9621 = vmatprep.subr.mxu0 %v6563_v62  ;;  %9640 = vmatprep.subr.mxu1 %v6563_v62  ;;  %v8067_v7 = vld [vmem:[%s13989_s9 + $0x130] sm:$0xff] }
 0x5e7   : > { %9622 = vmatpush3.msra.mxu0 %v6563_v62  ;;  %9641 = vmatpush3.msra.mxu1 %v6563_v62 }
 0x5e8   : > { %9623 = vmatprep.subr.mxu0 %v6562_v37  ;;  %9642 = vmatprep.subr.mxu1 %v6562_v37 }
 0x5e9   : > { %9624 = vmatpush3.msra.mxu0 %v6562_v37  ;;  %9643 = vmatpush3.msra.mxu1 %v6562_v37 }
 0x5ea   : > { %9625 = vmatprep.subr.mxu0 %v6561_v34  ;;  %9644 = vmatprep.subr.mxu1 %v6561_v34 }
 0x5eb   : > { %9626 = vmatpush3.msra.mxu0 %v6561_v34  ;;  %9645 = vmatpush3.msra.mxu1 %v6561_v34 }
 0x5ec   : > { %9627 = vmatprep.subr.mxu0 %v6560_v55  ;;  %9646 = vmatprep.subr.mxu1 %v6560_v55 }
 0x5ed   : > { %9628 = vmatpush3.msra.mxu0 %v6560_v55  ;;  %9647 = vmatpush3.msra.mxu1 %v6560_v55 }
 0x5ee   : > { %9629 = vmatprep.subr.mxu0 %v6559_v6  ;;  %9648 = vmatprep.subr.mxu1 %v6559_v6 }
 0x5ef   : > { %9630 = vmatpush3.msra.mxu0 %v6559_v6  ;;  %9649 = vmatpush3.msra.mxu1 %v6559_v6 }
 0x5f0   : > { %9631 = vmatprep.subr.mxu0 %v6558_v20  ;;  %9650 = vmatprep.subr.mxu1 %v6558_v20 }
 0x5f1   : > { %9632 = vmatpush3.msra.mxu0 %v6558_v20  ;;  %9651 = vmatpush3.msra.mxu1 %v6558_v20 }
 0x5f2   : > { %9633 = vmatprep.subr.mxu0 %v6557_v35  ;;  %9652 = vmatprep.subr.mxu1 %v6557_v35 }
 0x5f3   : > { %9634 = vmatpush3.msra.mxu0 %v6557_v35  ;;  %9653 = vmatpush3.msra.mxu1 %v6557_v35 }
 0x5f4   : > { %9657 = vmatprep.subr.mxu0 %v13428_v21  ;;  %9676 = vmatprep.subr.mxu1 %v13428_v21 }
 0x5f5   : > { %9636 = vmatmul.mubr.msk.f32.vlgmr.msra.gmra.mxu0 %vm3767_vm15, %v6587_v8  ;;  %9655 = vmatmul.mubr.msk.f32.vlgmr.msra.gmra.mxu1 %vm3767_vm15, %v8046_v1  ;;  %v8065_v8 = vld [vmem:[%s13989_s9 + $0x120] sm:$0xff]  ;;  %v7055_v1 = vld [vmem:[%s13989_s9 + $0x88] sm:$0xff] }
 0x5f6   : > { %9658 = vmatpush3.msra.mxu0 %v13428_v21  ;;  %9677 = vmatpush3.msra.mxu1 %v13428_v21  ;;  %v7059_v21 = vld [vmem:[%s13989_s9 + $0xa8] sm:$0xff] }
 0x5f7   : > { %9659 = vmatprep.subr.mxu0 %v6563_v62  ;;  %9678 = vmatprep.subr.mxu1 %v6563_v62 }
 0x5f8   : > { %9660 = vmatpush3.msra.mxu0 %v6563_v62  ;;  %9679 = vmatpush3.msra.mxu1 %v6563_v62  ;;  %v7057_v62 = vld [vmem:[%s13989_s9 + $0x98] sm:$0xff] }
 0x5f9   : > { %9661 = vmatprep.subr.mxu0 %v6562_v37  ;;  %9680 = vmatprep.subr.mxu1 %v6562_v37 }
 0x5fa   : > { %9662 = vmatpush3.msra.mxu0 %v6562_v37  ;;  %9681 = vmatpush3.msra.mxu1 %v6562_v37 }
 0x5fb   : > { %9663 = vmatprep.subr.mxu0 %v6561_v34  ;;  %9682 = vmatprep.subr.mxu1 %v6561_v34 }
 0x5fc   : > { %9664 = vmatpush3.msra.mxu0 %v6561_v34  ;;  %9683 = vmatpush3.msra.mxu1 %v6561_v34  ;;  %v8082_v34 = vld [vmem:[%s13989_s9 + $0x1a8] sm:$0xff] }
 0x5fd   : > { %9665 = vmatprep.subr.mxu0 %v6560_v55  ;;  %9684 = vmatprep.subr.mxu1 %v6560_v55 }
 0x5fe   : > { %9666 = vmatpush3.msra.mxu0 %v6560_v55  ;;  %9685 = vmatpush3.msra.mxu1 %v6560_v55  ;;  %v8066_v55 = vld [vmem:[%s13989_s9 + $0x128] sm:$0xff] }
 0x5ff   : > { %9667 = vmatprep.subr.mxu0 %v6559_v6  ;;  %9686 = vmatprep.subr.mxu1 %v6559_v6 }
 0x600   : > { %9668 = vmatpush3.msra.mxu0 %v6559_v6  ;;  %9687 = vmatpush3.msra.mxu1 %v6559_v6  ;;  %v8081_v6 = vld [vmem:[%s13989_s9 + $0x1a0] sm:$0xff] }
 0x601   : > { %9669 = vmatprep.subr.mxu0 %v6558_v20  ;;  %9688 = vmatprep.subr.mxu1 %v6558_v20 }
 0x602   : > { %9670 = vmatpush3.msra.mxu0 %v6558_v20  ;;  %9689 = vmatpush3.msra.mxu1 %v6558_v20 }
 0x603   : > { %9671 = vmatprep.subr.mxu0 %v6557_v35  ;;  %9690 = vmatprep.subr.mxu1 %v6557_v35 }
 0x604   : > { %9672 = vmatpush3.msra.mxu0 %v6557_v35  ;;  %9673 = vmatprep.mubr.msk.f32.mxu0 %vm3767_vm15, %v8049_v63 }
 0x605   : > { %9691 = vmatpush3.msra.mxu1 %v6557_v35  ;;  %9674 = vmatmul.mubr.msk.f32.vlgmr.msra.gmra.mxu0 %vm3767_vm15, %v8050_v41  ;;  %v7040_v35 = vld [vmem:[%s13989_s9 + $0x10] sm:$0xff] }
 0x606   : > { %9692 = vmatprep.mubr.msk.f32.mxu1 %vm3767_vm15, %v8053_v52  ;;  %8865 = vmatprep.subr.mxu1 %v7069_v3  ;;  %v8080_v52 = vld [vmem:[%s13989_s9 + $0x198] sm:$0xff]  ;;  %v7054_v3 = vld [vmem:[%s13989_s9 + $0x80] sm:$0xff] }
 0x607   : > { %9693 = vmatmul.mubr.msk.f32.vlgmr.msra.gmra.mxu1 %vm3767_vm15, %v8054_v38  ;;  %8827 = vmatprep.subr.mxu0 %v8092_v4  ;;  %v7039_v38 = vld [vmem:[%s13989_s9 + $0x8] sm:$0xff]  ;;  %v8063_v4 = vld [vmem:[%s13989_s9 + $0x110] sm:$0xff] }
 0x608   : > { %8866 = vmatpush3.msra.mxu1 %v7053_v39  ;;  %8828 = vmatpush3.msra.mxu0 %v8076_v56  ;;  %v8078_v56 = vld [vmem:[%s13989_s9 + $0x188] sm:$0xff] }
 0x609   : > { %8867 = vmatprep.subr.mxu1 %v7068_v58  ;;  %8829 = vmatprep.subr.mxu0 %v8091_v14  ;;  %v8079_v58 = vld [vmem:[%s13989_s9 + $0x190] sm:$0xff]  ;;  %v8077_v14 = vld [vmem:[%s13989_s9 + $0x180] sm:$0xff] }
 0x60a   : > { %8868 = vmatpush3.msra.mxu1 %v7052_v16  ;;  %8830 = vmatpush3.msra.mxu0 %v8075_v0  ;;  %v7038_v16 = vld [vmem:[%s13989_s9] sm:$0xff] }
 0x60b   : > { %8869 = vmatprep.subr.mxu1 %v7067_v46  ;;  %8831 = vmatprep.subr.mxu0 %v8090_v57  ;;  %v8165_v46 = vld [vmem:[%s13989_s9 + $0x3f8] sm:$0xff]  ;;  %v8061_v0 = vld [vmem:[%s13989_s9 + $0x100] sm:$0xff] }
 0x60c   : > { %8870 = vmatpush3.msra.mxu1 %v7051_v50  ;;  %8832 = vmatpush3.msra.mxu0 %v8074_v40  ;;  %v8062_v50 = vld [vmem:[%s13989_s9 + $0x108] sm:$0xff] }
 0x60d   : > { %8871 = vmatprep.subr.mxu1 %v7066_v30  ;;  %8833 = vmatprep.subr.mxu0 %v8089_v53 }
 0x60e   : > { %8872 = vmatpush3.msra.mxu1 %v7050_v23  ;;  %8834 = vmatpush3.msra.mxu0 %v8073_v42  ;;  %v8128_v23 = vld [vmem:[%s13989_s9 + $0x2f8] sm:$0xff] }
 0x60f   : > { %8873 = vmatprep.subr.mxu1 %v7065_v44  ;;  %8835 = vmatprep.subr.mxu0 %v8088_v17  ;;  %v6975_v17 = vld [vmem:[#allocation4 + $0x98] sm:$0x1f] }
 0x610   : > { %8874 = vmatpush3.msra.mxu1 %v7049_v28  ;;  %8836 = vmatpush3.msra.mxu0 %v8072_v10  ;;  %v6955_v10 = vld [vmem:[#allocation4] sm:$0x1f] }
 0x611   : > { %8875 = vmatprep.subr.mxu1 %v7064_v59  ;;  %8837 = vmatprep.subr.mxu0 %v8087_v9 }
 0x612   : > { %8876 = vmatpush3.msra.mxu1 %v7048_v15  ;;  %8838 = vmatpush3.msra.mxu0 %v8071_v13 }
 0x613   : > { %8877 = vmatprep.subr.mxu1 %v7063_v60  ;;  %8839 = vmatprep.subr.mxu0 %v8086_v22 }
 0x614   : > { %8878 = vmatpush3.msra.mxu1 %v7047_v29  ;;  %8840 = vmatpush3.msra.mxu0 %v8070_v51 }
 0x615   : > { %8879 = vmatprep.subr.mxu1 %v7062_v61  ;;  %8841 = vmatprep.subr.mxu0 %v8085_v32 }
 0x616   : > { %8880 = vmatpush3.msra.mxu1 %v7046_v18  ;;  %8842 = vmatpush3.msra.mxu0 %v8069_v36 }
 0x617   : > { %8881 = vmatprep.subr.mxu1 %v7061_v43  ;;  %8843 = vmatprep.subr.mxu0 %v8084_v49 }
 0x618   : > { %8882 = vmatpush3.msra.mxu1 %v7045_v19  ;;  %8844 = vmatpush3.msra.mxu0 %v8068_v47 }
 0x619   : > { %8883 = vmatprep.subr.mxu1 %v7060_v11  ;;  %8845 = vmatprep.subr.mxu0 %v8083_v24 }
 0x61a   : > { %8884 = vmatpush3.msra.mxu1 %v7044_v27  ;;  %8846 = vmatpush3.msra.mxu0 %v8067_v7 }
 0x61b   : > { %8885 = vmatprep.subr.mxu1 %v7059_v21  ;;  %8847 = vmatprep.subr.mxu0 %v8082_v34 }
 0x61c   : > { %8886 = vmatpush3.msra.mxu1 %v7043_v26  ;;  %8848 = vmatpush3.msra.mxu0 %v8066_v55  ;;  %v8163_v55 = vld [vmem:[%s13989_s9 + $0x3e8] sm:$0xff] }
 0x61d   : > { %8887 = vmatprep.subr.mxu1 %v7058_v31  ;;  %8849 = vmatprep.subr.mxu0 %v8081_v6 }
 0x61e   : > { %8888 = vmatpush3.msra.mxu1 %v7042_v5  ;;  %8850 = vmatpush3.msra.mxu0 %v8065_v8  ;;  %v8149_v5 = vld [vmem:[%s13989_s9 + $0x378] sm:$0xff] }
 0x61f   : > { %8889 = vmatprep.subr.mxu1 %v7057_v62  ;;  %8851 = vmatprep.subr.mxu0 %v8080_v52 }
 0x620   : > { %8890 = vmatpush3.msra.mxu1 %v7041_v54  ;;  %8852 = vmatpush3.msra.mxu0 %v8064_v2  ;;  %v8148_v54 = vld [vmem:[%s13989_s9 + $0x370] sm:$0xff]  ;;  %v8112_v2 = vld [vmem:[%s13989_s9 + $0x278] sm:$0xff] }
 0x621   : > { %8891 = vmatprep.subr.mxu1 %v7056_v48  ;;  %8853 = vmatprep.subr.mxu0 %v8079_v58 }
 0x622   : > { %8892 = vmatpush3.msra.mxu1 %v7040_v35  ;;  %8854 = vmatpush3.msra.mxu0 %v8063_v4  ;;  %v8146_v4 = vld [vmem:[%s13989_s9 + $0x360] sm:$0xff] }
 0x623   : > { %8893 = vmatprep.subr.mxu1 %v7055_v1  ;;  %8855 = vmatprep.subr.mxu0 %v8078_v56 }
 0x624   : > { %8894 = vmatpush3.msra.mxu1 %v7039_v38  ;;  %8856 = vmatpush3.msra.mxu0 %v8062_v50 }
 0x625   : > { %8895 = vmatprep.subr.mxu1 %v7054_v3  ;;  %8857 = vmatprep.subr.mxu0 %v8077_v14  ;;  %v8162_v3 = vld [vmem:[%s13989_s9 + $0x3e0] sm:$0xff] }
 0x626   : > { %8896 = vmatpush3.msra.mxu1 %v7038_v16  ;;  %8858 = vmatpush3.msra.mxu0 %v8061_v0  ;;  %v8127_v16 = vld [vmem:[%s13989_s9 + $0x2f0] sm:$0xff] }
 0x627   : > { %8941 = vmatprep.subr.mxu1 %v8165_v46  ;;  %8903 = vmatprep.subr.mxu0 %v8128_v23  ;;  %v8111_v0 = vld [vmem:[%s13989_s9 + $0x270] sm:$0xff]  ;;  %v8145_v23 = vld [vmem:[%s13989_s9 + $0x358] sm:$0xff] }
 0x64c   : > { %v6982_v59 = vpop.permute.xlu0 %6981 }
 0x64d   : > { %v7016_v60 = vsel %vm3767_vm15, %v6955_v10, %v6982_v59  ;;  %v8109_v10 = vld [vmem:[%s13989_s9 + $0x260] sm:$0xff] }
 0x6b5   : > { %v9637_v33 = vpop.f32.mrf.mxu0  ;;  %v9656_v25 = vpop.f32.mrf.mxu1 }
 0x6b6   : > { %6676 = vst.msk [vmem:[#allocation4 + $0x88] sm:$0xf] %vm6670_vm9, %v9637_v33  ;;  %6768 = vst.msk [vmem:[#allocation4 + $0x61] sm:$0xf] %vm6670_vm9, %v9656_v25 }
 0x6b7   : > { %6678 = vst.msk [vmem:[#allocation4 + $0x8c] sm:$0xf0] %vm6673_vm10, %v9637_v33  ;;  %6770 = vst.msk [vmem:[#allocation4 + $0x65] sm:$0xf0] %vm6673_vm10, %v9656_v25  ;;  %v6660_v37 = vpop.f32.mrf.mxu0  ;;  %v6754_v45 = vpop.f32.mrf.mxu1 }
 0x6b8   : > { %6671 = vst.msk [vmem:[#allocation4 + $0x78] sm:$0xf] %vm6670_vm9, %v6660_v37  ;;  %6764 = vst.msk [vmem:[#allocation4 + $0x51] sm:$0xf] %vm6670_vm9, %v6754_v45 }
 0x6b9   : > { %6674 = vst.msk [vmem:[#allocation4 + $0x7c] sm:$0xf0] %vm6673_vm10, %v6660_v37  ;;  %6766 = vst.msk [vmem:[#allocation4 + $0x55] sm:$0xf0] %vm6673_vm10, %v6754_v45 }
 0x6bd   : > { %v6973_v53 = vld [vmem:[#allocation4 + $0x88] sm:$0x1f]  ;;  %v6968_v26 = vld [vmem:[#allocation4 + $0x60] sm:$0x1f] }
 0x6be   : > { %v6974_v28 = vld [vmem:[#allocation4 + $0x90] sm:$0x1f]  ;;  %v6969_v8 = vld [vmem:[#allocation4 + $0x68] sm:$0x1f] }
 0x6bf   : > { %v6971_v12 = vld [vmem:[#allocation4 + $0x78] sm:$0x1f]  ;;  %v6966_v15 = vld [vmem:[#allocation4 + $0x50] sm:$0x1f] }
 0x6c0   : > { %7001 = vrot.lane.b32.xlu0 %v6971_v12, %s9859_s27  ;;  %v6972_v40 = vld [vmem:[#allocation4 + $0x80] sm:$0x1f]  ;;  %v6967_v43 = vld [vmem:[#allocation4 + $0x58] sm:$0x1f]  ;;  %v8164_v12 = vld [vmem:[%s13989_s9 + $0x3f0] sm:$0xff] }
 0x6c5   : > { %v9675_v20 = vpop.f32.mrf.mxu0 }
 0x6c6   : > { %6860 = vst.msk [vmem:[#allocation4 + $0x40] sm:$0xf] %vm6670_vm9, %v9675_v20 }
 0x6c7   : > { %6862 = vst.msk [vmem:[#allocation4 + $0x44] sm:$0xf0] %vm6673_vm10, %v9675_v20  ;;  %v6846_v63 = vpop.f32.mrf.mxu0  ;;  %v9694_v41 = vpop.f32.mrf.mxu1 }
 0x6c8   : > { %6856 = vst.msk [vmem:[#allocation4 + $0x30] sm:$0xf] %vm6670_vm9, %v6846_v63  ;;  %6952 = vst.msk [vmem:[#allocation4 + $0x19] sm:$0xf] %vm6670_vm9, %v9694_v41 }
 0x6c9   : > { %6858 = vst.msk [vmem:[#allocation4 + $0x34] sm:$0xf0] %vm6673_vm10, %v6846_v63  ;;  %6954 = vst.msk [vmem:[#allocation4 + $0x1d] sm:$0xf0] %vm6673_vm10, %v9694_v41  ;;  %v6938_v39 = vpop.f32.mrf.mxu1  ;;  %v8147_v41 = vld [vmem:[%s13989_s9 + $0x368] sm:$0xff] }
 0x6ca   : > { %6948 = vst.msk [vmem:[#allocation4 + $0x9] sm:$0xf] %vm6670_vm9, %v6938_v39 }
 0x6cb   : > { %6950 = vst.msk [vmem:[#allocation4 + $0xd] sm:$0xf0] %vm6673_vm10, %v6938_v39 }
 0x6cd   : > { %v6964_v44 = vld [vmem:[#allocation4 + $0x40] sm:$0x1f] }
 0x6ce   : > { %v6965_v42 = vld [vmem:[#allocation4 + $0x48] sm:$0x1f] }
 0x6cf   : > { %v6962_v30 = vld [vmem:[#allocation4 + $0x30] sm:$0x1f]  ;;  %v6958_v52 = vld [vmem:[#allocation4 + $0x18] sm:$0x1f] }
 0x6d0   : > { %v6963_v57 = vld [vmem:[#allocation4 + $0x38] sm:$0x1f]  ;;  %6983 = vrot.lane.b32.xlu1 %v6962_v30, %s9859_s27 }
 0x6d1   : > { %6985 = vrot.lane.b32.xlu0 %v6963_v57, %s9859_s27  ;;  %v6956_v61 = vld [vmem:[#allocation4 + $0x8] sm:$0x1f]  ;;  %v8161_v30 = vld [vmem:[%s13989_s9 + $0x3d8] sm:$0xff] }
 0x6d2   : > { %v6957_v7 = vld [vmem:[#allocation4 + $0x10] sm:$0x1f]  ;;  %v8126_v57 = vld [vmem:[%s13989_s9 + $0x2e8] sm:$0xff] }
 0x6d4   : > { %7003 = vrot.lane.b32.xlu1 %v6972_v40, %s9859_s27 }
 0x6d5   : > { %7005 = vrot.lane.b32.xlu0 %v6973_v53, %s9859_s27 }
 0x6d8   : > { %6987 = vrot.lane.b32.xlu1 %v6964_v44, %s9859_s27  ;;  %v8110_v44 = vld [vmem:[%s13989_s9 + $0x268] sm:$0xff] }
 0x6d9   : > { %6989 = vrot.lane.b32.xlu0 %v6965_v42, %s9859_s27  ;;  %v8160_v42 = vld [vmem:[%s13989_s9 + $0x3d0] sm:$0xff] }
 0x6dc   : > { %7007 = vrot.lane.b32.xlu1 %v6974_v28, %s9859_s27  ;;  %v8125_v28 = vld [vmem:[%s13989_s9 + $0x2e0] sm:$0xff] }
 0x6e0   : > { %7009 = vrot.lane.b32.xlu1 %v6975_v17, %s9859_s27  ;;  %v8144_v17 = vld [vmem:[%s13989_s9 + $0x350] sm:$0xff] }
 0x732   : > { %v7002_v9 = vpop.permute.xlu0 %7001 }
 0x733   : > { %v7021_v13 = vsel %vm3767_vm15, %v6966_v15, %v7002_v9 }
 0x734   : > { %v7034_v51 = vcombine.low %v7016_v60, %v7021_v13  ;;  %v7070_v18 = vcombine.high %v7016_v60, %v7021_v13 }
 0x736   : > { %v8057_v11 = vrot.slane %v7034_v51, 9  ;;  %v7079_v24 = vrot.slane %v7070_v18, 5  ;;  %v8158_v51 = vld [vmem:[%s13989_s9 + $0x3c0] sm:$0xff]  ;;  %v8108_v18 = vld [vmem:[%s13989_s9 + $0x258] sm:$0xff] }
 0x738   : > { %v7080_v20 = vsel %vm13706_vm13, %v8057_v11, %v7079_v24  ;;  %v8142_v11 = vld [vmem:[%s13989_s9 + $0x340] sm:$0xff]  ;;  %v8122_v24 = vld [vmem:[%s13989_s9 + $0x2c8] sm:$0xff] }
 0x742   : > { %v6984_v29 = vpop.permute.xlu1 %6983 }
 0x743   : > { %v6986_v22 = vpop.permute.xlu0 %6985  ;;  %v13689_v32 = vsel %vm3767_vm15, %v6956_v61, %v6984_v29  ;;  %v8124_v29 = vld [vmem:[%s13989_s9 + $0x2d8] sm:$0xff] }
 0x744   : > { %v8093_v31 = vcombine.low %v7016_v60, %v13689_v32  ;;  %v13714_v34 = vsel %vm3767_vm15, %v6957_v7, %v6986_v22  ;;  %v8159_v60 = vld [vmem:[%s13989_s9 + $0x3c8] sm:$0xff]  ;;  %v8141_v7 = vld [vmem:[%s13989_s9 + $0x338] sm:$0xff] }
 0x745   : > { %v8143_v22 = vld [vmem:[%s13989_s9 + $0x348] sm:$0xff] }
 0x746   : > { %v7004_v36 = vpop.permute.xlu1 %7003 }
 0x747   : > { %v7006_v19 = vpop.permute.xlu0 %7005  ;;  %v13692_v49 = vsel %vm3767_vm15, %v6967_v43, %v7004_v36  ;;  %v8123_v36 = vld [vmem:[%s13989_s9 + $0x2d0] sm:$0xff] }
 0x748   : > { %v7035_v47 = vcombine.low %v13689_v32, %v13692_v49  ;;  %v7071_v27 = vcombine.high %v13689_v32, %v13692_v49  ;;  %v8094_v21 = vcombine.low %v7021_v13, %v13692_v49  ;;  %v13704_v62 = vsel %vm3767_vm15, %v6968_v26, %v7006_v19 }
 0x749   : > { %v7036_v48 = vcombine.low %v13714_v34, %v13704_v62  ;;  %v7072_v6 = vcombine.high %v13714_v34, %v13704_v62  ;;  %v8130_v19 = vcombine.low %v13692_v49, %v13704_v62 }
 0x74a   : > { %v8058_v25 = vrot.slane %v7035_v47, 9  ;;  %v7083_v37 = vrot.slane %v7071_v27, 5  ;;  %v6988_v45 = vpop.permute.xlu1 %6987  ;;  %7281 = vmatprep.mubr.f32.mxu1 %v8094_v21  ;;  %v8107_v47 = vld [vmem:[%s13989_s9 + $0x250] sm:$0xff]  ;;  %v8157_v27 = vld [vmem:[%s13989_s9 + $0x3b8] sm:$0xff] }
 0x74b   : > { %7282 = vmatmul.mubr.f32.vlgmr.msra.gmra.mxu1 %v8093_v31  ;;  %v13744_v39 = vsel %vm3767_vm15, %v6958_v52, %v6988_v45  ;;  %v8059_v50 = vrot.slane %v7036_v48, 9  ;;  %v7087_v14 = vrot.slane %v7072_v6, 5  ;;  %v6970_v21 = vld [vmem:[#allocation4 + $0x70] sm:$0x1f]  ;;  %v8106_v31 = vld [vmem:[%s13989_s9 + $0x248] sm:$0xff]  ;;  %v8120_v48 = vld [vmem:[%s13989_s9 + $0x2b8] sm:$0xff] }
 0x74c   : > { %8942 = vmatpush3.msra.mxu1 %v8149_v5  ;;  %v13730_v35 = vsel %vm13706_vm13, %v8058_v25, %v7083_v37  ;;  %v8095_v43 = vcombine.low %v13714_v34, %v13744_v39  ;;  %v8156_v5 = vld [vmem:[%s13989_s9 + $0x3b0] sm:$0xff]  ;;  %v8121_v25 = vld [vmem:[%s13989_s9 + $0x2c0] sm:$0xff]  ;;  %v8139_v6 = vld [vmem:[%s13989_s9 + $0x328] sm:$0xff] }
 0x74d   : > { %8943 = vmatprep.subr.mxu1 %v8164_v12  ;;  %v7126_v1 = vcombine.low %v7080_v20, %v13730_v35  ;;  %v7127_v63 = vcombine.high %v7080_v20, %v13730_v35  ;;  %v13790_v15 = vsel %vm13706_vm13, %v8059_v50, %v7087_v14  ;;  %v8140_v37 = vld [vmem:[%s13989_s9 + $0x330] sm:$0xff]  ;;  %v8105_v12 = vld [vmem:[%s13989_s9 + $0x240] sm:$0xff] }
 0x74e   : > { %8944 = vmatpush3.msra.mxu1 %v8148_v54  ;;  %v7008_v38 = vpop.permute.xlu1 %7007  ;;  %v7452_v26 = vcombine.high %v13730_v35, %v13790_v15  ;;  %v8155_v54 = vld [vmem:[%s13989_s9 + $0x3a8] sm:$0xff]  ;;  %v8119_v52 = vld [vmem:[%s13989_s9 + $0x2b0] sm:$0xff] }
 0x74f   : > { %v13747_v58 = vsel %vm3767_vm15, %v6969_v8, %v7008_v38  ;;  %8945 = vmatprep.subr.mxu1 %v8163_v55  ;;  %7198 = vmatprep.mubr.f32.mxu0 %v7127_v63  ;;  %v6959_v55 = vld [vmem:[#allocation4 + $0x20] sm:$0x1f]  ;;  %v8104_v8 = vld [vmem:[%s13989_s9 + $0x238] sm:$0xff] }
 0x750   : > { %v7037_v46 = vcombine.low %v13744_v39, %v13747_v58  ;;  %v7073_v56 = vcombine.high %v13744_v39, %v13747_v58  ;;  %8946 = vmatpush3.msra.mxu1 %v8147_v41  ;;  %7199 = vmatmul.mubr.f32.vlgmr.msra.gmra.mxu0 %v7126_v1  ;;  %v8096_v59 = vcombine.low %v13704_v62, %v13747_v58  ;;  %v6990_v62 = vpop.permute.xlu0 %6989  ;;  %v8154_v1 = vld [vmem:[%s13989_s9 + $0x3a0] sm:$0xff] }
 0x751   : > { %8904 = vmatpush3.msra.mxu0 %v8112_v2  ;;  %8947 = vmatprep.subr.mxu1 %v8162_v3  ;;  %v13867_v20 = vsel %vm3767_vm15, %v6959_v55, %v6990_v62  ;;  %v8138_v38 = vld [vmem:[%s13989_s9 + $0x320] sm:$0xff]  ;;  %v8103_v2 = vld [vmem:[%s13989_s9 + $0x230] sm:$0xff]  ;;  %v8153_v3 = vld [vmem:[%s13989_s9 + $0x398] sm:$0xff] }
 0x752   : > { %v8060_v40 = vrot.slane %v7037_v46, 9  ;;  %v7091_v53 = vrot.slane %v7073_v56, 5  ;;  %8905 = vmatprep.subr.mxu0 %v8127_v16  ;;  %8948 = vmatpush3.msra.mxu1 %v8146_v4  ;;  %v7010_v49 = vpop.permute.xlu1 %7009  ;;  %v8118_v16 = vld [vmem:[%s13989_s9 + $0x2a8] sm:$0xff]  ;;  %v8137_v4 = vld [vmem:[%s13989_s9 + $0x318] sm:$0xff]  ;;  %v8152_v56 = vld [vmem:[%s13989_s9 + $0x390] sm:$0xff] }
 0x753   : > { %8906 = vmatpush3.msra.mxu0 %v8111_v0  ;;  %8949 = vmatprep.subr.mxu1 %v8161_v30  ;;  %v13852_v45 = vsel %vm3767_vm15, %v6970_v21, %v7010_v49  ;;  %v8102_v46 = vld [vmem:[%s13989_s9 + $0x228] sm:$0xff]  ;;  %v8117_v0 = vld [vmem:[%s13989_s9 + $0x2a0] sm:$0xff]  ;;  %v8136_v30 = vld [vmem:[%s13989_s9 + $0x310] sm:$0xff] }
 0x754   : > { %8907 = vmatprep.subr.mxu0 %v8126_v57  ;;  %8950 = vmatpush3.msra.mxu1 %v8145_v23  ;;  %v13794_v9 = vsel %vm13706_vm13, %v8060_v40, %v7091_v53  ;;  %v7294_v63 = vcombine.low %v13867_v20, %v13852_v45  ;;  %v7413_v41 = vcombine.high %v13867_v20, %v13852_v45  ;;  %v8101_v57 = vld [vmem:[%s13989_s9 + $0x220] sm:$0xff]  ;;  %v8151_v23 = vld [vmem:[%s13989_s9 + $0x388] sm:$0xff]  ;;  %v8116_v40 = vld [vmem:[%s13989_s9 + $0x298] sm:$0xff] }
 0x755   : > { %8908 = vmatpush3.msra.mxu0 %v8110_v44  ;;  %8951 = vmatprep.subr.mxu1 %v8160_v42  ;;  %v7129_v13 = vcombine.high %v13790_v15, %v13794_v9  ;;  %v7128_v61 = vcombine.low %v13790_v15, %v13794_v9  ;;  %v8135_v53 = vld [vmem:[%s13989_s9 + $0x308] sm:$0xff]  ;;  %v8100_v44 = vld [vmem:[%s13989_s9 + $0x218] sm:$0xff]  ;;  %v8150_v42 = vld [vmem:[%s13989_s9 + $0x380] sm:$0xff] }
 0x756   : > { %8909 = vmatprep.subr.mxu0 %v8125_v28  ;;  %8952 = vmatpush3.msra.mxu1 %v8144_v17  ;;  %v8133_v50 = vrot.slane %v7294_v63, 9  ;;  %v7416_v14 = vrot.slane %v7413_v41, 5  ;;  %v8115_v28 = vld [vmem:[%s13989_s9 + $0x290] sm:$0xff]  ;;  %v8134_v17 = vld [vmem:[%s13989_s9 + $0x300] sm:$0xff] }
 0x757   : > { %7286 = vmatprep.mubr.f32.mxu1 %v8096_v59  ;;  %8910 = vmatpush3.msra.mxu0 %v8109_v10  ;;  %v8099_v10 = vld [vmem:[%s13989_s9 + $0x210] sm:$0xff] }
 0x758   : > { %8953 = vmatprep.subr.mxu1 %v8159_v60  ;;  %7203 = vmatprep.mubr.f32.mxu0 %v7129_v13  ;;  %v7417_v59 = vsel %vm13706_vm13, %v8133_v50, %v7416_v14  ;;  %v7451_v60 = vcombine.low %v13730_v35, %v13790_v15  ;;  %v8114_v13 = vld [vmem:[%s13989_s9 + $0x288] sm:$0xff]  ;;  %v8113_v35 = vld [vmem:[%s13989_s9 + $0x280] sm:$0xff] }
 0x759   : > { %8911 = vmatprep.subr.mxu0 %v8124_v29  ;;  %8954 = vmatpush3.msra.mxu1 %v8143_v22  ;;  %v7454_v33 = vcombine.high %v13794_v9, %v7417_v59  ;;  %v8098_v29 = vld [vmem:[%s13989_s9 + $0x208] sm:$0xff]  ;;  %v8097_v15 = vld [vmem:[%s13989_s9 + $0x200] sm:$0xff]  ;;  %v7453_v22 = vcombine.low %v13794_v9, %v7417_v59 }
 0x75a   : > { %7204 = vmatmul.mubr.f32.gmra.mxu0 %v7128_v61  ;;  %8955 = vmatprep.subr.mxu1 %v8158_v51  ;;  %v8129_v61 = vcombine.low %v13689_v32, %v13714_v34  ;;  %v8132_v51 = vcombine.low %v13747_v58, %v13852_v45 }
 0x75b   : > { %8912 = vmatpush3.msra.mxu0 %v8108_v18  ;;  %7287 = vmatmul.mubr.f32.gmra.mxu1 %v8095_v43  ;;  %v8131_v18 = vcombine.low %v13744_v39, %v13867_v20 }
 0x75c   : > { %8913 = vmatprep.subr.mxu0 %v8123_v36  ;;  %7400 = vmatprep.mubr.f32.mxu0 %v8130_v19 }
 0x75d   : > { %8956 = vmatpush3.msra.mxu1 %v8142_v11  ;;  %8914 = vmatpush3.msra.mxu0 %v8107_v47 }
 0x75e   : > { %8957 = vmatprep.subr.mxu1 %v8157_v27  ;;  %8915 = vmatprep.subr.mxu0 %v8122_v24 }
 0x75f   : > { %8958 = vmatpush3.msra.mxu1 %v8141_v7  ;;  %7523 = vmatprep.mubr.f32.mxu1 %v7452_v26 }
 0x760   : > { %8916 = vmatpush3.msra.mxu0 %v8106_v31  ;;  %8959 = vmatprep.subr.mxu1 %v8156_v5 }
 0x761   : > { %8917 = vmatprep.subr.mxu0 %v8121_v25  ;;  %8960 = vmatpush3.msra.mxu1 %v8140_v37 }
 0x762   : > { %8918 = vmatpush3.msra.mxu0 %v8105_v12  ;;  %8961 = vmatprep.subr.mxu1 %v8155_v54  ;;  %v8166_v54 = vld [vmem:[%s13990_s10] ss:$0 sm:$0xff] }
 0x763   : > { %8919 = vmatprep.subr.mxu0 %v8120_v48  ;;  %8962 = vmatpush3.msra.mxu1 %v8139_v6 }
 0x764   : > { %8920 = vmatpush3.msra.mxu0 %v8104_v8  ;;  %8963 = vmatprep.subr.mxu1 %v8154_v1 }
 0x765   : > { %8921 = vmatprep.subr.mxu0 %v8119_v52  ;;  %8964 = vmatpush3.msra.mxu1 %v8138_v38  ;;  %v7553_v38 = vld [vmem:[%s13991_s11] sm:$0xff] }
 0x766   : > { %8922 = vmatpush3.msra.mxu0 %v8103_v2  ;;  %8965 = vmatprep.subr.mxu1 %v8153_v3 }
 0x767   : > { %8923 = vmatprep.subr.mxu0 %v8118_v16  ;;  %8966 = vmatpush3.msra.mxu1 %v8137_v4 }
 0x768   : > { %8924 = vmatpush3.msra.mxu0 %v8102_v46  ;;  %8967 = vmatprep.subr.mxu1 %v8152_v56  ;;  %v7554_v46 = vld [vmem:[%s13991_s11 + $0x8] sm:$0xff] }
 0x769   : > { %8925 = vmatprep.subr.mxu0 %v8117_v0  ;;  %8968 = vmatpush3.msra.mxu1 %v8136_v30 }
 0x76a   : > { %8926 = vmatpush3.msra.mxu0 %v8101_v57  ;;  %8969 = vmatprep.subr.mxu1 %v8151_v23 }
 0x76b   : > { %8927 = vmatprep.subr.mxu0 %v8116_v40  ;;  %8970 = vmatpush3.msra.mxu1 %v8135_v53 }
 0x76c   : > { %8928 = vmatpush3.msra.mxu0 %v8100_v44  ;;  %8971 = vmatprep.subr.mxu1 %v8150_v42  ;;  %v7568_v42 = vld [vmem:[#allocation5] sm:$0x1] }
 0x76d   : > { %8929 = vmatprep.subr.mxu0 %v8115_v28  ;;  %8972 = vmatpush3.msra.mxu1 %v8134_v17 }
 0x76e   : > { %8930 = vmatpush3.msra.mxu0 %v8099_v10  ;;  %7524 = vmatmul.mubr.f32.vlgmr.msra.gmra.mxu1 %v7451_v60 }
 0x76f   : > { %8931 = vmatprep.subr.mxu0 %v8114_v13  ;;  %7528 = vmatprep.mubr.f32.mxu1 %v7454_v33 }
 0x770   : > { %8932 = vmatpush3.msra.mxu0 %v8098_v29 }
 0x771   : > { %8933 = vmatprep.subr.mxu0 %v8113_v35 }
 0x772   : > { %8934 = vmatpush3.msra.mxu0 %v8097_v15  ;;  %7529 = vmatmul.mubr.f32.gmra.mxu1 %v7453_v22 }
 0x773   : > { %7401 = vmatmul.mubr.f32.vlgmr.msra.gmra.mxu0 %v8129_v61 }
 0x774   : > { %7405 = vmatprep.mubr.f32.mxu0 %v8132_v51 }
 0x777   : > { %7406 = vmatmul.mubr.f32.gmra.mxu0 %v8131_v18 }
 0x80b   : > { %v8897_v43 = vpop.f32.mrf.mxu1 }
 0x80d   : > { %v8898_v36 = vpop.f32.mrf.mxu1 }
 0x80e   : > { %v8899_v7 = vadd.f32 %v8898_v36, %v8897_v43 }
 0x810   : > { %v8859_v19 = vpop.f32.mrf.mxu0 }
 0x812   : > { %v8860_v11 = vpop.f32.mrf.mxu0 }
 0x813   : > { %v8861_v21 = vadd.f32 %v8860_v11, %v8859_v19 }
 0x815   : > { %v7284_v31 = vadd.f32 %v8899_v7, %v8861_v21 }
 0x81a   : > { %v8862_v27 = vpop.f32.mrf.mxu0 }
 0x81b   : > { %v8900_v9 = vpop.f32.mrf.mxu1 }
 0x81c   : > { %v8863_v34 = vpop.f32.mrf.mxu0 }
 0x81d   : > { %v8901_v47 = vpop.f32.mrf.mxu1  ;;  %v8864_v5 = vadd.f32 %v8863_v34, %v8862_v27 }
 0x81e   : > { %v8902_v25 = vadd.f32 %v8901_v47, %v8900_v9 }
 0x820   : > { %v7289_v48 = vadd.f32 %v8902_v25, %v8864_v5 }
 0x82e   : > { %v8973_v32 = vpop.f32.mrf.mxu1 }
 0x830   : > { %v8974_v24 = vpop.f32.mrf.mxu1 }
 0x831   : > { %v8975_v37 = vadd.f32 %v8974_v24, %v8973_v32 }
 0x832   : > { %v8976_v58 = vpop.f32.mrf.mxu1 }
 0x833   : > { %v8935_v49 = vpop.f32.mrf.mxu0 }
 0x834   : > { %v8977_v12 = vpop.f32.mrf.mxu1 }
 0x835   : > { %v8936_v26 = vpop.f32.mrf.mxu0  ;;  %v8978_v8 = vadd.f32 %v8977_v12, %v8976_v58 }
 0x836   : > { %v8937_v39 = vadd.f32 %v8936_v26, %v8935_v49 }
 0x837   : > { %v8938_v62 = vpop.f32.mrf.mxu0 }
 0x838   : > { %v7411_v45 = vadd.f32 %v8937_v39, %v7284_v31 }
 0x839   : > { %v8939_v55 = vpop.f32.mrf.mxu0 }
 0x83a   : > { %v7534_v6 = vadd.f32 %v8975_v37, %v7411_v45  ;;  %v8940_v20 = vadd.f32 %v8939_v55, %v8938_v62 }
 0x83c   : > { %v7543_v1 = vadd.f32 %v8166_v54, %v7534_v6  ;;  %v7412_v63 = vadd.f32 %v8940_v20, %v7289_v48 }
 0x83e   : > { %v7535_v41 = vadd.f32 %v8978_v8, %v7412_v63  ;;  %vm7545_vm15 = vcmp.ge.f32.partialorder %v7543_v1, 0.0  ;;  %v7547_v52 = vmul.f32 0.1, %v7543_v1 }
 0x840   : > { %v7544_v2 = vadd.f32 %v8166_v54, %v7535_v41  ;;  %v7549_v3 = vsel %vm7545_vm15, %v7543_v1, %v7547_v52 }
 0x841   : > { %v7555_v16 = vmul.f32 %v7553_v38, %v7549_v3  ;;  %7551 = vst [vmem:[%s478_s24] sm:$0xff] %v7549_v3 }
 0x842   : > { %vm7546_vm14 = vcmp.ge.f32.partialorder %v7544_v2, 0.0  ;;  %v7548_v4 = vmul.f32 0.1, %v7544_v2 }
 0x843   : > { %7557 = vadd.xlane.f32.xlu0 %v7555_v16 }
 0x844   : > { %v7550_v56 = vsel %vm7546_vm14, %v7544_v2, %v7548_v4 }
 0x845   : > { %v7556_v50 = vmul.f32 %v7554_v46, %v7550_v56  ;;  %7552 = vst [vmem:[%s478_s24 + $0x8] sm:$0xff] %v7550_v56 }
 0x847   : > { %7559 = vadd.xlane.f32.xlu1 %v7556_v50 }
 0x8cc   : > { %v7558_v14 = vpop.xlane.xlu0 %7557 }
 0x8d0   : > { %v7560_v0 = vpop.xlane.xlu1 %7559 }
 0x8d1   : > { %v7561_v30 = vadd.f32 %v7560_v0, %v7558_v14 }
 0x8d3   : > { %v7562_v57 = vrot.slane %v7561_v30, 4 }
 0x8d5   : > { %v7563_v23 = vadd.f32 %v7562_v57, %v7561_v30 }
 0x8d7   : > { %v7564_v40 = vrot.slane %v7563_v23, 2 }
 0x8d9   : > { %v7565_v53 = vadd.f32 %v7564_v40, %v7563_v23 }
 0x8db   : > { %v7566_v44 = vrot.slane %v7565_v53, 1 }
 0x8dd   : > { %v7567_v28 = vadd.f32 %v7566_v44, %v7565_v53 }
 0x8df   : > { %v7569_v17 = vadd.f32 %v7568_v42, %v7567_v28 }
 0x8e1   : > { %7571 = vst.msk [vmem:[%s473_s19] sm:$0x1] %vm7570_vm2, %v7569_v17 }
 0x8e2 PF: > { %s27_s15 = sadd.s32 1, %s9853_s15  }
 0x8e3   : > { %p24_p4 = scmp.ge.s32.totalorder %s27_s15, 4  }
 0x8e5   :  { %26 = sbr.rel (!%p24_p4) target bundleno = 3 (0x3), region = 156 }

</bundles_post_ra>
